<compile_context>
chip_gen: v7x
topology: tpu7x:2x2x1
jax: 0.10.0
libtpu: 0.0.40
codegen_flags: <defaults>
</compile_context>

<pallas_src>
import functools
from dataclasses import dataclass

import jax
import jax.numpy as jnp
from jax.experimental import pallas as pl
from jax.experimental.pallas import tpu as pltpu  # noqa: F401  (TPU backend ext.)


# ----------------------------- config -----------------------------

@dataclass(frozen=True)
class JambaConfig:
    vocab_size: int = 128
    hidden_size: int = 64
    intermediate_size: int = 128          # FFN intermediate
    num_hidden_layers: int = 4
    num_attention_heads: int = 4
    num_key_value_heads: int = 2
    rms_norm_eps: float = 1e-6
    hidden_act: str = "silu"
    mamba_d_state: int = 16
    mamba_d_conv: int = 4
    mamba_expand: int = 2
    mamba_dt_rank: int = 4
    mamba_conv_bias: bool = True
    mamba_proj_bias: bool = False
    num_experts: int = 4
    num_experts_per_tok: int = 2
    attn_layer_offset: int = 1
    attn_layer_period: int = 2
    expert_layer_offset: int = 1
    expert_layer_period: int = 2

    @property
    def head_dim(self):
        return self.hidden_size // self.num_attention_heads

    @property
    def mamba_intermediate(self):
        return self.mamba_expand * self.hidden_size

    @property
    def layers_block_type(self):
        return ["attention" if i % self.attn_layer_period == self.attn_layer_offset
                else "mamba" for i in range(self.num_hidden_layers)]

    @property
    def layers_num_experts(self):
        return [self.num_experts if i % self.expert_layer_period == self.expert_layer_offset
                else 1 for i in range(self.num_hidden_layers)]


# ----------------------------- in-kernel helpers -----------------------------

def _rms(x, w, eps):
    var = jnp.mean(x * x, axis=-1, keepdims=True)
    return x * jax.lax.rsqrt(var + eps) * w


def _mlp_ffn(h, gate_up_ref, down_ref):
    gu = jnp.dot(h, gate_up_ref[...], preferred_element_type=jnp.float32)    # (T, 2I)
    d = gu.shape[-1] // 2
    act = jax.nn.silu(gu[:, :d]) * gu[:, d:]
    return jnp.dot(act, down_ref[...], preferred_element_type=jnp.float32)   # (T, H)


def _moe_ffn(h, router_ref, w1_ref, w2_ref, top_k):
    """Dense small-E MoE, fully in-kernel.  renormalize=False (raw softmax weights)."""
    num_experts = w1_ref.shape[0]
    logits = jnp.dot(h, router_ref[...], preferred_element_type=jnp.float32)  # (T, E)
    m = jnp.max(logits, axis=-1, keepdims=True)
    ex = jnp.exp(logits - m)
    probs = ex / jnp.sum(ex, axis=-1, keepdims=True)
    out = jnp.zeros(h.shape, jnp.float32)
    for e in range(num_experts):                       # E is tiny -> unrolled
        pe = probs[:, e:e + 1]                         # (T, 1)
        higher = jnp.zeros_like(pe)
        for j in range(num_experts):                   # rank via pairwise compare (no sort)
            if j != e:
                higher = higher + (probs[:, j:j + 1] > pe).astype(jnp.float32)
        coef = jnp.where(higher < top_k, pe, 0.0)      # expert e selected iff in top-k
        gu = jnp.dot(h, w1_ref[e], preferred_element_type=jnp.float32)        # (T, 2I)
        d = gu.shape[-1] // 2
        act = jax.nn.silu(gu[:, :d]) * gu[:, d:]
        out = out + coef * jnp.dot(act, w2_ref[e], preferred_element_type=jnp.float32)
    return out


def _self_attention(h, qkv_w_ref, o_w_ref, num_heads, num_kv_heads, head_dim):
    """Causal prefill self-attention with GQA head->kv mapping (no jnp.repeat)."""
    T = h.shape[0]
    qkv = jnp.dot(h, qkv_w_ref[...], preferred_element_type=jnp.float32)      # (T, (nH+2nKV)*Dh)
    q_size = num_heads * head_dim
    kv_size = num_kv_heads * head_dim
    scale = head_dim ** -0.5
    rep = num_heads // num_kv_heads
    row = jax.lax.broadcasted_iota(jnp.int32, (T, T), 0)
    col = jax.lax.broadcasted_iota(jnp.int32, (T, T), 1)
    causal = col <= row
    o_w = o_w_ref[...]
    out = jnp.zeros((T, o_w.shape[1]), jnp.float32)
    for hd in range(num_heads):                        # few heads -> unrolled
        kv = hd // rep
        q_h = qkv[:, hd * head_dim:(hd + 1) * head_dim]
        k_h = qkv[:, q_size + kv * head_dim:q_size + (kv + 1) * head_dim]
        v_h = qkv[:, q_size + kv_size + kv * head_dim:q_size + kv_size + (kv + 1) * head_dim]
        s = jnp.dot(q_h, k_h.T, preferred_element_type=jnp.float32) * scale   # (T, T)
        s = jnp.where(causal, s, -1e30)
        p = jnp.exp(s - jnp.max(s, axis=-1, keepdims=True))
        p = p * pl.reciprocal(jnp.sum(p, axis=-1, keepdims=True), approx=True)
        o_h = jnp.dot(p, v_h, preferred_element_type=jnp.float32)             # (T, Dh)
        # fold o_proj per head -> the (T, nH*Dh) concat is never materialized
        out = out + jnp.dot(o_h, o_w[hd * head_dim:(hd + 1) * head_dim, :],
                            preferred_element_type=jnp.float32)
    return out


def _mamba_mixer(h, in_w_ref, conv_wT_ref, conv_b_ref, x_w_ref, dt_ln_ref,
                 b_ln_ref, c_ln_ref, dt_w_ref, dt_b_ref, A_T_ref, D_ref,
                 out_w_ref, eps, d_state, dt_rank, conv_k):
    """Mamba mixer in (T, D_inner) lane-dense layout; sequential scan over T (prefill)."""
    T = h.shape[0]
    proj = jnp.dot(h, in_w_ref[...], preferred_element_type=jnp.float32)      # (T, 2I)
    inter = proj.shape[-1] // 2
    x = proj[:, :inter]                                                       # (T, I)
    gate = proj[:, inter:]                                                    # (T, I)

    # Depthwise causal conv1d + SiLU: each tap is a tiny (T, T) shift matmul so
    # the time shift runs on the MXU and the (T, I) tile stays lane-dense.
    row_tt = jax.lax.broadcasted_iota(jnp.int32, (T, T), 0)
    col_tt = jax.lax.broadcasted_iota(jnp.int32, (T, T), 1)
    conv_wT = conv_wT_ref[...]                                                # (K, I)
    acc = jnp.zeros_like(x)
    for k in range(conv_k):
        shift = conv_k - 1 - k
        s_mat = (row_tt - col_tt == shift).astype(jnp.float32)                # sub-diagonal 0/1
        acc = acc + jnp.dot(s_mat, x, preferred_element_type=jnp.float32) * conv_wT[k:k + 1, :]
    u = jax.nn.silu(acc + conv_b_ref[...])                                    # (T, I)

    ssm = jnp.dot(u, x_w_ref[...], preferred_element_type=jnp.float32)        # (T, R+2N)
    R, N = dt_rank, d_state
    dt_in = _rms(ssm[:, :R], dt_ln_ref[...], eps)                             # (T, R)
    B = _rms(ssm[:, R:R + N], b_ln_ref[...], eps)                             # (T, N)
    C = _rms(ssm[:, R + N:], c_ln_ref[...], eps)                              # (T, N)
    # softplus(dt_proj(dt) + dt_bias), hoisted out of the scan loop (whole tile at once).
    dts = jax.nn.softplus(
        jnp.dot(dt_in, dt_w_ref[...], preferred_element_type=jnp.float32) + dt_b_ref[...])  # (T, I)
    du = dts * u                                                              # (T, I), hoisted

    A_T = A_T_ref[...]                                                        # (N, I) — D_inner on lanes
    I_dim = A_T.shape[1]
    eye_n = (jax.lax.broadcasted_iota(jnp.int32, (N, N), 0) ==
             jax.lax.broadcasted_iota(jnp.int32, (N, N), 1)).astype(jnp.float32)
    row_ti = jax.lax.broadcasted_iota(jnp.int32, (T, I_dim), 0)
    state = jnp.zeros((N, I_dim), jnp.float32)
    ys = jnp.zeros((T, I_dim), jnp.float32)
    for t in range(T):                                                        # short prefill -> unrolled
        dt_t = dts[t:t + 1, :]                                                # (1, I)
        # B[t] as an (N, 1) column (mask + lane reduce; no in-kernel transpose).
        b_col = jnp.sum(eye_n * B[t:t + 1, :], axis=1, keepdims=True)         # (N, 1)
        state = jnp.exp(dt_t * A_T) * state + b_col * du[t:t + 1, :]          # (N, I)
        y_t = jnp.dot(C[t:t + 1, :], state, preferred_element_type=jnp.float32)  # (1, I)
        ys = ys + (row_ti == t).astype(jnp.float32) * y_t                     # accumulate in registers
    # TODO(synk): ssm_state / conv_state cache writeback (MambaCacheParams) omitted;
    # the single-prompt prefill path only needs the contextualized output.
    y = (ys + u * D_ref[...]) * jax.nn.silu(gate)                             # (T, I)
    return jnp.dot(y, out_w_ref[...], preferred_element_type=jnp.float32)     # (T, H)


# ----------------------------- fused layer kernel -----------------------------

def _layer_kernel(*refs, eps, block_type, num_heads, num_kv_heads, head_dim,
                  d_state, dt_rank, conv_k, use_moe, top_k, first, last):
    out_h_ref, out_res_ref = refs[-2], refs[-1]
    body = refs[:-2]

    if first:
        # Fused embedding lookup: residual-is-None case of the reference.
        ids_ref, table_ref = body[0], body[1]
        ids = ids_ref[...]                                                    # (T, 1) int32
        T = ids.shape[0]
        V = table_ref.shape[0]
        onehot = (jax.lax.broadcasted_iota(jnp.int32, (T, V), 1) == ids).astype(jnp.float32)
        s1 = jnp.dot(onehot, table_ref[...], preferred_element_type=jnp.float32)
    else:
        s1 = body[0][...] + body[1][...]                # fused residual-add
    pos = 2

    ln1_ref = body[pos]; pos += 1
    h1 = _rms(s1, ln1_ref[...], eps)

    if block_type == "attention":
        qkv_w_ref, o_w_ref = body[pos:pos + 2]; pos += 2
        mix = _self_attention(h1, qkv_w_ref, o_w_ref, num_heads, num_kv_heads, head_dim)
    else:
        (in_w_ref, conv_wT_ref, conv_b_ref, x_w_ref, dt_ln_ref, b_ln_ref,
         c_ln_ref, dt_w_ref, dt_b_ref, A_T_ref, D_ref, out_w_ref) = body[pos:pos + 12]
        pos += 12
        mix = _mamba_mixer(h1, in_w_ref, conv_wT_ref, conv_b_ref, x_w_ref,
                           dt_ln_ref, b_ln_ref, c_ln_ref, dt_w_ref, dt_b_ref,
                           A_T_ref, D_ref, out_w_ref, eps, d_state, dt_rank, conv_k)

    s2 = mix + s1
    out_res_ref[...] = s2
    ln2_ref = body[pos]; pos += 1
    h2 = _rms(s2, ln2_ref[...], eps)

    if use_moe:
        router_ref, w1_ref, w2_ref = body[pos:pos + 3]; pos += 3
        f = _moe_ffn(h2, router_ref, w1_ref, w2_ref, top_k)
    else:
        gate_up_ref, down_ref = body[pos:pos + 2]; pos += 2
        f = _mlp_ffn(h2, gate_up_ref, down_ref)

    if last:
        # Fused final RMSNorm: rms(ffn_out + residual).
        final_ln_ref = body[pos]; pos += 1
        out_h_ref[...] = _rms(f + s2, final_ln_ref[...], eps)
    else:
        out_h_ref[...] = f


# ----------------------------- model glue (JAX) -----------------------------

def jamba_forward(params, input_ids, positions, cfg):
    del positions                                      # Jamba attention uses no positional embedding
    T = input_ids.shape[0]
    H = cfg.hidden_size
    ids2d = input_ids.reshape(T, 1).astype(jnp.int32)

    layer_out_shape = (jax.ShapeDtypeStruct((T, H), jnp.float32),
                       jax.ShapeDtypeStruct((T, H), jnp.float32))
    n_layers = cfg.num_hidden_layers
    h = res = None
    for i, lp in enumerate(params["layers"]):
        first = (i == 0)
        last = (i == n_layers - 1)
        block_type = cfg.layers_block_type[i]
        use_moe = cfg.layers_num_experts[i] > 1

        args = [ids2d, params["embed"]] if first else [h, res]
        args.append(lp["input_ln"])
        if block_type == "attention":
            args += [lp["qkv_w"], lp["o_w"]]
        else:
            args += [lp["in_proj"], lp["conv_wT"], lp["conv_b"], lp["x_proj"],
                     lp["dt_ln"], lp["b_ln"], lp["c_ln"], lp["dt_proj_w"],
                     lp["dt_proj_b"], lp["A_T"], lp["D"], lp["out_proj"]]
        args.append(lp["pre_ff_ln"])
        if use_moe:
            args += [lp["router"], lp["w1"], lp["w2"]]
        else:
            args += [lp["gate_up"], lp["down"]]
        if last:
            args.append(params["final_ln"])

        kern = functools.partial(
            _layer_kernel, eps=cfg.rms_norm_eps, block_type=block_type,
            num_heads=cfg.num_attention_heads, num_kv_heads=cfg.num_key_value_heads,
            head_dim=cfg.head_dim, d_state=cfg.mamba_d_state,
            dt_rank=cfg.mamba_dt_rank, conv_k=cfg.mamba_d_conv,
            use_moe=use_moe, top_k=cfg.num_experts_per_tok,
            first=first, last=last)
        h, res = pl.pallas_call(kern, out_shape=layer_out_shape)(*args)

    return h                                           # last layer already applied the final norm


# ----------------------------- deterministic params (kernel-ready layout) -----------------------------

def init_params(cfg, key):
    def nrm(k, shape, scale=0.05):
        return jax.random.normal(k, shape, jnp.float32) * scale

    keys = iter(jax.random.split(key, 256))
    H, I = cfg.hidden_size, cfg.intermediate_size
    Im, N, R, K = cfg.mamba_intermediate, cfg.mamba_d_state, cfg.mamba_dt_rank, cfg.mamba_d_conv
    Dh = cfg.head_dim
    params = {
        "embed": nrm(next(keys), (cfg.vocab_size, H), 0.1),
        "final_ln": jnp.ones((1, H), jnp.float32),
        "layers": [],
    }
    for i in range(cfg.num_hidden_layers):
        lp = {"input_ln": jnp.ones((1, H), jnp.float32),
              "pre_ff_ln": jnp.ones((1, H), jnp.float32)}
        if cfg.layers_block_type[i] == "attention":
            qkv_out = (cfg.num_attention_heads + 2 * cfg.num_key_value_heads) * Dh
            lp["qkv_w"] = nrm(next(keys), (H, qkv_out))
            lp["o_w"] = nrm(next(keys), (cfg.num_attention_heads * Dh, H))
        else:
            lp["in_proj"] = nrm(next(keys), (H, 2 * Im))
            lp["conv_wT"] = nrm(next(keys), (K, Im), 0.2)         # conv1d.weight^T: taps rows, lane-dense channels
            lp["conv_b"] = nrm(next(keys), (1, Im), 0.1)
            lp["x_proj"] = nrm(next(keys), (Im, R + 2 * N))
            lp["dt_proj_w"] = nrm(next(keys), (R, Im), 0.2)
            lp["dt_proj_b"] = nrm(next(keys), (1, Im), 0.1)
            lp["A_T"] = -jnp.exp(nrm(next(keys), (N, Im), 0.5))   # A^T, negative (stable); D_inner on lanes
            lp["D"] = jnp.ones((1, Im), jnp.float32)
            lp["out_proj"] = nrm(next(keys), (Im, H))
            lp["dt_ln"] = jnp.ones((1, R), jnp.float32)
            lp["b_ln"] = jnp.ones((1, N), jnp.float32)
            lp["c_ln"] = jnp.ones((1, N), jnp.float32)
        if cfg.layers_num_experts[i] > 1:
            E = cfg.num_experts
            lp["router"] = nrm(next(keys), (H, E))
            lp["w1"] = nrm(next(keys), (E, H, 2 * I))
            lp["w2"] = nrm(next(keys), (E, I, H))
        else:
            lp["gate_up"] = nrm(next(keys), (H, 2 * I))
            lp["down"] = nrm(next(keys), (I, H))
        params["layers"].append(lp)
    return params


# ----------------------------- main -----------------------------

if __name__ == "__main__":
    cfg = JambaConfig()
    key = jax.random.PRNGKey(0)
    pkey, ikey = jax.random.split(key)
    params = init_params(cfg, pkey)

    seq_len = 8
    input_ids = jax.random.randint(ikey, (seq_len,), 0, cfg.vocab_size, dtype=jnp.int32)
    positions = jnp.arange(seq_len, dtype=jnp.int32)

    fwd = jax.jit(lambda p, ids, pos: jamba_forward(p, ids, pos, cfg))
    out = fwd(params, input_ids, positions)
    out = jax.block_until_ready(out)

    assert out.shape == (seq_len, cfg.hidden_size), out.shape
    assert bool(jnp.all(jnp.isfinite(out)))
    print("KERNEL_OK")
</pallas_src>

<mosaic_0001>
module attributes {stable_mosaic.version = 11 : i64} {
  func.func @_layer_kernel(%arg0: memref<8x1xi32, #tpu.memory_space<vmem>>, %arg1: memref<128x64xf32, #tpu.memory_space<vmem>>, %arg2: memref<1x64xf32, #tpu.memory_space<vmem>>, %arg3: memref<64x256xf32, #tpu.memory_space<vmem>>, %arg4: memref<4x128xf32, #tpu.memory_space<vmem>>, %arg5: memref<1x128xf32, #tpu.memory_space<vmem>>, %arg6: memref<128x36xf32, #tpu.memory_space<vmem>>, %arg7: memref<1x4xf32, #tpu.memory_space<vmem>>, %arg8: memref<1x16xf32, #tpu.memory_space<vmem>>, %arg9: memref<1x16xf32, #tpu.memory_space<vmem>>, %arg10: memref<4x128xf32, #tpu.memory_space<vmem>>, %arg11: memref<1x128xf32, #tpu.memory_space<vmem>>, %arg12: memref<16x128xf32, #tpu.memory_space<vmem>>, %arg13: memref<1x128xf32, #tpu.memory_space<vmem>>, %arg14: memref<128x64xf32, #tpu.memory_space<vmem>>, %arg15: memref<1x64xf32, #tpu.memory_space<vmem>>, %arg16: memref<64x256xf32, #tpu.memory_space<vmem>>, %arg17: memref<128x64xf32, #tpu.memory_space<vmem>>, %arg18: memref<8x64xf32, #tpu.memory_space<vmem>>, %arg19: memref<8x64xf32, #tpu.memory_space<vmem>>) attributes {dimension_semantics = [], scalar_prefetch = 0 : i64, scratch_operands = 0 : i64, tpu.core_type = #tpu.core_type<tc>} {
    %c0 = arith.constant 0 : index
    %c0_0 = arith.constant 0 : index
    %0 = vector.load %arg0[%c0, %c0_0] : memref<8x1xi32, #tpu.memory_space<vmem>>, vector<8x1xi32>
    %1 = tpu.iota {dimensions = array<i32: 1>} : vector<8x128xi32>
    %2 = vector.broadcast %0 : vector<8x1xi32> to vector<8x128xi32>
    %3 = arith.cmpi eq, %1, %2 : vector<8x128xi32>
    %4 = arith.extui %3 : vector<8x128xi1> to vector<8x128xi32>
    %5 = arith.sitofp %4 : vector<8x128xi32> to vector<8x128xf32>
    %c0_1 = arith.constant 0 : index
    %c0_2 = arith.constant 0 : index
    %6 = vector.load %arg1[%c0_1, %c0_2] : memref<128x64xf32, #tpu.memory_space<vmem>>, vector<128x64xf32>
    %cst = arith.constant dense<0.000000e+00> : vector<8x64xf32>
    %7 = tpu.matmul %5, %6, %cst {dimension_numbers = #tpu.dot_dimension_numbers<[1], [0], [0], [1], [0, 0, 1, 1], [], []>} : vector<8x128xf32>, vector<128x64xf32>, vector<8x64xf32> -> vector<8x64xf32>
    %c0_3 = arith.constant 0 : index
    %c0_4 = arith.constant 0 : index
    %8 = vector.load %arg2[%c0_3, %c0_4] : memref<1x64xf32, #tpu.memory_space<vmem>>, vector<1x64xf32>
    %9 = arith.mulf %7, %7 : vector<8x64xf32>
    %cst_5 = arith.constant dense<0.000000e+00> : vector<8xf32>
    %10 = vector.multi_reduction <add>, %9, %cst_5 [1] : vector<8x64xf32> to vector<8xf32>
    %11 = vector.shape_cast %10 : vector<8xf32> to vector<8x1xf32>
    %cst_6 = arith.constant 6.400000e+01 : f32
    %12 = vector.broadcast %cst_6 : f32 to vector<8x1xf32>
    %13 = arith.divf %11, %12 : vector<8x1xf32>
    %cst_7 = arith.constant 9.99999997E-7 : f32
    %14 = vector.broadcast %cst_7 : f32 to vector<8x1xf32>
    %15 = arith.addf %13, %14 : vector<8x1xf32>
    %16 = math.rsqrt %15 : vector<8x1xf32>
    %17 = vector.broadcast %16 : vector<8x1xf32> to vector<8x64xf32>
    %18 = arith.mulf %7, %17 : vector<8x64xf32>
    %19 = vector.broadcast %8 : vector<1x64xf32> to vector<8x64xf32>
    %20 = arith.mulf %18, %19 : vector<8x64xf32>
    %c0_8 = arith.constant 0 : index
    %c0_9 = arith.constant 0 : index
    %21 = vector.load %arg3[%c0_8, %c0_9] : memref<64x256xf32, #tpu.memory_space<vmem>>, vector<64x256xf32>
    %cst_10 = arith.constant dense<0.000000e+00> : vector<8x256xf32>
    %22 = tpu.matmul %20, %21, %cst_10 {dimension_numbers = #tpu.dot_dimension_numbers<[1], [0], [0], [1], [0, 0, 1, 1], [], []>} : vector<8x64xf32>, vector<64x256xf32>, vector<8x256xf32> -> vector<8x256xf32>
    %23 = vector.extract_strided_slice %22 {offsets = [0, 0], sizes = [8, 128], strides = [1, 1]} : vector<8x256xf32> to vector<8x128xf32>
    %24 = vector.extract_strided_slice %22 {offsets = [0, 128], sizes = [8, 128], strides = [1, 1]} : vector<8x256xf32> to vector<8x128xf32>
    %25 = tpu.iota {dimensions = array<i32: 0>} : vector<8x8xi32>
    %26 = tpu.iota {dimensions = array<i32: 1>} : vector<8x8xi32>
    %c0_11 = arith.constant 0 : index
    %c0_12 = arith.constant 0 : index
    %27 = vector.load %arg4[%c0_11, %c0_12] : memref<4x128xf32, #tpu.memory_space<vmem>>, vector<4x128xf32>
    %cst_13 = arith.constant 0.000000e+00 : f32
    %28 = vector.broadcast %cst_13 : f32 to vector<8x128xf32>
    %29 = arith.subi %25, %26 : vector<8x8xi32>
    %c3_i32 = arith.constant 3 : i32
    %30 = vector.broadcast %c3_i32 : i32 to vector<8x8xi32>
    %31 = arith.cmpi eq, %29, %30 : vector<8x8xi32>
    %32 = arith.extui %31 : vector<8x8xi1> to vector<8x8xi32>
    %33 = arith.sitofp %32 : vector<8x8xi32> to vector<8x8xf32>
    %cst_14 = arith.constant dense<0.000000e+00> : vector<8x128xf32>
    %34 = tpu.matmul %33, %23, %cst_14 {dimension_numbers = #tpu.dot_dimension_numbers<[1], [0], [0], [1], [0, 0, 1, 1], [], []>} : vector<8x8xf32>, vector<8x128xf32>, vector<8x128xf32> -> vector<8x128xf32>
    %35 = vector.extract_strided_slice %27 {offsets = [0, 0], sizes = [1, 128], strides = [1, 1]} : vector<4x128xf32> to vector<1x128xf32>
    %36 = vector.broadcast %35 : vector<1x128xf32> to vector<8x128xf32>
    %37 = arith.mulf %34, %36 : vector<8x128xf32>
    %38 = arith.addf %28, %37 : vector<8x128xf32>
    %39 = arith.subi %25, %26 : vector<8x8xi32>
    %c2_i32 = arith.constant 2 : i32
    %40 = vector.broadcast %c2_i32 : i32 to vector<8x8xi32>
    %41 = arith.cmpi eq, %39, %40 : vector<8x8xi32>
    %42 = arith.extui %41 : vector<8x8xi1> to vector<8x8xi32>
    %43 = arith.sitofp %42 : vector<8x8xi32> to vector<8x8xf32>
    %cst_15 = arith.constant dense<0.000000e+00> : vector<8x128xf32>
    %44 = tpu.matmul %43, %23, %cst_15 {dimension_numbers = #tpu.dot_dimension_numbers<[1], [0], [0], [1], [0, 0, 1, 1], [], []>} : vector<8x8xf32>, vector<8x128xf32>, vector<8x128xf32> -> vector<8x128xf32>
    %45 = vector.extract_strided_slice %27 {offsets = [1, 0], sizes = [1, 128], strides = [1, 1]} : vector<4x128xf32> to vector<1x128xf32>
    %46 = vector.broadcast %45 : vector<1x128xf32> to vector<8x128xf32>
    %47 = arith.mulf %44, %46 : vector<8x128xf32>
    %48 = arith.addf %38, %47 : vector<8x128xf32>
    %49 = arith.subi %25, %26 : vector<8x8xi32>
    %c1_i32 = arith.constant 1 : i32
    %50 = vector.broadcast %c1_i32 : i32 to vector<8x8xi32>
    %51 = arith.cmpi eq, %49, %50 : vector<8x8xi32>
    %52 = arith.extui %51 : vector<8x8xi1> to vector<8x8xi32>
    %53 = arith.sitofp %52 : vector<8x8xi32> to vector<8x8xf32>
    %cst_16 = arith.constant dense<0.000000e+00> : vector<8x128xf32>
    %54 = tpu.matmul %53, %23, %cst_16 {dimension_numbers = #tpu.dot_dimension_numbers<[1], [0], [0], [1], [0, 0, 1, 1], [], []>} : vector<8x8xf32>, vector<8x128xf32>, vector<8x128xf32> -> vector<8x128xf32>
    %55 = vector.extract_strided_slice %27 {offsets = [2, 0], sizes = [1, 128], strides = [1, 1]} : vector<4x128xf32> to vector<1x128xf32>
    %56 = vector.broadcast %55 : vector<1x128xf32> to vector<8x128xf32>
    %57 = arith.mulf %54, %56 : vector<8x128xf32>
    %58 = arith.addf %48, %57 : vector<8x128xf32>
    %59 = arith.subi %25, %26 : vector<8x8xi32>
    %c0_i32 = arith.constant 0 : i32
    %60 = vector.broadcast %c0_i32 : i32 to vector<8x8xi32>
    %61 = arith.cmpi eq, %59, %60 : vector<8x8xi32>
    %62 = arith.extui %61 : vector<8x8xi1> to vector<8x8xi32>
    %63 = arith.sitofp %62 : vector<8x8xi32> to vector<8x8xf32>
    %cst_17 = arith.constant dense<0.000000e+00> : vector<8x128xf32>
    %64 = tpu.matmul %63, %23, %cst_17 {dimension_numbers = #tpu.dot_dimension_numbers<[1], [0], [0], [1], [0, 0, 1, 1], [], []>} : vector<8x8xf32>, vector<8x128xf32>, vector<8x128xf32> -> vector<8x128xf32>
    %65 = vector.extract_strided_slice %27 {offsets = [3, 0], sizes = [1, 128], strides = [1, 1]} : vector<4x128xf32> to vector<1x128xf32>
    %66 = vector.broadcast %65 : vector<1x128xf32> to vector<8x128xf32>
    %67 = arith.mulf %64, %66 : vector<8x128xf32>
    %68 = arith.addf %58, %67 : vector<8x128xf32>
    %c0_18 = arith.constant 0 : index
    %c0_19 = arith.constant 0 : index
    %69 = vector.load %arg5[%c0_18, %c0_19] : memref<1x128xf32, #tpu.memory_space<vmem>>, vector<1x128xf32>
    %70 = vector.broadcast %69 : vector<1x128xf32> to vector<8x128xf32>
    %71 = arith.addf %68, %70 : vector<8x128xf32>
    %72 = arith.negf %71 : vector<8x128xf32>
    %73 = math.exp %72 : vector<8x128xf32>
    %cst_20 = arith.constant 1.000000e+00 : f32
    %74 = vector.broadcast %cst_20 : f32 to vector<8x128xf32>
    %75 = arith.addf %74, %73 : vector<8x128xf32>
    %76 = arith.divf %74, %75 : vector<8x128xf32>
    %77 = arith.mulf %71, %76 : vector<8x128xf32>
    %c0_21 = arith.constant 0 : index
    %c0_22 = arith.constant 0 : index
    %78 = vector.load %arg6[%c0_21, %c0_22] : memref<128x36xf32, #tpu.memory_space<vmem>>, vector<128x36xf32>
    %cst_23 = arith.constant dense<0.000000e+00> : vector<8x36xf32>
    %79 = tpu.matmul %77, %78, %cst_23 {dimension_numbers = #tpu.dot_dimension_numbers<[1], [0], [0], [1], [0, 0, 1, 1], [], []>} : vector<8x128xf32>, vector<128x36xf32>, vector<8x36xf32> -> vector<8x36xf32>
    %80 = vector.extract_strided_slice %79 {offsets = [0, 0], sizes = [8, 4], strides = [1, 1]} : vector<8x36xf32> to vector<8x4xf32>
    %c0_24 = arith.constant 0 : index
    %c0_25 = arith.constant 0 : index
    %81 = vector.load %arg7[%c0_24, %c0_25] : memref<1x4xf32, #tpu.memory_space<vmem>>, vector<1x4xf32>
    %82 = arith.mulf %80, %80 : vector<8x4xf32>
    %cst_26 = arith.constant dense<0.000000e+00> : vector<8xf32>
    %83 = vector.multi_reduction <add>, %82, %cst_26 [1] : vector<8x4xf32> to vector<8xf32>
    %84 = vector.shape_cast %83 : vector<8xf32> to vector<8x1xf32>
    %cst_27 = arith.constant 4.000000e+00 : f32
    %85 = vector.broadcast %cst_27 : f32 to vector<8x1xf32>
    %86 = arith.divf %84, %85 : vector<8x1xf32>
    %cst_28 = arith.constant 9.99999997E-7 : f32
    %87 = vector.broadcast %cst_28 : f32 to vector<8x1xf32>
    %88 = arith.addf %86, %87 : vector<8x1xf32>
    %89 = math.rsqrt %88 : vector<8x1xf32>
    %90 = vector.broadcast %89 : vector<8x1xf32> to vector<8x4xf32>
    %91 = arith.mulf %80, %90 : vector<8x4xf32>
    %92 = vector.broadcast %81 : vector<1x4xf32> to vector<8x4xf32>
    %93 = arith.mulf %91, %92 : vector<8x4xf32>
    %94 = vector.extract_strided_slice %79 {offsets = [0, 4], sizes = [8, 16], strides = [1, 1]} : vector<8x36xf32> to vector<8x16xf32>
    %c0_29 = arith.constant 0 : index
    %c0_30 = arith.constant 0 : index
    %95 = vector.load %arg8[%c0_29, %c0_30] : memref<1x16xf32, #tpu.memory_space<vmem>>, vector<1x16xf32>
    %96 = arith.mulf %94, %94 : vector<8x16xf32>
    %cst_31 = arith.constant dense<0.000000e+00> : vector<8xf32>
    %97 = vector.multi_reduction <add>, %96, %cst_31 [1] : vector<8x16xf32> to vector<8xf32>
    %98 = vector.shape_cast %97 : vector<8xf32> to vector<8x1xf32>
    %cst_32 = arith.constant 1.600000e+01 : f32
    %99 = vector.broadcast %cst_32 : f32 to vector<8x1xf32>
    %100 = arith.divf %98, %99 : vector<8x1xf32>
    %cst_33 = arith.constant 9.99999997E-7 : f32
    %101 = vector.broadcast %cst_33 : f32 to vector<8x1xf32>
    %102 = arith.addf %100, %101 : vector<8x1xf32>
    %103 = math.rsqrt %102 : vector<8x1xf32>
    %104 = vector.broadcast %103 : vector<8x1xf32> to vector<8x16xf32>
    %105 = arith.mulf %94, %104 : vector<8x16xf32>
    %106 = vector.broadcast %95 : vector<1x16xf32> to vector<8x16xf32>
    %107 = arith.mulf %105, %106 : vector<8x16xf32>
    %108 = vector.extract_strided_slice %79 {offsets = [0, 20], sizes = [8, 16], strides = [1, 1]} : vector<8x36xf32> to vector<8x16xf32>
    %c0_34 = arith.constant 0 : index
    %c0_35 = arith.constant 0 : index
    %109 = vector.load %arg9[%c0_34, %c0_35] : memref<1x16xf32, #tpu.memory_space<vmem>>, vector<1x16xf32>
    %110 = arith.mulf %108, %108 : vector<8x16xf32>
    %cst_36 = arith.constant dense<0.000000e+00> : vector<8xf32>
    %111 = vector.multi_reduction <add>, %110, %cst_36 [1] : vector<8x16xf32> to vector<8xf32>
    %112 = vector.shape_cast %111 : vector<8xf32> to vector<8x1xf32>
    %cst_37 = arith.constant 1.600000e+01 : f32
    %113 = vector.broadcast %cst_37 : f32 to vector<8x1xf32>
    %114 = arith.divf %112, %113 : vector<8x1xf32>
    %cst_38 = arith.constant 9.99999997E-7 : f32
    %115 = vector.broadcast %cst_38 : f32 to vector<8x1xf32>
    %116 = arith.addf %114, %115 : vector<8x1xf32>
    %117 = math.rsqrt %116 : vector<8x1xf32>
    %118 = vector.broadcast %117 : vector<8x1xf32> to vector<8x16xf32>
    %119 = arith.mulf %108, %118 : vector<8x16xf32>
    %120 = vector.broadcast %109 : vector<1x16xf32> to vector<8x16xf32>
    %121 = arith.mulf %119, %120 : vector<8x16xf32>
    %c0_39 = arith.constant 0 : index
    %c0_40 = arith.constant 0 : index
    %122 = vector.load %arg10[%c0_39, %c0_40] : memref<4x128xf32, #tpu.memory_space<vmem>>, vector<4x128xf32>
    %cst_41 = arith.constant dense<0.000000e+00> : vector<8x128xf32>
    %123 = tpu.matmul %93, %122, %cst_41 {dimension_numbers = #tpu.dot_dimension_numbers<[1], [0], [0], [1], [0, 0, 1, 1], [], []>} : vector<8x4xf32>, vector<4x128xf32>, vector<8x128xf32> -> vector<8x128xf32>
    %c0_42 = arith.constant 0 : index
    %c0_43 = arith.constant 0 : index
    %124 = vector.load %arg11[%c0_42, %c0_43] : memref<1x128xf32, #tpu.memory_space<vmem>>, vector<1x128xf32>
    %125 = vector.broadcast %124 : vector<1x128xf32> to vector<8x128xf32>
    %126 = arith.addf %123, %125 : vector<8x128xf32>
    %cst_44 = arith.constant 0.000000e+00 : f32
    %127 = vector.broadcast %cst_44 : f32 to vector<8x128xf32>
    %128 = arith.maximumf %126, %127 : vector<8x128xf32>
    %129 = vector.broadcast %cst_44 : f32 to vector<8x128xf32>
    %130 = arith.subf %126, %129 : vector<8x128xf32>
    %131 = arith.cmpf one, %130, %130 : vector<8x128xf32>
    %132 = vector.broadcast %cst_44 : f32 to vector<8x128xf32>
    %133 = arith.addf %126, %132 : vector<8x128xf32>
    %134 = math.absf %130 : vector<8x128xf32>
    %cst_45 = arith.constant 0.000000e+00 : f32
    %135 = vector.broadcast %cst_45 : f32 to vector<8x128xf32>
    %136 = arith.subf %135, %134 : vector<8x128xf32>
    %137 = math.exp %136 : vector<8x128xf32>
    %138 = math.log1p %137 : vector<8x128xf32>
    %139 = arith.addf %128, %138 : vector<8x128xf32>
    %140 = arith.select %131, %133, %139 : vector<8x128xi1>, vector<8x128xf32>
    %141 = arith.mulf %140, %77 : vector<8x128xf32>
    %c0_46 = arith.constant 0 : index
    %c0_47 = arith.constant 0 : index
    %142 = vector.load %arg12[%c0_46, %c0_47] : memref<16x128xf32, #tpu.memory_space<vmem>>, vector<16x128xf32>
    %143 = tpu.iota {dimensions = array<i32: 0>} : vector<16x16xi32>
    %144 = tpu.iota {dimensions = array<i32: 1>} : vector<16x16xi32>
    %145 = arith.cmpi eq, %143, %144 : vector<16x16xi32>
    %146 = arith.extui %145 : vector<16x16xi1> to vector<16x16xi32>
    %147 = arith.sitofp %146 : vector<16x16xi32> to vector<16x16xf32>
    %148 = tpu.iota {dimensions = array<i32: 0>} : vector<8x128xi32>
    %cst_48 = arith.constant 0.000000e+00 : f32
    %149 = vector.broadcast %cst_48 : f32 to vector<16x128xf32>
    %cst_49 = arith.constant 0.000000e+00 : f32
    %150 = vector.broadcast %cst_49 : f32 to vector<8x128xf32>
    %151 = vector.extract_strided_slice %140 {offsets = [0, 0], sizes = [1, 128], strides = [1, 1]} : vector<8x128xf32> to vector<1x128xf32>
    %152 = vector.extract_strided_slice %107 {offsets = [0, 0], sizes = [1, 16], strides = [1, 1]} : vector<8x16xf32> to vector<1x16xf32>
    %153 = vector.broadcast %152 : vector<1x16xf32> to vector<16x16xf32>
    %154 = arith.mulf %147, %153 : vector<16x16xf32>
    %cst_50 = arith.constant dense<0.000000e+00> : vector<16xf32>
    %155 = vector.multi_reduction <add>, %154, %cst_50 [1] : vector<16x16xf32> to vector<16xf32>
    %156 = vector.shape_cast %155 : vector<16xf32> to vector<16x1xf32>
    %157 = vector.broadcast %151 : vector<1x128xf32> to vector<16x128xf32>
    %158 = arith.mulf %157, %142 : vector<16x128xf32>
    %159 = math.exp %158 : vector<16x128xf32>
    %160 = arith.mulf %159, %149 : vector<16x128xf32>
    %161 = vector.extract_strided_slice %141 {offsets = [0, 0], sizes = [1, 128], strides = [1, 1]} : vector<8x128xf32> to vector<1x128xf32>
    %162 = vector.broadcast %156 : vector<16x1xf32> to vector<16x128xf32>
    %163 = vector.broadcast %161 : vector<1x128xf32> to vector<16x128xf32>
    %164 = arith.mulf %162, %163 : vector<16x128xf32>
    %165 = arith.addf %160, %164 : vector<16x128xf32>
    %166 = vector.extract_strided_slice %121 {offsets = [0, 0], sizes = [1, 16], strides = [1, 1]} : vector<8x16xf32> to vector<1x16xf32>
    %cst_51 = arith.constant dense<0.000000e+00> : vector<1x128xf32>
    %167 = tpu.matmul %166, %165, %cst_51 {dimension_numbers = #tpu.dot_dimension_numbers<[1], [0], [0], [1], [0, 0, 1, 1], [], []>} : vector<1x16xf32>, vector<16x128xf32>, vector<1x128xf32> -> vector<1x128xf32>
    %c0_i32_52 = arith.constant 0 : i32
    %168 = vector.broadcast %c0_i32_52 : i32 to vector<8x128xi32>
    %169 = arith.cmpi eq, %148, %168 : vector<8x128xi32>
    %170 = arith.extui %169 : vector<8x128xi1> to vector<8x128xi32>
    %171 = arith.sitofp %170 : vector<8x128xi32> to vector<8x128xf32>
    %172 = vector.broadcast %167 : vector<1x128xf32> to vector<8x128xf32>
    %173 = arith.mulf %171, %172 : vector<8x128xf32>
    %174 = arith.addf %150, %173 : vector<8x128xf32>
    %175 = vector.extract_strided_slice %140 {offsets = [1, 0], sizes = [1, 128], strides = [1, 1]} : vector<8x128xf32> to vector<1x128xf32>
    %176 = vector.extract_strided_slice %107 {offsets = [1, 0], sizes = [1, 16], strides = [1, 1]} : vector<8x16xf32> to vector<1x16xf32>
    %177 = vector.broadcast %176 : vector<1x16xf32> to vector<16x16xf32>
    %178 = arith.mulf %147, %177 : vector<16x16xf32>
    %cst_53 = arith.constant dense<0.000000e+00> : vector<16xf32>
    %179 = vector.multi_reduction <add>, %178, %cst_53 [1] : vector<16x16xf32> to vector<16xf32>
    %180 = vector.shape_cast %179 : vector<16xf32> to vector<16x1xf32>
    %181 = vector.broadcast %175 : vector<1x128xf32> to vector<16x128xf32>
    %182 = arith.mulf %181, %142 : vector<16x128xf32>
    %183 = math.exp %182 : vector<16x128xf32>
    %184 = arith.mulf %183, %165 : vector<16x128xf32>
    %185 = vector.extract_strided_slice %141 {offsets = [1, 0], sizes = [1, 128], strides = [1, 1]} : vector<8x128xf32> to vector<1x128xf32>
    %186 = vector.broadcast %180 : vector<16x1xf32> to vector<16x128xf32>
    %187 = vector.broadcast %185 : vector<1x128xf32> to vector<16x128xf32>
    %188 = arith.mulf %186, %187 : vector<16x128xf32>
    %189 = arith.addf %184, %188 : vector<16x128xf32>
    %190 = vector.extract_strided_slice %121 {offsets = [1, 0], sizes = [1, 16], strides = [1, 1]} : vector<8x16xf32> to vector<1x16xf32>
    %cst_54 = arith.constant dense<0.000000e+00> : vector<1x128xf32>
    %191 = tpu.matmul %190, %189, %cst_54 {dimension_numbers = #tpu.dot_dimension_numbers<[1], [0], [0], [1], [0, 0, 1, 1], [], []>} : vector<1x16xf32>, vector<16x128xf32>, vector<1x128xf32> -> vector<1x128xf32>
    %c1_i32_55 = arith.constant 1 : i32
    %192 = vector.broadcast %c1_i32_55 : i32 to vector<8x128xi32>
    %193 = arith.cmpi eq, %148, %192 : vector<8x128xi32>
    %194 = arith.extui %193 : vector<8x128xi1> to vector<8x128xi32>
    %195 = arith.sitofp %194 : vector<8x128xi32> to vector<8x128xf32>
    %196 = vector.broadcast %191 : vector<1x128xf32> to vector<8x128xf32>
    %197 = arith.mulf %195, %196 : vector<8x128xf32>
    %198 = arith.addf %174, %197 : vector<8x128xf32>
    %199 = vector.extract_strided_slice %140 {offsets = [2, 0], sizes = [1, 128], strides = [1, 1]} : vector<8x128xf32> to vector<1x128xf32>
    %200 = vector.extract_strided_slice %107 {offsets = [2, 0], sizes = [1, 16], strides = [1, 1]} : vector<8x16xf32> to vector<1x16xf32>
    %201 = vector.broadcast %200 : vector<1x16xf32> to vector<16x16xf32>
    %202 = arith.mulf %147, %201 : vector<16x16xf32>
    %cst_56 = arith.constant dense<0.000000e+00> : vector<16xf32>
    %203 = vector.multi_reduction <add>, %202, %cst_56 [1] : vector<16x16xf32> to vector<16xf32>
    %204 = vector.shape_cast %203 : vector<16xf32> to vector<16x1xf32>
    %205 = vector.broadcast %199 : vector<1x128xf32> to vector<16x128xf32>
    %206 = arith.mulf %205, %142 : vector<16x128xf32>
    %207 = math.exp %206 : vector<16x128xf32>
    %208 = arith.mulf %207, %189 : vector<16x128xf32>
    %209 = vector.extract_strided_slice %141 {offsets = [2, 0], sizes = [1, 128], strides = [1, 1]} : vector<8x128xf32> to vector<1x128xf32>
    %210 = vector.broadcast %204 : vector<16x1xf32> to vector<16x128xf32>
    %211 = vector.broadcast %209 : vector<1x128xf32> to vector<16x128xf32>
    %212 = arith.mulf %210, %211 : vector<16x128xf32>
    %213 = arith.addf %208, %212 : vector<16x128xf32>
    %214 = vector.extract_strided_slice %121 {offsets = [2, 0], sizes = [1, 16], strides = [1, 1]} : vector<8x16xf32> to vector<1x16xf32>
    %cst_57 = arith.constant dense<0.000000e+00> : vector<1x128xf32>
    %215 = tpu.matmul %214, %213, %cst_57 {dimension_numbers = #tpu.dot_dimension_numbers<[1], [0], [0], [1], [0, 0, 1, 1], [], []>} : vector<1x16xf32>, vector<16x128xf32>, vector<1x128xf32> -> vector<1x128xf32>
    %c2_i32_58 = arith.constant 2 : i32
    %216 = vector.broadcast %c2_i32_58 : i32 to vector<8x128xi32>
    %217 = arith.cmpi eq, %148, %216 : vector<8x128xi32>
    %218 = arith.extui %217 : vector<8x128xi1> to vector<8x128xi32>
    %219 = arith.sitofp %218 : vector<8x128xi32> to vector<8x128xf32>
    %220 = vector.broadcast %215 : vector<1x128xf32> to vector<8x128xf32>
    %221 = arith.mulf %219, %220 : vector<8x128xf32>
    %222 = arith.addf %198, %221 : vector<8x128xf32>
    %223 = vector.extract_strided_slice %140 {offsets = [3, 0], sizes = [1, 128], strides = [1, 1]} : vector<8x128xf32> to vector<1x128xf32>
    %224 = vector.extract_strided_slice %107 {offsets = [3, 0], sizes = [1, 16], strides = [1, 1]} : vector<8x16xf32> to vector<1x16xf32>
    %225 = vector.broadcast %224 : vector<1x16xf32> to vector<16x16xf32>
    %226 = arith.mulf %147, %225 : vector<16x16xf32>
    %cst_59 = arith.constant dense<0.000000e+00> : vector<16xf32>
    %227 = vector.multi_reduction <add>, %226, %cst_59 [1] : vector<16x16xf32> to vector<16xf32>
    %228 = vector.shape_cast %227 : vector<16xf32> to vector<16x1xf32>
    %229 = vector.broadcast %223 : vector<1x128xf32> to vector<16x128xf32>
    %230 = arith.mulf %229, %142 : vector<16x128xf32>
    %231 = math.exp %230 : vector<16x128xf32>
    %232 = arith.mulf %231, %213 : vector<16x128xf32>
    %233 = vector.extract_strided_slice %141 {offsets = [3, 0], sizes = [1, 128], strides = [1, 1]} : vector<8x128xf32> to vector<1x128xf32>
    %234 = vector.broadcast %228 : vector<16x1xf32> to vector<16x128xf32>
    %235 = vector.broadcast %233 : vector<1x128xf32> to vector<16x128xf32>
    %236 = arith.mulf %234, %235 : vector<16x128xf32>
    %237 = arith.addf %232, %236 : vector<16x128xf32>
    %238 = vector.extract_strided_slice %121 {offsets = [3, 0], sizes = [1, 16], strides = [1, 1]} : vector<8x16xf32> to vector<1x16xf32>
    %cst_60 = arith.constant dense<0.000000e+00> : vector<1x128xf32>
    %239 = tpu.matmul %238, %237, %cst_60 {dimension_numbers = #tpu.dot_dimension_numbers<[1], [0], [0], [1], [0, 0, 1, 1], [], []>} : vector<1x16xf32>, vector<16x128xf32>, vector<1x128xf32> -> vector<1x128xf32>
    %c3_i32_61 = arith.constant 3 : i32
    %240 = vector.broadcast %c3_i32_61 : i32 to vector<8x128xi32>
    %241 = arith.cmpi eq, %148, %240 : vector<8x128xi32>
    %242 = arith.extui %241 : vector<8x128xi1> to vector<8x128xi32>
    %243 = arith.sitofp %242 : vector<8x128xi32> to vector<8x128xf32>
    %244 = vector.broadcast %239 : vector<1x128xf32> to vector<8x128xf32>
    %245 = arith.mulf %243, %244 : vector<8x128xf32>
    %246 = arith.addf %222, %245 : vector<8x128xf32>
    %247 = vector.extract_strided_slice %140 {offsets = [4, 0], sizes = [1, 128], strides = [1, 1]} : vector<8x128xf32> to vector<1x128xf32>
    %248 = vector.extract_strided_slice %107 {offsets = [4, 0], sizes = [1, 16], strides = [1, 1]} : vector<8x16xf32> to vector<1x16xf32>
    %249 = vector.broadcast %248 : vector<1x16xf32> to vector<16x16xf32>
    %250 = arith.mulf %147, %249 : vector<16x16xf32>
    %cst_62 = arith.constant dense<0.000000e+00> : vector<16xf32>
    %251 = vector.multi_reduction <add>, %250, %cst_62 [1] : vector<16x16xf32> to vector<16xf32>
    %252 = vector.shape_cast %251 : vector<16xf32> to vector<16x1xf32>
    %253 = vector.broadcast %247 : vector<1x128xf32> to vector<16x128xf32>
    %254 = arith.mulf %253, %142 : vector<16x128xf32>
    %255 = math.exp %254 : vector<16x128xf32>
    %256 = arith.mulf %255, %237 : vector<16x128xf32>
    %257 = vector.extract_strided_slice %141 {offsets = [4, 0], sizes = [1, 128], strides = [1, 1]} : vector<8x128xf32> to vector<1x128xf32>
    %258 = vector.broadcast %252 : vector<16x1xf32> to vector<16x128xf32>
    %259 = vector.broadcast %257 : vector<1x128xf32> to vector<16x128xf32>
    %260 = arith.mulf %258, %259 : vector<16x128xf32>
    %261 = arith.addf %256, %260 : vector<16x128xf32>
    %262 = vector.extract_strided_slice %121 {offsets = [4, 0], sizes = [1, 16], strides = [1, 1]} : vector<8x16xf32> to vector<1x16xf32>
    %cst_63 = arith.constant dense<0.000000e+00> : vector<1x128xf32>
    %263 = tpu.matmul %262, %261, %cst_63 {dimension_numbers = #tpu.dot_dimension_numbers<[1], [0], [0], [1], [0, 0, 1, 1], [], []>} : vector<1x16xf32>, vector<16x128xf32>, vector<1x128xf32> -> vector<1x128xf32>
    %c4_i32 = arith.constant 4 : i32
    %264 = vector.broadcast %c4_i32 : i32 to vector<8x128xi32>
    %265 = arith.cmpi eq, %148, %264 : vector<8x128xi32>
    %266 = arith.extui %265 : vector<8x128xi1> to vector<8x128xi32>
    %267 = arith.sitofp %266 : vector<8x128xi32> to vector<8x128xf32>
    %268 = vector.broadcast %263 : vector<1x128xf32> to vector<8x128xf32>
    %269 = arith.mulf %267, %268 : vector<8x128xf32>
    %270 = arith.addf %246, %269 : vector<8x128xf32>
    %271 = vector.extract_strided_slice %140 {offsets = [5, 0], sizes = [1, 128], strides = [1, 1]} : vector<8x128xf32> to vector<1x128xf32>
    %272 = vector.extract_strided_slice %107 {offsets = [5, 0], sizes = [1, 16], strides = [1, 1]} : vector<8x16xf32> to vector<1x16xf32>
    %273 = vector.broadcast %272 : vector<1x16xf32> to vector<16x16xf32>
    %274 = arith.mulf %147, %273 : vector<16x16xf32>
    %cst_64 = arith.constant dense<0.000000e+00> : vector<16xf32>
    %275 = vector.multi_reduction <add>, %274, %cst_64 [1] : vector<16x16xf32> to vector<16xf32>
    %276 = vector.shape_cast %275 : vector<16xf32> to vector<16x1xf32>
    %277 = vector.broadcast %271 : vector<1x128xf32> to vector<16x128xf32>
    %278 = arith.mulf %277, %142 : vector<16x128xf32>
    %279 = math.exp %278 : vector<16x128xf32>
    %280 = arith.mulf %279, %261 : vector<16x128xf32>
    %281 = vector.extract_strided_slice %141 {offsets = [5, 0], sizes = [1, 128], strides = [1, 1]} : vector<8x128xf32> to vector<1x128xf32>
    %282 = vector.broadcast %276 : vector<16x1xf32> to vector<16x128xf32>
    %283 = vector.broadcast %281 : vector<1x128xf32> to vector<16x128xf32>
    %284 = arith.mulf %282, %283 : vector<16x128xf32>
    %285 = arith.addf %280, %284 : vector<16x128xf32>
    %286 = vector.extract_strided_slice %121 {offsets = [5, 0], sizes = [1, 16], strides = [1, 1]} : vector<8x16xf32> to vector<1x16xf32>
    %cst_65 = arith.constant dense<0.000000e+00> : vector<1x128xf32>
    %287 = tpu.matmul %286, %285, %cst_65 {dimension_numbers = #tpu.dot_dimension_numbers<[1], [0], [0], [1], [0, 0, 1, 1], [], []>} : vector<1x16xf32>, vector<16x128xf32>, vector<1x128xf32> -> vector<1x128xf32>
    %c5_i32 = arith.constant 5 : i32
    %288 = vector.broadcast %c5_i32 : i32 to vector<8x128xi32>
    %289 = arith.cmpi eq, %148, %288 : vector<8x128xi32>
    %290 = arith.extui %289 : vector<8x128xi1> to vector<8x128xi32>
    %291 = arith.sitofp %290 : vector<8x128xi32> to vector<8x128xf32>
    %292 = vector.broadcast %287 : vector<1x128xf32> to vector<8x128xf32>
    %293 = arith.mulf %291, %292 : vector<8x128xf32>
    %294 = arith.addf %270, %293 : vector<8x128xf32>
    %295 = vector.extract_strided_slice %140 {offsets = [6, 0], sizes = [1, 128], strides = [1, 1]} : vector<8x128xf32> to vector<1x128xf32>
    %296 = vector.extract_strided_slice %107 {offsets = [6, 0], sizes = [1, 16], strides = [1, 1]} : vector<8x16xf32> to vector<1x16xf32>
    %297 = vector.broadcast %296 : vector<1x16xf32> to vector<16x16xf32>
    %298 = arith.mulf %147, %297 : vector<16x16xf32>
    %cst_66 = arith.constant dense<0.000000e+00> : vector<16xf32>
    %299 = vector.multi_reduction <add>, %298, %cst_66 [1] : vector<16x16xf32> to vector<16xf32>
    %300 = vector.shape_cast %299 : vector<16xf32> to vector<16x1xf32>
    %301 = vector.broadcast %295 : vector<1x128xf32> to vector<16x128xf32>
    %302 = arith.mulf %301, %142 : vector<16x128xf32>
    %303 = math.exp %302 : vector<16x128xf32>
    %304 = arith.mulf %303, %285 : vector<16x128xf32>
    %305 = vector.extract_strided_slice %141 {offsets = [6, 0], sizes = [1, 128], strides = [1, 1]} : vector<8x128xf32> to vector<1x128xf32>
    %306 = vector.broadcast %300 : vector<16x1xf32> to vector<16x128xf32>
    %307 = vector.broadcast %305 : vector<1x128xf32> to vector<16x128xf32>
    %308 = arith.mulf %306, %307 : vector<16x128xf32>
    %309 = arith.addf %304, %308 : vector<16x128xf32>
    %310 = vector.extract_strided_slice %121 {offsets = [6, 0], sizes = [1, 16], strides = [1, 1]} : vector<8x16xf32> to vector<1x16xf32>
    %cst_67 = arith.constant dense<0.000000e+00> : vector<1x128xf32>
    %311 = tpu.matmul %310, %309, %cst_67 {dimension_numbers = #tpu.dot_dimension_numbers<[1], [0], [0], [1], [0, 0, 1, 1], [], []>} : vector<1x16xf32>, vector<16x128xf32>, vector<1x128xf32> -> vector<1x128xf32>
    %c6_i32 = arith.constant 6 : i32
    %312 = vector.broadcast %c6_i32 : i32 to vector<8x128xi32>
    %313 = arith.cmpi eq, %148, %312 : vector<8x128xi32>
    %314 = arith.extui %313 : vector<8x128xi1> to vector<8x128xi32>
    %315 = arith.sitofp %314 : vector<8x128xi32> to vector<8x128xf32>
    %316 = vector.broadcast %311 : vector<1x128xf32> to vector<8x128xf32>
    %317 = arith.mulf %315, %316 : vector<8x128xf32>
    %318 = arith.addf %294, %317 : vector<8x128xf32>
    %319 = vector.extract_strided_slice %140 {offsets = [7, 0], sizes = [1, 128], strides = [1, 1]} : vector<8x128xf32> to vector<1x128xf32>
    %320 = vector.extract_strided_slice %107 {offsets = [7, 0], sizes = [1, 16], strides = [1, 1]} : vector<8x16xf32> to vector<1x16xf32>
    %321 = vector.broadcast %320 : vector<1x16xf32> to vector<16x16xf32>
    %322 = arith.mulf %147, %321 : vector<16x16xf32>
    %cst_68 = arith.constant dense<0.000000e+00> : vector<16xf32>
    %323 = vector.multi_reduction <add>, %322, %cst_68 [1] : vector<16x16xf32> to vector<16xf32>
    %324 = vector.shape_cast %323 : vector<16xf32> to vector<16x1xf32>
    %325 = vector.broadcast %319 : vector<1x128xf32> to vector<16x128xf32>
    %326 = arith.mulf %325, %142 : vector<16x128xf32>
    %327 = math.exp %326 : vector<16x128xf32>
    %328 = arith.mulf %327, %309 : vector<16x128xf32>
    %329 = vector.extract_strided_slice %141 {offsets = [7, 0], sizes = [1, 128], strides = [1, 1]} : vector<8x128xf32> to vector<1x128xf32>
    %330 = vector.broadcast %324 : vector<16x1xf32> to vector<16x128xf32>
    %331 = vector.broadcast %329 : vector<1x128xf32> to vector<16x128xf32>
    %332 = arith.mulf %330, %331 : vector<16x128xf32>
    %333 = arith.addf %328, %332 : vector<16x128xf32>
    %334 = vector.extract_strided_slice %121 {offsets = [7, 0], sizes = [1, 16], strides = [1, 1]} : vector<8x16xf32> to vector<1x16xf32>
    %cst_69 = arith.constant dense<0.000000e+00> : vector<1x128xf32>
    %335 = tpu.matmul %334, %333, %cst_69 {dimension_numbers = #tpu.dot_dimension_numbers<[1], [0], [0], [1], [0, 0, 1, 1], [], []>} : vector<1x16xf32>, vector<16x128xf32>, vector<1x128xf32> -> vector<1x128xf32>
    %c7_i32 = arith.constant 7 : i32
    %336 = vector.broadcast %c7_i32 : i32 to vector<8x128xi32>
    %337 = arith.cmpi eq, %148, %336 : vector<8x128xi32>
    %338 = arith.extui %337 : vector<8x128xi1> to vector<8x128xi32>
    %339 = arith.sitofp %338 : vector<8x128xi32> to vector<8x128xf32>
    %340 = vector.broadcast %335 : vector<1x128xf32> to vector<8x128xf32>
    %341 = arith.mulf %339, %340 : vector<8x128xf32>
    %342 = arith.addf %318, %341 : vector<8x128xf32>
    %c0_70 = arith.constant 0 : index
    %c0_71 = arith.constant 0 : index
    %343 = vector.load %arg13[%c0_70, %c0_71] : memref<1x128xf32, #tpu.memory_space<vmem>>, vector<1x128xf32>
    %344 = vector.broadcast %343 : vector<1x128xf32> to vector<8x128xf32>
    %345 = arith.mulf %77, %344 : vector<8x128xf32>
    %346 = arith.addf %342, %345 : vector<8x128xf32>
    %347 = arith.negf %24 : vector<8x128xf32>
    %348 = math.exp %347 : vector<8x128xf32>
    %cst_72 = arith.constant 1.000000e+00 : f32
    %349 = vector.broadcast %cst_72 : f32 to vector<8x128xf32>
    %350 = arith.addf %349, %348 : vector<8x128xf32>
    %351 = arith.divf %349, %350 : vector<8x128xf32>
    %352 = arith.mulf %24, %351 : vector<8x128xf32>
    %353 = arith.mulf %346, %352 : vector<8x128xf32>
    %c0_73 = arith.constant 0 : index
    %c0_74 = arith.constant 0 : index
    %354 = vector.load %arg14[%c0_73, %c0_74] : memref<128x64xf32, #tpu.memory_space<vmem>>, vector<128x64xf32>
    %cst_75 = arith.constant dense<0.000000e+00> : vector<8x64xf32>
    %355 = tpu.matmul %353, %354, %cst_75 {dimension_numbers = #tpu.dot_dimension_numbers<[1], [0], [0], [1], [0, 0, 1, 1], [], []>} : vector<8x128xf32>, vector<128x64xf32>, vector<8x64xf32> -> vector<8x64xf32>
    %356 = arith.addf %355, %7 : vector<8x64xf32>
    %c0_76 = arith.constant 0 : index
    %c0_77 = arith.constant 0 : index
    %357 = vector.load %arg19[%c0_76, %c0_77] : memref<8x64xf32, #tpu.memory_space<vmem>>, vector<8x64xf32>
    tpu.vector_store %arg19[%c0_76, %c0_77], %356 {strides = array<i32>} : memref<8x64xf32, #tpu.memory_space<vmem>>, vector<8x64xf32>,
    %c0_78 = arith.constant 0 : index
    %c0_79 = arith.constant 0 : index
    %358 = vector.load %arg15[%c0_78, %c0_79] : memref<1x64xf32, #tpu.memory_space<vmem>>, vector<1x64xf32>
    %359 = arith.mulf %356, %356 : vector<8x64xf32>
    %cst_80 = arith.constant dense<0.000000e+00> : vector<8xf32>
    %360 = vector.multi_reduction <add>, %359, %cst_80 [1] : vector<8x64xf32> to vector<8xf32>
    %361 = vector.shape_cast %360 : vector<8xf32> to vector<8x1xf32>
    %cst_81 = arith.constant 6.400000e+01 : f32
    %362 = vector.broadcast %cst_81 : f32 to vector<8x1xf32>
    %363 = arith.divf %361, %362 : vector<8x1xf32>
    %cst_82 = arith.constant 9.99999997E-7 : f32
    %364 = vector.broadcast %cst_82 : f32 to vector<8x1xf32>
    %365 = arith.addf %363, %364 : vector<8x1xf32>
    %366 = math.rsqrt %365 : vector<8x1xf32>
    %367 = vector.broadcast %366 : vector<8x1xf32> to vector<8x64xf32>
    %368 = arith.mulf %356, %367 : vector<8x64xf32>
    %369 = vector.broadcast %358 : vector<1x64xf32> to vector<8x64xf32>
    %370 = arith.mulf %368, %369 : vector<8x64xf32>
    %c0_83 = arith.constant 0 : index
    %c0_84 = arith.constant 0 : index
    %371 = vector.load %arg16[%c0_83, %c0_84] : memref<64x256xf32, #tpu.memory_space<vmem>>, vector<64x256xf32>
    %cst_85 = arith.constant dense<0.000000e+00> : vector<8x256xf32>
    %372 = tpu.matmul %370, %371, %cst_85 {dimension_numbers = #tpu.dot_dimension_numbers<[1], [0], [0], [1], [0, 0, 1, 1], [], []>} : vector<8x64xf32>, vector<64x256xf32>, vector<8x256xf32> -> vector<8x256xf32>
    %373 = vector.extract_strided_slice %372 {offsets = [0, 0], sizes = [8, 128], strides = [1, 1]} : vector<8x256xf32> to vector<8x128xf32>
    %374 = arith.negf %373 : vector<8x128xf32>
    %375 = math.exp %374 : vector<8x128xf32>
    %cst_86 = arith.constant 1.000000e+00 : f32
    %376 = vector.broadcast %cst_86 : f32 to vector<8x128xf32>
    %377 = arith.addf %376, %375 : vector<8x128xf32>
    %378 = arith.divf %376, %377 : vector<8x128xf32>
    %379 = arith.mulf %373, %378 : vector<8x128xf32>
    %380 = vector.extract_strided_slice %372 {offsets = [0, 128], sizes = [8, 128], strides = [1, 1]} : vector<8x256xf32> to vector<8x128xf32>
    %381 = arith.mulf %379, %380 : vector<8x128xf32>
    %c0_87 = arith.constant 0 : index
    %c0_88 = arith.constant 0 : index
    %382 = vector.load %arg17[%c0_87, %c0_88] : memref<128x64xf32, #tpu.memory_space<vmem>>, vector<128x64xf32>
    %cst_89 = arith.constant dense<0.000000e+00> : vector<8x64xf32>
    %383 = tpu.matmul %381, %382, %cst_89 {dimension_numbers = #tpu.dot_dimension_numbers<[1], [0], [0], [1], [0, 0, 1, 1], [], []>} : vector<8x128xf32>, vector<128x64xf32>, vector<8x64xf32> -> vector<8x64xf32>
    %c0_90 = arith.constant 0 : index
    %c0_91 = arith.constant 0 : index
    %384 = vector.load %arg18[%c0_90, %c0_91] : memref<8x64xf32, #tpu.memory_space<vmem>>, vector<8x64xf32>
    tpu.vector_store %arg18[%c0_90, %c0_91], %383 {strides = array<i32>} : memref<8x64xf32, #tpu.memory_space<vmem>>, vector<8x64xf32>,
    return
  }
}

module attributes {stable_mosaic.version = 11 : i64} {
  func.func @_layer_kernel(%arg0: memref<8x64xf32, #tpu.memory_space<vmem>>, %arg1: memref<8x64xf32, #tpu.memory_space<vmem>>, %arg2: memref<1x64xf32, #tpu.memory_space<vmem>>, %arg3: memref<64x128xf32, #tpu.memory_space<vmem>>, %arg4: memref<64x64xf32, #tpu.memory_space<vmem>>, %arg5: memref<1x64xf32, #tpu.memory_space<vmem>>, %arg6: memref<64x4xf32, #tpu.memory_space<vmem>>, %arg7: memref<4x64x256xf32, #tpu.memory_space<vmem>>, %arg8: memref<4x128x64xf32, #tpu.memory_space<vmem>>, %arg9: memref<8x64xf32, #tpu.memory_space<vmem>>, %arg10: memref<8x64xf32, #tpu.memory_space<vmem>>) attributes {dimension_semantics = [], scalar_prefetch = 0 : i64, scratch_operands = 0 : i64, tpu.core_type = #tpu.core_type<tc>} {
    %c0 = arith.constant 0 : index
    %c0_0 = arith.constant 0 : index
    %0 = vector.load %arg0[%c0, %c0_0] : memref<8x64xf32, #tpu.memory_space<vmem>>, vector<8x64xf32>
    %c0_1 = arith.constant 0 : index
    %c0_2 = arith.constant 0 : index
    %1 = vector.load %arg1[%c0_1, %c0_2] : memref<8x64xf32, #tpu.memory_space<vmem>>, vector<8x64xf32>
    %2 = arith.addf %0, %1 : vector<8x64xf32>
    %c0_3 = arith.constant 0 : index
    %c0_4 = arith.constant 0 : index
    %3 = vector.load %arg2[%c0_3, %c0_4] : memref<1x64xf32, #tpu.memory_space<vmem>>, vector<1x64xf32>
    %4 = arith.mulf %2, %2 : vector<8x64xf32>
    %cst = arith.constant dense<0.000000e+00> : vector<8xf32>
    %5 = vector.multi_reduction <add>, %4, %cst [1] : vector<8x64xf32> to vector<8xf32>
    %6 = vector.shape_cast %5 : vector<8xf32> to vector<8x1xf32>
    %cst_5 = arith.constant 6.400000e+01 : f32
    %7 = vector.broadcast %cst_5 : f32 to vector<8x1xf32>
    %8 = arith.divf %6, %7 : vector<8x1xf32>
    %cst_6 = arith.constant 9.99999997E-7 : f32
    %9 = vector.broadcast %cst_6 : f32 to vector<8x1xf32>
    %10 = arith.addf %8, %9 : vector<8x1xf32>
    %11 = math.rsqrt %10 : vector<8x1xf32>
    %12 = vector.broadcast %11 : vector<8x1xf32> to vector<8x64xf32>
    %13 = arith.mulf %2, %12 : vector<8x64xf32>
    %14 = vector.broadcast %3 : vector<1x64xf32> to vector<8x64xf32>
    %15 = arith.mulf %13, %14 : vector<8x64xf32>
    %c0_7 = arith.constant 0 : index
    %c0_8 = arith.constant 0 : index
    %16 = vector.load %arg3[%c0_7, %c0_8] : memref<64x128xf32, #tpu.memory_space<vmem>>, vector<64x128xf32>
    %cst_9 = arith.constant dense<0.000000e+00> : vector<8x128xf32>
    %17 = tpu.matmul %15, %16, %cst_9 {dimension_numbers = #tpu.dot_dimension_numbers<[1], [0], [0], [1], [0, 0, 1, 1], [], []>} : vector<8x64xf32>, vector<64x128xf32>, vector<8x128xf32> -> vector<8x128xf32>
    %18 = tpu.iota {dimensions = array<i32: 0>} : vector<8x8xi32>
    %19 = tpu.iota {dimensions = array<i32: 1>} : vector<8x8xi32>
    %20 = arith.cmpi sle, %19, %18 : vector<8x8xi32>
    %c0_10 = arith.constant 0 : index
    %c0_11 = arith.constant 0 : index
    %21 = vector.load %arg4[%c0_10, %c0_11] : memref<64x64xf32, #tpu.memory_space<vmem>>, vector<64x64xf32>
    %cst_12 = arith.constant 0.000000e+00 : f32
    %22 = vector.broadcast %cst_12 : f32 to vector<8x64xf32>
    %23 = vector.extract_strided_slice %17 {offsets = [0, 0], sizes = [8, 16], strides = [1, 1]} : vector<8x128xf32> to vector<8x16xf32>
    %24 = vector.extract_strided_slice %17 {offsets = [0, 64], sizes = [8, 16], strides = [1, 1]} : vector<8x128xf32> to vector<8x16xf32>
    %25 = vector.extract_strided_slice %17 {offsets = [0, 96], sizes = [8, 16], strides = [1, 1]} : vector<8x128xf32> to vector<8x16xf32>
    %26 = tpu.transpose %24, [1, 0] : vector<8x16xf32> -> vector<16x8xf32>
    %cst_13 = arith.constant dense<0.000000e+00> : vector<8x8xf32>
    %27 = tpu.matmul %23, %26, %cst_13 {dimension_numbers = #tpu.dot_dimension_numbers<[1], [0], [0], [1], [0, 0, 1, 1], [], []>} : vector<8x16xf32>, vector<16x8xf32>, vector<8x8xf32> -> vector<8x8xf32>
    %cst_14 = arith.constant 2.500000e-01 : f32
    %28 = vector.broadcast %cst_14 : f32 to vector<8x8xf32>
    %29 = arith.mulf %27, %28 : vector<8x8xf32>
    %cst_15 = arith.constant -1.000000e+30 : f32
    %30 = vector.broadcast %cst_15 : f32 to vector<8x8xf32>
    %31 = arith.select %20, %29, %30 : vector<8x8xi1>, vector<8x8xf32>
    %cst_16 = arith.constant dense<0xFF800000> : vector<8xf32>
    %32 = vector.multi_reduction <maximumf>, %31, %cst_16 [1] : vector<8x8xf32> to vector<8xf32>
    %33 = vector.shape_cast %32 : vector<8xf32> to vector<8x1xf32>
    %34 = vector.broadcast %33 : vector<8x1xf32> to vector<8x8xf32>
    %35 = arith.subf %31, %34 : vector<8x8xf32>
    %36 = math.exp %35 : vector<8x8xf32>
    %cst_17 = arith.constant dense<0.000000e+00> : vector<8xf32>
    %37 = vector.multi_reduction <add>, %36, %cst_17 [1] : vector<8x8xf32> to vector<8xf32>
    %38 = vector.shape_cast %37 : vector<8xf32> to vector<8x1xf32>
    %39 = tpu.reciprocal %38 {approx = true} : vector<8x1xf32> -> vector<8x1xf32>
    %40 = vector.broadcast %39 : vector<8x1xf32> to vector<8x8xf32>
    %41 = arith.mulf %36, %40 : vector<8x8xf32>
    %cst_18 = arith.constant dense<0.000000e+00> : vector<8x16xf32>
    %42 = tpu.matmul %41, %25, %cst_18 {dimension_numbers = #tpu.dot_dimension_numbers<[1], [0], [0], [1], [0, 0, 1, 1], [], []>} : vector<8x8xf32>, vector<8x16xf32>, vector<8x16xf32> -> vector<8x16xf32>
    %43 = vector.extract_strided_slice %21 {offsets = [0, 0], sizes = [16, 64], strides = [1, 1]} : vector<64x64xf32> to vector<16x64xf32>
    %cst_19 = arith.constant dense<0.000000e+00> : vector<8x64xf32>
    %44 = tpu.matmul %42, %43, %cst_19 {dimension_numbers = #tpu.dot_dimension_numbers<[1], [0], [0], [1], [0, 0, 1, 1], [], []>} : vector<8x16xf32>, vector<16x64xf32>, vector<8x64xf32> -> vector<8x64xf32>
    %45 = arith.addf %22, %44 : vector<8x64xf32>
    %46 = vector.extract_strided_slice %17 {offsets = [0, 16], sizes = [8, 16], strides = [1, 1]} : vector<8x128xf32> to vector<8x16xf32>
    %47 = vector.extract_strided_slice %17 {offsets = [0, 64], sizes = [8, 16], strides = [1, 1]} : vector<8x128xf32> to vector<8x16xf32>
    %48 = vector.extract_strided_slice %17 {offsets = [0, 96], sizes = [8, 16], strides = [1, 1]} : vector<8x128xf32> to vector<8x16xf32>
    %49 = tpu.transpose %47, [1, 0] : vector<8x16xf32> -> vector<16x8xf32>
    %cst_20 = arith.constant dense<0.000000e+00> : vector<8x8xf32>
    %50 = tpu.matmul %46, %49, %cst_20 {dimension_numbers = #tpu.dot_dimension_numbers<[1], [0], [0], [1], [0, 0, 1, 1], [], []>} : vector<8x16xf32>, vector<16x8xf32>, vector<8x8xf32> -> vector<8x8xf32>
    %cst_21 = arith.constant 2.500000e-01 : f32
    %51 = vector.broadcast %cst_21 : f32 to vector<8x8xf32>
    %52 = arith.mulf %50, %51 : vector<8x8xf32>
    %cst_22 = arith.constant -1.000000e+30 : f32
    %53 = vector.broadcast %cst_22 : f32 to vector<8x8xf32>
    %54 = arith.select %20, %52, %53 : vector<8x8xi1>, vector<8x8xf32>
    %cst_23 = arith.constant dense<0xFF800000> : vector<8xf32>
    %55 = vector.multi_reduction <maximumf>, %54, %cst_23 [1] : vector<8x8xf32> to vector<8xf32>
    %56 = vector.shape_cast %55 : vector<8xf32> to vector<8x1xf32>
    %57 = vector.broadcast %56 : vector<8x1xf32> to vector<8x8xf32>
    %58 = arith.subf %54, %57 : vector<8x8xf32>
    %59 = math.exp %58 : vector<8x8xf32>
    %cst_24 = arith.constant dense<0.000000e+00> : vector<8xf32>
    %60 = vector.multi_reduction <add>, %59, %cst_24 [1] : vector<8x8xf32> to vector<8xf32>
    %61 = vector.shape_cast %60 : vector<8xf32> to vector<8x1xf32>
    %62 = tpu.reciprocal %61 {approx = true} : vector<8x1xf32> -> vector<8x1xf32>
    %63 = vector.broadcast %62 : vector<8x1xf32> to vector<8x8xf32>
    %64 = arith.mulf %59, %63 : vector<8x8xf32>
    %cst_25 = arith.constant dense<0.000000e+00> : vector<8x16xf32>
    %65 = tpu.matmul %64, %48, %cst_25 {dimension_numbers = #tpu.dot_dimension_numbers<[1], [0], [0], [1], [0, 0, 1, 1], [], []>} : vector<8x8xf32>, vector<8x16xf32>, vector<8x16xf32> -> vector<8x16xf32>
    %66 = vector.extract_strided_slice %21 {offsets = [16, 0], sizes = [16, 64], strides = [1, 1]} : vector<64x64xf32> to vector<16x64xf32>
    %cst_26 = arith.constant dense<0.000000e+00> : vector<8x64xf32>
    %67 = tpu.matmul %65, %66, %cst_26 {dimension_numbers = #tpu.dot_dimension_numbers<[1], [0], [0], [1], [0, 0, 1, 1], [], []>} : vector<8x16xf32>, vector<16x64xf32>, vector<8x64xf32> -> vector<8x64xf32>
    %68 = arith.addf %45, %67 : vector<8x64xf32>
    %69 = vector.extract_strided_slice %17 {offsets = [0, 32], sizes = [8, 16], strides = [1, 1]} : vector<8x128xf32> to vector<8x16xf32>
    %70 = vector.extract_strided_slice %17 {offsets = [0, 80], sizes = [8, 16], strides = [1, 1]} : vector<8x128xf32> to vector<8x16xf32>
    %71 = vector.extract_strided_slice %17 {offsets = [0, 112], sizes = [8, 16], strides = [1, 1]} : vector<8x128xf32> to vector<8x16xf32>
    %72 = tpu.transpose %70, [1, 0] : vector<8x16xf32> -> vector<16x8xf32>
    %cst_27 = arith.constant dense<0.000000e+00> : vector<8x8xf32>
    %73 = tpu.matmul %69, %72, %cst_27 {dimension_numbers = #tpu.dot_dimension_numbers<[1], [0], [0], [1], [0, 0, 1, 1], [], []>} : vector<8x16xf32>, vector<16x8xf32>, vector<8x8xf32> -> vector<8x8xf32>
    %cst_28 = arith.constant 2.500000e-01 : f32
    %74 = vector.broadcast %cst_28 : f32 to vector<8x8xf32>
    %75 = arith.mulf %73, %74 : vector<8x8xf32>
    %cst_29 = arith.constant -1.000000e+30 : f32
    %76 = vector.broadcast %cst_29 : f32 to vector<8x8xf32>
    %77 = arith.select %20, %75, %76 : vector<8x8xi1>, vector<8x8xf32>
    %cst_30 = arith.constant dense<0xFF800000> : vector<8xf32>
    %78 = vector.multi_reduction <maximumf>, %77, %cst_30 [1] : vector<8x8xf32> to vector<8xf32>
    %79 = vector.shape_cast %78 : vector<8xf32> to vector<8x1xf32>
    %80 = vector.broadcast %79 : vector<8x1xf32> to vector<8x8xf32>
    %81 = arith.subf %77, %80 : vector<8x8xf32>
    %82 = math.exp %81 : vector<8x8xf32>
    %cst_31 = arith.constant dense<0.000000e+00> : vector<8xf32>
    %83 = vector.multi_reduction <add>, %82, %cst_31 [1] : vector<8x8xf32> to vector<8xf32>
    %84 = vector.shape_cast %83 : vector<8xf32> to vector<8x1xf32>
    %85 = tpu.reciprocal %84 {approx = true} : vector<8x1xf32> -> vector<8x1xf32>
    %86 = vector.broadcast %85 : vector<8x1xf32> to vector<8x8xf32>
    %87 = arith.mulf %82, %86 : vector<8x8xf32>
    %cst_32 = arith.constant dense<0.000000e+00> : vector<8x16xf32>
    %88 = tpu.matmul %87, %71, %cst_32 {dimension_numbers = #tpu.dot_dimension_numbers<[1], [0], [0], [1], [0, 0, 1, 1], [], []>} : vector<8x8xf32>, vector<8x16xf32>, vector<8x16xf32> -> vector<8x16xf32>
    %89 = vector.extract_strided_slice %21 {offsets = [32, 0], sizes = [16, 64], strides = [1, 1]} : vector<64x64xf32> to vector<16x64xf32>
    %cst_33 = arith.constant dense<0.000000e+00> : vector<8x64xf32>
    %90 = tpu.matmul %88, %89, %cst_33 {dimension_numbers = #tpu.dot_dimension_numbers<[1], [0], [0], [1], [0, 0, 1, 1], [], []>} : vector<8x16xf32>, vector<16x64xf32>, vector<8x64xf32> -> vector<8x64xf32>
    %91 = arith.addf %68, %90 : vector<8x64xf32>
    %92 = vector.extract_strided_slice %17 {offsets = [0, 48], sizes = [8, 16], strides = [1, 1]} : vector<8x128xf32> to vector<8x16xf32>
    %93 = vector.extract_strided_slice %17 {offsets = [0, 80], sizes = [8, 16], strides = [1, 1]} : vector<8x128xf32> to vector<8x16xf32>
    %94 = vector.extract_strided_slice %17 {offsets = [0, 112], sizes = [8, 16], strides = [1, 1]} : vector<8x128xf32> to vector<8x16xf32>
    %95 = tpu.transpose %93, [1, 0] : vector<8x16xf32> -> vector<16x8xf32>
    %cst_34 = arith.constant dense<0.000000e+00> : vector<8x8xf32>
    %96 = tpu.matmul %92, %95, %cst_34 {dimension_numbers = #tpu.dot_dimension_numbers<[1], [0], [0], [1], [0, 0, 1, 1], [], []>} : vector<8x16xf32>, vector<16x8xf32>, vector<8x8xf32> -> vector<8x8xf32>
    %cst_35 = arith.constant 2.500000e-01 : f32
    %97 = vector.broadcast %cst_35 : f32 to vector<8x8xf32>
    %98 = arith.mulf %96, %97 : vector<8x8xf32>
    %cst_36 = arith.constant -1.000000e+30 : f32
    %99 = vector.broadcast %cst_36 : f32 to vector<8x8xf32>
    %100 = arith.select %20, %98, %99 : vector<8x8xi1>, vector<8x8xf32>
    %cst_37 = arith.constant dense<0xFF800000> : vector<8xf32>
    %101 = vector.multi_reduction <maximumf>, %100, %cst_37 [1] : vector<8x8xf32> to vector<8xf32>
    %102 = vector.shape_cast %101 : vector<8xf32> to vector<8x1xf32>
    %103 = vector.broadcast %102 : vector<8x1xf32> to vector<8x8xf32>
    %104 = arith.subf %100, %103 : vector<8x8xf32>
    %105 = math.exp %104 : vector<8x8xf32>
    %cst_38 = arith.constant dense<0.000000e+00> : vector<8xf32>
    %106 = vector.multi_reduction <add>, %105, %cst_38 [1] : vector<8x8xf32> to vector<8xf32>
    %107 = vector.shape_cast %106 : vector<8xf32> to vector<8x1xf32>
    %108 = tpu.reciprocal %107 {approx = true} : vector<8x1xf32> -> vector<8x1xf32>
    %109 = vector.broadcast %108 : vector<8x1xf32> to vector<8x8xf32>
    %110 = arith.mulf %105, %109 : vector<8x8xf32>
    %cst_39 = arith.constant dense<0.000000e+00> : vector<8x16xf32>
    %111 = tpu.matmul %110, %94, %cst_39 {dimension_numbers = #tpu.dot_dimension_numbers<[1], [0], [0], [1], [0, 0, 1, 1], [], []>} : vector<8x8xf32>, vector<8x16xf32>, vector<8x16xf32> -> vector<8x16xf32>
    %112 = vector.extract_strided_slice %21 {offsets = [48, 0], sizes = [16, 64], strides = [1, 1]} : vector<64x64xf32> to vector<16x64xf32>
    %cst_40 = arith.constant dense<0.000000e+00> : vector<8x64xf32>
    %113 = tpu.matmul %111, %112, %cst_40 {dimension_numbers = #tpu.dot_dimension_numbers<[1], [0], [0], [1], [0, 0, 1, 1], [], []>} : vector<8x16xf32>, vector<16x64xf32>, vector<8x64xf32> -> vector<8x64xf32>
    %114 = arith.addf %91, %113 : vector<8x64xf32>
    %115 = arith.addf %114, %2 : vector<8x64xf32>
    %c0_41 = arith.constant 0 : index
    %c0_42 = arith.constant 0 : index
    %116 = vector.load %arg10[%c0_41, %c0_42] : memref<8x64xf32, #tpu.memory_space<vmem>>, vector<8x64xf32>
    tpu.vector_store %arg10[%c0_41, %c0_42], %115 {strides = array<i32>} : memref<8x64xf32, #tpu.memory_space<vmem>>, vector<8x64xf32>,
    %c0_43 = arith.constant 0 : index
    %c0_44 = arith.constant 0 : index
    %117 = vector.load %arg5[%c0_43, %c0_44] : memref<1x64xf32, #tpu.memory_space<vmem>>, vector<1x64xf32>
    %118 = arith.mulf %115, %115 : vector<8x64xf32>
    %cst_45 = arith.constant dense<0.000000e+00> : vector<8xf32>
    %119 = vector.multi_reduction <add>, %118, %cst_45 [1] : vector<8x64xf32> to vector<8xf32>
    %120 = vector.shape_cast %119 : vector<8xf32> to vector<8x1xf32>
    %cst_46 = arith.constant 6.400000e+01 : f32
    %121 = vector.broadcast %cst_46 : f32 to vector<8x1xf32>
    %122 = arith.divf %120, %121 : vector<8x1xf32>
    %cst_47 = arith.constant 9.99999997E-7 : f32
    %123 = vector.broadcast %cst_47 : f32 to vector<8x1xf32>
    %124 = arith.addf %122, %123 : vector<8x1xf32>
    %125 = math.rsqrt %124 : vector<8x1xf32>
    %126 = vector.broadcast %125 : vector<8x1xf32> to vector<8x64xf32>
    %127 = arith.mulf %115, %126 : vector<8x64xf32>
    %128 = vector.broadcast %117 : vector<1x64xf32> to vector<8x64xf32>
    %129 = arith.mulf %127, %128 : vector<8x64xf32>
    %c0_48 = arith.constant 0 : index
    %c0_49 = arith.constant 0 : index
    %130 = vector.load %arg6[%c0_48, %c0_49] : memref<64x4xf32, #tpu.memory_space<vmem>>, vector<64x4xf32>
    %cst_50 = arith.constant dense<0.000000e+00> : vector<8x4xf32>
    %131 = tpu.matmul %129, %130, %cst_50 {dimension_numbers = #tpu.dot_dimension_numbers<[1], [0], [0], [1], [0, 0, 1, 1], [], []>} : vector<8x64xf32>, vector<64x4xf32>, vector<8x4xf32> -> vector<8x4xf32>
    %cst_51 = arith.constant dense<0xFF800000> : vector<8xf32>
    %132 = vector.multi_reduction <maximumf>, %131, %cst_51 [1] : vector<8x4xf32> to vector<8xf32>
    %133 = vector.shape_cast %132 : vector<8xf32> to vector<8x1xf32>
    %134 = vector.broadcast %133 : vector<8x1xf32> to vector<8x4xf32>
    %135 = arith.subf %131, %134 : vector<8x4xf32>
    %136 = math.exp %135 : vector<8x4xf32>
    %cst_52 = arith.constant dense<0.000000e+00> : vector<8xf32>
    %137 = vector.multi_reduction <add>, %136, %cst_52 [1] : vector<8x4xf32> to vector<8xf32>
    %138 = vector.shape_cast %137 : vector<8xf32> to vector<8x1xf32>
    %139 = vector.broadcast %138 : vector<8x1xf32> to vector<8x4xf32>
    %140 = arith.divf %136, %139 : vector<8x4xf32>
    %cst_53 = arith.constant 0.000000e+00 : f32
    %141 = vector.broadcast %cst_53 : f32 to vector<8x64xf32>
    %142 = vector.extract_strided_slice %140 {offsets = [0, 0], sizes = [8, 1], strides = [1, 1]} : vector<8x4xf32> to vector<8x1xf32>
    %cst_54 = arith.constant 0.000000e+00 : f32
    %143 = vector.broadcast %cst_54 : f32 to vector<8x1xf32>
    %144 = vector.extract_strided_slice %140 {offsets = [0, 1], sizes = [8, 1], strides = [1, 1]} : vector<8x4xf32> to vector<8x1xf32>
    %145 = arith.cmpf ogt, %144, %142 : vector<8x1xf32>
    %146 = arith.extui %145 : vector<8x1xi1> to vector<8x1xi32>
    %147 = arith.sitofp %146 : vector<8x1xi32> to vector<8x1xf32>
    %148 = arith.addf %143, %147 : vector<8x1xf32>
    %149 = vector.extract_strided_slice %140 {offsets = [0, 2], sizes = [8, 1], strides = [1, 1]} : vector<8x4xf32> to vector<8x1xf32>
    %150 = arith.cmpf ogt, %149, %142 : vector<8x1xf32>
    %151 = arith.extui %150 : vector<8x1xi1> to vector<8x1xi32>
    %152 = arith.sitofp %151 : vector<8x1xi32> to vector<8x1xf32>
    %153 = arith.addf %148, %152 : vector<8x1xf32>
    %154 = vector.extract_strided_slice %140 {offsets = [0, 3], sizes = [8, 1], strides = [1, 1]} : vector<8x4xf32> to vector<8x1xf32>
    %155 = arith.cmpf ogt, %154, %142 : vector<8x1xf32>
    %156 = arith.extui %155 : vector<8x1xi1> to vector<8x1xi32>
    %157 = arith.sitofp %156 : vector<8x1xi32> to vector<8x1xf32>
    %158 = arith.addf %153, %157 : vector<8x1xf32>
    %cst_55 = arith.constant 2.000000e+00 : f32
    %159 = vector.broadcast %cst_55 : f32 to vector<8x1xf32>
    %160 = arith.cmpf olt, %158, %159 : vector<8x1xf32>
    %cst_56 = arith.constant 0.000000e+00 : f32
    %161 = vector.broadcast %cst_56 : f32 to vector<8x1xf32>
    %162 = arith.select %160, %142, %161 : vector<8x1xi1>, vector<8x1xf32>
    %c0_57 = arith.constant 0 : index
    %c0_58 = arith.constant 0 : index
    %c0_59 = arith.constant 0 : index
    %163 = vector.load %arg7[%c0_57, %c0_58, %c0_59] : memref<4x64x256xf32, #tpu.memory_space<vmem>>, vector<1x64x256xf32>
    %164 = vector.shape_cast %163 : vector<1x64x256xf32> to vector<64x256xf32>
    %cst_60 = arith.constant dense<0.000000e+00> : vector<8x256xf32>
    %165 = tpu.matmul %129, %164, %cst_60 {dimension_numbers = #tpu.dot_dimension_numbers<[1], [0], [0], [1], [0, 0, 1, 1], [], []>} : vector<8x64xf32>, vector<64x256xf32>, vector<8x256xf32> -> vector<8x256xf32>
    %166 = vector.extract_strided_slice %165 {offsets = [0, 0], sizes = [8, 128], strides = [1, 1]} : vector<8x256xf32> to vector<8x128xf32>
    %167 = arith.negf %166 : vector<8x128xf32>
    %168 = math.exp %167 : vector<8x128xf32>
    %cst_61 = arith.constant 1.000000e+00 : f32
    %169 = vector.broadcast %cst_61 : f32 to vector<8x128xf32>
    %170 = arith.addf %169, %168 : vector<8x128xf32>
    %171 = arith.divf %169, %170 : vector<8x128xf32>
    %172 = arith.mulf %166, %171 : vector<8x128xf32>
    %173 = vector.extract_strided_slice %165 {offsets = [0, 128], sizes = [8, 128], strides = [1, 1]} : vector<8x256xf32> to vector<8x128xf32>
    %174 = arith.mulf %172, %173 : vector<8x128xf32>
    %c0_62 = arith.constant 0 : index
    %c0_63 = arith.constant 0 : index
    %c0_64 = arith.constant 0 : index
    %175 = vector.load %arg8[%c0_62, %c0_63, %c0_64] : memref<4x128x64xf32, #tpu.memory_space<vmem>>, vector<1x128x64xf32>
    %176 = vector.shape_cast %175 : vector<1x128x64xf32> to vector<128x64xf32>
    %cst_65 = arith.constant dense<0.000000e+00> : vector<8x64xf32>
    %177 = tpu.matmul %174, %176, %cst_65 {dimension_numbers = #tpu.dot_dimension_numbers<[1], [0], [0], [1], [0, 0, 1, 1], [], []>} : vector<8x128xf32>, vector<128x64xf32>, vector<8x64xf32> -> vector<8x64xf32>
    %178 = vector.broadcast %162 : vector<8x1xf32> to vector<8x64xf32>
    %179 = arith.mulf %178, %177 : vector<8x64xf32>
    %180 = arith.addf %141, %179 : vector<8x64xf32>
    %181 = vector.extract_strided_slice %140 {offsets = [0, 1], sizes = [8, 1], strides = [1, 1]} : vector<8x4xf32> to vector<8x1xf32>
    %cst_66 = arith.constant 0.000000e+00 : f32
    %182 = vector.broadcast %cst_66 : f32 to vector<8x1xf32>
    %183 = vector.extract_strided_slice %140 {offsets = [0, 0], sizes = [8, 1], strides = [1, 1]} : vector<8x4xf32> to vector<8x1xf32>
    %184 = arith.cmpf ogt, %183, %181 : vector<8x1xf32>
    %185 = arith.extui %184 : vector<8x1xi1> to vector<8x1xi32>
    %186 = arith.sitofp %185 : vector<8x1xi32> to vector<8x1xf32>
    %187 = arith.addf %182, %186 : vector<8x1xf32>
    %188 = vector.extract_strided_slice %140 {offsets = [0, 2], sizes = [8, 1], strides = [1, 1]} : vector<8x4xf32> to vector<8x1xf32>
    %189 = arith.cmpf ogt, %188, %181 : vector<8x1xf32>
    %190 = arith.extui %189 : vector<8x1xi1> to vector<8x1xi32>
    %191 = arith.sitofp %190 : vector<8x1xi32> to vector<8x1xf32>
    %192 = arith.addf %187, %191 : vector<8x1xf32>
    %193 = vector.extract_strided_slice %140 {offsets = [0, 3], sizes = [8, 1], strides = [1, 1]} : vector<8x4xf32> to vector<8x1xf32>
    %194 = arith.cmpf ogt, %193, %181 : vector<8x1xf32>
    %195 = arith.extui %194 : vector<8x1xi1> to vector<8x1xi32>
    %196 = arith.sitofp %195 : vector<8x1xi32> to vector<8x1xf32>
    %197 = arith.addf %192, %196 : vector<8x1xf32>
    %cst_67 = arith.constant 2.000000e+00 : f32
    %198 = vector.broadcast %cst_67 : f32 to vector<8x1xf32>
    %199 = arith.cmpf olt, %197, %198 : vector<8x1xf32>
    %cst_68 = arith.constant 0.000000e+00 : f32
    %200 = vector.broadcast %cst_68 : f32 to vector<8x1xf32>
    %201 = arith.select %199, %181, %200 : vector<8x1xi1>, vector<8x1xf32>
    %c1 = arith.constant 1 : index
    %c0_69 = arith.constant 0 : index
    %c0_70 = arith.constant 0 : index
    %202 = vector.load %arg7[%c1, %c0_69, %c0_70] : memref<4x64x256xf32, #tpu.memory_space<vmem>>, vector<1x64x256xf32>
    %203 = vector.shape_cast %202 : vector<1x64x256xf32> to vector<64x256xf32>
    %cst_71 = arith.constant dense<0.000000e+00> : vector<8x256xf32>
    %204 = tpu.matmul %129, %203, %cst_71 {dimension_numbers = #tpu.dot_dimension_numbers<[1], [0], [0], [1], [0, 0, 1, 1], [], []>} : vector<8x64xf32>, vector<64x256xf32>, vector<8x256xf32> -> vector<8x256xf32>
    %205 = vector.extract_strided_slice %204 {offsets = [0, 0], sizes = [8, 128], strides = [1, 1]} : vector<8x256xf32> to vector<8x128xf32>
    %206 = arith.negf %205 : vector<8x128xf32>
    %207 = math.exp %206 : vector<8x128xf32>
    %cst_72 = arith.constant 1.000000e+00 : f32
    %208 = vector.broadcast %cst_72 : f32 to vector<8x128xf32>
    %209 = arith.addf %208, %207 : vector<8x128xf32>
    %210 = arith.divf %208, %209 : vector<8x128xf32>
    %211 = arith.mulf %205, %210 : vector<8x128xf32>
    %212 = vector.extract_strided_slice %204 {offsets = [0, 128], sizes = [8, 128], strides = [1, 1]} : vector<8x256xf32> to vector<8x128xf32>
    %213 = arith.mulf %211, %212 : vector<8x128xf32>
    %c1_73 = arith.constant 1 : index
    %c0_74 = arith.constant 0 : index
    %c0_75 = arith.constant 0 : index
    %214 = vector.load %arg8[%c1_73, %c0_74, %c0_75] : memref<4x128x64xf32, #tpu.memory_space<vmem>>, vector<1x128x64xf32>
    %215 = vector.shape_cast %214 : vector<1x128x64xf32> to vector<128x64xf32>
    %cst_76 = arith.constant dense<0.000000e+00> : vector<8x64xf32>
    %216 = tpu.matmul %213, %215, %cst_76 {dimension_numbers = #tpu.dot_dimension_numbers<[1], [0], [0], [1], [0, 0, 1, 1], [], []>} : vector<8x128xf32>, vector<128x64xf32>, vector<8x64xf32> -> vector<8x64xf32>
    %217 = vector.broadcast %201 : vector<8x1xf32> to vector<8x64xf32>
    %218 = arith.mulf %217, %216 : vector<8x64xf32>
    %219 = arith.addf %180, %218 : vector<8x64xf32>
    %220 = vector.extract_strided_slice %140 {offsets = [0, 2], sizes = [8, 1], strides = [1, 1]} : vector<8x4xf32> to vector<8x1xf32>
    %cst_77 = arith.constant 0.000000e+00 : f32
    %221 = vector.broadcast %cst_77 : f32 to vector<8x1xf32>
    %222 = vector.extract_strided_slice %140 {offsets = [0, 0], sizes = [8, 1], strides = [1, 1]} : vector<8x4xf32> to vector<8x1xf32>
    %223 = arith.cmpf ogt, %222, %220 : vector<8x1xf32>
    %224 = arith.extui %223 : vector<8x1xi1> to vector<8x1xi32>
    %225 = arith.sitofp %224 : vector<8x1xi32> to vector<8x1xf32>
    %226 = arith.addf %221, %225 : vector<8x1xf32>
    %227 = vector.extract_strided_slice %140 {offsets = [0, 1], sizes = [8, 1], strides = [1, 1]} : vector<8x4xf32> to vector<8x1xf32>
    %228 = arith.cmpf ogt, %227, %220 : vector<8x1xf32>
    %229 = arith.extui %228 : vector<8x1xi1> to vector<8x1xi32>
    %230 = arith.sitofp %229 : vector<8x1xi32> to vector<8x1xf32>
    %231 = arith.addf %226, %230 : vector<8x1xf32>
    %232 = vector.extract_strided_slice %140 {offsets = [0, 3], sizes = [8, 1], strides = [1, 1]} : vector<8x4xf32> to vector<8x1xf32>
    %233 = arith.cmpf ogt, %232, %220 : vector<8x1xf32>
    %234 = arith.extui %233 : vector<8x1xi1> to vector<8x1xi32>
    %235 = arith.sitofp %234 : vector<8x1xi32> to vector<8x1xf32>
    %236 = arith.addf %231, %235 : vector<8x1xf32>
    %cst_78 = arith.constant 2.000000e+00 : f32
    %237 = vector.broadcast %cst_78 : f32 to vector<8x1xf32>
    %238 = arith.cmpf olt, %236, %237 : vector<8x1xf32>
    %cst_79 = arith.constant 0.000000e+00 : f32
    %239 = vector.broadcast %cst_79 : f32 to vector<8x1xf32>
    %240 = arith.select %238, %220, %239 : vector<8x1xi1>, vector<8x1xf32>
    %c2 = arith.constant 2 : index
    %c0_80 = arith.constant 0 : index
    %c0_81 = arith.constant 0 : index
    %241 = vector.load %arg7[%c2, %c0_80, %c0_81] : memref<4x64x256xf32, #tpu.memory_space<vmem>>, vector<1x64x256xf32>
    %242 = vector.shape_cast %241 : vector<1x64x256xf32> to vector<64x256xf32>
    %cst_82 = arith.constant dense<0.000000e+00> : vector<8x256xf32>
    %243 = tpu.matmul %129, %242, %cst_82 {dimension_numbers = #tpu.dot_dimension_numbers<[1], [0], [0], [1], [0, 0, 1, 1], [], []>} : vector<8x64xf32>, vector<64x256xf32>, vector<8x256xf32> -> vector<8x256xf32>
    %244 = vector.extract_strided_slice %243 {offsets = [0, 0], sizes = [8, 128], strides = [1, 1]} : vector<8x256xf32> to vector<8x128xf32>
    %245 = arith.negf %244 : vector<8x128xf32>
    %246 = math.exp %245 : vector<8x128xf32>
    %cst_83 = arith.constant 1.000000e+00 : f32
    %247 = vector.broadcast %cst_83 : f32 to vector<8x128xf32>
    %248 = arith.addf %247, %246 : vector<8x128xf32>
    %249 = arith.divf %247, %248 : vector<8x128xf32>
    %250 = arith.mulf %244, %249 : vector<8x128xf32>
    %251 = vector.extract_strided_slice %243 {offsets = [0, 128], sizes = [8, 128], strides = [1, 1]} : vector<8x256xf32> to vector<8x128xf32>
    %252 = arith.mulf %250, %251 : vector<8x128xf32>
    %c2_84 = arith.constant 2 : index
    %c0_85 = arith.constant 0 : index
    %c0_86 = arith.constant 0 : index
    %253 = vector.load %arg8[%c2_84, %c0_85, %c0_86] : memref<4x128x64xf32, #tpu.memory_space<vmem>>, vector<1x128x64xf32>
    %254 = vector.shape_cast %253 : vector<1x128x64xf32> to vector<128x64xf32>
    %cst_87 = arith.constant dense<0.000000e+00> : vector<8x64xf32>
    %255 = tpu.matmul %252, %254, %cst_87 {dimension_numbers = #tpu.dot_dimension_numbers<[1], [0], [0], [1], [0, 0, 1, 1], [], []>} : vector<8x128xf32>, vector<128x64xf32>, vector<8x64xf32> -> vector<8x64xf32>
    %256 = vector.broadcast %240 : vector<8x1xf32> to vector<8x64xf32>
    %257 = arith.mulf %256, %255 : vector<8x64xf32>
    %258 = arith.addf %219, %257 : vector<8x64xf32>
    %259 = vector.extract_strided_slice %140 {offsets = [0, 3], sizes = [8, 1], strides = [1, 1]} : vector<8x4xf32> to vector<8x1xf32>
    %cst_88 = arith.constant 0.000000e+00 : f32
    %260 = vector.broadcast %cst_88 : f32 to vector<8x1xf32>
    %261 = vector.extract_strided_slice %140 {offsets = [0, 0], sizes = [8, 1], strides = [1, 1]} : vector<8x4xf32> to vector<8x1xf32>
    %262 = arith.cmpf ogt, %261, %259 : vector<8x1xf32>
    %263 = arith.extui %262 : vector<8x1xi1> to vector<8x1xi32>
    %264 = arith.sitofp %263 : vector<8x1xi32> to vector<8x1xf32>
    %265 = arith.addf %260, %264 : vector<8x1xf32>
    %266 = vector.extract_strided_slice %140 {offsets = [0, 1], sizes = [8, 1], strides = [1, 1]} : vector<8x4xf32> to vector<8x1xf32>
    %267 = arith.cmpf ogt, %266, %259 : vector<8x1xf32>
    %268 = arith.extui %267 : vector<8x1xi1> to vector<8x1xi32>
    %269 = arith.sitofp %268 : vector<8x1xi32> to vector<8x1xf32>
    %270 = arith.addf %265, %269 : vector<8x1xf32>
    %271 = vector.extract_strided_slice %140 {offsets = [0, 2], sizes = [8, 1], strides = [1, 1]} : vector<8x4xf32> to vector<8x1xf32>
    %272 = arith.cmpf ogt, %271, %259 : vector<8x1xf32>
    %273 = arith.extui %272 : vector<8x1xi1> to vector<8x1xi32>
    %274 = arith.sitofp %273 : vector<8x1xi32> to vector<8x1xf32>
    %275 = arith.addf %270, %274 : vector<8x1xf32>
    %cst_89 = arith.constant 2.000000e+00 : f32
    %276 = vector.broadcast %cst_89 : f32 to vector<8x1xf32>
    %277 = arith.cmpf olt, %275, %276 : vector<8x1xf32>
    %cst_90 = arith.constant 0.000000e+00 : f32
    %278 = vector.broadcast %cst_90 : f32 to vector<8x1xf32>
    %279 = arith.select %277, %259, %278 : vector<8x1xi1>, vector<8x1xf32>
    %c3 = arith.constant 3 : index
    %c0_91 = arith.constant 0 : index
    %c0_92 = arith.constant 0 : index
    %280 = vector.load %arg7[%c3, %c0_91, %c0_92] : memref<4x64x256xf32, #tpu.memory_space<vmem>>, vector<1x64x256xf32>
    %281 = vector.shape_cast %280 : vector<1x64x256xf32> to vector<64x256xf32>
    %cst_93 = arith.constant dense<0.000000e+00> : vector<8x256xf32>
    %282 = tpu.matmul %129, %281, %cst_93 {dimension_numbers = #tpu.dot_dimension_numbers<[1], [0], [0], [1], [0, 0, 1, 1], [], []>} : vector<8x64xf32>, vector<64x256xf32>, vector<8x256xf32> -> vector<8x256xf32>
    %283 = vector.extract_strided_slice %282 {offsets = [0, 0], sizes = [8, 128], strides = [1, 1]} : vector<8x256xf32> to vector<8x128xf32>
    %284 = arith.negf %283 : vector<8x128xf32>
    %285 = math.exp %284 : vector<8x128xf32>
    %cst_94 = arith.constant 1.000000e+00 : f32
    %286 = vector.broadcast %cst_94 : f32 to vector<8x128xf32>
    %287 = arith.addf %286, %285 : vector<8x128xf32>
    %288 = arith.divf %286, %287 : vector<8x128xf32>
    %289 = arith.mulf %283, %288 : vector<8x128xf32>
    %290 = vector.extract_strided_slice %282 {offsets = [0, 128], sizes = [8, 128], strides = [1, 1]} : vector<8x256xf32> to vector<8x128xf32>
    %291 = arith.mulf %289, %290 : vector<8x128xf32>
    %c3_95 = arith.constant 3 : index
    %c0_96 = arith.constant 0 : index
    %c0_97 = arith.constant 0 : index
    %292 = vector.load %arg8[%c3_95, %c0_96, %c0_97] : memref<4x128x64xf32, #tpu.memory_space<vmem>>, vector<1x128x64xf32>
    %293 = vector.shape_cast %292 : vector<1x128x64xf32> to vector<128x64xf32>
    %cst_98 = arith.constant dense<0.000000e+00> : vector<8x64xf32>
    %294 = tpu.matmul %291, %293, %cst_98 {dimension_numbers = #tpu.dot_dimension_numbers<[1], [0], [0], [1], [0, 0, 1, 1], [], []>} : vector<8x128xf32>, vector<128x64xf32>, vector<8x64xf32> -> vector<8x64xf32>
    %295 = vector.broadcast %279 : vector<8x1xf32> to vector<8x64xf32>
    %296 = arith.mulf %295, %294 : vector<8x64xf32>
    %297 = arith.addf %258, %296 : vector<8x64xf32>
    %c0_99 = arith.constant 0 : index
    %c0_100 = arith.constant 0 : index
    %298 = vector.load %arg9[%c0_99, %c0_100] : memref<8x64xf32, #tpu.memory_space<vmem>>, vector<8x64xf32>
    tpu.vector_store %arg9[%c0_99, %c0_100], %297 {strides = array<i32>} : memref<8x64xf32, #tpu.memory_space<vmem>>, vector<8x64xf32>,
    return
  }
}

module attributes {stable_mosaic.version = 11 : i64} {
  func.func @_layer_kernel(%arg0: memref<8x64xf32, #tpu.memory_space<vmem>>, %arg1: memref<8x64xf32, #tpu.memory_space<vmem>>, %arg2: memref<1x64xf32, #tpu.memory_space<vmem>>, %arg3: memref<64x256xf32, #tpu.memory_space<vmem>>, %arg4: memref<4x128xf32, #tpu.memory_space<vmem>>, %arg5: memref<1x128xf32, #tpu.memory_space<vmem>>, %arg6: memref<128x36xf32, #tpu.memory_space<vmem>>, %arg7: memref<1x4xf32, #tpu.memory_space<vmem>>, %arg8: memref<1x16xf32, #tpu.memory_space<vmem>>, %arg9: memref<1x16xf32, #tpu.memory_space<vmem>>, %arg10: memref<4x128xf32, #tpu.memory_space<vmem>>, %arg11: memref<1x128xf32, #tpu.memory_space<vmem>>, %arg12: memref<16x128xf32, #tpu.memory_space<vmem>>, %arg13: memref<1x128xf32, #tpu.memory_space<vmem>>, %arg14: memref<128x64xf32, #tpu.memory_space<vmem>>, %arg15: memref<1x64xf32, #tpu.memory_space<vmem>>, %arg16: memref<64x256xf32, #tpu.memory_space<vmem>>, %arg17: memref<128x64xf32, #tpu.memory_space<vmem>>, %arg18: memref<8x64xf32, #tpu.memory_space<vmem>>, %arg19: memref<8x64xf32, #tpu.memory_space<vmem>>) attributes {dimension_semantics = [], scalar_prefetch = 0 : i64, scratch_operands = 0 : i64, tpu.core_type = #tpu.core_type<tc>} {
    %c0 = arith.constant 0 : index
    %c0_0 = arith.constant 0 : index
    %0 = vector.load %arg0[%c0, %c0_0] : memref<8x64xf32, #tpu.memory_space<vmem>>, vector<8x64xf32>
    %c0_1 = arith.constant 0 : index
    %c0_2 = arith.constant 0 : index
    %1 = vector.load %arg1[%c0_1, %c0_2] : memref<8x64xf32, #tpu.memory_space<vmem>>, vector<8x64xf32>
    %2 = arith.addf %0, %1 : vector<8x64xf32>
    %c0_3 = arith.constant 0 : index
    %c0_4 = arith.constant 0 : index
    %3 = vector.load %arg2[%c0_3, %c0_4] : memref<1x64xf32, #tpu.memory_space<vmem>>, vector<1x64xf32>
    %4 = arith.mulf %2, %2 : vector<8x64xf32>
    %cst = arith.constant dense<0.000000e+00> : vector<8xf32>
    %5 = vector.multi_reduction <add>, %4, %cst [1] : vector<8x64xf32> to vector<8xf32>
    %6 = vector.shape_cast %5 : vector<8xf32> to vector<8x1xf32>
    %cst_5 = arith.constant 6.400000e+01 : f32
    %7 = vector.broadcast %cst_5 : f32 to vector<8x1xf32>
    %8 = arith.divf %6, %7 : vector<8x1xf32>
    %cst_6 = arith.constant 9.99999997E-7 : f32
    %9 = vector.broadcast %cst_6 : f32 to vector<8x1xf32>
    %10 = arith.addf %8, %9 : vector<8x1xf32>
    %11 = math.rsqrt %10 : vector<8x1xf32>
    %12 = vector.broadcast %11 : vector<8x1xf32> to vector<8x64xf32>
    %13 = arith.mulf %2, %12 : vector<8x64xf32>
    %14 = vector.broadcast %3 : vector<1x64xf32> to vector<8x64xf32>
    %15 = arith.mulf %13, %14 : vector<8x64xf32>
    %c0_7 = arith.constant 0 : index
    %c0_8 = arith.constant 0 : index
    %16 = vector.load %arg3[%c0_7, %c0_8] : memref<64x256xf32, #tpu.memory_space<vmem>>, vector<64x256xf32>
    %cst_9 = arith.constant dense<0.000000e+00> : vector<8x256xf32>
    %17 = tpu.matmul %15, %16, %cst_9 {dimension_numbers = #tpu.dot_dimension_numbers<[1], [0], [0], [1], [0, 0, 1, 1], [], []>} : vector<8x64xf32>, vector<64x256xf32>, vector<8x256xf32> -> vector<8x256xf32>
    %18 = vector.extract_strided_slice %17 {offsets = [0, 0], sizes = [8, 128], strides = [1, 1]} : vector<8x256xf32> to vector<8x128xf32>
    %19 = vector.extract_strided_slice %17 {offsets = [0, 128], sizes = [8, 128], strides = [1, 1]} : vector<8x256xf32> to vector<8x128xf32>
    %20 = tpu.iota {dimensions = array<i32: 0>} : vector<8x8xi32>
    %21 = tpu.iota {dimensions = array<i32: 1>} : vector<8x8xi32>
    %c0_10 = arith.constant 0 : index
    %c0_11 = arith.constant 0 : index
    %22 = vector.load %arg4[%c0_10, %c0_11] : memref<4x128xf32, #tpu.memory_space<vmem>>, vector<4x128xf32>
    %cst_12 = arith.constant 0.000000e+00 : f32
    %23 = vector.broadcast %cst_12 : f32 to vector<8x128xf32>
    %24 = arith.subi %20, %21 : vector<8x8xi32>
    %c3_i32 = arith.constant 3 : i32
    %25 = vector.broadcast %c3_i32 : i32 to vector<8x8xi32>
    %26 = arith.cmpi eq, %24, %25 : vector<8x8xi32>
    %27 = arith.extui %26 : vector<8x8xi1> to vector<8x8xi32>
    %28 = arith.sitofp %27 : vector<8x8xi32> to vector<8x8xf32>
    %cst_13 = arith.constant dense<0.000000e+00> : vector<8x128xf32>
    %29 = tpu.matmul %28, %18, %cst_13 {dimension_numbers = #tpu.dot_dimension_numbers<[1], [0], [0], [1], [0, 0, 1, 1], [], []>} : vector<8x8xf32>, vector<8x128xf32>, vector<8x128xf32> -> vector<8x128xf32>
    %30 = vector.extract_strided_slice %22 {offsets = [0, 0], sizes = [1, 128], strides = [1, 1]} : vector<4x128xf32> to vector<1x128xf32>
    %31 = vector.broadcast %30 : vector<1x128xf32> to vector<8x128xf32>
    %32 = arith.mulf %29, %31 : vector<8x128xf32>
    %33 = arith.addf %23, %32 : vector<8x128xf32>
    %34 = arith.subi %20, %21 : vector<8x8xi32>
    %c2_i32 = arith.constant 2 : i32
    %35 = vector.broadcast %c2_i32 : i32 to vector<8x8xi32>
    %36 = arith.cmpi eq, %34, %35 : vector<8x8xi32>
    %37 = arith.extui %36 : vector<8x8xi1> to vector<8x8xi32>
    %38 = arith.sitofp %37 : vector<8x8xi32> to vector<8x8xf32>
    %cst_14 = arith.constant dense<0.000000e+00> : vector<8x128xf32>
    %39 = tpu.matmul %38, %18, %cst_14 {dimension_numbers = #tpu.dot_dimension_numbers<[1], [0], [0], [1], [0, 0, 1, 1], [], []>} : vector<8x8xf32>, vector<8x128xf32>, vector<8x128xf32> -> vector<8x128xf32>
    %40 = vector.extract_strided_slice %22 {offsets = [1, 0], sizes = [1, 128], strides = [1, 1]} : vector<4x128xf32> to vector<1x128xf32>
    %41 = vector.broadcast %40 : vector<1x128xf32> to vector<8x128xf32>
    %42 = arith.mulf %39, %41 : vector<8x128xf32>
    %43 = arith.addf %33, %42 : vector<8x128xf32>
    %44 = arith.subi %20, %21 : vector<8x8xi32>
    %c1_i32 = arith.constant 1 : i32
    %45 = vector.broadcast %c1_i32 : i32 to vector<8x8xi32>
    %46 = arith.cmpi eq, %44, %45 : vector<8x8xi32>
    %47 = arith.extui %46 : vector<8x8xi1> to vector<8x8xi32>
    %48 = arith.sitofp %47 : vector<8x8xi32> to vector<8x8xf32>
    %cst_15 = arith.constant dense<0.000000e+00> : vector<8x128xf32>
    %49 = tpu.matmul %48, %18, %cst_15 {dimension_numbers = #tpu.dot_dimension_numbers<[1], [0], [0], [1], [0, 0, 1, 1], [], []>} : vector<8x8xf32>, vector<8x128xf32>, vector<8x128xf32> -> vector<8x128xf32>
    %50 = vector.extract_strided_slice %22 {offsets = [2, 0], sizes = [1, 128], strides = [1, 1]} : vector<4x128xf32> to vector<1x128xf32>
    %51 = vector.broadcast %50 : vector<1x128xf32> to vector<8x128xf32>
    %52 = arith.mulf %49, %51 : vector<8x128xf32>
    %53 = arith.addf %43, %52 : vector<8x128xf32>
    %54 = arith.subi %20, %21 : vector<8x8xi32>
    %c0_i32 = arith.constant 0 : i32
    %55 = vector.broadcast %c0_i32 : i32 to vector<8x8xi32>
    %56 = arith.cmpi eq, %54, %55 : vector<8x8xi32>
    %57 = arith.extui %56 : vector<8x8xi1> to vector<8x8xi32>
    %58 = arith.sitofp %57 : vector<8x8xi32> to vector<8x8xf32>
    %cst_16 = arith.constant dense<0.000000e+00> : vector<8x128xf32>
    %59 = tpu.matmul %58, %18, %cst_16 {dimension_numbers = #tpu.dot_dimension_numbers<[1], [0], [0], [1], [0, 0, 1, 1], [], []>} : vector<8x8xf32>, vector<8x128xf32>, vector<8x128xf32> -> vector<8x128xf32>
    %60 = vector.extract_strided_slice %22 {offsets = [3, 0], sizes = [1, 128], strides = [1, 1]} : vector<4x128xf32> to vector<1x128xf32>
    %61 = vector.broadcast %60 : vector<1x128xf32> to vector<8x128xf32>
    %62 = arith.mulf %59, %61 : vector<8x128xf32>
    %63 = arith.addf %53, %62 : vector<8x128xf32>
    %c0_17 = arith.constant 0 : index
    %c0_18 = arith.constant 0 : index
    %64 = vector.load %arg5[%c0_17, %c0_18] : memref<1x128xf32, #tpu.memory_space<vmem>>, vector<1x128xf32>
    %65 = vector.broadcast %64 : vector<1x128xf32> to vector<8x128xf32>
    %66 = arith.addf %63, %65 : vector<8x128xf32>
    %67 = arith.negf %66 : vector<8x128xf32>
    %68 = math.exp %67 : vector<8x128xf32>
    %cst_19 = arith.constant 1.000000e+00 : f32
    %69 = vector.broadcast %cst_19 : f32 to vector<8x128xf32>
    %70 = arith.addf %69, %68 : vector<8x128xf32>
    %71 = arith.divf %69, %70 : vector<8x128xf32>
    %72 = arith.mulf %66, %71 : vector<8x128xf32>
    %c0_20 = arith.constant 0 : index
    %c0_21 = arith.constant 0 : index
    %73 = vector.load %arg6[%c0_20, %c0_21] : memref<128x36xf32, #tpu.memory_space<vmem>>, vector<128x36xf32>
    %cst_22 = arith.constant dense<0.000000e+00> : vector<8x36xf32>
    %74 = tpu.matmul %72, %73, %cst_22 {dimension_numbers = #tpu.dot_dimension_numbers<[1], [0], [0], [1], [0, 0, 1, 1], [], []>} : vector<8x128xf32>, vector<128x36xf32>, vector<8x36xf32> -> vector<8x36xf32>
    %75 = vector.extract_strided_slice %74 {offsets = [0, 0], sizes = [8, 4], strides = [1, 1]} : vector<8x36xf32> to vector<8x4xf32>
    %c0_23 = arith.constant 0 : index
    %c0_24 = arith.constant 0 : index
    %76 = vector.load %arg7[%c0_23, %c0_24] : memref<1x4xf32, #tpu.memory_space<vmem>>, vector<1x4xf32>
    %77 = arith.mulf %75, %75 : vector<8x4xf32>
    %cst_25 = arith.constant dense<0.000000e+00> : vector<8xf32>
    %78 = vector.multi_reduction <add>, %77, %cst_25 [1] : vector<8x4xf32> to vector<8xf32>
    %79 = vector.shape_cast %78 : vector<8xf32> to vector<8x1xf32>
    %cst_26 = arith.constant 4.000000e+00 : f32
    %80 = vector.broadcast %cst_26 : f32 to vector<8x1xf32>
    %81 = arith.divf %79, %80 : vector<8x1xf32>
    %cst_27 = arith.constant 9.99999997E-7 : f32
    %82 = vector.broadcast %cst_27 : f32 to vector<8x1xf32>
    %83 = arith.addf %81, %82 : vector<8x1xf32>
    %84 = math.rsqrt %83 : vector<8x1xf32>
    %85 = vector.broadcast %84 : vector<8x1xf32> to vector<8x4xf32>
    %86 = arith.mulf %75, %85 : vector<8x4xf32>
    %87 = vector.broadcast %76 : vector<1x4xf32> to vector<8x4xf32>
    %88 = arith.mulf %86, %87 : vector<8x4xf32>
    %89 = vector.extract_strided_slice %74 {offsets = [0, 4], sizes = [8, 16], strides = [1, 1]} : vector<8x36xf32> to vector<8x16xf32>
    %c0_28 = arith.constant 0 : index
    %c0_29 = arith.constant 0 : index
    %90 = vector.load %arg8[%c0_28, %c0_29] : memref<1x16xf32, #tpu.memory_space<vmem>>, vector<1x16xf32>
    %91 = arith.mulf %89, %89 : vector<8x16xf32>
    %cst_30 = arith.constant dense<0.000000e+00> : vector<8xf32>
    %92 = vector.multi_reduction <add>, %91, %cst_30 [1] : vector<8x16xf32> to vector<8xf32>
    %93 = vector.shape_cast %92 : vector<8xf32> to vector<8x1xf32>
    %cst_31 = arith.constant 1.600000e+01 : f32
    %94 = vector.broadcast %cst_31 : f32 to vector<8x1xf32>
    %95 = arith.divf %93, %94 : vector<8x1xf32>
    %cst_32 = arith.constant 9.99999997E-7 : f32
    %96 = vector.broadcast %cst_32 : f32 to vector<8x1xf32>
    %97 = arith.addf %95, %96 : vector<8x1xf32>
    %98 = math.rsqrt %97 : vector<8x1xf32>
    %99 = vector.broadcast %98 : vector<8x1xf32> to vector<8x16xf32>
    %100 = arith.mulf %89, %99 : vector<8x16xf32>
    %101 = vector.broadcast %90 : vector<1x16xf32> to vector<8x16xf32>
    %102 = arith.mulf %100, %101 : vector<8x16xf32>
    %103 = vector.extract_strided_slice %74 {offsets = [0, 20], sizes = [8, 16], strides = [1, 1]} : vector<8x36xf32> to vector<8x16xf32>
    %c0_33 = arith.constant 0 : index
    %c0_34 = arith.constant 0 : index
    %104 = vector.load %arg9[%c0_33, %c0_34] : memref<1x16xf32, #tpu.memory_space<vmem>>, vector<1x16xf32>
    %105 = arith.mulf %103, %103 : vector<8x16xf32>
    %cst_35 = arith.constant dense<0.000000e+00> : vector<8xf32>
    %106 = vector.multi_reduction <add>, %105, %cst_35 [1] : vector<8x16xf32> to vector<8xf32>
    %107 = vector.shape_cast %106 : vector<8xf32> to vector<8x1xf32>
    %cst_36 = arith.constant 1.600000e+01 : f32
    %108 = vector.broadcast %cst_36 : f32 to vector<8x1xf32>
    %109 = arith.divf %107, %108 : vector<8x1xf32>
    %cst_37 = arith.constant 9.99999997E-7 : f32
    %110 = vector.broadcast %cst_37 : f32 to vector<8x1xf32>
    %111 = arith.addf %109, %110 : vector<8x1xf32>
    %112 = math.rsqrt %111 : vector<8x1xf32>
    %113 = vector.broadcast %112 : vector<8x1xf32> to vector<8x16xf32>
    %114 = arith.mulf %103, %113 : vector<8x16xf32>
    %115 = vector.broadcast %104 : vector<1x16xf32> to vector<8x16xf32>
    %116 = arith.mulf %114, %115 : vector<8x16xf32>
    %c0_38 = arith.constant 0 : index
    %c0_39 = arith.constant 0 : index
    %117 = vector.load %arg10[%c0_38, %c0_39] : memref<4x128xf32, #tpu.memory_space<vmem>>, vector<4x128xf32>
    %cst_40 = arith.constant dense<0.000000e+00> : vector<8x128xf32>
    %118 = tpu.matmul %88, %117, %cst_40 {dimension_numbers = #tpu.dot_dimension_numbers<[1], [0], [0], [1], [0, 0, 1, 1], [], []>} : vector<8x4xf32>, vector<4x128xf32>, vector<8x128xf32> -> vector<8x128xf32>
    %c0_41 = arith.constant 0 : index
    %c0_42 = arith.constant 0 : index
    %119 = vector.load %arg11[%c0_41, %c0_42] : memref<1x128xf32, #tpu.memory_space<vmem>>, vector<1x128xf32>
    %120 = vector.broadcast %119 : vector<1x128xf32> to vector<8x128xf32>
    %121 = arith.addf %118, %120 : vector<8x128xf32>
    %cst_43 = arith.constant 0.000000e+00 : f32
    %122 = vector.broadcast %cst_43 : f32 to vector<8x128xf32>
    %123 = arith.maximumf %121, %122 : vector<8x128xf32>
    %124 = vector.broadcast %cst_43 : f32 to vector<8x128xf32>
    %125 = arith.subf %121, %124 : vector<8x128xf32>
    %126 = arith.cmpf one, %125, %125 : vector<8x128xf32>
    %127 = vector.broadcast %cst_43 : f32 to vector<8x128xf32>
    %128 = arith.addf %121, %127 : vector<8x128xf32>
    %129 = math.absf %125 : vector<8x128xf32>
    %cst_44 = arith.constant 0.000000e+00 : f32
    %130 = vector.broadcast %cst_44 : f32 to vector<8x128xf32>
    %131 = arith.subf %130, %129 : vector<8x128xf32>
    %132 = math.exp %131 : vector<8x128xf32>
    %133 = math.log1p %132 : vector<8x128xf32>
    %134 = arith.addf %123, %133 : vector<8x128xf32>
    %135 = arith.select %126, %128, %134 : vector<8x128xi1>, vector<8x128xf32>
    %136 = arith.mulf %135, %72 : vector<8x128xf32>
    %c0_45 = arith.constant 0 : index
    %c0_46 = arith.constant 0 : index
    %137 = vector.load %arg12[%c0_45, %c0_46] : memref<16x128xf32, #tpu.memory_space<vmem>>, vector<16x128xf32>
    %138 = tpu.iota {dimensions = array<i32: 0>} : vector<16x16xi32>
    %139 = tpu.iota {dimensions = array<i32: 1>} : vector<16x16xi32>
    %140 = arith.cmpi eq, %138, %139 : vector<16x16xi32>
    %141 = arith.extui %140 : vector<16x16xi1> to vector<16x16xi32>
    %142 = arith.sitofp %141 : vector<16x16xi32> to vector<16x16xf32>
    %143 = tpu.iota {dimensions = array<i32: 0>} : vector<8x128xi32>
    %cst_47 = arith.constant 0.000000e+00 : f32
    %144 = vector.broadcast %cst_47 : f32 to vector<16x128xf32>
    %cst_48 = arith.constant 0.000000e+00 : f32
    %145 = vector.broadcast %cst_48 : f32 to vector<8x128xf32>
    %146 = vector.extract_strided_slice %135 {offsets = [0, 0], sizes = [1, 128], strides = [1, 1]} : vector<8x128xf32> to vector<1x128xf32>
    %147 = vector.extract_strided_slice %102 {offsets = [0, 0], sizes = [1, 16], strides = [1, 1]} : vector<8x16xf32> to vector<1x16xf32>
    %148 = vector.broadcast %147 : vector<1x16xf32> to vector<16x16xf32>
    %149 = arith.mulf %142, %148 : vector<16x16xf32>
    %cst_49 = arith.constant dense<0.000000e+00> : vector<16xf32>
    %150 = vector.multi_reduction <add>, %149, %cst_49 [1] : vector<16x16xf32> to vector<16xf32>
    %151 = vector.shape_cast %150 : vector<16xf32> to vector<16x1xf32>
    %152 = vector.broadcast %146 : vector<1x128xf32> to vector<16x128xf32>
    %153 = arith.mulf %152, %137 : vector<16x128xf32>
    %154 = math.exp %153 : vector<16x128xf32>
    %155 = arith.mulf %154, %144 : vector<16x128xf32>
    %156 = vector.extract_strided_slice %136 {offsets = [0, 0], sizes = [1, 128], strides = [1, 1]} : vector<8x128xf32> to vector<1x128xf32>
    %157 = vector.broadcast %151 : vector<16x1xf32> to vector<16x128xf32>
    %158 = vector.broadcast %156 : vector<1x128xf32> to vector<16x128xf32>
    %159 = arith.mulf %157, %158 : vector<16x128xf32>
    %160 = arith.addf %155, %159 : vector<16x128xf32>
    %161 = vector.extract_strided_slice %116 {offsets = [0, 0], sizes = [1, 16], strides = [1, 1]} : vector<8x16xf32> to vector<1x16xf32>
    %cst_50 = arith.constant dense<0.000000e+00> : vector<1x128xf32>
    %162 = tpu.matmul %161, %160, %cst_50 {dimension_numbers = #tpu.dot_dimension_numbers<[1], [0], [0], [1], [0, 0, 1, 1], [], []>} : vector<1x16xf32>, vector<16x128xf32>, vector<1x128xf32> -> vector<1x128xf32>
    %c0_i32_51 = arith.constant 0 : i32
    %163 = vector.broadcast %c0_i32_51 : i32 to vector<8x128xi32>
    %164 = arith.cmpi eq, %143, %163 : vector<8x128xi32>
    %165 = arith.extui %164 : vector<8x128xi1> to vector<8x128xi32>
    %166 = arith.sitofp %165 : vector<8x128xi32> to vector<8x128xf32>
    %167 = vector.broadcast %162 : vector<1x128xf32> to vector<8x128xf32>
    %168 = arith.mulf %166, %167 : vector<8x128xf32>
    %169 = arith.addf %145, %168 : vector<8x128xf32>
    %170 = vector.extract_strided_slice %135 {offsets = [1, 0], sizes = [1, 128], strides = [1, 1]} : vector<8x128xf32> to vector<1x128xf32>
    %171 = vector.extract_strided_slice %102 {offsets = [1, 0], sizes = [1, 16], strides = [1, 1]} : vector<8x16xf32> to vector<1x16xf32>
    %172 = vector.broadcast %171 : vector<1x16xf32> to vector<16x16xf32>
    %173 = arith.mulf %142, %172 : vector<16x16xf32>
    %cst_52 = arith.constant dense<0.000000e+00> : vector<16xf32>
    %174 = vector.multi_reduction <add>, %173, %cst_52 [1] : vector<16x16xf32> to vector<16xf32>
    %175 = vector.shape_cast %174 : vector<16xf32> to vector<16x1xf32>
    %176 = vector.broadcast %170 : vector<1x128xf32> to vector<16x128xf32>
    %177 = arith.mulf %176, %137 : vector<16x128xf32>
    %178 = math.exp %177 : vector<16x128xf32>
    %179 = arith.mulf %178, %160 : vector<16x128xf32>
    %180 = vector.extract_strided_slice %136 {offsets = [1, 0], sizes = [1, 128], strides = [1, 1]} : vector<8x128xf32> to vector<1x128xf32>
    %181 = vector.broadcast %175 : vector<16x1xf32> to vector<16x128xf32>
    %182 = vector.broadcast %180 : vector<1x128xf32> to vector<16x128xf32>
    %183 = arith.mulf %181, %182 : vector<16x128xf32>
    %184 = arith.addf %179, %183 : vector<16x128xf32>
    %185 = vector.extract_strided_slice %116 {offsets = [1, 0], sizes = [1, 16], strides = [1, 1]} : vector<8x16xf32> to vector<1x16xf32>
    %cst_53 = arith.constant dense<0.000000e+00> : vector<1x128xf32>
    %186 = tpu.matmul %185, %184, %cst_53 {dimension_numbers = #tpu.dot_dimension_numbers<[1], [0], [0], [1], [0, 0, 1, 1], [], []>} : vector<1x16xf32>, vector<16x128xf32>, vector<1x128xf32> -> vector<1x128xf32>
    %c1_i32_54 = arith.constant 1 : i32
    %187 = vector.broadcast %c1_i32_54 : i32 to vector<8x128xi32>
    %188 = arith.cmpi eq, %143, %187 : vector<8x128xi32>
    %189 = arith.extui %188 : vector<8x128xi1> to vector<8x128xi32>
    %190 = arith.sitofp %189 : vector<8x128xi32> to vector<8x128xf32>
    %191 = vector.broadcast %186 : vector<1x128xf32> to vector<8x128xf32>
    %192 = arith.mulf %190, %191 : vector<8x128xf32>
    %193 = arith.addf %169, %192 : vector<8x128xf32>
    %194 = vector.extract_strided_slice %135 {offsets = [2, 0], sizes = [1, 128], strides = [1, 1]} : vector<8x128xf32> to vector<1x128xf32>
    %195 = vector.extract_strided_slice %102 {offsets = [2, 0], sizes = [1, 16], strides = [1, 1]} : vector<8x16xf32> to vector<1x16xf32>
    %196 = vector.broadcast %195 : vector<1x16xf32> to vector<16x16xf32>
    %197 = arith.mulf %142, %196 : vector<16x16xf32>
    %cst_55 = arith.constant dense<0.000000e+00> : vector<16xf32>
    %198 = vector.multi_reduction <add>, %197, %cst_55 [1] : vector<16x16xf32> to vector<16xf32>
    %199 = vector.shape_cast %198 : vector<16xf32> to vector<16x1xf32>
    %200 = vector.broadcast %194 : vector<1x128xf32> to vector<16x128xf32>
    %201 = arith.mulf %200, %137 : vector<16x128xf32>
    %202 = math.exp %201 : vector<16x128xf32>
    %203 = arith.mulf %202, %184 : vector<16x128xf32>
    %204 = vector.extract_strided_slice %136 {offsets = [2, 0], sizes = [1, 128], strides = [1, 1]} : vector<8x128xf32> to vector<1x128xf32>
    %205 = vector.broadcast %199 : vector<16x1xf32> to vector<16x128xf32>
    %206 = vector.broadcast %204 : vector<1x128xf32> to vector<16x128xf32>
    %207 = arith.mulf %205, %206 : vector<16x128xf32>
    %208 = arith.addf %203, %207 : vector<16x128xf32>
    %209 = vector.extract_strided_slice %116 {offsets = [2, 0], sizes = [1, 16], strides = [1, 1]} : vector<8x16xf32> to vector<1x16xf32>
    %cst_56 = arith.constant dense<0.000000e+00> : vector<1x128xf32>
    %210 = tpu.matmul %209, %208, %cst_56 {dimension_numbers = #tpu.dot_dimension_numbers<[1], [0], [0], [1], [0, 0, 1, 1], [], []>} : vector<1x16xf32>, vector<16x128xf32>, vector<1x128xf32> -> vector<1x128xf32>
    %c2_i32_57 = arith.constant 2 : i32
    %211 = vector.broadcast %c2_i32_57 : i32 to vector<8x128xi32>
    %212 = arith.cmpi eq, %143, %211 : vector<8x128xi32>
    %213 = arith.extui %212 : vector<8x128xi1> to vector<8x128xi32>
    %214 = arith.sitofp %213 : vector<8x128xi32> to vector<8x128xf32>
    %215 = vector.broadcast %210 : vector<1x128xf32> to vector<8x128xf32>
    %216 = arith.mulf %214, %215 : vector<8x128xf32>
    %217 = arith.addf %193, %216 : vector<8x128xf32>
    %218 = vector.extract_strided_slice %135 {offsets = [3, 0], sizes = [1, 128], strides = [1, 1]} : vector<8x128xf32> to vector<1x128xf32>
    %219 = vector.extract_strided_slice %102 {offsets = [3, 0], sizes = [1, 16], strides = [1, 1]} : vector<8x16xf32> to vector<1x16xf32>
    %220 = vector.broadcast %219 : vector<1x16xf32> to vector<16x16xf32>
    %221 = arith.mulf %142, %220 : vector<16x16xf32>
    %cst_58 = arith.constant dense<0.000000e+00> : vector<16xf32>
    %222 = vector.multi_reduction <add>, %221, %cst_58 [1] : vector<16x16xf32> to vector<16xf32>
    %223 = vector.shape_cast %222 : vector<16xf32> to vector<16x1xf32>
    %224 = vector.broadcast %218 : vector<1x128xf32> to vector<16x128xf32>
    %225 = arith.mulf %224, %137 : vector<16x128xf32>
    %226 = math.exp %225 : vector<16x128xf32>
    %227 = arith.mulf %226, %208 : vector<16x128xf32>
    %228 = vector.extract_strided_slice %136 {offsets = [3, 0], sizes = [1, 128], strides = [1, 1]} : vector<8x128xf32> to vector<1x128xf32>
    %229 = vector.broadcast %223 : vector<16x1xf32> to vector<16x128xf32>
    %230 = vector.broadcast %228 : vector<1x128xf32> to vector<16x128xf32>
    %231 = arith.mulf %229, %230 : vector<16x128xf32>
    %232 = arith.addf %227, %231 : vector<16x128xf32>
    %233 = vector.extract_strided_slice %116 {offsets = [3, 0], sizes = [1, 16], strides = [1, 1]} : vector<8x16xf32> to vector<1x16xf32>
    %cst_59 = arith.constant dense<0.000000e+00> : vector<1x128xf32>
    %234 = tpu.matmul %233, %232, %cst_59 {dimension_numbers = #tpu.dot_dimension_numbers<[1], [0], [0], [1], [0, 0, 1, 1], [], []>} : vector<1x16xf32>, vector<16x128xf32>, vector<1x128xf32> -> vector<1x128xf32>
    %c3_i32_60 = arith.constant 3 : i32
    %235 = vector.broadcast %c3_i32_60 : i32 to vector<8x128xi32>
    %236 = arith.cmpi eq, %143, %235 : vector<8x128xi32>
    %237 = arith.extui %236 : vector<8x128xi1> to vector<8x128xi32>
    %238 = arith.sitofp %237 : vector<8x128xi32> to vector<8x128xf32>
    %239 = vector.broadcast %234 : vector<1x128xf32> to vector<8x128xf32>
    %240 = arith.mulf %238, %239 : vector<8x128xf32>
    %241 = arith.addf %217, %240 : vector<8x128xf32>
    %242 = vector.extract_strided_slice %135 {offsets = [4, 0], sizes = [1, 128], strides = [1, 1]} : vector<8x128xf32> to vector<1x128xf32>
    %243 = vector.extract_strided_slice %102 {offsets = [4, 0], sizes = [1, 16], strides = [1, 1]} : vector<8x16xf32> to vector<1x16xf32>
    %244 = vector.broadcast %243 : vector<1x16xf32> to vector<16x16xf32>
    %245 = arith.mulf %142, %244 : vector<16x16xf32>
    %cst_61 = arith.constant dense<0.000000e+00> : vector<16xf32>
    %246 = vector.multi_reduction <add>, %245, %cst_61 [1] : vector<16x16xf32> to vector<16xf32>
    %247 = vector.shape_cast %246 : vector<16xf32> to vector<16x1xf32>
    %248 = vector.broadcast %242 : vector<1x128xf32> to vector<16x128xf32>
    %249 = arith.mulf %248, %137 : vector<16x128xf32>
    %250 = math.exp %249 : vector<16x128xf32>
    %251 = arith.mulf %250, %232 : vector<16x128xf32>
    %252 = vector.extract_strided_slice %136 {offsets = [4, 0], sizes = [1, 128], strides = [1, 1]} : vector<8x128xf32> to vector<1x128xf32>
    %253 = vector.broadcast %247 : vector<16x1xf32> to vector<16x128xf32>
    %254 = vector.broadcast %252 : vector<1x128xf32> to vector<16x128xf32>
    %255 = arith.mulf %253, %254 : vector<16x128xf32>
    %256 = arith.addf %251, %255 : vector<16x128xf32>
    %257 = vector.extract_strided_slice %116 {offsets = [4, 0], sizes = [1, 16], strides = [1, 1]} : vector<8x16xf32> to vector<1x16xf32>
    %cst_62 = arith.constant dense<0.000000e+00> : vector<1x128xf32>
    %258 = tpu.matmul %257, %256, %cst_62 {dimension_numbers = #tpu.dot_dimension_numbers<[1], [0], [0], [1], [0, 0, 1, 1], [], []>} : vector<1x16xf32>, vector<16x128xf32>, vector<1x128xf32> -> vector<1x128xf32>
    %c4_i32 = arith.constant 4 : i32
    %259 = vector.broadcast %c4_i32 : i32 to vector<8x128xi32>
    %260 = arith.cmpi eq, %143, %259 : vector<8x128xi32>
    %261 = arith.extui %260 : vector<8x128xi1> to vector<8x128xi32>
    %262 = arith.sitofp %261 : vector<8x128xi32> to vector<8x128xf32>
    %263 = vector.broadcast %258 : vector<1x128xf32> to vector<8x128xf32>
    %264 = arith.mulf %262, %263 : vector<8x128xf32>
    %265 = arith.addf %241, %264 : vector<8x128xf32>
    %266 = vector.extract_strided_slice %135 {offsets = [5, 0], sizes = [1, 128], strides = [1, 1]} : vector<8x128xf32> to vector<1x128xf32>
    %267 = vector.extract_strided_slice %102 {offsets = [5, 0], sizes = [1, 16], strides = [1, 1]} : vector<8x16xf32> to vector<1x16xf32>
    %268 = vector.broadcast %267 : vector<1x16xf32> to vector<16x16xf32>
    %269 = arith.mulf %142, %268 : vector<16x16xf32>
    %cst_63 = arith.constant dense<0.000000e+00> : vector<16xf32>
    %270 = vector.multi_reduction <add>, %269, %cst_63 [1] : vector<16x16xf32> to vector<16xf32>
    %271 = vector.shape_cast %270 : vector<16xf32> to vector<16x1xf32>
    %272 = vector.broadcast %266 : vector<1x128xf32> to vector<16x128xf32>
    %273 = arith.mulf %272, %137 : vector<16x128xf32>
    %274 = math.exp %273 : vector<16x128xf32>
    %275 = arith.mulf %274, %256 : vector<16x128xf32>
    %276 = vector.extract_strided_slice %136 {offsets = [5, 0], sizes = [1, 128], strides = [1, 1]} : vector<8x128xf32> to vector<1x128xf32>
    %277 = vector.broadcast %271 : vector<16x1xf32> to vector<16x128xf32>
    %278 = vector.broadcast %276 : vector<1x128xf32> to vector<16x128xf32>
    %279 = arith.mulf %277, %278 : vector<16x128xf32>
    %280 = arith.addf %275, %279 : vector<16x128xf32>
    %281 = vector.extract_strided_slice %116 {offsets = [5, 0], sizes = [1, 16], strides = [1, 1]} : vector<8x16xf32> to vector<1x16xf32>
    %cst_64 = arith.constant dense<0.000000e+00> : vector<1x128xf32>
    %282 = tpu.matmul %281, %280, %cst_64 {dimension_numbers = #tpu.dot_dimension_numbers<[1], [0], [0], [1], [0, 0, 1, 1], [], []>} : vector<1x16xf32>, vector<16x128xf32>, vector<1x128xf32> -> vector<1x128xf32>
    %c5_i32 = arith.constant 5 : i32
    %283 = vector.broadcast %c5_i32 : i32 to vector<8x128xi32>
    %284 = arith.cmpi eq, %143, %283 : vector<8x128xi32>
    %285 = arith.extui %284 : vector<8x128xi1> to vector<8x128xi32>
    %286 = arith.sitofp %285 : vector<8x128xi32> to vector<8x128xf32>
    %287 = vector.broadcast %282 : vector<1x128xf32> to vector<8x128xf32>
    %288 = arith.mulf %286, %287 : vector<8x128xf32>
    %289 = arith.addf %265, %288 : vector<8x128xf32>
    %290 = vector.extract_strided_slice %135 {offsets = [6, 0], sizes = [1, 128], strides = [1, 1]} : vector<8x128xf32> to vector<1x128xf32>
    %291 = vector.extract_strided_slice %102 {offsets = [6, 0], sizes = [1, 16], strides = [1, 1]} : vector<8x16xf32> to vector<1x16xf32>
    %292 = vector.broadcast %291 : vector<1x16xf32> to vector<16x16xf32>
    %293 = arith.mulf %142, %292 : vector<16x16xf32>
    %cst_65 = arith.constant dense<0.000000e+00> : vector<16xf32>
    %294 = vector.multi_reduction <add>, %293, %cst_65 [1] : vector<16x16xf32> to vector<16xf32>
    %295 = vector.shape_cast %294 : vector<16xf32> to vector<16x1xf32>
    %296 = vector.broadcast %290 : vector<1x128xf32> to vector<16x128xf32>
    %297 = arith.mulf %296, %137 : vector<16x128xf32>
    %298 = math.exp %297 : vector<16x128xf32>
    %299 = arith.mulf %298, %280 : vector<16x128xf32>
    %300 = vector.extract_strided_slice %136 {offsets = [6, 0], sizes = [1, 128], strides = [1, 1]} : vector<8x128xf32> to vector<1x128xf32>
    %301 = vector.broadcast %295 : vector<16x1xf32> to vector<16x128xf32>
    %302 = vector.broadcast %300 : vector<1x128xf32> to vector<16x128xf32>
    %303 = arith.mulf %301, %302 : vector<16x128xf32>
    %304 = arith.addf %299, %303 : vector<16x128xf32>
    %305 = vector.extract_strided_slice %116 {offsets = [6, 0], sizes = [1, 16], strides = [1, 1]} : vector<8x16xf32> to vector<1x16xf32>
    %cst_66 = arith.constant dense<0.000000e+00> : vector<1x128xf32>
    %306 = tpu.matmul %305, %304, %cst_66 {dimension_numbers = #tpu.dot_dimension_numbers<[1], [0], [0], [1], [0, 0, 1, 1], [], []>} : vector<1x16xf32>, vector<16x128xf32>, vector<1x128xf32> -> vector<1x128xf32>
    %c6_i32 = arith.constant 6 : i32
    %307 = vector.broadcast %c6_i32 : i32 to vector<8x128xi32>
    %308 = arith.cmpi eq, %143, %307 : vector<8x128xi32>
    %309 = arith.extui %308 : vector<8x128xi1> to vector<8x128xi32>
    %310 = arith.sitofp %309 : vector<8x128xi32> to vector<8x128xf32>
    %311 = vector.broadcast %306 : vector<1x128xf32> to vector<8x128xf32>
    %312 = arith.mulf %310, %311 : vector<8x128xf32>
    %313 = arith.addf %289, %312 : vector<8x128xf32>
    %314 = vector.extract_strided_slice %135 {offsets = [7, 0], sizes = [1, 128], strides = [1, 1]} : vector<8x128xf32> to vector<1x128xf32>
    %315 = vector.extract_strided_slice %102 {offsets = [7, 0], sizes = [1, 16], strides = [1, 1]} : vector<8x16xf32> to vector<1x16xf32>
    %316 = vector.broadcast %315 : vector<1x16xf32> to vector<16x16xf32>
    %317 = arith.mulf %142, %316 : vector<16x16xf32>
    %cst_67 = arith.constant dense<0.000000e+00> : vector<16xf32>
    %318 = vector.multi_reduction <add>, %317, %cst_67 [1] : vector<16x16xf32> to vector<16xf32>
    %319 = vector.shape_cast %318 : vector<16xf32> to vector<16x1xf32>
    %320 = vector.broadcast %314 : vector<1x128xf32> to vector<16x128xf32>
    %321 = arith.mulf %320, %137 : vector<16x128xf32>
    %322 = math.exp %321 : vector<16x128xf32>
    %323 = arith.mulf %322, %304 : vector<16x128xf32>
    %324 = vector.extract_strided_slice %136 {offsets = [7, 0], sizes = [1, 128], strides = [1, 1]} : vector<8x128xf32> to vector<1x128xf32>
    %325 = vector.broadcast %319 : vector<16x1xf32> to vector<16x128xf32>
    %326 = vector.broadcast %324 : vector<1x128xf32> to vector<16x128xf32>
    %327 = arith.mulf %325, %326 : vector<16x128xf32>
    %328 = arith.addf %323, %327 : vector<16x128xf32>
    %329 = vector.extract_strided_slice %116 {offsets = [7, 0], sizes = [1, 16], strides = [1, 1]} : vector<8x16xf32> to vector<1x16xf32>
    %cst_68 = arith.constant dense<0.000000e+00> : vector<1x128xf32>
    %330 = tpu.matmul %329, %328, %cst_68 {dimension_numbers = #tpu.dot_dimension_numbers<[1], [0], [0], [1], [0, 0, 1, 1], [], []>} : vector<1x16xf32>, vector<16x128xf32>, vector<1x128xf32> -> vector<1x128xf32>
    %c7_i32 = arith.constant 7 : i32
    %331 = vector.broadcast %c7_i32 : i32 to vector<8x128xi32>
    %332 = arith.cmpi eq, %143, %331 : vector<8x128xi32>
    %333 = arith.extui %332 : vector<8x128xi1> to vector<8x128xi32>
    %334 = arith.sitofp %333 : vector<8x128xi32> to vector<8x128xf32>
    %335 = vector.broadcast %330 : vector<1x128xf32> to vector<8x128xf32>
    %336 = arith.mulf %334, %335 : vector<8x128xf32>
    %337 = arith.addf %313, %336 : vector<8x128xf32>
    %c0_69 = arith.constant 0 : index
    %c0_70 = arith.constant 0 : index
    %338 = vector.load %arg13[%c0_69, %c0_70] : memref<1x128xf32, #tpu.memory_space<vmem>>, vector<1x128xf32>
    %339 = vector.broadcast %338 : vector<1x128xf32> to vector<8x128xf32>
    %340 = arith.mulf %72, %339 : vector<8x128xf32>
    %341 = arith.addf %337, %340 : vector<8x128xf32>
    %342 = arith.negf %19 : vector<8x128xf32>
    %343 = math.exp %342 : vector<8x128xf32>
    %cst_71 = arith.constant 1.000000e+00 : f32
    %344 = vector.broadcast %cst_71 : f32 to vector<8x128xf32>
    %345 = arith.addf %344, %343 : vector<8x128xf32>
    %346 = arith.divf %344, %345 : vector<8x128xf32>
    %347 = arith.mulf %19, %346 : vector<8x128xf32>
    %348 = arith.mulf %341, %347 : vector<8x128xf32>
    %c0_72 = arith.constant 0 : index
    %c0_73 = arith.constant 0 : index
    %349 = vector.load %arg14[%c0_72, %c0_73] : memref<128x64xf32, #tpu.memory_space<vmem>>, vector<128x64xf32>
    %cst_74 = arith.constant dense<0.000000e+00> : vector<8x64xf32>
    %350 = tpu.matmul %348, %349, %cst_74 {dimension_numbers = #tpu.dot_dimension_numbers<[1], [0], [0], [1], [0, 0, 1, 1], [], []>} : vector<8x128xf32>, vector<128x64xf32>, vector<8x64xf32> -> vector<8x64xf32>
    %351 = arith.addf %350, %2 : vector<8x64xf32>
    %c0_75 = arith.constant 0 : index
    %c0_76 = arith.constant 0 : index
    %352 = vector.load %arg19[%c0_75, %c0_76] : memref<8x64xf32, #tpu.memory_space<vmem>>, vector<8x64xf32>
    tpu.vector_store %arg19[%c0_75, %c0_76], %351 {strides = array<i32>} : memref<8x64xf32, #tpu.memory_space<vmem>>, vector<8x64xf32>,
    %c0_77 = arith.constant 0 : index
    %c0_78 = arith.constant 0 : index
    %353 = vector.load %arg15[%c0_77, %c0_78] : memref<1x64xf32, #tpu.memory_space<vmem>>, vector<1x64xf32>
    %354 = arith.mulf %351, %351 : vector<8x64xf32>
    %cst_79 = arith.constant dense<0.000000e+00> : vector<8xf32>
    %355 = vector.multi_reduction <add>, %354, %cst_79 [1] : vector<8x64xf32> to vector<8xf32>
    %356 = vector.shape_cast %355 : vector<8xf32> to vector<8x1xf32>
    %cst_80 = arith.constant 6.400000e+01 : f32
    %357 = vector.broadcast %cst_80 : f32 to vector<8x1xf32>
    %358 = arith.divf %356, %357 : vector<8x1xf32>
    %cst_81 = arith.constant 9.99999997E-7 : f32
    %359 = vector.broadcast %cst_81 : f32 to vector<8x1xf32>
    %360 = arith.addf %358, %359 : vector<8x1xf32>
    %361 = math.rsqrt %360 : vector<8x1xf32>
    %362 = vector.broadcast %361 : vector<8x1xf32> to vector<8x64xf32>
    %363 = arith.mulf %351, %362 : vector<8x64xf32>
    %364 = vector.broadcast %353 : vector<1x64xf32> to vector<8x64xf32>
    %365 = arith.mulf %363, %364 : vector<8x64xf32>
    %c0_82 = arith.constant 0 : index
    %c0_83 = arith.constant 0 : index
    %366 = vector.load %arg16[%c0_82, %c0_83] : memref<64x256xf32, #tpu.memory_space<vmem>>, vector<64x256xf32>
    %cst_84 = arith.constant dense<0.000000e+00> : vector<8x256xf32>
    %367 = tpu.matmul %365, %366, %cst_84 {dimension_numbers = #tpu.dot_dimension_numbers<[1], [0], [0], [1], [0, 0, 1, 1], [], []>} : vector<8x64xf32>, vector<64x256xf32>, vector<8x256xf32> -> vector<8x256xf32>
    %368 = vector.extract_strided_slice %367 {offsets = [0, 0], sizes = [8, 128], strides = [1, 1]} : vector<8x256xf32> to vector<8x128xf32>
    %369 = arith.negf %368 : vector<8x128xf32>
    %370 = math.exp %369 : vector<8x128xf32>
    %cst_85 = arith.constant 1.000000e+00 : f32
    %371 = vector.broadcast %cst_85 : f32 to vector<8x128xf32>
    %372 = arith.addf %371, %370 : vector<8x128xf32>
    %373 = arith.divf %371, %372 : vector<8x128xf32>
    %374 = arith.mulf %368, %373 : vector<8x128xf32>
    %375 = vector.extract_strided_slice %367 {offsets = [0, 128], sizes = [8, 128], strides = [1, 1]} : vector<8x256xf32> to vector<8x128xf32>
    %376 = arith.mulf %374, %375 : vector<8x128xf32>
    %c0_86 = arith.constant 0 : index
    %c0_87 = arith.constant 0 : index
    %377 = vector.load %arg17[%c0_86, %c0_87] : memref<128x64xf32, #tpu.memory_space<vmem>>, vector<128x64xf32>
    %cst_88 = arith.constant dense<0.000000e+00> : vector<8x64xf32>
    %378 = tpu.matmul %376, %377, %cst_88 {dimension_numbers = #tpu.dot_dimension_numbers<[1], [0], [0], [1], [0, 0, 1, 1], [], []>} : vector<8x128xf32>, vector<128x64xf32>, vector<8x64xf32> -> vector<8x64xf32>
    %c0_89 = arith.constant 0 : index
    %c0_90 = arith.constant 0 : index
    %379 = vector.load %arg18[%c0_89, %c0_90] : memref<8x64xf32, #tpu.memory_space<vmem>>, vector<8x64xf32>
    tpu.vector_store %arg18[%c0_89, %c0_90], %378 {strides = array<i32>} : memref<8x64xf32, #tpu.memory_space<vmem>>, vector<8x64xf32>,
    return
  }
}

module attributes {stable_mosaic.version = 11 : i64} {
  func.func @_layer_kernel(%arg0: memref<8x64xf32, #tpu.memory_space<vmem>>, %arg1: memref<8x64xf32, #tpu.memory_space<vmem>>, %arg2: memref<1x64xf32, #tpu.memory_space<vmem>>, %arg3: memref<64x128xf32, #tpu.memory_space<vmem>>, %arg4: memref<64x64xf32, #tpu.memory_space<vmem>>, %arg5: memref<1x64xf32, #tpu.memory_space<vmem>>, %arg6: memref<64x4xf32, #tpu.memory_space<vmem>>, %arg7: memref<4x64x256xf32, #tpu.memory_space<vmem>>, %arg8: memref<4x128x64xf32, #tpu.memory_space<vmem>>, %arg9: memref<1x64xf32, #tpu.memory_space<vmem>>, %arg10: memref<8x64xf32, #tpu.memory_space<vmem>>, %arg11: memref<8x64xf32, #tpu.memory_space<vmem>>) attributes {dimension_semantics = [], scalar_prefetch = 0 : i64, scratch_operands = 0 : i64, tpu.core_type = #tpu.core_type<tc>} {
    %c0 = arith.constant 0 : index
    %c0_0 = arith.constant 0 : index
    %0 = vector.load %arg0[%c0, %c0_0] : memref<8x64xf32, #tpu.memory_space<vmem>>, vector<8x64xf32>
    %c0_1 = arith.constant 0 : index
    %c0_2 = arith.constant 0 : index
    %1 = vector.load %arg1[%c0_1, %c0_2] : memref<8x64xf32, #tpu.memory_space<vmem>>, vector<8x64xf32>
    %2 = arith.addf %0, %1 : vector<8x64xf32>
    %c0_3 = arith.constant 0 : index
    %c0_4 = arith.constant 0 : index
    %3 = vector.load %arg2[%c0_3, %c0_4] : memref<1x64xf32, #tpu.memory_space<vmem>>, vector<1x64xf32>
    %4 = arith.mulf %2, %2 : vector<8x64xf32>
    %cst = arith.constant dense<0.000000e+00> : vector<8xf32>
    %5 = vector.multi_reduction <add>, %4, %cst [1] : vector<8x64xf32> to vector<8xf32>
    %6 = vector.shape_cast %5 : vector<8xf32> to vector<8x1xf32>
    %cst_5 = arith.constant 6.400000e+01 : f32
    %7 = vector.broadcast %cst_5 : f32 to vector<8x1xf32>
    %8 = arith.divf %6, %7 : vector<8x1xf32>
    %cst_6 = arith.constant 9.99999997E-7 : f32
    %9 = vector.broadcast %cst_6 : f32 to vector<8x1xf32>
    %10 = arith.addf %8, %9 : vector<8x1xf32>
    %11 = math.rsqrt %10 : vector<8x1xf32>
    %12 = vector.broadcast %11 : vector<8x1xf32> to vector<8x64xf32>
    %13 = arith.mulf %2, %12 : vector<8x64xf32>
    %14 = vector.broadcast %3 : vector<1x64xf32> to vector<8x64xf32>
    %15 = arith.mulf %13, %14 : vector<8x64xf32>
    %c0_7 = arith.constant 0 : index
    %c0_8 = arith.constant 0 : index
    %16 = vector.load %arg3[%c0_7, %c0_8] : memref<64x128xf32, #tpu.memory_space<vmem>>, vector<64x128xf32>
    %cst_9 = arith.constant dense<0.000000e+00> : vector<8x128xf32>
    %17 = tpu.matmul %15, %16, %cst_9 {dimension_numbers = #tpu.dot_dimension_numbers<[1], [0], [0], [1], [0, 0, 1, 1], [], []>} : vector<8x64xf32>, vector<64x128xf32>, vector<8x128xf32> -> vector<8x128xf32>
    %18 = tpu.iota {dimensions = array<i32: 0>} : vector<8x8xi32>
    %19 = tpu.iota {dimensions = array<i32: 1>} : vector<8x8xi32>
    %20 = arith.cmpi sle, %19, %18 : vector<8x8xi32>
    %c0_10 = arith.constant 0 : index
    %c0_11 = arith.constant 0 : index
    %21 = vector.load %arg4[%c0_10, %c0_11] : memref<64x64xf32, #tpu.memory_space<vmem>>, vector<64x64xf32>
    %cst_12 = arith.constant 0.000000e+00 : f32
    %22 = vector.broadcast %cst_12 : f32 to vector<8x64xf32>
    %23 = vector.extract_strided_slice %17 {offsets = [0, 0], sizes = [8, 16], strides = [1, 1]} : vector<8x128xf32> to vector<8x16xf32>
    %24 = vector.extract_strided_slice %17 {offsets = [0, 64], sizes = [8, 16], strides = [1, 1]} : vector<8x128xf32> to vector<8x16xf32>
    %25 = vector.extract_strided_slice %17 {offsets = [0, 96], sizes = [8, 16], strides = [1, 1]} : vector<8x128xf32> to vector<8x16xf32>
    %26 = tpu.transpose %24, [1, 0] : vector<8x16xf32> -> vector<16x8xf32>
    %cst_13 = arith.constant dense<0.000000e+00> : vector<8x8xf32>
    %27 = tpu.matmul %23, %26, %cst_13 {dimension_numbers = #tpu.dot_dimension_numbers<[1], [0], [0], [1], [0, 0, 1, 1], [], []>} : vector<8x16xf32>, vector<16x8xf32>, vector<8x8xf32> -> vector<8x8xf32>
    %cst_14 = arith.constant 2.500000e-01 : f32
    %28 = vector.broadcast %cst_14 : f32 to vector<8x8xf32>
    %29 = arith.mulf %27, %28 : vector<8x8xf32>
    %cst_15 = arith.constant -1.000000e+30 : f32
    %30 = vector.broadcast %cst_15 : f32 to vector<8x8xf32>
    %31 = arith.select %20, %29, %30 : vector<8x8xi1>, vector<8x8xf32>
    %cst_16 = arith.constant dense<0xFF800000> : vector<8xf32>
    %32 = vector.multi_reduction <maximumf>, %31, %cst_16 [1] : vector<8x8xf32> to vector<8xf32>
    %33 = vector.shape_cast %32 : vector<8xf32> to vector<8x1xf32>
    %34 = vector.broadcast %33 : vector<8x1xf32> to vector<8x8xf32>
    %35 = arith.subf %31, %34 : vector<8x8xf32>
    %36 = math.exp %35 : vector<8x8xf32>
    %cst_17 = arith.constant dense<0.000000e+00> : vector<8xf32>
    %37 = vector.multi_reduction <add>, %36, %cst_17 [1] : vector<8x8xf32> to vector<8xf32>
    %38 = vector.shape_cast %37 : vector<8xf32> to vector<8x1xf32>
    %39 = tpu.reciprocal %38 {approx = true} : vector<8x1xf32> -> vector<8x1xf32>
    %40 = vector.broadcast %39 : vector<8x1xf32> to vector<8x8xf32>
    %41 = arith.mulf %36, %40 : vector<8x8xf32>
    %cst_18 = arith.constant dense<0.000000e+00> : vector<8x16xf32>
    %42 = tpu.matmul %41, %25, %cst_18 {dimension_numbers = #tpu.dot_dimension_numbers<[1], [0], [0], [1], [0, 0, 1, 1], [], []>} : vector<8x8xf32>, vector<8x16xf32>, vector<8x16xf32> -> vector<8x16xf32>
    %43 = vector.extract_strided_slice %21 {offsets = [0, 0], sizes = [16, 64], strides = [1, 1]} : vector<64x64xf32> to vector<16x64xf32>
    %cst_19 = arith.constant dense<0.000000e+00> : vector<8x64xf32>
    %44 = tpu.matmul %42, %43, %cst_19 {dimension_numbers = #tpu.dot_dimension_numbers<[1], [0], [0], [1], [0, 0, 1, 1], [], []>} : vector<8x16xf32>, vector<16x64xf32>, vector<8x64xf32> -> vector<8x64xf32>
    %45 = arith.addf %22, %44 : vector<8x64xf32>
    %46 = vector.extract_strided_slice %17 {offsets = [0, 16], sizes = [8, 16], strides = [1, 1]} : vector<8x128xf32> to vector<8x16xf32>
    %47 = vector.extract_strided_slice %17 {offsets = [0, 64], sizes = [8, 16], strides = [1, 1]} : vector<8x128xf32> to vector<8x16xf32>
    %48 = vector.extract_strided_slice %17 {offsets = [0, 96], sizes = [8, 16], strides = [1, 1]} : vector<8x128xf32> to vector<8x16xf32>
    %49 = tpu.transpose %47, [1, 0] : vector<8x16xf32> -> vector<16x8xf32>
    %cst_20 = arith.constant dense<0.000000e+00> : vector<8x8xf32>
    %50 = tpu.matmul %46, %49, %cst_20 {dimension_numbers = #tpu.dot_dimension_numbers<[1], [0], [0], [1], [0, 0, 1, 1], [], []>} : vector<8x16xf32>, vector<16x8xf32>, vector<8x8xf32> -> vector<8x8xf32>
    %cst_21 = arith.constant 2.500000e-01 : f32
    %51 = vector.broadcast %cst_21 : f32 to vector<8x8xf32>
    %52 = arith.mulf %50, %51 : vector<8x8xf32>
    %cst_22 = arith.constant -1.000000e+30 : f32
    %53 = vector.broadcast %cst_22 : f32 to vector<8x8xf32>
    %54 = arith.select %20, %52, %53 : vector<8x8xi1>, vector<8x8xf32>
    %cst_23 = arith.constant dense<0xFF800000> : vector<8xf32>
    %55 = vector.multi_reduction <maximumf>, %54, %cst_23 [1] : vector<8x8xf32> to vector<8xf32>
    %56 = vector.shape_cast %55 : vector<8xf32> to vector<8x1xf32>
    %57 = vector.broadcast %56 : vector<8x1xf32> to vector<8x8xf32>
    %58 = arith.subf %54, %57 : vector<8x8xf32>
    %59 = math.exp %58 : vector<8x8xf32>
    %cst_24 = arith.constant dense<0.000000e+00> : vector<8xf32>
    %60 = vector.multi_reduction <add>, %59, %cst_24 [1] : vector<8x8xf32> to vector<8xf32>
    %61 = vector.shape_cast %60 : vector<8xf32> to vector<8x1xf32>
    %62 = tpu.reciprocal %61 {approx = true} : vector<8x1xf32> -> vector<8x1xf32>
    %63 = vector.broadcast %62 : vector<8x1xf32> to vector<8x8xf32>
    %64 = arith.mulf %59, %63 : vector<8x8xf32>
    %cst_25 = arith.constant dense<0.000000e+00> : vector<8x16xf32>
    %65 = tpu.matmul %64, %48, %cst_25 {dimension_numbers = #tpu.dot_dimension_numbers<[1], [0], [0], [1], [0, 0, 1, 1], [], []>} : vector<8x8xf32>, vector<8x16xf32>, vector<8x16xf32> -> vector<8x16xf32>
    %66 = vector.extract_strided_slice %21 {offsets = [16, 0], sizes = [16, 64], strides = [1, 1]} : vector<64x64xf32> to vector<16x64xf32>
    %cst_26 = arith.constant dense<0.000000e+00> : vector<8x64xf32>
    %67 = tpu.matmul %65, %66, %cst_26 {dimension_numbers = #tpu.dot_dimension_numbers<[1], [0], [0], [1], [0, 0, 1, 1], [], []>} : vector<8x16xf32>, vector<16x64xf32>, vector<8x64xf32> -> vector<8x64xf32>
    %68 = arith.addf %45, %67 : vector<8x64xf32>
    %69 = vector.extract_strided_slice %17 {offsets = [0, 32], sizes = [8, 16], strides = [1, 1]} : vector<8x128xf32> to vector<8x16xf32>
    %70 = vector.extract_strided_slice %17 {offsets = [0, 80], sizes = [8, 16], strides = [1, 1]} : vector<8x128xf32> to vector<8x16xf32>
    %71 = vector.extract_strided_slice %17 {offsets = [0, 112], sizes = [8, 16], strides = [1, 1]} : vector<8x128xf32> to vector<8x16xf32>
    %72 = tpu.transpose %70, [1, 0] : vector<8x16xf32> -> vector<16x8xf32>
    %cst_27 = arith.constant dense<0.000000e+00> : vector<8x8xf32>
    %73 = tpu.matmul %69, %72, %cst_27 {dimension_numbers = #tpu.dot_dimension_numbers<[1], [0], [0], [1], [0, 0, 1, 1], [], []>} : vector<8x16xf32>, vector<16x8xf32>, vector<8x8xf32> -> vector<8x8xf32>
    %cst_28 = arith.constant 2.500000e-01 : f32
    %74 = vector.broadcast %cst_28 : f32 to vector<8x8xf32>
    %75 = arith.mulf %73, %74 : vector<8x8xf32>
    %cst_29 = arith.constant -1.000000e+30 : f32
    %76 = vector.broadcast %cst_29 : f32 to vector<8x8xf32>
    %77 = arith.select %20, %75, %76 : vector<8x8xi1>, vector<8x8xf32>
    %cst_30 = arith.constant dense<0xFF800000> : vector<8xf32>
    %78 = vector.multi_reduction <maximumf>, %77, %cst_30 [1] : vector<8x8xf32> to vector<8xf32>
    %79 = vector.shape_cast %78 : vector<8xf32> to vector<8x1xf32>
    %80 = vector.broadcast %79 : vector<8x1xf32> to vector<8x8xf32>
    %81 = arith.subf %77, %80 : vector<8x8xf32>
    %82 = math.exp %81 : vector<8x8xf32>
    %cst_31 = arith.constant dense<0.000000e+00> : vector<8xf32>
    %83 = vector.multi_reduction <add>, %82, %cst_31 [1] : vector<8x8xf32> to vector<8xf32>
    %84 = vector.shape_cast %83 : vector<8xf32> to vector<8x1xf32>
    %85 = tpu.reciprocal %84 {approx = true} : vector<8x1xf32> -> vector<8x1xf32>
    %86 = vector.broadcast %85 : vector<8x1xf32> to vector<8x8xf32>
    %87 = arith.mulf %82, %86 : vector<8x8xf32>
    %cst_32 = arith.constant dense<0.000000e+00> : vector<8x16xf32>
    %88 = tpu.matmul %87, %71, %cst_32 {dimension_numbers = #tpu.dot_dimension_numbers<[1], [0], [0], [1], [0, 0, 1, 1], [], []>} : vector<8x8xf32>, vector<8x16xf32>, vector<8x16xf32> -> vector<8x16xf32>
    %89 = vector.extract_strided_slice %21 {offsets = [32, 0], sizes = [16, 64], strides = [1, 1]} : vector<64x64xf32> to vector<16x64xf32>
    %cst_33 = arith.constant dense<0.000000e+00> : vector<8x64xf32>
    %90 = tpu.matmul %88, %89, %cst_33 {dimension_numbers = #tpu.dot_dimension_numbers<[1], [0], [0], [1], [0, 0, 1, 1], [], []>} : vector<8x16xf32>, vector<16x64xf32>, vector<8x64xf32> -> vector<8x64xf32>
    %91 = arith.addf %68, %90 : vector<8x64xf32>
    %92 = vector.extract_strided_slice %17 {offsets = [0, 48], sizes = [8, 16], strides = [1, 1]} : vector<8x128xf32> to vector<8x16xf32>
    %93 = vector.extract_strided_slice %17 {offsets = [0, 80], sizes = [8, 16], strides = [1, 1]} : vector<8x128xf32> to vector<8x16xf32>
    %94 = vector.extract_strided_slice %17 {offsets = [0, 112], sizes = [8, 16], strides = [1, 1]} : vector<8x128xf32> to vector<8x16xf32>
    %95 = tpu.transpose %93, [1, 0] : vector<8x16xf32> -> vector<16x8xf32>
    %cst_34 = arith.constant dense<0.000000e+00> : vector<8x8xf32>
    %96 = tpu.matmul %92, %95, %cst_34 {dimension_numbers = #tpu.dot_dimension_numbers<[1], [0], [0], [1], [0, 0, 1, 1], [], []>} : vector<8x16xf32>, vector<16x8xf32>, vector<8x8xf32> -> vector<8x8xf32>
    %cst_35 = arith.constant 2.500000e-01 : f32
    %97 = vector.broadcast %cst_35 : f32 to vector<8x8xf32>
    %98 = arith.mulf %96, %97 : vector<8x8xf32>
    %cst_36 = arith.constant -1.000000e+30 : f32
    %99 = vector.broadcast %cst_36 : f32 to vector<8x8xf32>
    %100 = arith.select %20, %98, %99 : vector<8x8xi1>, vector<8x8xf32>
    %cst_37 = arith.constant dense<0xFF800000> : vector<8xf32>
    %101 = vector.multi_reduction <maximumf>, %100, %cst_37 [1] : vector<8x8xf32> to vector<8xf32>
    %102 = vector.shape_cast %101 : vector<8xf32> to vector<8x1xf32>
    %103 = vector.broadcast %102 : vector<8x1xf32> to vector<8x8xf32>
    %104 = arith.subf %100, %103 : vector<8x8xf32>
    %105 = math.exp %104 : vector<8x8xf32>
    %cst_38 = arith.constant dense<0.000000e+00> : vector<8xf32>
    %106 = vector.multi_reduction <add>, %105, %cst_38 [1] : vector<8x8xf32> to vector<8xf32>
    %107 = vector.shape_cast %106 : vector<8xf32> to vector<8x1xf32>
    %108 = tpu.reciprocal %107 {approx = true} : vector<8x1xf32> -> vector<8x1xf32>
    %109 = vector.broadcast %108 : vector<8x1xf32> to vector<8x8xf32>
    %110 = arith.mulf %105, %109 : vector<8x8xf32>
    %cst_39 = arith.constant dense<0.000000e+00> : vector<8x16xf32>
    %111 = tpu.matmul %110, %94, %cst_39 {dimension_numbers = #tpu.dot_dimension_numbers<[1], [0], [0], [1], [0, 0, 1, 1], [], []>} : vector<8x8xf32>, vector<8x16xf32>, vector<8x16xf32> -> vector<8x16xf32>
    %112 = vector.extract_strided_slice %21 {offsets = [48, 0], sizes = [16, 64], strides = [1, 1]} : vector<64x64xf32> to vector<16x64xf32>
    %cst_40 = arith.constant dense<0.000000e+00> : vector<8x64xf32>
    %113 = tpu.matmul %111, %112, %cst_40 {dimension_numbers = #tpu.dot_dimension_numbers<[1], [0], [0], [1], [0, 0, 1, 1], [], []>} : vector<8x16xf32>, vector<16x64xf32>, vector<8x64xf32> -> vector<8x64xf32>
    %114 = arith.addf %91, %113 : vector<8x64xf32>
    %115 = arith.addf %114, %2 : vector<8x64xf32>
    %c0_41 = arith.constant 0 : index
    %c0_42 = arith.constant 0 : index
    %116 = vector.load %arg11[%c0_41, %c0_42] : memref<8x64xf32, #tpu.memory_space<vmem>>, vector<8x64xf32>
    tpu.vector_store %arg11[%c0_41, %c0_42], %115 {strides = array<i32>} : memref<8x64xf32, #tpu.memory_space<vmem>>, vector<8x64xf32>,
    %c0_43 = arith.constant 0 : index
    %c0_44 = arith.constant 0 : index
    %117 = vector.load %arg5[%c0_43, %c0_44] : memref<1x64xf32, #tpu.memory_space<vmem>>, vector<1x64xf32>
    %118 = arith.mulf %115, %115 : vector<8x64xf32>
    %cst_45 = arith.constant dense<0.000000e+00> : vector<8xf32>
    %119 = vector.multi_reduction <add>, %118, %cst_45 [1] : vector<8x64xf32> to vector<8xf32>
    %120 = vector.shape_cast %119 : vector<8xf32> to vector<8x1xf32>
    %cst_46 = arith.constant 6.400000e+01 : f32
    %121 = vector.broadcast %cst_46 : f32 to vector<8x1xf32>
    %122 = arith.divf %120, %121 : vector<8x1xf32>
    %cst_47 = arith.constant 9.99999997E-7 : f32
    %123 = vector.broadcast %cst_47 : f32 to vector<8x1xf32>
    %124 = arith.addf %122, %123 : vector<8x1xf32>
    %125 = math.rsqrt %124 : vector<8x1xf32>
    %126 = vector.broadcast %125 : vector<8x1xf32> to vector<8x64xf32>
    %127 = arith.mulf %115, %126 : vector<8x64xf32>
    %128 = vector.broadcast %117 : vector<1x64xf32> to vector<8x64xf32>
    %129 = arith.mulf %127, %128 : vector<8x64xf32>
    %c0_48 = arith.constant 0 : index
    %c0_49 = arith.constant 0 : index
    %130 = vector.load %arg6[%c0_48, %c0_49] : memref<64x4xf32, #tpu.memory_space<vmem>>, vector<64x4xf32>
    %cst_50 = arith.constant dense<0.000000e+00> : vector<8x4xf32>
    %131 = tpu.matmul %129, %130, %cst_50 {dimension_numbers = #tpu.dot_dimension_numbers<[1], [0], [0], [1], [0, 0, 1, 1], [], []>} : vector<8x64xf32>, vector<64x4xf32>, vector<8x4xf32> -> vector<8x4xf32>
    %cst_51 = arith.constant dense<0xFF800000> : vector<8xf32>
    %132 = vector.multi_reduction <maximumf>, %131, %cst_51 [1] : vector<8x4xf32> to vector<8xf32>
    %133 = vector.shape_cast %132 : vector<8xf32> to vector<8x1xf32>
    %134 = vector.broadcast %133 : vector<8x1xf32> to vector<8x4xf32>
    %135 = arith.subf %131, %134 : vector<8x4xf32>
    %136 = math.exp %135 : vector<8x4xf32>
    %cst_52 = arith.constant dense<0.000000e+00> : vector<8xf32>
    %137 = vector.multi_reduction <add>, %136, %cst_52 [1] : vector<8x4xf32> to vector<8xf32>
    %138 = vector.shape_cast %137 : vector<8xf32> to vector<8x1xf32>
    %139 = vector.broadcast %138 : vector<8x1xf32> to vector<8x4xf32>
    %140 = arith.divf %136, %139 : vector<8x4xf32>
    %cst_53 = arith.constant 0.000000e+00 : f32
    %141 = vector.broadcast %cst_53 : f32 to vector<8x64xf32>
    %142 = vector.extract_strided_slice %140 {offsets = [0, 0], sizes = [8, 1], strides = [1, 1]} : vector<8x4xf32> to vector<8x1xf32>
    %cst_54 = arith.constant 0.000000e+00 : f32
    %143 = vector.broadcast %cst_54 : f32 to vector<8x1xf32>
    %144 = vector.extract_strided_slice %140 {offsets = [0, 1], sizes = [8, 1], strides = [1, 1]} : vector<8x4xf32> to vector<8x1xf32>
    %145 = arith.cmpf ogt, %144, %142 : vector<8x1xf32>
    %146 = arith.extui %145 : vector<8x1xi1> to vector<8x1xi32>
    %147 = arith.sitofp %146 : vector<8x1xi32> to vector<8x1xf32>
    %148 = arith.addf %143, %147 : vector<8x1xf32>
    %149 = vector.extract_strided_slice %140 {offsets = [0, 2], sizes = [8, 1], strides = [1, 1]} : vector<8x4xf32> to vector<8x1xf32>
    %150 = arith.cmpf ogt, %149, %142 : vector<8x1xf32>
    %151 = arith.extui %150 : vector<8x1xi1> to vector<8x1xi32>
    %152 = arith.sitofp %151 : vector<8x1xi32> to vector<8x1xf32>
    %153 = arith.addf %148, %152 : vector<8x1xf32>
    %154 = vector.extract_strided_slice %140 {offsets = [0, 3], sizes = [8, 1], strides = [1, 1]} : vector<8x4xf32> to vector<8x1xf32>
    %155 = arith.cmpf ogt, %154, %142 : vector<8x1xf32>
    %156 = arith.extui %155 : vector<8x1xi1> to vector<8x1xi32>
    %157 = arith.sitofp %156 : vector<8x1xi32> to vector<8x1xf32>
    %158 = arith.addf %153, %157 : vector<8x1xf32>
    %cst_55 = arith.constant 2.000000e+00 : f32
    %159 = vector.broadcast %cst_55 : f32 to vector<8x1xf32>
    %160 = arith.cmpf olt, %158, %159 : vector<8x1xf32>
    %cst_56 = arith.constant 0.000000e+00 : f32
    %161 = vector.broadcast %cst_56 : f32 to vector<8x1xf32>
    %162 = arith.select %160, %142, %161 : vector<8x1xi1>, vector<8x1xf32>
    %c0_57 = arith.constant 0 : index
    %c0_58 = arith.constant 0 : index
    %c0_59 = arith.constant 0 : index
    %163 = vector.load %arg7[%c0_57, %c0_58, %c0_59] : memref<4x64x256xf32, #tpu.memory_space<vmem>>, vector<1x64x256xf32>
    %164 = vector.shape_cast %163 : vector<1x64x256xf32> to vector<64x256xf32>
    %cst_60 = arith.constant dense<0.000000e+00> : vector<8x256xf32>
    %165 = tpu.matmul %129, %164, %cst_60 {dimension_numbers = #tpu.dot_dimension_numbers<[1], [0], [0], [1], [0, 0, 1, 1], [], []>} : vector<8x64xf32>, vector<64x256xf32>, vector<8x256xf32> -> vector<8x256xf32>
    %166 = vector.extract_strided_slice %165 {offsets = [0, 0], sizes = [8, 128], strides = [1, 1]} : vector<8x256xf32> to vector<8x128xf32>
    %167 = arith.negf %166 : vector<8x128xf32>
    %168 = math.exp %167 : vector<8x128xf32>
    %cst_61 = arith.constant 1.000000e+00 : f32
    %169 = vector.broadcast %cst_61 : f32 to vector<8x128xf32>
    %170 = arith.addf %169, %168 : vector<8x128xf32>
    %171 = arith.divf %169, %170 : vector<8x128xf32>
    %172 = arith.mulf %166, %171 : vector<8x128xf32>
    %173 = vector.extract_strided_slice %165 {offsets = [0, 128], sizes = [8, 128], strides = [1, 1]} : vector<8x256xf32> to vector<8x128xf32>
    %174 = arith.mulf %172, %173 : vector<8x128xf32>
    %c0_62 = arith.constant 0 : index
    %c0_63 = arith.constant 0 : index
    %c0_64 = arith.constant 0 : index
    %175 = vector.load %arg8[%c0_62, %c0_63, %c0_64] : memref<4x128x64xf32, #tpu.memory_space<vmem>>, vector<1x128x64xf32>
    %176 = vector.shape_cast %175 : vector<1x128x64xf32> to vector<128x64xf32>
    %cst_65 = arith.constant dense<0.000000e+00> : vector<8x64xf32>
    %177 = tpu.matmul %174, %176, %cst_65 {dimension_numbers = #tpu.dot_dimension_numbers<[1], [0], [0], [1], [0, 0, 1, 1], [], []>} : vector<8x128xf32>, vector<128x64xf32>, vector<8x64xf32> -> vector<8x64xf32>
    %178 = vector.broadcast %162 : vector<8x1xf32> to vector<8x64xf32>
    %179 = arith.mulf %178, %177 : vector<8x64xf32>
    %180 = arith.addf %141, %179 : vector<8x64xf32>
    %181 = vector.extract_strided_slice %140 {offsets = [0, 1], sizes = [8, 1], strides = [1, 1]} : vector<8x4xf32> to vector<8x1xf32>
    %cst_66 = arith.constant 0.000000e+00 : f32
    %182 = vector.broadcast %cst_66 : f32 to vector<8x1xf32>
    %183 = vector.extract_strided_slice %140 {offsets = [0, 0], sizes = [8, 1], strides = [1, 1]} : vector<8x4xf32> to vector<8x1xf32>
    %184 = arith.cmpf ogt, %183, %181 : vector<8x1xf32>
    %185 = arith.extui %184 : vector<8x1xi1> to vector<8x1xi32>
    %186 = arith.sitofp %185 : vector<8x1xi32> to vector<8x1xf32>
    %187 = arith.addf %182, %186 : vector<8x1xf32>
    %188 = vector.extract_strided_slice %140 {offsets = [0, 2], sizes = [8, 1], strides = [1, 1]} : vector<8x4xf32> to vector<8x1xf32>
    %189 = arith.cmpf ogt, %188, %181 : vector<8x1xf32>
    %190 = arith.extui %189 : vector<8x1xi1> to vector<8x1xi32>
    %191 = arith.sitofp %190 : vector<8x1xi32> to vector<8x1xf32>
    %192 = arith.addf %187, %191 : vector<8x1xf32>
    %193 = vector.extract_strided_slice %140 {offsets = [0, 3], sizes = [8, 1], strides = [1, 1]} : vector<8x4xf32> to vector<8x1xf32>
    %194 = arith.cmpf ogt, %193, %181 : vector<8x1xf32>
    %195 = arith.extui %194 : vector<8x1xi1> to vector<8x1xi32>
    %196 = arith.sitofp %195 : vector<8x1xi32> to vector<8x1xf32>
    %197 = arith.addf %192, %196 : vector<8x1xf32>
    %cst_67 = arith.constant 2.000000e+00 : f32
    %198 = vector.broadcast %cst_67 : f32 to vector<8x1xf32>
    %199 = arith.cmpf olt, %197, %198 : vector<8x1xf32>
    %cst_68 = arith.constant 0.000000e+00 : f32
    %200 = vector.broadcast %cst_68 : f32 to vector<8x1xf32>
    %201 = arith.select %199, %181, %200 : vector<8x1xi1>, vector<8x1xf32>
    %c1 = arith.constant 1 : index
    %c0_69 = arith.constant 0 : index
    %c0_70 = arith.constant 0 : index
    %202 = vector.load %arg7[%c1, %c0_69, %c0_70] : memref<4x64x256xf32, #tpu.memory_space<vmem>>, vector<1x64x256xf32>
    %203 = vector.shape_cast %202 : vector<1x64x256xf32> to vector<64x256xf32>
    %cst_71 = arith.constant dense<0.000000e+00> : vector<8x256xf32>
    %204 = tpu.matmul %129, %203, %cst_71 {dimension_numbers = #tpu.dot_dimension_numbers<[1], [0], [0], [1], [0, 0, 1, 1], [], []>} : vector<8x64xf32>, vector<64x256xf32>, vector<8x256xf32> -> vector<8x256xf32>
    %205 = vector.extract_strided_slice %204 {offsets = [0, 0], sizes = [8, 128], strides = [1, 1]} : vector<8x256xf32> to vector<8x128xf32>
    %206 = arith.negf %205 : vector<8x128xf32>
    %207 = math.exp %206 : vector<8x128xf32>
    %cst_72 = arith.constant 1.000000e+00 : f32
    %208 = vector.broadcast %cst_72 : f32 to vector<8x128xf32>
    %209 = arith.addf %208, %207 : vector<8x128xf32>
    %210 = arith.divf %208, %209 : vector<8x128xf32>
    %211 = arith.mulf %205, %210 : vector<8x128xf32>
    %212 = vector.extract_strided_slice %204 {offsets = [0, 128], sizes = [8, 128], strides = [1, 1]} : vector<8x256xf32> to vector<8x128xf32>
    %213 = arith.mulf %211, %212 : vector<8x128xf32>
    %c1_73 = arith.constant 1 : index
    %c0_74 = arith.constant 0 : index
    %c0_75 = arith.constant 0 : index
    %214 = vector.load %arg8[%c1_73, %c0_74, %c0_75] : memref<4x128x64xf32, #tpu.memory_space<vmem>>, vector<1x128x64xf32>
    %215 = vector.shape_cast %214 : vector<1x128x64xf32> to vector<128x64xf32>
    %cst_76 = arith.constant dense<0.000000e+00> : vector<8x64xf32>
    %216 = tpu.matmul %213, %215, %cst_76 {dimension_numbers = #tpu.dot_dimension_numbers<[1], [0], [0], [1], [0, 0, 1, 1], [], []>} : vector<8x128xf32>, vector<128x64xf32>, vector<8x64xf32> -> vector<8x64xf32>
    %217 = vector.broadcast %201 : vector<8x1xf32> to vector<8x64xf32>
    %218 = arith.mulf %217, %216 : vector<8x64xf32>
    %219 = arith.addf %180, %218 : vector<8x64xf32>
    %220 = vector.extract_strided_slice %140 {offsets = [0, 2], sizes = [8, 1], strides = [1, 1]} : vector<8x4xf32> to vector<8x1xf32>
    %cst_77 = arith.constant 0.000000e+00 : f32
    %221 = vector.broadcast %cst_77 : f32 to vector<8x1xf32>
    %222 = vector.extract_strided_slice %140 {offsets = [0, 0], sizes = [8, 1], strides = [1, 1]} : vector<8x4xf32> to vector<8x1xf32>
    %223 = arith.cmpf ogt, %222, %220 : vector<8x1xf32>
    %224 = arith.extui %223 : vector<8x1xi1> to vector<8x1xi32>
    %225 = arith.sitofp %224 : vector<8x1xi32> to vector<8x1xf32>
    %226 = arith.addf %221, %225 : vector<8x1xf32>
    %227 = vector.extract_strided_slice %140 {offsets = [0, 1], sizes = [8, 1], strides = [1, 1]} : vector<8x4xf32> to vector<8x1xf32>
    %228 = arith.cmpf ogt, %227, %220 : vector<8x1xf32>
    %229 = arith.extui %228 : vector<8x1xi1> to vector<8x1xi32>
    %230 = arith.sitofp %229 : vector<8x1xi32> to vector<8x1xf32>
    %231 = arith.addf %226, %230 : vector<8x1xf32>
    %232 = vector.extract_strided_slice %140 {offsets = [0, 3], sizes = [8, 1], strides = [1, 1]} : vector<8x4xf32> to vector<8x1xf32>
    %233 = arith.cmpf ogt, %232, %220 : vector<8x1xf32>
    %234 = arith.extui %233 : vector<8x1xi1> to vector<8x1xi32>
    %235 = arith.sitofp %234 : vector<8x1xi32> to vector<8x1xf32>
    %236 = arith.addf %231, %235 : vector<8x1xf32>
    %cst_78 = arith.constant 2.000000e+00 : f32
    %237 = vector.broadcast %cst_78 : f32 to vector<8x1xf32>
    %238 = arith.cmpf olt, %236, %237 : vector<8x1xf32>
    %cst_79 = arith.constant 0.000000e+00 : f32
    %239 = vector.broadcast %cst_79 : f32 to vector<8x1xf32>
    %240 = arith.select %238, %220, %239 : vector<8x1xi1>, vector<8x1xf32>
    %c2 = arith.constant 2 : index
    %c0_80 = arith.constant 0 : index
    %c0_81 = arith.constant 0 : index
    %241 = vector.load %arg7[%c2, %c0_80, %c0_81] : memref<4x64x256xf32, #tpu.memory_space<vmem>>, vector<1x64x256xf32>
    %242 = vector.shape_cast %241 : vector<1x64x256xf32> to vector<64x256xf32>
    %cst_82 = arith.constant dense<0.000000e+00> : vector<8x256xf32>
    %243 = tpu.matmul %129, %242, %cst_82 {dimension_numbers = #tpu.dot_dimension_numbers<[1], [0], [0], [1], [0, 0, 1, 1], [], []>} : vector<8x64xf32>, vector<64x256xf32>, vector<8x256xf32> -> vector<8x256xf32>
    %244 = vector.extract_strided_slice %243 {offsets = [0, 0], sizes = [8, 128], strides = [1, 1]} : vector<8x256xf32> to vector<8x128xf32>
    %245 = arith.negf %244 : vector<8x128xf32>
    %246 = math.exp %245 : vector<8x128xf32>
    %cst_83 = arith.constant 1.000000e+00 : f32
    %247 = vector.broadcast %cst_83 : f32 to vector<8x128xf32>
    %248 = arith.addf %247, %246 : vector<8x128xf32>
    %249 = arith.divf %247, %248 : vector<8x128xf32>
    %250 = arith.mulf %244, %249 : vector<8x128xf32>
    %251 = vector.extract_strided_slice %243 {offsets = [0, 128], sizes = [8, 128], strides = [1, 1]} : vector<8x256xf32> to vector<8x128xf32>
    %252 = arith.mulf %250, %251 : vector<8x128xf32>
    %c2_84 = arith.constant 2 : index
    %c0_85 = arith.constant 0 : index
    %c0_86 = arith.constant 0 : index
    %253 = vector.load %arg8[%c2_84, %c0_85, %c0_86] : memref<4x128x64xf32, #tpu.memory_space<vmem>>, vector<1x128x64xf32>
    %254 = vector.shape_cast %253 : vector<1x128x64xf32> to vector<128x64xf32>
    %cst_87 = arith.constant dense<0.000000e+00> : vector<8x64xf32>
    %255 = tpu.matmul %252, %254, %cst_87 {dimension_numbers = #tpu.dot_dimension_numbers<[1], [0], [0], [1], [0, 0, 1, 1], [], []>} : vector<8x128xf32>, vector<128x64xf32>, vector<8x64xf32> -> vector<8x64xf32>
    %256 = vector.broadcast %240 : vector<8x1xf32> to vector<8x64xf32>
    %257 = arith.mulf %256, %255 : vector<8x64xf32>
    %258 = arith.addf %219, %257 : vector<8x64xf32>
    %259 = vector.extract_strided_slice %140 {offsets = [0, 3], sizes = [8, 1], strides = [1, 1]} : vector<8x4xf32> to vector<8x1xf32>
    %cst_88 = arith.constant 0.000000e+00 : f32
    %260 = vector.broadcast %cst_88 : f32 to vector<8x1xf32>
    %261 = vector.extract_strided_slice %140 {offsets = [0, 0], sizes = [8, 1], strides = [1, 1]} : vector<8x4xf32> to vector<8x1xf32>
    %262 = arith.cmpf ogt, %261, %259 : vector<8x1xf32>
    %263 = arith.extui %262 : vector<8x1xi1> to vector<8x1xi32>
    %264 = arith.sitofp %263 : vector<8x1xi32> to vector<8x1xf32>
    %265 = arith.addf %260, %264 : vector<8x1xf32>
    %266 = vector.extract_strided_slice %140 {offsets = [0, 1], sizes = [8, 1], strides = [1, 1]} : vector<8x4xf32> to vector<8x1xf32>
    %267 = arith.cmpf ogt, %266, %259 : vector<8x1xf32>
    %268 = arith.extui %267 : vector<8x1xi1> to vector<8x1xi32>
    %269 = arith.sitofp %268 : vector<8x1xi32> to vector<8x1xf32>
    %270 = arith.addf %265, %269 : vector<8x1xf32>
    %271 = vector.extract_strided_slice %140 {offsets = [0, 2], sizes = [8, 1], strides = [1, 1]} : vector<8x4xf32> to vector<8x1xf32>
    %272 = arith.cmpf ogt, %271, %259 : vector<8x1xf32>
    %273 = arith.extui %272 : vector<8x1xi1> to vector<8x1xi32>
    %274 = arith.sitofp %273 : vector<8x1xi32> to vector<8x1xf32>
    %275 = arith.addf %270, %274 : vector<8x1xf32>
    %cst_89 = arith.constant 2.000000e+00 : f32
    %276 = vector.broadcast %cst_89 : f32 to vector<8x1xf32>
    %277 = arith.cmpf olt, %275, %276 : vector<8x1xf32>
    %cst_90 = arith.constant 0.000000e+00 : f32
    %278 = vector.broadcast %cst_90 : f32 to vector<8x1xf32>
    %279 = arith.select %277, %259, %278 : vector<8x1xi1>, vector<8x1xf32>
    %c3 = arith.constant 3 : index
    %c0_91 = arith.constant 0 : index
    %c0_92 = arith.constant 0 : index
    %280 = vector.load %arg7[%c3, %c0_91, %c0_92] : memref<4x64x256xf32, #tpu.memory_space<vmem>>, vector<1x64x256xf32>
    %281 = vector.shape_cast %280 : vector<1x64x256xf32> to vector<64x256xf32>
    %cst_93 = arith.constant dense<0.000000e+00> : vector<8x256xf32>
    %282 = tpu.matmul %129, %281, %cst_93 {dimension_numbers = #tpu.dot_dimension_numbers<[1], [0], [0], [1], [0, 0, 1, 1], [], []>} : vector<8x64xf32>, vector<64x256xf32>, vector<8x256xf32> -> vector<8x256xf32>
    %283 = vector.extract_strided_slice %282 {offsets = [0, 0], sizes = [8, 128], strides = [1, 1]} : vector<8x256xf32> to vector<8x128xf32>
    %284 = arith.negf %283 : vector<8x128xf32>
    %285 = math.exp %284 : vector<8x128xf32>
    %cst_94 = arith.constant 1.000000e+00 : f32
    %286 = vector.broadcast %cst_94 : f32 to vector<8x128xf32>
    %287 = arith.addf %286, %285 : vector<8x128xf32>
    %288 = arith.divf %286, %287 : vector<8x128xf32>
    %289 = arith.mulf %283, %288 : vector<8x128xf32>
    %290 = vector.extract_strided_slice %282 {offsets = [0, 128], sizes = [8, 128], strides = [1, 1]} : vector<8x256xf32> to vector<8x128xf32>
    %291 = arith.mulf %289, %290 : vector<8x128xf32>
    %c3_95 = arith.constant 3 : index
    %c0_96 = arith.constant 0 : index
    %c0_97 = arith.constant 0 : index
    %292 = vector.load %arg8[%c3_95, %c0_96, %c0_97] : memref<4x128x64xf32, #tpu.memory_space<vmem>>, vector<1x128x64xf32>
    %293 = vector.shape_cast %292 : vector<1x128x64xf32> to vector<128x64xf32>
    %cst_98 = arith.constant dense<0.000000e+00> : vector<8x64xf32>
    %294 = tpu.matmul %291, %293, %cst_98 {dimension_numbers = #tpu.dot_dimension_numbers<[1], [0], [0], [1], [0, 0, 1, 1], [], []>} : vector<8x128xf32>, vector<128x64xf32>, vector<8x64xf32> -> vector<8x64xf32>
    %295 = vector.broadcast %279 : vector<8x1xf32> to vector<8x64xf32>
    %296 = arith.mulf %295, %294 : vector<8x64xf32>
    %297 = arith.addf %258, %296 : vector<8x64xf32>
    %298 = arith.addf %297, %115 : vector<8x64xf32>
    %c0_99 = arith.constant 0 : index
    %c0_100 = arith.constant 0 : index
    %299 = vector.load %arg9[%c0_99, %c0_100] : memref<1x64xf32, #tpu.memory_space<vmem>>, vector<1x64xf32>
    %300 = arith.mulf %298, %298 : vector<8x64xf32>
    %cst_101 = arith.constant dense<0.000000e+00> : vector<8xf32>
    %301 = vector.multi_reduction <add>, %300, %cst_101 [1] : vector<8x64xf32> to vector<8xf32>
    %302 = vector.shape_cast %301 : vector<8xf32> to vector<8x1xf32>
    %cst_102 = arith.constant 6.400000e+01 : f32
    %303 = vector.broadcast %cst_102 : f32 to vector<8x1xf32>
    %304 = arith.divf %302, %303 : vector<8x1xf32>
    %cst_103 = arith.constant 9.99999997E-7 : f32
    %305 = vector.broadcast %cst_103 : f32 to vector<8x1xf32>
    %306 = arith.addf %304, %305 : vector<8x1xf32>
    %307 = math.rsqrt %306 : vector<8x1xf32>
    %308 = vector.broadcast %307 : vector<8x1xf32> to vector<8x64xf32>
    %309 = arith.mulf %298, %308 : vector<8x64xf32>
    %310 = vector.broadcast %299 : vector<1x64xf32> to vector<8x64xf32>
    %311 = arith.mulf %309, %310 : vector<8x64xf32>
    %c0_104 = arith.constant 0 : index
    %c0_105 = arith.constant 0 : index
    %312 = vector.load %arg10[%c0_104, %c0_105] : memref<8x64xf32, #tpu.memory_space<vmem>>, vector<8x64xf32>
    tpu.vector_store %arg10[%c0_104, %c0_105], %311 {strides = array<i32>} : memref<8x64xf32, #tpu.memory_space<vmem>>, vector<8x64xf32>,
    return
  }
}

</mosaic_0001>

<bundles_post_ra>
// kernel: _lambda_.5
= control target key start
LH: loop header
LB: loop body
LE: loop exit
PB: predicated region body
PF: predicated region fallthrough
CT: control target
= control target key end

     0   :  { %vm39_vm0 = vcmask 523264   ;;  %v2830_v8 = vmov 0.0|0.0   ;;  %vm2831_vm1 = vmmov 0   ;;  %v2832_v14 = vmov 0.0   ;;  %s2834_s13 = smov 64   ;;  %s2836_s14 = smov 48   ;;  %s3571_s0 = inlined_call_operand.vmem [shape: f32[8,64], index: 0, kind: input, shape index: {}]   ;;  %s3572_s1 = inlined_call_operand.vmem [shape: f32[8,64], index: 1, kind: input, shape index: {}]   ;;  %s3573_s3 = inlined_call_operand.vmem [shape: f32[64,128], index: 3, kind: input, shape index: {}]   ;;  %s3574_s2 = inlined_call_operand.vmem [shape: f32[1,64], index: 2, kind: input, shape index: {}]   ;;  %s3575_s4 = inlined_call_operand.vmem [shape: f32[64,64], index: 4, kind: input, shape index: {}]   ;;  %s3576_s10 = inlined_call_operand.vmem [shape: f32[8,64], index: 10, kind: output, shape index: {1}]   ;;  %s3577_s7 = inlined_call_operand.vmem [shape: f32[4,64,256], index: 7, kind: input, shape index: {}]   ;;  %s3578_s6 = inlined_call_operand.vmem [shape: f32[64,4], index: 6, kind: input, shape index: {}]   ;;  %s3579_s5 = inlined_call_operand.vmem [shape: f32[1,64], index: 5, kind: input, shape index: {}]   ;;  %s3580_s8 = inlined_call_operand.vmem [shape: f32[4,128,64], index: 8, kind: input, shape index: {}]   ;;  %s3581_s9 = inlined_call_operand.vmem [shape: f32[8,64], index: 9, kind: output, shape index: {0}]  }
   0x1   :  { %v34_v0 = vld [vmem:[%s3571_s0] sm:$0xff]  ;;  %v56_v6 = vld [vmem:[%s3573_s3 + $0x8] sm:$0xff]  ;;  %2552 = vmatprep.subr.bf16.mxu0 %v2830_v8  ;;  %v57_v9 = vld [vmem:[%s3573_s3 + $0x10] sm:$0xff]  ;;  %2322 = vmatprep.mubr.msk.f32.mxu0 %vm2831_vm1, %v2832_v14  ;;  %vm152_vm2 = vcmask 130048   ;;  %v136_v30 = vlaneseq  ;;  %vm229_vm4 = vcmask 64512   ;;  %s2837_s15 = smov 96  }
   0x2   :  { %v35_v1 = vld [vmem:[%s3572_s1] sm:$0xff]  ;;  %v58_v10 = vld [vmem:[%s3573_s3 + $0x18] sm:$0xff]  ;;  %v60_v13 = vld [vmem:[%s3573_s3 + $0x28] sm:$0xff]  ;;  %2335 = vmatprep.subr.mxu1 %v2832_v14  ;;  %2337 = vmatprep.mubr.msk.f32.mxu1 %vm2831_vm1, %v2832_v14  ;;  %s2838_s16 = smov 16   ;;  %s2839_s23 = smov 80   ;;  %vm1197_vm5 = vcmask 31744  }
   0x3   :  { %v2909_v2 = vadd.f32 %v35_v1, %v34_v0  ;;  %v55_v5 = vld [vmem:[%s3573_s3] sm:$0xff]  ;;  %v2556_v11 = vpack.c.bf16 %v58_v10, %v57_v9  ;;  %v61_v16 = vld [vmem:[%s3573_s3 + $0x30] sm:$0xff]  ;;  %v62_v17 = vld [vmem:[%s3573_s3 + $0x38] sm:$0xff]  ;;  %v2970_v31 = vshrl.u32 %v136_v30, 7  ;;  %v2972_v32 = vand.u32 127, %v136_v30  ;;  %s2841_s29 = smov 1  }
   0x4   :  { %v2553_v7 = vpack.c.bf16 %v56_v6, %v55_v5  ;;  %v59_v12 = vld [vmem:[%s3573_s3 + $0x20] sm:$0xff]  ;;  %v2562_v18 = vpack.c.bf16 %v62_v17, %v61_v16  ;;  %s2833_s3 = smov 112   ;;  %v142_v58 = vld [vmem:[%s3575_s4 + $0x8] sm:$0xff]  ;;  %v143_v61 = vld [vmem:[%s3575_s4 + $0x10] sm:$0xff]  ;;  %s2842_s30 = smov 3  }
   0x5   :  { %v38_v3 = vmul.f32 %v2909_v2, %v2909_v2  ;;  %v2559_v15 = vpack.c.bf16 %v60_v13, %v59_v12  ;;  %v2062_v23 = vld [vmem:[%s3574_s2] ss:$0 sm:$0xff]  ;;  %vm140_vm3 = vcmp.le.s32.totalorder %v2972_v32, %v2970_v31  ;;  %s2835_s2 = smov 32   ;;  %v144_v62 = vld [vmem:[%s3575_s4 + $0x18] sm:$0xff]  ;;  %s2843_s11 = smov 127  }
   0x6   :  { %2554 = vmatpush3.bf16.msra.mxu0 %v2553_v7  ;;  %v141_v57 = vld [vmem:[%s3575_s4] sm:$0xff]  ;;  %v2565_v0 = vpack.c.bf16 %v144_v62, %v143_v61  ;;  %v148_v31 = vld [vmem:[%s3575_s4 + $0x38] sm:$0xff]  ;;  %s2847_s12 = smov 125  }
   0x7   :  { %v40_v4 = vsel %vm39_vm0, %v38_v3, 0.0  ;;  %2555 = vmatprep.subr.bf16.mxu0 %v2830_v8  ;;  %v2568_v59 = vpack.c.bf16 %v142_v58, %v141_v57 }
   0x8   :  { %41 = vadd.xlane.f32.xlu0 %v40_v4 }
   0xa   :  { %2557 = vmatpush3.bf16.msra.mxu0 %v2556_v11 }
   0xb   :  { %2558 = vmatprep.subr.bf16.mxu0 %v2830_v8 }
   0xe   :  { %2560 = vmatpush3.bf16.msra.mxu0 %v2559_v15 }
   0xf   :  { %2561 = vmatprep.subr.bf16.mxu0 %v2830_v8 }
  0x12   :  { %2563 = vmatpush3.bf16.msra.mxu0 %v2562_v18 }
  0x13   :  { %2325 = vmatprep.subr.mxu0 %v2832_v14 }
  0x95   :  { %v42_v19 = vpop.xlane.xlu0 %41 }
  0x96   :  { %v44_v20 = vmul.f32 0.015625, %v42_v19 }
  0x98   :  { %v45_v21 = vadd.f32 1e-06, %v44_v20 }
  0x9a   :  { %2784 = vrsqrt.f32 %v45_v21 }
  0xa4   :  { %v2785_v22 = vpop.eup %2784 }
  0xa5   :  { %v47_v24 = vmul.f32 %v2785_v22, %v2909_v2 }
  0xa7   :  { %v54_v25 = vmul.f32 %v2062_v23, %v47_v24 }
  0xa9   :  { %2323 = vmatmul.mubr.msk.f32.vlgmr.msra.gmra.mrb[0].mxu0 %vm39_vm0, %v54_v25 }
  0xaa   :  { %2327 = vmatprep.mubr.msk.f32.mxu0 %vm2831_vm1, %v2832_v14 }
 0x17c   :  { %v2955_v26 = vpop.f32.mrb[0].mxu0 }
 0x17d   :  { %317 = vrot.lane.b32.xlu1 %v2955_v26, %s2833_s3  ;;  %150 = vrot.lane.b32.xlu0 %v2955_v26, %s2834_s13  ;;  %v2324_v27 = vpop.f32.mrb[1].mxu0 }
 0x1ef   :  { %v151_v28 = vpop.permute.xlu0 %150  ;;  %v318_v29 = vpop.permute.xlu1 %317 }
 0x1f0   :  { %2326 = vmatpush3.xpose.msk.msra.mxu0 %vm152_vm2, %v151_v28  ;;  %2336 = vmatpush3.xpose.msk.msra.mxu1 %vm152_vm2, %v151_v28  ;;  %v145_v28 = vld [vmem:[%s3575_s4 + $0x20] sm:$0xff] }
 0x1f1   :  { %2340 = vmatprep.subr.mxu1 %v2832_v14  ;;  %2330 = vmatprep.subr.mxu0 %v2832_v14 }
 0x1f3   :  { %2328 = vmatmul.mubr.msk.f32.vlgmr.msra.gmra.mrb[2].mxu0 %vm152_vm2, %v2955_v26  ;;  %2338 = vmatmul.mubr.msk.f32.vlgmr.msra.gmra.mrb[0].mxu1 %vm152_vm2, %v318_v29  ;;  %v146_v29 = vld [vmem:[%s3575_s4 + $0x28] sm:$0xff] }
 0x1f4   :  { %2342 = vmatprep.mubr.msk.f32.mxu1 %vm2831_vm1, %v2832_v14  ;;  %2332 = vmatprep.mubr.msk.f32.mxu0 %vm2831_vm1, %v2832_v14  ;;  %v2571_v30 = vpack.c.bf16 %v146_v29, %v145_v28  ;;  %v1254_v29 = vld [vmem:[%s3577_s7 + $0x68] sm:$0xff] }
 0x2c6   :  { %v223_v33 = vpop.f32.mrb[2].mxu0  ;;  %v387_v34 = vpop.f32.mrb[0].mxu1 }
 0x2c7   :  { %v391_v35 = vmul.f32 0.25, %v387_v34  ;;  %v2329_v36 = vpop.f32.mrb[3].mxu0  ;;  %v2339_v37 = vpop.f32.mrb[1].mxu1  ;;  %v227_v44 = vmul.f32 0.25, %v223_v33 }
 0x2c9   :  { %v392_v38 = vsel %vm140_vm3, %v391_v35, -1e+30  ;;  %v228_v47 = vsel %vm140_vm3, %v227_v44, -1e+30 }
 0x2ca   :  { %v393_v39 = vsel %vm229_vm4, %v392_v38, -inf  ;;  %v230_v48 = vsel %vm229_vm4, %v228_v47, -inf }
 0x2cb   :  { %394 = vmax.xlane.f32.xlu1 %v393_v39 }
 0x2dc   :  { %241 = vrot.lane.b32.xlu1 %v2955_v26, %s2835_s2 }
 0x358   :  { %v395_v40 = vpop.xlane.xlu1 %394 }
 0x359   :  { %v396_v41 = vsub.f32 %v392_v38, %v395_v40 }
 0x35b   :  { %v397_v42 = vmul.f32 1.442695, %v396_v41 }
 0x35c   :  { %v242_v43 = vpop.permute.xlu1 %241 }
 0x35d   :  { %2786 = vpow2.f32 %v397_v42  ;;  %2331 = vmatpush3.msra.mxu0 %v242_v43  ;;  %2341 = vmatpush3.msra.mxu1 %v242_v43 }
 0x35e   :  { %2564 = vmatprep.subr.bf16.mxu0 %v2830_v8  ;;  %2567 = vmatprep.subr.bf16.mxu1 %v2830_v8 }
 0x367   :  { %v2787_v45 = vpop.eup %2786 }
 0x368   :  { %v399_v46 = vsel %vm229_vm4, %v2787_v45, 0.0 }
 0x369   :  { %400 = vadd.xlane.f32.xlu0 %v399_v46 }
 0x36d   :  { %231 = vmax.xlane.f32.xlu0 %v230_v48  ;;  %v147_v48 = vld [vmem:[%s3575_s4 + $0x30] sm:$0xff]  ;;  %s2844_s4 = smov 126  }
 0x36e   :  { %v2574_v32 = vpack.c.bf16 %v148_v31, %v147_v48  ;;  %v2093_v48 = vld [vmem:[%s3577_s7 + $0xa8] sm:$0xff] }
 0x383   :  { %625 = vrot.lane.b32.xlu0 %v2955_v26, %s2836_s14 }
 0x387   :  { %623 = vrot.lane.b32.xlu0 %v2955_v26, %s2837_s15 }
 0x3f6   :  { %v401_v49 = vpop.xlane.xlu0 %400 }
 0x3f7   :  { %2788 = vrcp.f32 %v401_v49 }
 0x3fa   :  { %v232_v50 = vpop.xlane.xlu0 %231 }
 0x3fb   :  { %v233_v51 = vsub.f32 %v228_v47, %v232_v50 }
 0x3fd   :  { %v234_v52 = vmul.f32 1.442695, %v233_v51 }
 0x3fe   :  { %v626_v3 = vpop.permute.xlu0 %625 }
 0x3ff   :  { %2790 = vpow2.f32 %v234_v52 }
 0x401   :  { %v2789_v53 = vpop.eup %2788 }
 0x402   :  { %v403_v54 = vmul.f32 %v2789_v53, %v2787_v45  ;;  %v624_v6 = vpop.permute.xlu0 %623 }
 0x404   :  { %2343 = vmatmul.mubr.msk.f32.vlgmr.msra.gmra.mrb[2].mxu1 %vm229_vm4, %v403_v54 }
 0x405   :  { %2356 = vmatprep.mubr.msk.f32.mxu1 %vm2831_vm1, %v2832_v14  ;;  %2569 = vmatpush3.bf16.msra.mxu1 %v2568_v59 }
 0x406   :  { %2364 = vmatprep.subr.mxu1 %v2832_v14 }
 0x409   :  { %v2791_v55 = vpop.eup %2790 }
 0x40a   :  { %v236_v56 = vsel %vm229_vm4, %v2791_v55, 0.0 }
 0x40b   :  { %237 = vadd.xlane.f32.xlu1 %v236_v56 }
 0x41c   :  { %714 = vrot.lane.b32.xlu1 %v2955_v26, %s2838_s16 }
 0x498   :  { %v238_v60 = vpop.xlane.xlu1 %237 }
 0x499   :  { %2792 = vrcp.f32 %v238_v60 }
 0x49c   :  { %v715_v9 = vpop.permute.xlu1 %714 }
 0x4a3   :  { %v2793_v63 = vpop.eup %2792 }
 0x4a4   :  { %v240_v1 = vmul.f32 %v2793_v63, %v2791_v55  ;;  %v1242_v63 = vld [vmem:[%s3577_s7 + $0x8] sm:$0xff] }
 0x4a6   :  { %2333 = vmatmul.mubr.msk.f32.vlgmr.msra.gmra.mrb[4].mxu0 %vm229_vm4, %v240_v1  ;;  %v1241_v1 = vld [vmem:[%s3577_s7] sm:$0xff] }
 0x4a7   :  { %2566 = vmatpush3.bf16.msra.mxu0 %v2565_v0  ;;  %2349 = vmatprep.mubr.msk.f32.mxu0 %vm2831_vm1, %v2832_v14 }
 0x4a8   :  { %2359 = vmatprep.subr.mxu0 %v2832_v14 }
 0x4d7   :  { %v473_v4 = vpop.f32.mrb[2].mxu1 }
 0x4d8   :  { %v2344_v5 = vpop.f32.mrb[3].mxu1  ;;  %2350 = vmatmul.mubr.msk.f32.vlgmr.msra.gmra.mrb[6].mxu0 %vm152_vm2, %v473_v4 }
 0x4d9   :  { %2360 = vmatpush3.xpose.msk.msra.mxu0 %vm152_vm2, %v626_v3  ;;  %2361 = vmatprep.mubr.msk.f32.mxu0 %vm2831_vm1, %v2832_v14  ;;  %v1116_v5 = vld [vmem:[%s3578_s6] sm:$0xff] }
 0x4da   :  { %2570 = vmatprep.subr.bf16.mxu0 %v2830_v8 }
 0x4dc   :  { %2362 = vmatmul.mubr.msk.f32.vlgmr.msra.gmra.mrb[8].mxu0 %vm152_vm2, %v624_v6  ;;  %v1117_v6 = vld [vmem:[%s3578_s6 + $0x8] sm:$0xff] }
 0x4dd   :  { %2373 = vmatprep.mubr.msk.f32.mxu0 %vm2831_vm1, %v2832_v14  ;;  %2572 = vmatpush3.bf16.msra.mxu0 %v2571_v30  ;;  %v1256_v30 = vld [vmem:[%s3577_s7 + $0x78] sm:$0xff] }
 0x4de   :  { %2381 = vmatprep.subr.mxu0 %v2832_v14 }
 0x579   :  { %v313_v7 = vpop.f32.mrb[4].mxu0 }
 0x57a   :  { %v2334_v10 = vpop.f32.mrb[5].mxu0  ;;  %2357 = vmatmul.mubr.msk.f32.vlgmr.msra.gmra.mrb[4].mxu1 %vm152_vm2, %v313_v7  ;;  %v2577_v7 = vpack.c.bf16 %v1117_v6, %v1116_v5  ;;  %v2102_v5 = vld [vmem:[%s3577_s7 + $0xf0] sm:$0xff] }
 0x57b   :  { %2365 = vmatpush3.msra.mxu1 %v715_v9  ;;  %2366 = vmatprep.mubr.msk.f32.mxu1 %vm2831_vm1, %v2832_v14  ;;  %v1248_v10 = vld [vmem:[%s3577_s7 + $0x38] sm:$0xff] }
 0x57c   :  { %2376 = vmatprep.subr.mxu1 %v2832_v14 }
 0x5ab   :  { %v546_v11 = vpop.f32.mrb[6].mxu0 }
 0x5ac   :  { %v2351_v12 = vpop.f32.mrb[7].mxu0 }
 0x5ad   :  { %v1245_v12 = vld [vmem:[%s3577_s7 + $0x20] sm:$0xff] }
 0x5af   :  { %v697_v13 = vpop.f32.mrb[8].mxu0 }
 0x5b0   :  { %v701_v15 = vmul.f32 0.25, %v697_v13  ;;  %v2363_v16 = vpop.f32.mrb[9].mxu0  ;;  %v1247_v13 = vld [vmem:[%s3577_s7 + $0x30] sm:$0xff] }
 0x5b1   :  { %v1118_v16 = vld [vmem:[%s3578_s6 + $0x10] sm:$0xff] }
 0x5b2   :  { %v702_v17 = vsel %vm140_vm3, %v701_v15, -1e+30  ;;  %v2594_v15 = vpack.c.bf16 %v1247_v13, %v1245_v12  ;;  %v1341_v12 = vld [vmem:[%s3580_s8 + $0x28] sm:$0xff] }
 0x5b3   :  { %v703_v18 = vsel %vm229_vm4, %v702_v17, -inf }
 0x5b4   :  { %704 = vmax.xlane.f32.xlu0 %v703_v18 }
 0x641   :  { %v705_v19 = vpop.xlane.xlu0 %704 }
 0x642   :  { %v706_v20 = vsub.f32 %v702_v17, %v705_v19  ;;  %v1119_v17 = vld [vmem:[%s3578_s6 + $0x18] sm:$0xff]  ;;  %v1250_v19 = vld [vmem:[%s3577_s7 + $0x48] sm:$0xff] }
 0x643   :  { %v2580_v18 = vpack.c.bf16 %v1119_v17, %v1118_v16  ;;  %v1343_v16 = vld [vmem:[%s3580_s8 + $0x38] sm:$0xff] }
 0x644   :  { %v707_v21 = vmul.f32 1.442695, %v706_v20  ;;  %v1252_v20 = vld [vmem:[%s3577_s7 + $0x58] sm:$0xff] }
 0x646   :  { %2794 = vpow2.f32 %v707_v21  ;;  %v2596_v21 = vpack.c.bf16 %v1252_v20, %v1250_v19  ;;  %v2107_v19 = vld [vmem:[%s3580_s8 + $0x88] sm:$0xff] }
 0x64d   :  { %v619_v22 = vpop.f32.mrb[4].mxu1 }
 0x64e   :  { %v620_v23 = vadd.f32 %v619_v22, %v546_v11  ;;  %v2358_v24 = vpop.f32.mrb[5].mxu1  ;;  %v1249_v22 = vld [vmem:[%s3577_s7 + $0x40] sm:$0xff] }
 0x650   :  { %v2795_v25 = vpop.eup %2794 }
 0x651   :  { %v709_v27 = vsel %vm229_vm4, %v2795_v25, 0.0 }
 0x652   :  { %710 = vadd.xlane.f32.xlu1 %v709_v27  ;;  %v1121_v27 = vld [vmem:[%s3578_s6 + $0x28] sm:$0xff] }
 0x663   :  { %864 = vrot.lane.b32.xlu1 %v2955_v26, %s2839_s23 }
 0x6df   :  { %v711_v33 = vpop.xlane.xlu1 %710 }
 0x6e0   :  { %2796 = vrcp.f32 %v711_v33  ;;  %v2600_v33 = vpack.c.bf16 %v1256_v30, %v1254_v29  ;;  %v1347_v29 = vld [vmem:[%s3580_s8 + $0x58] sm:$0xff] }
 0x6e3   :  { %v865_v26 = vpop.permute.xlu1 %864 }
 0x6ea   :  { %v2797_v34 = vpop.eup %2796 }
 0x6eb   :  { %v713_v35 = vmul.f32 %v2797_v34, %v2795_v25  ;;  %v1120_v25 = vld [vmem:[%s3578_s6 + $0x20] sm:$0xff] }
 0x6ec   :  { %v2583_v28 = vpack.c.bf16 %v1121_v27, %v1120_v25  ;;  %v1253_v34 = vld [vmem:[%s3577_s7 + $0x60] sm:$0xff]  ;;  %v2109_v25 = vld [vmem:[%s3580_s8 + $0x98] sm:$0xff] }
 0x6ed   :  { %2367 = vmatmul.mubr.msk.f32.vlgmr.msra.gmra.mrb[6].mxu1 %vm229_vm4, %v713_v35  ;;  %v1255_v35 = vld [vmem:[%s3577_s7 + $0x70] sm:$0xff] }
 0x6ee   :  { %2377 = vmatpush3.xpose.msk.msra.mxu1 %vm152_vm2, %v626_v3  ;;  %2378 = vmatprep.mubr.msk.f32.mxu1 %vm2831_vm1, %v2832_v14  ;;  %v1243_v3 = vld [vmem:[%s3577_s7 + $0x10] sm:$0xff] }
 0x6ef   :  { %2573 = vmatprep.subr.bf16.mxu1 %v2830_v8  ;;  %v2590_v4 = vpack.c.bf16 %v1243_v3, %v1241_v1 }
 0x6f1   :  { %2379 = vmatmul.mubr.msk.f32.vlgmr.msra.gmra.mrb[8].mxu1 %vm152_vm2, %v865_v26  ;;  %v2602_v26 = vpack.c.bf16 %v1255_v35, %v1253_v34  ;;  %v2111_v34 = vld [vmem:[%s3580_s8 + $0xa8] sm:$0xff] }
 0x6f2   :  { %2390 = vmatprep.mubr.msk.f32.mxu1 %vm2831_vm1, %v2832_v14  ;;  %2575 = vmatpush3.bf16.msra.mxu1 %v2574_v32  ;;  %v2095_v32 = vld [vmem:[%s3577_s7 + $0xb8] sm:$0xff] }
 0x7c0   :  { %v786_v36 = vpop.f32.mrb[6].mxu1 }
 0x7c1   :  { %v2368_v37 = vpop.f32.mrb[7].mxu1  ;;  %2374 = vmatmul.mubr.msk.f32.vlgmr.msra.gmra.mrb[10].mxu0 %vm152_vm2, %v786_v36  ;;  %v1122_v36 = vld [vmem:[%s3578_s6 + $0x30] sm:$0xff] }
 0x7c2   :  { %2382 = vmatpush3.msra.mxu0 %v715_v9  ;;  %2383 = vmatprep.mubr.msk.f32.mxu0 %vm2831_vm1, %v2832_v14  ;;  %v1246_v9 = vld [vmem:[%s3577_s7 + $0x28] sm:$0xff]  ;;  %v1123_v37 = vld [vmem:[%s3578_s6 + $0x38] sm:$0xff] }
 0x7c3   :  { %2576 = vmatprep.subr.bf16.mxu0 %v2830_v8  ;;  %v2592_v11 = vpack.c.bf16 %v1248_v10, %v1246_v9  ;;  %v1339_v9 = vld [vmem:[%s3580_s8 + $0x18] sm:$0xff] }
 0x7c4   :  { %v934_v38 = vpop.f32.mrb[8].mxu1 }
 0x7c5   :  { %v938_v39 = vmul.f32 0.25, %v934_v38  ;;  %v2380_v40 = vpop.f32.mrb[9].mxu1  ;;  %v2586_v38 = vpack.c.bf16 %v1123_v37, %v1122_v36  ;;  %v1349_v36 = vld [vmem:[%s3580_s8 + $0x68] sm:$0xff] }
 0x7c6   :  { %v2091_v40 = vld [vmem:[%s3577_s7 + $0x98] sm:$0xff] }
 0x7c7   :  { %v939_v41 = vsel %vm140_vm3, %v938_v39, -1e+30  ;;  %v2089_v39 = vld [vmem:[%s3577_s7 + $0x88] sm:$0xff] }
 0x7c8   :  { %v940_v42 = vsel %vm229_vm4, %v939_v41, -inf }
 0x7c9   :  { %941 = vmax.xlane.f32.xlu0 %v940_v42 }
 0x856   :  { %v942_v43 = vpop.xlane.xlu0 %941 }
 0x857   :  { %v943_v44 = vsub.f32 %v939_v41, %v942_v43  ;;  %v2628_v41 = vpack.c.bf16 %v2091_v40, %v2089_v39  ;;  %v2113_v39 = vld [vmem:[%s3580_s8 + $0xb8] sm:$0xff] }
 0x859   :  { %v944_v45 = vmul.f32 1.442695, %v943_v44 }
 0x85b   :  { %2798 = vpow2.f32 %v944_v45  ;;  %v2080_v45 = vld [vmem:[%s3579_s5] ss:$0 sm:$0xff] }
 0x865   :  { %v2799_v46 = vpop.eup %2798 }
 0x866   :  { %v946_v47 = vsel %vm229_vm4, %v2799_v46, 0.0 }
 0x867   :  { %947 = vadd.xlane.f32.xlu1 %v946_v47  ;;  %v2090_v47 = vld [vmem:[%s3577_s7 + $0x90] sm:$0xff] }
 0x894   :  { %v859_v49 = vpop.f32.mrb[10].mxu0 }
 0x895   :  { %v863_v50 = vadd.f32 %v859_v49, %v620_v23  ;;  %v2375_v51 = vpop.f32.mrb[11].mxu0  ;;  %v1251_v23 = vld [vmem:[%s3577_s7 + $0x50] sm:$0xff]  ;;  %v1336_v49 = vld [vmem:[%s3580_s8] sm:$0xff] }
 0x896   :  { %v2598_v24 = vpack.c.bf16 %v1251_v23, %v1249_v22  ;;  %v1345_v22 = vld [vmem:[%s3580_s8 + $0x48] sm:$0xff] }
 0x8f4   :  { %v948_v52 = vpop.xlane.xlu1 %947 }
 0x8f5   :  { %2800 = vrcp.f32 %v948_v52 }
 0x8ff   :  { %v2801_v53 = vpop.eup %2800 }
 0x900   :  { %v950_v54 = vmul.f32 %v2801_v53, %v2799_v46  ;;  %v2088_v46 = vld [vmem:[%s3577_s7 + $0x80] sm:$0xff] }
 0x901   :  { %v2630_v52 = vpack.c.bf16 %v2090_v47, %v2088_v46  ;;  %v2124_v46 = vld [vmem:[%s3577_s7 + $0x108] sm:$0xff] }
 0x902   :  { %2384 = vmatmul.mubr.msk.f32.vlgmr.msra.gmra.mrb[12].mxu0 %vm229_vm4, %v950_v54  ;;  %v2632_v54 = vpack.c.bf16 %v2095_v32, %v2093_v48  ;;  %v2126_v48 = vld [vmem:[%s3577_s7 + $0x118] sm:$0xff]  ;;  %v2116_v32 = vld [vmem:[%s3580_s8 + $0xd0] sm:$0xff] }
 0x903   :  { %2409 = vmatprep.mubr.msk.f32.mxu0 %vm2831_vm1, %v2832_v14  ;;  %2578 = vmatpush3.bf16.msra.mxu0 %v2577_v7  ;;  %v1338_v7 = vld [vmem:[%s3580_s8 + $0x10] sm:$0xff] }
 0x904   :  { %2579 = vmatprep.subr.bf16.mxu0 %v2830_v8  ;;  %v2608_v10 = vpack.c.bf16 %v1339_v9, %v1338_v7  ;;  %v2123_v9 = vld [vmem:[%s3577_s7 + $0x100] sm:$0xff] }
 0x907   :  { %2581 = vmatpush3.bf16.msra.mxu0 %v2580_v18  ;;  %v2106_v18 = vld [vmem:[%s3580_s8 + $0x80] sm:$0xff] }
 0x908   :  { %2582 = vmatprep.subr.bf16.mxu0 %v2830_v8  ;;  %v2645_v20 = vpack.c.bf16 %v2107_v19, %v2106_v18 }
 0x90b   :  { %2584 = vmatpush3.bf16.msra.mxu0 %v2583_v28  ;;  %v1346_v28 = vld [vmem:[%s3580_s8 + $0x50] sm:$0xff] }
 0x90c   :  { %2585 = vmatprep.subr.bf16.mxu0 %v2830_v8  ;;  %v2620_v30 = vpack.c.bf16 %v1347_v29, %v1346_v28  ;;  %v2131_v28 = vld [vmem:[%s3577_s7 + $0x140] sm:$0xff]  ;;  %v2133_v29 = vld [vmem:[%s3577_s7 + $0x150] sm:$0xff] }
 0x90f   :  { %2587 = vmatpush3.bf16.msra.mxu0 %v2586_v38  ;;  %v2112_v38 = vld [vmem:[%s3580_s8 + $0xb0] sm:$0xff] }
 0x910   :  { %2604 = vmatprep.subr.bf16.mxu0 %v2830_v8  ;;  %v2654_v40 = vpack.c.bf16 %v2113_v39, %v2112_v38  ;;  %v2158_v38 = vld [vmem:[%s3577_s7 + $0x180] sm:$0xff]  ;;  %v2160_v39 = vld [vmem:[%s3577_s7 + $0x190] sm:$0xff] }
 0x9d5   :  { %v1020_v55 = vpop.f32.mrb[12].mxu0 }
 0x9d6   :  { %v2385_v56 = vpop.f32.mrb[13].mxu0  ;;  %2391 = vmatmul.mubr.msk.f32.vlgmr.msra.gmra.mrb[10].mxu1 %vm152_vm2, %v1020_v55  ;;  %v2092_v55 = vld [vmem:[%s3577_s7 + $0xa0] sm:$0xff] }
 0x9d7   :  { %1321 = vmatprep.mubr.f32.mxu1 %v2832_v14  ;;  %v2094_v56 = vld [vmem:[%s3577_s7 + $0xb0] sm:$0xff] }
 0xaa9   :  { %v1093_v57 = vpop.f32.mrb[10].mxu1 }
 0xaaa   :  { %v1097_v58 = vadd.f32 %v1093_v57, %v863_v50  ;;  %v2392_v59 = vpop.f32.mrb[11].mxu1  ;;  %v1337_v50 = vld [vmem:[%s3580_s8 + $0x8] sm:$0xff] }
 0xaab   :  { %v2605_v57 = vpack.c.bf16 %v1337_v50, %v1336_v49  ;;  %v2099_v59 = vld [vmem:[%s3577_s7 + $0xd8] sm:$0xff] }
 0xaac   :  { %v3066_v60 = vadd.f32 %v1097_v58, %v2909_v2  ;;  %v1244_v2 = vld [vmem:[%s3577_s7 + $0x18] sm:$0xff]  ;;  %v2097_v58 = vld [vmem:[%s3577_s7 + $0xc8] sm:$0xff] }
 0xaad   :  { %v2588_v0 = vpack.c.bf16 %v1244_v2, %v1242_v63  ;;  %v2098_v63 = vld [vmem:[%s3577_s7 + $0xd0] sm:$0xff]  ;;  %v2101_v2 = vld [vmem:[%s3577_s7 + $0xe8] sm:$0xff]  ;;  %v2117_v49 = vld [vmem:[%s3580_s8 + $0xd8] sm:$0xff] }
 0xaae   :  { %1099 = vst.msk [vmem:[%s3576_s10] sm:$0xff] %vm39_vm0, %v3066_v60  ;;  %v1101_v61 = vmul.f32 %v3066_v60, %v3066_v60  ;;  %v2660_v50 = vpack.c.bf16 %v2117_v49, %v2116_v32  ;;  %v2169_v32 = vld [vmem:[%s3577_s7 + $0x1d8] sm:$0xff] }
 0xaaf   :  { %2589 = vmatprep.subr.bf16.mxu1 %v2588_v0  ;;  %v2103_v0 = vld [vmem:[%s3577_s7 + $0xf8] sm:$0xff] }
 0xab0   :  { %v1102_v62 = vsel %vm39_vm0, %v1101_v61, 0.0  ;;  %2591 = vmatpush1.bf16.msra.mxu1 %v2590_v4  ;;  %v2636_v61 = vpack.c.bf16 %v2099_v59, %v2097_v58  ;;  %v2640_v3 = vpack.c.bf16 %v2103_v0, %v2101_v2  ;;  %v2100_v4 = vld [vmem:[%s3577_s7 + $0xe0] sm:$0xff]  ;;  %v2159_v58 = vld [vmem:[%s3577_s7 + $0x188] sm:$0xff]  ;;  %v2161_v59 = vld [vmem:[%s3577_s7 + $0x198] sm:$0xff] }
 0xab1   :  { %1103 = vadd.xlane.f32.xlu0 %v1102_v62  ;;  %2593 = vmatprep.subr.bf16.mxu1 %v2592_v11  ;;  %v2096_v62 = vld [vmem:[%s3577_s7 + $0xc0] sm:$0xff]  ;;  %v2642_v6 = vpack.c.bf16 %v2102_v5, %v2100_v4 }
 0xab2   :  { %v2638_v1 = vpack.c.bf16 %v2098_v63, %v2096_v62  ;;  %v1340_v11 = vld [vmem:[%s3580_s8 + $0x20] sm:$0xff] }
 0xab3   :  { %v2611_v13 = vpack.c.bf16 %v1341_v12, %v1340_v11  ;;  %v2128_v12 = vld [vmem:[%s3577_s7 + $0x128] sm:$0xff] }
 0xab4   :  { %2595 = vmatpush1.bf16.msra.mxu1 %v2594_v15  ;;  %v1342_v15 = vld [vmem:[%s3580_s8 + $0x30] sm:$0xff] }
 0xab5   :  { %2597 = vmatprep.subr.bf16.mxu1 %v2596_v21  ;;  %v2614_v17 = vpack.c.bf16 %v1343_v16, %v1342_v15  ;;  %v1344_v21 = vld [vmem:[%s3580_s8 + $0x40] sm:$0xff] }
 0xab6   :  { %v2617_v23 = vpack.c.bf16 %v1345_v22, %v1344_v21  ;;  %v2129_v21 = vld [vmem:[%s3577_s7 + $0x130] sm:$0xff] }
 0xab8   :  { %2599 = vmatpush1.bf16.msra.mxu1 %v2598_v24  ;;  %v2108_v24 = vld [vmem:[%s3580_s8 + $0x90] sm:$0xff] }
 0xab9   :  { %2601 = vmatprep.subr.bf16.mxu1 %v2600_v33  ;;  %v2648_v27 = vpack.c.bf16 %v2109_v25, %v2108_v24  ;;  %v2110_v33 = vld [vmem:[%s3580_s8 + $0xa0] sm:$0xff]  ;;  %v2134_v24 = vld [vmem:[%s3577_s7 + $0x158] sm:$0xff] }
 0xaba   :  { %v2651_v35 = vpack.c.bf16 %v2111_v34, %v2110_v33  ;;  %v2138_v33 = vld [vmem:[%s3577_s7 + $0x178] sm:$0xff]  ;;  %v2678_v34 = vpack.c.bf16 %v2133_v29, %v2131_v28  ;;  %v2153_v29 = vld [vmem:[%s3580_s8 + $0x160] sm:$0xff] }
 0xabc   :  { %2603 = vmatpush1.bf16.msra.mxu1 %v2602_v26  ;;  %v1348_v26 = vld [vmem:[%s3580_s8 + $0x60] sm:$0xff] }
 0xabd   :  { %2629 = vmatprep.subr.bf16.mxu1 %v2628_v41  ;;  %v2623_v37 = vpack.c.bf16 %v1349_v36, %v1348_v26  ;;  %v1350_v41 = vld [vmem:[%s3580_s8 + $0x70] sm:$0xff]  ;;  %v2135_v26 = vld [vmem:[%s3577_s7 + $0x160] sm:$0xff] }
 0xabe   :  { %v2137_v36 = vld [vmem:[%s3577_s7 + $0x170] sm:$0xff] }
 0xb3e   :  { %v1104_v42 = vpop.xlane.xlu0 %1103 }
 0xb3f   :  { %v1105_v43 = vmul.f32 0.015625, %v1104_v42  ;;  %v1351_v42 = vld [vmem:[%s3580_s8 + $0x78] sm:$0xff] }
 0xb41   :  { %v1106_v44 = vadd.f32 1e-06, %v1105_v43  ;;  %v2626_v43 = vpack.c.bf16 %v1351_v42, %v1350_v41  ;;  %v2163_v41 = vld [vmem:[%s3577_s7 + $0x1a8] sm:$0xff]  ;;  %v2165_v42 = vld [vmem:[%s3577_s7 + $0x1b8] sm:$0xff] }
 0xb43   :  { %2802 = vrsqrt.f32 %v1106_v44  ;;  %v2114_v44 = vld [vmem:[%s3580_s8 + $0xc0] sm:$0xff] }
 0xb4d   :  { %v2803_v31 = vpop.eup %2802 }
 0xb4e   :  { %v1108_v51 = vmul.f32 %v2803_v31, %v3066_v60  ;;  %v2634_v60 = vpack.c.bf16 %v2094_v56, %v2092_v55  ;;  %v2668_v31 = vpack.c.bf16 %v2126_v48, %v2124_v46  ;;  %v2120_v55 = vld [vmem:[%s3580_s8 + $0xf0] sm:$0xff]  ;;  %v2121_v56 = vld [vmem:[%s3580_s8 + $0xf8] sm:$0xff]  ;;  %v2712_v46 = vpack.c.bf16 %v2165_v42, %v2163_v41  ;;  %v2184_v41 = vld [vmem:[%s3580_s8 + $0x1c0] sm:$0xff] }
 0xb4f   :  { %v2164_v48 = vld [vmem:[%s3577_s7 + $0x1b0] sm:$0xff]  ;;  %v2185_v42 = vld [vmem:[%s3580_s8 + $0x1c8] sm:$0xff] }
 0xb50   :  { %v3180_v53 = vmul.f32 %v2080_v45, %v1108_v51  ;;  %v2115_v45 = vld [vmem:[%s3580_s8 + $0xc8] sm:$0xff]  ;;  %v2118_v51 = vld [vmem:[%s3580_s8 + $0xe0] sm:$0xff] }
 0xb51   :  { %v2657_v47 = vpack.c.bf16 %v2115_v45, %v2114_v44  ;;  %v2710_v44 = vpack.c.bf16 %v2160_v39, %v2158_v38 }
 0xb52   :  { %2410 = vmatmul.mubr.msk.f32.vlgmr.msra.gmra.mrb[14].mxu0 %vm39_vm0, %v3180_v53  ;;  %2085 = vmatmul.mubr.msk.f32.vlgmr.msra.gmra.mrb[12].mxu1 %vm39_vm0, %v3180_v53 }
 0xb53   :  { %2631 = vmatpush1.bf16.msra.mxu1 %v2630_v52  ;;  %1528 = vmatprep.mubr.f32.mxu1 %v2832_v14  ;;  %v2119_v52 = vld [vmem:[%s3580_s8 + $0xe8] sm:$0xff] }
 0xb54   :  { %2633 = vmatprep.subr.bf16.mxu1 %v2632_v54  ;;  %2606 = vmatpush3.bf16.msra.mxu0 %v2605_v57  ;;  %v2663_v54 = vpack.c.bf16 %v2119_v52, %v2118_v51  ;;  %v2666_v57 = vpack.c.bf16 %v2121_v56, %v2120_v55  ;;  %v2166_v51 = vld [vmem:[%s3577_s7 + $0x1c0] sm:$0xff]  ;;  %v2168_v52 = vld [vmem:[%s3577_s7 + $0x1d0] sm:$0xff]  ;;  %v2173_v55 = vld [vmem:[%s3577_s7 + $0x1f8] sm:$0xff] }
 0xb55   :  { %2607 = vmatprep.subr.bf16.mxu0 %v2830_v8  ;;  %2444 = vmatprep.mubr.msk.f32.mxu0 %vm2831_vm1, %v2832_v14  ;;  %v2718_v56 = vpack.c.bf16 %v2168_v52, %v2166_v51 }
 0xb57   :  { %2635 = vmatpush1.bf16.msra.mxu1 %v2634_v60  ;;  %v2708_v60 = vpack.c.bf16 %v2161_v59, %v2159_v58  ;;  %v2170_v58 = vld [vmem:[%s3577_s7 + $0x1e0] sm:$0xff]  ;;  %v2172_v59 = vld [vmem:[%s3577_s7 + $0x1f0] sm:$0xff] }
 0xb58   :  { %2637 = vmatprep.subr.bf16.mxu1 %v2636_v61  ;;  %2609 = vmatpush3.bf16.msra.mxu0 %v2608_v10  ;;  %v2125_v10 = vld [vmem:[%s3577_s7 + $0x110] sm:$0xff] }
 0xb59   :  { %2610 = vmatprep.subr.bf16.mxu0 %v2830_v8  ;;  %v2670_v16 = vpack.c.bf16 %v2125_v10, %v2123_v9 }
 0xb5b   :  { %2639 = vmatpush1.bf16.msra.mxu1 %v2638_v1 }
 0xb5c   :  { %2641 = vmatprep.subr.bf16.mxu1 %v2640_v3  ;;  %2612 = vmatpush3.bf16.msra.mxu0 %v2611_v13  ;;  %v2130_v13 = vld [vmem:[%s3577_s7 + $0x138] sm:$0xff] }
 0xb5d   :  { %2613 = vmatprep.subr.bf16.mxu0 %v2830_v8  ;;  %v2672_v19 = vpack.c.bf16 %v2130_v13, %v2128_v12  ;;  %v2177_v12 = vld [vmem:[%s3580_s8 + $0x188] sm:$0xff] }
 0xb5f   :  { %2643 = vmatpush1.bf16.msra.mxu1 %v2642_v6 }
 0xb60   :  { %2644 = vmatprep.subr.bf16.mxu1 %v2830_v8  ;;  %2615 = vmatpush3.bf16.msra.mxu0 %v2614_v17 }
 0xb61   :  { %2616 = vmatprep.subr.bf16.mxu0 %v2830_v8 }
 0xb62   :  { %2104 = vmatmul.mubr.msk.f32.vlgmr.msra.gmra.mrb[14].mxu1 %vm39_vm0, %v3180_v53 }
 0xb63   :  { %2479 = vmatprep.mubr.msk.f32.mxu1 %vm2831_vm1, %v2832_v14  ;;  %2646 = vmatpush3.bf16.msra.mxu1 %v2645_v20  ;;  %v2127_v20 = vld [vmem:[%s3577_s7 + $0x120] sm:$0xff] }
 0xb64   :  { %2618 = vmatpush3.bf16.msra.mxu0 %v2617_v23  ;;  %2647 = vmatprep.subr.bf16.mxu1 %v2830_v8  ;;  %v2132_v23 = vld [vmem:[%s3577_s7 + $0x148] sm:$0xff]  ;;  %v2674_v25 = vpack.c.bf16 %v2129_v21, %v2127_v20  ;;  %v2179_v20 = vld [vmem:[%s3580_s8 + $0x198] sm:$0xff] }
 0xb65   :  { %2619 = vmatprep.subr.bf16.mxu0 %v2830_v8 }
 0xb67   :  { %2649 = vmatpush3.bf16.msra.mxu1 %v2648_v27  ;;  %v2676_v27 = vpack.c.bf16 %v2134_v24, %v2132_v23  ;;  %v2152_v23 = vld [vmem:[%s3580_s8 + $0x158] sm:$0xff] }
 0xb68   :  { %2621 = vmatpush3.bf16.msra.mxu0 %v2620_v30  ;;  %2650 = vmatprep.subr.bf16.mxu1 %v2830_v8  ;;  %v2136_v30 = vld [vmem:[%s3577_s7 + $0x168] sm:$0xff] }
 0xb69   :  { %2622 = vmatprep.subr.bf16.mxu0 %v2830_v8 }
 0xb6b   :  { %2652 = vmatpush3.bf16.msra.mxu1 %v2651_v35  ;;  %v2680_v35 = vpack.c.bf16 %v2138_v33, %v2136_v30  ;;  %v2154_v30 = vld [vmem:[%s3580_s8 + $0x168] sm:$0xff] }
 0xb6c   :  { %2624 = vmatpush3.bf16.msra.mxu0 %v2623_v37  ;;  %2653 = vmatprep.subr.bf16.mxu1 %v2830_v8  ;;  %v2682_v37 = vpack.c.bf16 %v2137_v36, %v2135_v26  ;;  %v2703_v33 = vpack.c.bf16 %v2154_v30, %v2153_v29  ;;  %v2155_v36 = vld [vmem:[%s3580_s8 + $0x170] sm:$0xff] }
 0xb6d   :  { %2625 = vmatprep.subr.bf16.mxu0 %v2830_v8 }
 0xb6f   :  { %2655 = vmatpush3.bf16.msra.mxu1 %v2654_v40 }
 0xb70   :  { %2627 = vmatpush3.bf16.msra.mxu0 %v2626_v43  ;;  %2656 = vmatprep.subr.bf16.mxu1 %v2830_v8 }
 0xb71   :  { %2669 = vmatprep.subr.bf16.mxu0 %v2668_v31  ;;  %v2167_v31 = vld [vmem:[%s3577_s7 + $0x1c8] sm:$0xff] }
 0xb73   :  { %2658 = vmatpush3.bf16.msra.mxu1 %v2657_v47  ;;  %v2162_v47 = vld [vmem:[%s3577_s7 + $0x1a0] sm:$0xff] }
 0xb74   :  { %2659 = vmatprep.subr.bf16.mxu1 %v2830_v8  ;;  %v2714_v49 = vpack.c.bf16 %v2164_v48, %v2162_v47  ;;  %v2188_v47 = vld [vmem:[%s3580_s8 + $0x1e0] sm:$0xff]  ;;  %v2189_v48 = vld [vmem:[%s3580_s8 + $0x1e8] sm:$0xff] }
 0xb77   :  { %2661 = vmatpush3.bf16.msra.mxu1 %v2660_v50  ;;  %v2716_v50 = vpack.c.bf16 %v2169_v32, %v2167_v31  ;;  %v2743_v31 = vpack.c.bf16 %v2189_v48, %v2188_v47  ;;  %v2190_v32 = vld [vmem:[%s3580_s8 + $0x1f0] sm:$0xff] }
 0xb78   :  { %2662 = vmatprep.subr.bf16.mxu1 %v2830_v8 }
 0xb7b   :  { %2664 = vmatpush3.bf16.msra.mxu1 %v2663_v54  ;;  %v2171_v54 = vld [vmem:[%s3577_s7 + $0x1e8] sm:$0xff] }
 0xb7c   :  { %2665 = vmatprep.subr.bf16.mxu1 %v2830_v8 }
 0xb7f   :  { %2667 = vmatpush3.bf16.msra.mxu1 %v2666_v57  ;;  %v2720_v57 = vpack.c.bf16 %v2173_v55, %v2171_v54 }
 0xb80   :  { %2709 = vmatprep.subr.bf16.mxu1 %v2708_v60  ;;  %v2722_v60 = vpack.c.bf16 %v2172_v59, %v2170_v58 }
 0xc25   :  { %v3340_v61 = vpop.f32.mrb[14].mxu0  ;;  %v1323_v62 = vpop.f32.mrb[12].mxu1 }
 0xc26   :  { %v2086_v63 = vmul.f32 -1.442695, %v1323_v62  ;;  %v2411_v2 = vpop.f32.mrb[15].mxu0  ;;  %v1325_v0 = vpop.f32.mrb[13].mxu1  ;;  %v1198_v1 = vsel %vm1197_vm5, %v3340_v61, -inf }
 0xc27   :  { %1199 = vmax.xlane.f32.xlu0 %v1198_v1 }
 0xc28   :  { %2804 = vpow2.f32 %v2086_v63  ;;  %v2142_v63 = vld [vmem:[%s3580_s8 + $0x108] sm:$0xff] }
 0xc32   :  { %v2805_v3 = vpop.eup %2804 }
 0xc33   :  { %v1331_v4 = vadd.f32 1.0, %v2805_v3  ;;  %v2145_v3 = vld [vmem:[%s3580_s8 + $0x120] sm:$0xff] }
 0xc35   :  { %2806 = vrcp.f32 %v1331_v4  ;;  %v1530_v5 = vpop.f32.mrb[14].mxu1  ;;  %v2146_v4 = vld [vmem:[%s3580_s8 + $0x128] sm:$0xff] }
 0xc36   :  { %v2105_v6 = vmul.f32 -1.442695, %v1530_v5  ;;  %v1532_v7 = vpop.f32.mrb[15].mxu1 }
 0xc38   :  { %2808 = vpow2.f32 %v2105_v6  ;;  %v2147_v6 = vld [vmem:[%s3580_s8 + $0x130] sm:$0xff] }
 0xc3f   :  { %v2807_v11 = vpop.eup %2806 }
 0xc40   :  { %v1334_v15 = vmul.f32 %v2807_v11, %v1323_v62  ;;  %v2141_v62 = vld [vmem:[%s3580_s8 + $0x100] sm:$0xff] }
 0xc41   :  { %v2685_v2 = vpack.c.bf16 %v2142_v63, %v2141_v62  ;;  %v2176_v11 = vld [vmem:[%s3580_s8 + $0x180] sm:$0xff] }
 0xc42   :  { %v2809_v17 = vpop.eup %2808  ;;  %v1335_v18 = vmul.f32 %v1334_v15, %v1325_v0  ;;  %v2143_v0 = vld [vmem:[%s3580_s8 + $0x110] sm:$0xff]  ;;  %v2725_v15 = vpack.c.bf16 %v2177_v12, %v2176_v11 }
 0xc43   :  { %v1538_v22 = vadd.f32 1.0, %v2809_v17  ;;  %v2150_v17 = vld [vmem:[%s3580_s8 + $0x148] sm:$0xff] }
 0xc44   :  { %2445 = vmatmul.mubr.f32.vlgmr.msra.gmra.mrb[16].mxu0 %v1335_v18 }
 0xc45   :  { %2810 = vrcp.f32 %v1538_v22  ;;  %2671 = vmatpush1.bf16.msra.mxu0 %v2670_v16  ;;  %1736 = vmatprep.mubr.f32.mxu0 %v2832_v14  ;;  %v2149_v16 = vld [vmem:[%s3580_s8 + $0x140] sm:$0xff]  ;;  %v2151_v22 = vld [vmem:[%s3580_s8 + $0x150] sm:$0xff] }
 0xc46   :  { %2673 = vmatprep.subr.bf16.mxu0 %v2672_v19  ;;  %v2697_v18 = vpack.c.bf16 %v2150_v17, %v2149_v16  ;;  %v2700_v24 = vpack.c.bf16 %v2152_v23, %v2151_v22  ;;  %v2846_v22 = vmov 0  }
 0xc47   :  { %2782 = vset.pattern.permute.xlu1 %v2846_v22 }
 0xc49   :  { %2675 = vmatpush1.bf16.msra.mxu0 %v2674_v25  ;;  %v2180_v25 = vld [vmem:[%s3580_s8 + $0x1a0] sm:$0xff] }
 0xc4a   :  { %2677 = vmatprep.subr.bf16.mxu0 %v2676_v27  ;;  %v2181_v27 = vld [vmem:[%s3580_s8 + $0x1a8] sm:$0xff] }
 0xc4b   :  { %v2731_v28 = vpack.c.bf16 %v2181_v27, %v2180_v25 }
 0xc4d   :  { %2679 = vmatpush1.bf16.msra.mxu0 %v2678_v34  ;;  %v2182_v34 = vld [vmem:[%s3580_s8 + $0x1b0] sm:$0xff] }
 0xc4e   :  { %2681 = vmatprep.subr.bf16.mxu0 %v2680_v35  ;;  %v2183_v35 = vld [vmem:[%s3580_s8 + $0x1b8] sm:$0xff] }
 0xc4f   :  { %v2811_v40 = vpop.eup %2810  ;;  %v2734_v26 = vpack.c.bf16 %v2183_v35, %v2182_v34 }
 0xc50   :  { %v1541_v43 = vmul.f32 %v2811_v40, %v1530_v5  ;;  %v2691_v5 = vpack.c.bf16 %v2146_v4, %v2145_v3 }
 0xc51   :  { %2683 = vmatpush1.bf16.msra.mxu0 %v2682_v37  ;;  %v2156_v37 = vld [vmem:[%s3580_s8 + $0x178] sm:$0xff] }
 0xc52   :  { %v1542_v45 = vmul.f32 %v1541_v43, %v1532_v7  ;;  %2684 = vmatprep.subr.bf16.mxu0 %v2830_v8  ;;  %v2148_v7 = vld [vmem:[%s3580_s8 + $0x138] sm:$0xff]  ;;  %v2706_v38 = vpack.c.bf16 %v2156_v37, %v2155_v36  ;;  %v2737_v43 = vpack.c.bf16 %v2185_v42, %v2184_v41 }
 0xc53   :  { %v2694_v9 = vpack.c.bf16 %v2148_v7, %v2147_v6 }
 0xc54   :  { %2480 = vmatmul.mubr.f32.vlgmr.msra.gmra.mrb[16].mxu1 %v1542_v45  ;;  %2139 = vmatmul.mubr.msk.f32.vlgmr.msra.gmra.mrb[18].mxu0 %vm39_vm0, %v3180_v53  ;;  %v2187_v45 = vld [vmem:[%s3580_s8 + $0x1d8] sm:$0xff] }
 0xc55   :  { %2711 = vmatpush1.bf16.msra.mxu1 %v2710_v44  ;;  %1944 = vmatprep.mubr.f32.mxu1 %v2832_v14  ;;  %v2186_v44 = vld [vmem:[%s3580_s8 + $0x1d0] sm:$0xff] }
 0xc56   :  { %2713 = vmatprep.subr.bf16.mxu1 %v2712_v46  ;;  %2514 = vmatprep.mubr.msk.f32.mxu0 %vm2831_vm1, %v2832_v14  ;;  %v2740_v46 = vpack.c.bf16 %v2187_v45, %v2186_v44 }
 0xc57   :  { %2686 = vmatpush3.bf16.msra.mxu0 %v2685_v2 }
 0xc58   :  { %2687 = vmatprep.subr.bf16.mxu0 %v2830_v8 }
 0xc59   :  { %2715 = vmatpush1.bf16.msra.mxu1 %v2714_v49  ;;  %v2191_v49 = vld [vmem:[%s3580_s8 + $0x1f8] sm:$0xff] }
 0xc5a   :  { %2717 = vmatprep.subr.bf16.mxu1 %v2716_v50  ;;  %v2746_v50 = vpack.c.bf16 %v2191_v49, %v2190_v32 }
 0xc5d   :  { %2719 = vmatpush1.bf16.msra.mxu1 %v2718_v56 }
 0xc5e   :  { %2721 = vmatprep.subr.bf16.mxu1 %v2720_v57 }
 0xc61   :  { %2723 = vmatpush1.bf16.msra.mxu1 %v2722_v60 }
 0xc62   :  { %2724 = vmatprep.subr.bf16.mxu1 %v2830_v8 }
 0xc64   :  { %2174 = vmatmul.mubr.msk.f32.vlgmr.msra.gmra.mrb[18].mxu1 %vm39_vm0, %v3180_v53  ;;  %v2144_v53 = vld [vmem:[%s3580_s8 + $0x118] sm:$0xff] }
 0xc65   :  { %2549 = vmatprep.mubr.msk.f32.mxu1 %vm2831_vm1, %v2832_v14  ;;  %v2688_v1 = vpack.c.bf16 %v2144_v53, %v2143_v0  ;;  %2726 = vmatpush3.bf16.msra.mxu1 %v2725_v15  ;;  %v2845_v15 = vmov 1  }
 0xc66   :  { %2727 = vmatprep.subr.bf16.mxu1 %v2830_v8  ;;  %2781 = vset.pattern.permute.xlu0 %v2845_v15 }
 0xc67   :  { %2689 = vmatpush3.bf16.msra.mxu0 %v2688_v1 }
 0xc68   :  { %2690 = vmatprep.subr.bf16.mxu0 %v2830_v8 }
 0xc6b   :  { %2692 = vmatpush3.bf16.msra.mxu0 %v2691_v5 }
 0xc6c   :  { %2693 = vmatprep.subr.bf16.mxu0 %v2830_v8 }
 0xc6f   :  { %2695 = vmatpush3.bf16.msra.mxu0 %v2694_v9 }
 0xc70   :  { %2696 = vmatprep.subr.bf16.mxu0 %v2830_v8 }
 0xc73   :  { %2698 = vmatpush3.bf16.msra.mxu0 %v2697_v18 }
 0xc74   :  { %2699 = vmatprep.subr.bf16.mxu0 %v2830_v8 }
 0xc77   :  { %2701 = vmatpush3.bf16.msra.mxu0 %v2700_v24 }
 0xc78   :  { %2702 = vmatprep.subr.bf16.mxu0 %v2830_v8 }
 0xc7b   :  { %2704 = vmatpush3.bf16.msra.mxu0 %v2703_v33 }
 0xc7c   :  { %2705 = vmatprep.subr.bf16.mxu0 %v2830_v8 }
 0xc7f   :  { %2707 = vmatpush3.bf16.msra.mxu0 %v2706_v38 }
 0xcb4   :  { %v1200_v10 = vpop.xlane.xlu0 %1199 }
 0xcb5   :  { %v1201_v13 = vsub.f32 %v3340_v61, %v1200_v10  ;;  %v2178_v61 = vld [vmem:[%s3580_s8 + $0x190] sm:$0xff]  ;;  %s2840_s8 = smov 2  }
 0xcb6   :  { %v2728_v21 = vpack.c.bf16 %v2179_v20, %v2178_v61 }
 0xcb7   :  { %v1202_v19 = vmul.f32 1.442695, %v1201_v13 }
 0xcb8   :  { %2729 = vmatpush3.bf16.msra.mxu1 %v2728_v21 }
 0xcb9   :  { %2812 = vpow2.f32 %v1202_v19  ;;  %2730 = vmatprep.subr.bf16.mxu1 %v2830_v8 }
 0xcbc   :  { %2732 = vmatpush3.bf16.msra.mxu1 %v2731_v28 }
 0xcbd   :  { %2733 = vmatprep.subr.bf16.mxu1 %v2830_v8 }
 0xcc0   :  { %2735 = vmatpush3.bf16.msra.mxu1 %v2734_v26 }
 0xcc1   :  { %2736 = vmatprep.subr.bf16.mxu1 %v2830_v8 }
 0xcc3   :  { %v2813_v39 = vpop.eup %2812 }
 0xcc4   :  { %v1204_v40 = vsel %vm1197_vm5, %v2813_v39, 0.0  ;;  %2738 = vmatpush3.bf16.msra.mxu1 %v2737_v43 }
 0xcc5   :  { %1205 = vadd.xlane.f32.xlu0 %v1204_v40  ;;  %2739 = vmatprep.subr.bf16.mxu1 %v2830_v8 }
 0xcc8   :  { %2741 = vmatpush3.bf16.msra.mxu1 %v2740_v46 }
 0xcc9   :  { %2742 = vmatprep.subr.bf16.mxu1 %v2830_v8 }
 0xccc   :  { %2744 = vmatpush3.bf16.msra.mxu1 %v2743_v31 }
 0xccd   :  { %2745 = vmatprep.subr.bf16.mxu1 %v2830_v8 }
 0xcd0   :  { %2747 = vmatpush3.bf16.msra.mxu1 %v2746_v50 }
 0xd17   :  { %v3552_v51 = vpop.f32.mrb[16].mxu0 }
 0xd18   :  { %v2446_v52 = vpop.f32.mrb[17].mxu0 }
 0xd27   :  { %v3554_v54 = vpop.f32.mrb[16].mxu1  ;;  %v1738_v55 = vpop.f32.mrb[18].mxu0 }
 0xd28   :  { %v2140_v56 = vmul.f32 -1.442695, %v1738_v55  ;;  %v2481_v57 = vpop.f32.mrb[17].mxu1  ;;  %v1740_v58 = vpop.f32.mrb[19].mxu0 }
 0xd2a   :  { %2814 = vpow2.f32 %v2140_v56 }
 0xd34   :  { %v2815_v8 = vpop.eup %2814 }
 0xd35   :  { %v1746_v59 = vadd.f32 1.0, %v2815_v8 }
 0xd37   :  { %2816 = vrcp.f32 %v1746_v59  ;;  %v1946_v60 = vpop.f32.mrb[18].mxu1 }
 0xd38   :  { %v2175_v62 = vmul.f32 -1.442695, %v1946_v60  ;;  %v1948_v63 = vpop.f32.mrb[19].mxu1 }
 0xd3a   :  { %2818 = vpow2.f32 %v2175_v62 }
 0xd41   :  { %v2817_v2 = vpop.eup %2816 }
 0xd42   :  { %v1749_v0 = vmul.f32 %v2817_v2, %v1738_v55 }
 0xd44   :  { %v2819_v53 = vpop.eup %2818  ;;  %v1750_v1 = vmul.f32 %v1749_v0, %v1740_v58 }
 0xd45   :  { %v1954_v3 = vadd.f32 1.0, %v2819_v53 }
 0xd46   :  { %2515 = vmatmul.mubr.f32.vlgmr.msra.gmra.mrb[20].mxu0 %v1750_v1 }
 0xd47   :  { %2820 = vrcp.f32 %v1954_v3 }
 0xd51   :  { %v2821_v4 = vpop.eup %2820 }
 0xd52   :  { %v1957_v5 = vmul.f32 %v2821_v4, %v1946_v60  ;;  %v1206_v6 = vpop.xlane.xlu0 %1205 }
 0xd53   :  { %2822 = vrcp.f32 %v1206_v6 }
 0xd54   :  { %v1958_v7 = vmul.f32 %v1957_v5, %v1948_v63 }
 0xd56   :  { %2550 = vmatmul.mubr.f32.vlgmr.msra.gmra.mrb[20].mxu1 %v1958_v7 }
 0xd5d   :  { %v2823_v9 = vpop.eup %2822 }
 0xd5e   :  { %v1208_v10 = vmul.f32 %v2823_v9, %v2813_v39 }
 0xd60   :  { %1217 = vrot.lane.b32.xlu1 %v1208_v10, %s2840_s8  ;;  %1210 = vrot.lane.b32.xlu0 %v1208_v10, %s2841_s29 }
 0xd64   :  { %1228 = vrot.lane.b32.xlu0 %v1208_v10, %s2842_s30 }
 0xd68   :  { %1429 = vrot.lane.b32.xlu0 %v1208_v10, %s2843_s11 }
 0xd6c   :  { %1637 = vrot.lane.b32.xlu0 %v1208_v10, %s2844_s4 }
 0xdd2   :  { %v1211_v11 = vpop.permute.xlu0 %1210  ;;  %v1218_v12 = vpop.permute.xlu1 %1217 }
 0xdd3   :  { %vm1213_vm6 = vcmp.gt.f32.partialorder %v1208_v10, %v1211_v11  ;;  %vm1220_vm8 = vcmp.gt.f32.partialorder %v1208_v10, %v1218_v12 }
 0xdd4   :  { %v2082_v16 = vsel %vm1213_vm6, 1.0, %v2832_v14  ;;  %v2083_v61 = vsel %vm1220_vm8, 1.0, %v2832_v14 }
 0xdd5   :  { %v2776_v24 = vpack.i.bf16 %v2082_v16, %v2083_v61 }
 0xdd6   :  { %v1229_v13 = vpop.permute.xlu0 %1228 }
 0xdd7   :  { %vm1231_vm7 = vcmp.gt.f32.partialorder %v1208_v10, %v1229_v13 }
 0xdd8   :  { %v2084_v17 = vsel %vm1231_vm7, 1.0, %v2832_v14 }
 0xdd9   :  { %v2771_v18 = vpack.i.bf16 %v2084_v17, %v2082_v16 }
 0xdda   :  { %v1430_v19 = vpop.permute.xlu0 %1429 }
 0xddb   :  { %vm1432_vm9 = vcmp.gt.f32.partialorder %v1208_v10, %v1430_v19  ;;  %2772 = vrot.lane.b32.xlu1 %v2771_v18, %s2844_s4 }
 0xddc   :  { %v2087_v20 = vsel %vm1432_vm9, 1.0, %v2832_v14 }
 0xddd   :  { %v2766_v21 = vpack.i.bf16 %v2087_v20, %v2083_v61 }
 0xdde   :  { %v1638_v23 = vpop.permute.xlu0 %1637 }
 0xddf   :  { %1845 = vrot.lane.b32.xlu1 %v1208_v10, %s2847_s12  ;;  %2767 = vrot.lane.b32.xlu0 %v2766_v21, %s2843_s11  ;;  %vm1640_vm10 = vcmp.gt.f32.partialorder %v1208_v10, %v1638_v23 }
 0xde0   :  { %v2122_v25 = vsel %vm1640_vm10, 1.0, %v2832_v14 }
 0xde3   :  { %1857 = vrot.lane.b32.xlu1 %v2087_v20, %s2844_s4  ;;  %2777 = vrot.lane.b32.xlu0 %v2776_v24, %s2847_s12 }
 0xde7   :  { %1853 = vrot.lane.b32.xlu0 %v2122_v25, %s2843_s11 }
 0xe19   :  { %v1834_v27 = vpop.f32.mrb[20].mxu0 }
 0xe1a   :  { %v2516_v28 = vpop.f32.mrb[21].mxu0 }
 0xe29   :  { %v2042_v29 = vpop.f32.mrb[20].mxu1 }
 0xe2a   :  { %v2551_v30 = vpop.f32.mrb[21].mxu1 }
 0xe4d   :  { %v2773_v33 = vpop.permute.xlu1 %2772 }
 0xe4e   :  { %v2825_v36 = vadd.low.f32.bf16 %v2087_v20, %v2773_v33 }
 0xe51   :  { %v2768_v34 = vpop.permute.xlu0 %2767  ;;  %v1846_v35 = vpop.permute.xlu1 %1845 }
 0xe52   :  { %v2824_v26 = vadd.low.f32.bf16 %v2082_v16, %v2768_v34  ;;  %vm1848_vm11 = vcmp.gt.f32.partialorder %v1208_v10, %v1846_v35  ;;  %v2826_v38 = vadd.high.f32.bf16 %v2122_v25, %v2768_v34 }
 0xe53   :  { %v2157_v42 = vsel %vm1848_vm11, 1.0, %v2832_v14 }
 0xe54   :  { %v2827_v39 = vadd.high.f32.bf16 %v2824_v26, %v2773_v33 }
 0xe55   :  { %v2778_v37 = vpop.permute.xlu0 %2777  ;;  %v1858_v46 = vpop.permute.xlu1 %1857 }
 0xe56   :  { %vm1239_vm12 = vcmp.lt.f32.partialorder %v2827_v39, 2.0  ;;  %v2828_v40 = vadd.low.f32.bf16 %v2825_v36, %v2778_v37  ;;  %v2829_v41 = vadd.high.f32.bf16 %v2826_v38, %v2778_v37 }
 0xe57   :  { %v1240_v44 = vsel %vm1239_vm12, %v1211_v11, 0.0 }
 0xe58   :  { %1424 = vperm.xlu0 %2781, %v1240_v44   ;;  %vm1445_vm13 = vcmp.lt.f32.partialorder %v2828_v40, 2.0  ;;  %vm1653_vm14 = vcmp.lt.f32.partialorder %v2829_v41, 2.0 }
 0xe59   :  { %v1854_v43 = vpop.permute.xlu0 %1853  ;;  %v1446_v47 = vsel %vm1445_vm13, %v1430_v19, 0.0  ;;  %v1654_v31 = vsel %vm1653_vm14, %v1638_v23, 0.0 }
 0xe5a   :  { %v1856_v45 = vadd.f32 %v2157_v42, %v1854_v43  ;;  %1632 = vperm.xlu1 %2782, %v1446_v47  }
 0xe5c   :  { %v1860_v48 = vadd.f32 %v1858_v46, %v1856_v45  ;;  %2783 = vset.pattern.permute.xlu0 %v2846_v22 }
 0xe5e   :  { %vm1861_vm15 = vcmp.lt.f32.partialorder %v1860_v48, 2.0  ;;  %1840 = vperm.xlu1 %2782, %v1654_v31  }
 0xe5f   :  { %v1862_v32 = vsel %vm1861_vm15, %v1846_v35, 0.0 }
 0xe60   :  { %2048 = vperm.xlu0 %2783, %v1862_v32  }
 0xed7   :  { %v1425_v49 = vpop.permute.xlu0 %1424 }
 0xed8   :  { %v1427_v14 = vmul.f32 %v1425_v49, %v3552_v51 }
 0xed9   :  { %v1633_v50 = vpop.permute.xlu1 %1632 }
 0xeda   :  { %v1635_v52 = vmul.f32 %v1633_v50, %v3554_v54 }
 0xedc   :  { %v1636_v55 = vadd.f32 %v1635_v52, %v1427_v14 }
 0xedd   :  { %v1841_v56 = vpop.permute.xlu1 %1840 }
 0xede   :  { %v1843_v58 = vmul.f32 %v1841_v56, %v1834_v27 }
 0xedf   :  { %v2049_v57 = vpop.permute.xlu0 %2048 }
 0xee0   :  { %v1844_v8 = vadd.f32 %v1843_v58, %v1636_v55  ;;  %v2051_v59 = vmul.f32 %v2049_v57, %v2042_v29 }
 0xee2   :  { %v2052_v60 = vadd.f32 %v2051_v59, %v1844_v8 }
 0xee4   :  { %2053 = vst.msk [vmem:[%s3581_s9] sm:$0xff] %vm39_vm0, %v2052_v60 }

// kernel: _lambda_.4
= control target key start
LH: loop header
LB: loop body
LE: loop exit
PB: predicated region body
PF: predicated region fallthrough
CT: control target
= control target key end

     0   :  { %v2731_v0 = vmov 0   ;;  %v2732_v2 = vmov 0.0|0.0   ;;  %vm2733_vm0 = vmmov 0   ;;  %v2734_v8 = vmov 0.0   ;;  %s2737_s21 = smov 124   ;;  %s2738_s24 = smov 4   ;;  %s3519_s0 = inlined_call_operand.vmem [shape: s32[8,1], index: 0, kind: input, shape index: {}]   ;;  %s3520_s1 = inlined_call_operand.vmem [shape: f32[128,64], index: 1, kind: input, shape index: {}]   ;;  %s3521_s3 = inlined_call_operand.vmem [shape: f32[64,256], index: 3, kind: input, shape index: {}]   ;;  %s3522_s2 = inlined_call_operand.vmem [shape: f32[1,64], index: 2, kind: input, shape index: {}]   ;;  %s3523_s6 = inlined_call_operand.vmem [shape: f32[128,36], index: 6, kind: input, shape index: {}]   ;;  %s3524_s4 = inlined_call_operand.vmem [shape: f32[4,128], index: 4, kind: input, shape index: {}]   ;;  %s3525_s5 = inlined_call_operand.vmem [shape: f32[1,128], index: 5, kind: input, shape index: {}]   ;;  %s3526_s10 = inlined_call_operand.vmem [shape: f32[4,128], index: 10, kind: input, shape index: {}]   ;;  %s3527_s8 = inlined_call_operand.vmem [shape: f32[1,16], index: 8, kind: input, shape index: {}]   ;;  %s3528_s7 = inlined_call_operand.vmem [shape: f32[1,4], index: 7, kind: input, shape index: {}]   ;;  %s3529_s9 = inlined_call_operand.vmem [shape: f32[1,16], index: 9, kind: input, shape index: {}]   ;;  %s3530_s11 = inlined_call_operand.vmem [shape: f32[1,128], index: 11, kind: input, shape index: {}]   ;;  %s3531_s12 = inlined_call_operand.vmem [shape: f32[16,128], index: 12, kind: input, shape index: {}]   ;;  %s3532_s14 = inlined_call_operand.vmem [shape: f32[128,64], index: 14, kind: input, shape index: {}]   ;;  %s3533_s13 = inlined_call_operand.vmem [shape: f32[1,128], index: 13, kind: input, shape index: {}]   ;;  %s3534_s19 = inlined_call_operand.vmem [shape: f32[8,64], index: 19, kind: output, shape index: {1}]   ;;  %s3535_s16 = inlined_call_operand.vmem [shape: f32[64,256], index: 16, kind: input, shape index: {}]   ;;  %s3536_s15 = inlined_call_operand.vmem [shape: f32[1,64], index: 15, kind: input, shape index: {}]   ;;  %s3537_s17 = inlined_call_operand.vmem [shape: f32[128,64], index: 17, kind: input, shape index: {}]   ;;  %s3538_s18 = inlined_call_operand.vmem [shape: f32[8,64], index: 18, kind: output, shape index: {0}]  }
   0x1   :  { %3541 = sst [smem:[#allocation2_spill]] %s3519_s0  ;;  %2672 = vset.pattern.permute.xlu0 %v2731_v0  ;;  %2511 = vmatprep.subr.bf16.mxu0 %v2732_v2  ;;  %v62_v28 = vlaneseq  ;;  %v2735_v31 = vmov 1.0   ;;  %vm158_vm2 = vcmask 523264   ;;  %vm271_vm4 = vcmask 64512   ;;  %s2739_s26 = smov 20  }
   0x2   :  { %3542 = sst [smem:[#allocation3_spill]] %s3520_s1  ;;  %s3545_s20 = sld [smem:[#allocation2_spill]]  ;;  %2322 = vmatprep.mubr.msk.f32.mxu0 %vm2733_vm0, %v2734_v8  ;;  %257 = vmatprep.mubr.f32.mxu1 %v2734_v8  ;;  %vm700_vm8 = vcmask 31744   ;;  %vm770_vm9 = vcmask 1043456   ;;  %vm721_vm10 = vcmask 130048  }
   0x3   :  { %3543 = sst [smem:[#allocation4_spill]] %s3521_s3  ;;  %s3546_s22 = sld [smem:[#allocation3_spill]]  ;;  %v2903_v29 = vand.u32 127, %v62_v28 }
   0x4   :  { %3544 = sst [smem:[#allocation5_spill]] %s3522_s2  ;;  %s3547_s25 = sld [smem:[#allocation4_spill]] }
   0x5   :  { %s3548_s29 = sld [smem:[#allocation5_spill]] }
   0x8   :  { %v61_v1 = vld [vmem:[%s3545_s20] sm:$0xff] }
   0x9   :  { %v70_v3 = vld [vmem:[%s3546_s22] sm:$0xff]  ;;  %v71_v4 = vld [vmem:[%s3546_s22 + $0x8] sm:$0xff]  ;;  %65 = vperm.xlu0 %2672, %v61_v1   ;;  %v72_v6 = vld [vmem:[%s3546_s22 + $0x10] sm:$0xff] }
   0xa   :  { %v2512_v5 = vpack.c.bf16 %v71_v4, %v70_v3  ;;  %v73_v7 = vld [vmem:[%s3546_s22 + $0x18] sm:$0xff]  ;;  %v74_v10 = vld [vmem:[%s3546_s22 + $0x20] sm:$0xff]  ;;  %v75_v11 = vld [vmem:[%s3546_s22 + $0x28] sm:$0xff]  ;;  %v2969_v4 = vshrl.u32 %v62_v28, 7 }
   0xb   :  { %v2515_v9 = vpack.c.bf16 %v73_v7, %v72_v6  ;;  %v2518_v12 = vpack.c.bf16 %v75_v11, %v74_v10  ;;  %v76_v13 = vld [vmem:[%s3546_s22 + $0x30] sm:$0xff]  ;;  %v77_v14 = vld [vmem:[%s3546_s22 + $0x38] sm:$0xff]  ;;  %v78_v16 = vld [vmem:[%s3546_s22 + $0x40] sm:$0xff] }
   0xc   :  { %2513 = vmatpush3.bf16.msra.mxu0 %v2512_v5  ;;  %v2521_v15 = vpack.c.bf16 %v77_v14, %v76_v13  ;;  %v79_v17 = vld [vmem:[%s3546_s22 + $0x48] sm:$0xff]  ;;  %v80_v19 = vld [vmem:[%s3546_s22 + $0x50] sm:$0xff]  ;;  %v81_v20 = vld [vmem:[%s3546_s22 + $0x58] sm:$0xff]  ;;  %v267_v5 = vsub.s32 %v2969_v4, %v2903_v29  ;;  %vm866_vm13 = vcmp.eq.s32.totalorder %v2969_v4, %v2903_v29  ;;  %vm983_vm15 = vcmp.eq.s32.totalorder %v2969_v4, 0 }
   0xd   :  { %2514 = vmatprep.subr.bf16.mxu0 %v2732_v2  ;;  %v2524_v18 = vpack.c.bf16 %v79_v17, %v78_v16  ;;  %v2527_v21 = vpack.c.bf16 %v81_v20, %v80_v19  ;;  %v82_v22 = vld [vmem:[%s3546_s22 + $0x60] sm:$0xff]  ;;  %v83_v23 = vld [vmem:[%s3546_s22 + $0x68] sm:$0xff]  ;;  %v84_v25 = vld [vmem:[%s3546_s22 + $0x70] sm:$0xff] }
   0xe   :  { %v2530_v24 = vpack.c.bf16 %v83_v23, %v82_v22  ;;  %v85_v26 = vld [vmem:[%s3546_s22 + $0x78] sm:$0xff]  ;;  %v175_v36 = vld [vmem:[%s3547_s25 + $0x8] sm:$0xff]  ;;  %v174_v39 = vld [vmem:[%s3547_s25] sm:$0xff]  ;;  %vm268_vm3 = vcmp.eq.s32.totalorder %v267_v5, 3  ;;  %vm351_vm5 = vcmp.eq.s32.totalorder %v267_v5, 2  ;;  %vm433_vm6 = vcmp.eq.s32.totalorder %v267_v5, 1 }
   0xf   :  { %v2533_v27 = vpack.c.bf16 %v85_v26, %v84_v25  ;;  %v177_v37 = vld [vmem:[%s3547_s25 + $0x18] sm:$0xff]  ;;  %v176_v40 = vld [vmem:[%s3547_s25 + $0x10] sm:$0xff]  ;;  %v179_v42 = vld [vmem:[%s3547_s25 + $0x28] sm:$0xff]  ;;  %v2149_v6 = vsel %vm268_vm3, 1.0, %v2734_v8  ;;  %v2151_v10 = vsel %vm351_vm5, 1.0, %v2734_v8  ;;  %v2153_v11 = vsel %vm433_vm6, 1.0, %v2734_v8 }
  0x10   :  { %2516 = vmatpush3.bf16.msra.mxu0 %v2515_v9  ;;  %v2535_v38 = vpack.c.bf16 %v177_v37, %v175_v36  ;;  %v2537_v41 = vpack.c.bf16 %v176_v40, %v174_v39  ;;  %v181_v43 = vld [vmem:[%s3547_s25 + $0x38] sm:$0xff]  ;;  %v178_v44 = vld [vmem:[%s3547_s25 + $0x20] sm:$0xff]  ;;  %v180_v46 = vld [vmem:[%s3547_s25 + $0x30] sm:$0xff]  ;;  %vm515_vm7 = vcmp.eq.s32.totalorder %v267_v5, 0  ;;  %v3051_v39 = vsub.s32 0, %v2969_v4 }
  0x11   :  { %2517 = vmatprep.subr.bf16.mxu0 %v2732_v2  ;;  %v2539_v45 = vpack.c.bf16 %v181_v43, %v179_v42  ;;  %v183_v47 = vld [vmem:[%s3547_s25 + $0x48] sm:$0xff]  ;;  %v185_v48 = vld [vmem:[%s3547_s25 + $0x58] sm:$0xff]  ;;  %v2541_v49 = vpack.c.bf16 %v180_v46, %v178_v44  ;;  %v182_v51 = vld [vmem:[%s3547_s25 + $0x40] sm:$0xff]  ;;  %v3054_v40 = vsub.s32 1, %v2969_v4  ;;  %v3062_v46 = vsub.s32 2, %v2969_v4 }
  0x12   :  { %2536 = vmatprep.subr.bf16.mxu1 %v2535_v38  ;;  %v2543_v50 = vpack.c.bf16 %v185_v48, %v183_v47  ;;  %v184_v52 = vld [vmem:[%s3547_s25 + $0x50] sm:$0xff]  ;;  %v187_v53 = vld [vmem:[%s3547_s25 + $0x68] sm:$0xff]  ;;  %v189_v54 = vld [vmem:[%s3547_s25 + $0x78] sm:$0xff]  ;;  %vm1223_vm3 = vcmp.eq.s32.totalorder %v2969_v4, 2  ;;  %vm1463_vm5 = vcmp.eq.s32.totalorder %v2969_v4, 4  ;;  %vm1583_vm6 = vcmp.eq.s32.totalorder %v2969_v4, 5 }
  0x13   :  { %2538 = vmatpush1.bf16.msra.mxu1 %v2537_v41  ;;  %v2545_v55 = vpack.c.bf16 %v184_v52, %v182_v51  ;;  %v2547_v56 = vpack.c.bf16 %v189_v54, %v187_v53  ;;  %v186_v57 = vld [vmem:[%s3547_s25 + $0x60] sm:$0xff]  ;;  %v188_v58 = vld [vmem:[%s3547_s25 + $0x70] sm:$0xff]  ;;  %v613_v14 = vld [vmem:[%s3523_s6 + $0x8] sm:$0xff]  ;;  %v3066_v52 = vsub.s32 3, %v2969_v4 }
  0x14   :  { %2519 = vmatpush3.bf16.msra.mxu0 %v2518_v12  ;;  %2540 = vmatprep.subr.bf16.mxu1 %v2539_v45  ;;  %v2549_v59 = vpack.c.bf16 %v188_v58, %v186_v57  ;;  %v2147_v0 = vld [vmem:[%s3548_s29] ss:$0 sm:$0xff]  ;;  %v2155_v12 = vsel %vm515_vm7, 1.0, %v2734_v8  ;;  %v614_v16 = vld [vmem:[%s3523_s6 + $0x10] sm:$0xff]  ;;  %v615_v17 = vld [vmem:[%s3523_s6 + $0x18] sm:$0xff]  ;;  %vm1703_vm7 = vcmp.eq.s32.totalorder %v2969_v4, 6 }
  0x15   :  { %2520 = vmatprep.subr.bf16.mxu0 %v2732_v2  ;;  %v612_v13 = vld [vmem:[%s3523_s6] sm:$0xff]  ;;  %v617_v20 = vld [vmem:[%s3523_s6 + $0x28] sm:$0xff]  ;;  %v618_v22 = vld [vmem:[%s3523_s6 + $0x30] sm:$0xff] }
  0x16   :  { %v616_v19 = vld [vmem:[%s3523_s6 + $0x20] sm:$0xff]  ;;  %v619_v23 = vld [vmem:[%s3523_s6 + $0x38] sm:$0xff]  ;;  %v621_v26 = vld [vmem:[%s3523_s6 + $0x48] sm:$0xff] }
  0x17   :  { %2542 = vmatpush1.bf16.msra.mxu1 %v2541_v49  ;;  %v620_v25 = vld [vmem:[%s3523_s6 + $0x40] sm:$0xff]  ;;  %v622_v28 = vld [vmem:[%s3523_s6 + $0x50] sm:$0xff]  ;;  %v627_v37 = vld [vmem:[%s3523_s6 + $0x78] sm:$0xff] }
  0x18   :  { %2522 = vmatpush3.bf16.msra.mxu0 %v2521_v15  ;;  %2544 = vmatprep.subr.bf16.mxu1 %v2543_v50  ;;  %v2552_v15 = vpack.c.bf16 %v613_v14, %v612_v13  ;;  %v626_v36 = vld [vmem:[%s3523_s6 + $0x70] sm:$0xff]  ;;  %v266_v41 = vld [vmem:[%s3524_s4] sm:$0xf] }
  0x19   :  { %2523 = vmatprep.subr.bf16.mxu0 %v2732_v2  ;;  %v2573_v38 = vpack.c.bf16 %v627_v37, %v626_v36  ;;  %v348_v43 = vrot.slane %v266_v41, %v3051_v39  ;;  %v430_v45 = vrot.slane %v266_v41, %v3054_v40  ;;  %v512_v51 = vrot.slane %v266_v41, %v3062_v46  ;;  %v759_v14 = vld [vmem:[%s3526_s10] sm:$0xf] }
  0x1a   :  { %v594_v57 = vrot.slane %v266_v41, %v3066_v52 }
  0x1b   :  { %2546 = vmatpush1.bf16.msra.mxu1 %v2545_v55 }
  0x1c   :  { %2525 = vmatpush3.bf16.msra.mxu0 %v2524_v18  ;;  %2548 = vmatprep.subr.bf16.mxu1 %v2547_v56  ;;  %v2555_v18 = vpack.c.bf16 %v615_v17, %v614_v16 }
  0x1d   :  { %2526 = vmatprep.subr.bf16.mxu0 %v2732_v2 }
  0x1f   :  { %2550 = vmatpush1.bf16.msra.mxu1 %v2549_v59 }
  0x20   :  { %2528 = vmatpush3.bf16.msra.mxu0 %v2527_v21  ;;  %2325 = vmatprep.subr.mxu1 %v2734_v8  ;;  %v2558_v21 = vpack.c.bf16 %v617_v20, %v616_v19 }
  0x21   :  { %2529 = vmatprep.subr.bf16.mxu0 %v2732_v2 }
  0x24   :  { %2531 = vmatpush3.bf16.msra.mxu0 %v2530_v24  ;;  %v2561_v24 = vpack.c.bf16 %v619_v23, %v618_v22 }
  0x25   :  { %2532 = vmatprep.subr.bf16.mxu0 %v2732_v2 }
  0x28   :  { %2534 = vmatpush3.bf16.msra.mxu0 %v2533_v27  ;;  %v2564_v27 = vpack.c.bf16 %v621_v26, %v620_v25 }
  0x29   :  { %2551 = vmatprep.subr.bf16.mxu0 %v2732_v2 }
  0x88   :  { %v66_v30 = vpop.permute.xlu0 %65 }
  0x89   :  { %vm67_vm1 = vcmp.eq.s32.totalorder %v2903_v29, %v66_v30  ;;  %v623_v30 = vld [vmem:[%s3523_s6 + $0x58] sm:$0xff] }
  0x8a   :  { %2323 = vmatmul.mubr.msk.f32.vlgmr.msra.gmra.mrb[0].mxu0 %vm67_vm1, %v2735_v31  ;;  %v2567_v31 = vpack.c.bf16 %v623_v30, %v622_v28  ;;  %vm1103_vm1 = vcmp.eq.s32.totalorder %v2969_v4, 1 }
  0x8b   :  { %2377 = vmatprep.mubr.msk.f32.mxu0 %vm2733_vm0, %v2734_v8  ;;  %2553 = vmatpush3.bf16.msra.mxu0 %v2552_v15  ;;  %v2160_v15 = vld [vmem:[%s3527_s8] ss:$0 sm:$0xff] }
  0x8c   :  { %2554 = vmatprep.subr.bf16.mxu0 %v2732_v2 }
  0x8f   :  { %2556 = vmatpush3.bf16.msra.mxu0 %v2555_v18 }
  0x90   :  { %2557 = vmatprep.subr.bf16.mxu0 %v2732_v2 }
  0x93   :  { %2559 = vmatpush3.bf16.msra.mxu0 %v2558_v21 }
  0x94   :  { %2560 = vmatprep.subr.bf16.mxu0 %v2732_v2 }
  0x97   :  { %2562 = vmatpush3.bf16.msra.mxu0 %v2561_v24  ;;  %v2159_v24 = vld [vmem:[%s3528_s7] ss:$0 sm:$0xff] }
  0x98   :  { %2563 = vmatprep.subr.bf16.mxu0 %v2732_v2 }
  0x9b   :  { %2565 = vmatpush3.bf16.msra.mxu0 %v2564_v27 }
  0x9c   :  { %2566 = vmatprep.subr.bf16.mxu0 %v2732_v2 }
  0x9f   :  { %2568 = vmatpush3.bf16.msra.mxu0 %v2567_v31 }
  0xa0   :  { %2569 = vmatprep.subr.bf16.mxu0 %v2732_v2 }
 0x15d   :  { %v2908_v32 = vpop.f32.mrb[0].mxu0 }
 0x15e   :  { %v2324_v33 = vpop.f32.mrb[1].mxu0  ;;  %v157_v34 = vmul.f32 %v2908_v32, %v2908_v32 }
 0x15f   :  { %v624_v33 = vld [vmem:[%s3523_s6 + $0x60] sm:$0xff] }
 0x160   :  { %v159_v35 = vsel %vm158_vm2, %v157_v34, 0.0  ;;  %v625_v34 = vld [vmem:[%s3523_s6 + $0x68] sm:$0xff] }
 0x161   :  { %160 = vadd.xlane.f32.xlu0 %v159_v35  ;;  %v2570_v35 = vpack.c.bf16 %v625_v34, %v624_v33 }
 0x163   :  { %2571 = vmatpush3.bf16.msra.mxu0 %v2570_v35 }
 0x164   :  { %2572 = vmatprep.subr.bf16.mxu0 %v2732_v2 }
 0x167   :  { %2574 = vmatpush3.bf16.msra.mxu0 %v2573_v38  ;;  %v2161_v38 = vld [vmem:[%s3529_s9] ss:$0 sm:$0xff] }
 0x1ee   :  { %v161_v60 = vpop.xlane.xlu0 %160 }
 0x1ef   :  { %v163_v61 = vmul.f32 0.015625, %v161_v60 }
 0x1f1   :  { %v164_v62 = vadd.f32 1e-06, %v163_v61 }
 0x1f3   :  { %2673 = vrsqrt.f32 %v164_v62  ;;  %v2157_v62 = vld [vmem:[%s3525_s5] ss:$0 sm:$0xff]  ;;  %s2736_s5 = smov 108  }
 0x1fd   :  { %v2674_v63 = vpop.eup %2673 }
 0x1fe   :  { %v166_v1 = vmul.f32 %v2674_v63, %v2908_v32 }
 0x200   :  { %v173_v3 = vmul.f32 %v2147_v0, %v166_v1 }
 0x202   :  { %2148 = vmatmul.mubr.msk.f32.vlgmr.msra.gmra.mrb[0].mxu1 %vm158_vm2, %v173_v3 }
 0x203   :  { %2327 = vmatprep.mubr.msk.f32.mxu1 %vm2733_vm0, %v2734_v8 }
 0x2d5   :  { %v259_v7 = vpop.f32.mrb[0].mxu1 }
 0x2d6   :  { %v2974_v9 = vpop.f32.mrb[1].mxu1  ;;  %2326 = vmatpush3.msra.mxu1 %v259_v7 }
 0x2d7   :  { %2328 = vmatmul.mubr.msk.f32.vlgmr.msra.gmra.mrb[2].mxu1 %vm271_vm4, %v2149_v6  ;;  %2330 = vmatprep.subr.mxu1 %v2734_v8 }
 0x2d8   :  { %2331 = vmatpush3.msra.mxu1 %v259_v7  ;;  %2332 = vmatprep.mubr.msk.f32.mxu1 %vm2733_vm0, %v2734_v8 }
 0x2d9   :  { %2335 = vmatprep.subr.mxu1 %v2734_v8 }
 0x2db   :  { %2333 = vmatmul.mubr.msk.f32.vlgmr.msra.gmra.mrb[4].mxu1 %vm271_vm4, %v2151_v10 }
 0x2dc   :  { %2336 = vmatpush3.msra.mxu1 %v259_v7  ;;  %2337 = vmatprep.mubr.msk.f32.mxu1 %vm2733_vm0, %v2734_v8 }
 0x2dd   :  { %2340 = vmatprep.subr.mxu1 %v2734_v8 }
 0x2df   :  { %2338 = vmatmul.mubr.msk.f32.vlgmr.msra.gmra.mrb[6].mxu1 %vm271_vm4, %v2153_v11 }
 0x2e0   :  { %2341 = vmatpush3.msra.mxu1 %v259_v7  ;;  %2342 = vmatprep.mubr.msk.f32.mxu1 %vm2733_vm0, %v2734_v8 }
 0x2e1   :  { %2380 = vmatprep.subr.mxu1 %v2734_v8 }
 0x2e3   :  { %2343 = vmatmul.mubr.msk.f32.vlgmr.msra.gmra.mrb[8].mxu1 %vm271_vm4, %v2155_v12  ;;  %vm1343_vm4 = vcmp.eq.s32.totalorder %v2969_v4, 3 }
 0x2e4   :  { %2382 = vmatprep.mubr.msk.f32.mxu1 %vm2733_vm0, %v2734_v8  ;;  %2381 = vmatpush3.msk.msra.mxu1 %vm770_vm9, %v759_v14 }
 0x2e5   :  { %2575 = vmatprep.subr.bf16.mxu1 %v2732_v2 }
 0x3aa   :  { %v341_v42 = vpop.f32.mrb[2].mxu1 }
 0x3ab   :  { %v2329_v44 = vpop.f32.mrb[3].mxu1  ;;  %v349_v48 = vmul.f32 %v348_v43, %v341_v42  ;;  %v3117_v43 = vsub.s32 4, %v2969_v4 }
 0x3ae   :  { %v423_v47 = vpop.f32.mrb[4].mxu1 }
 0x3af   :  { %v431_v49 = vmul.f32 %v430_v45, %v423_v47  ;;  %v2334_v50 = vpop.f32.mrb[5].mxu1  ;;  %v3123_v45 = vsub.s32 5, %v2969_v4 }
 0x3b0   :  { %v2162_v50 = vld [vmem:[%s3530_s11] ss:$0 sm:$0xff] }
 0x3b1   :  { %v432_v53 = vadd.f32 %v431_v49, %v349_v48  ;;  %v3129_v48 = vsub.s32 6, %v2969_v4 }
 0x3b2   :  { %v505_v54 = vpop.f32.mrb[6].mxu1 }
 0x3b3   :  { %v513_v55 = vmul.f32 %v512_v51, %v505_v54  ;;  %v2339_v56 = vpop.f32.mrb[7].mxu1 }
 0x3b5   :  { %v514_v58 = vadd.f32 %v513_v55, %v432_v53 }
 0x3b6   :  { %v587_v59 = vpop.f32.mrb[8].mxu1 }
 0x3b7   :  { %v595_v60 = vmul.f32 %v594_v57, %v587_v59  ;;  %v2344_v61 = vpop.f32.mrb[9].mxu1 }
 0x3b9   :  { %v596_v63 = vadd.f32 %v595_v60, %v514_v58 }
 0x3bb   :  { %v604_v0 = vadd.f32 %v2157_v62, %v596_v63 }
 0x3bd   :  { %v2158_v1 = vmul.f32 -1.442695, %v604_v0 }
 0x3bf   :  { %2675 = vpow2.f32 %v2158_v1 }
 0x3c9   :  { %v2676_v3 = vpop.eup %2675 }
 0x3ca   :  { %v608_v5 = vadd.f32 1.0, %v2676_v3 }
 0x3cc   :  { %2677 = vrcp.f32 %v608_v5 }
 0x3d6   :  { %v2678_v6 = vpop.eup %2677 }
 0x3d7   :  { %v3072_v7 = vmul.f32 %v2678_v6, %v604_v0 }
 0x3d9   :  { %2378 = vmatmul.mubr.f32.vlgmr.msra.gmra.mrb[2].mxu0 %v3072_v7 }
 0x3da   :  { %2035 = vmatprep.mubr.f32.mxu0 %v2734_v8 }
 0x4ac   :  { %v3076_v10 = vpop.f32.mrb[2].mxu0 }
 0x4ad   :  { %v2379_v11 = vpop.f32.mrb[3].mxu0  ;;  %v699_v12 = vmul.f32 %v3076_v10, %v3076_v10 }
 0x4af   :  { %740 = vrot.lane.b32.xlu0 %v699_v12, %s2736_s5  ;;  %v701_v13 = vsel %vm700_vm8, %v699_v12, 0.0 }
 0x4b0   :  { %702 = vadd.xlane.f32.xlu1 %v701_v13  ;;  %v3139_v13 = vsub.s32 7, %v2969_v4 }
 0x4b3   :  { %735 = vrot.lane.b32.xlu0 %v2160_v15, %s2738_s24 }
 0x4c1   :  { %718 = vrot.lane.b32.xlu1 %v699_v12, %s2737_s21 }
 0x521   :  { %v741_v21 = vpop.permute.xlu0 %740 }
 0x522   :  { %v743_v22 = vsel %vm721_vm10, %v741_v21, 0.0 }
 0x525   :  { %v736_v33 = vpop.permute.xlu0 %735 }
 0x53d   :  { %v703_v16 = vpop.xlane.xlu1 %702 }
 0x53e   :  { %v705_v17 = vmul.f32 0.25, %v703_v16  ;;  %v3146_v16 = vld [vmem:[%s3531_s12] sm:$0xff] }
 0x540   :  { %v706_v18 = vadd.f32 1e-06, %v705_v17  ;;  %v3151_v17 = vld [vmem:[%s3531_s12 + $0x8] sm:$0xff] }
 0x541   :  { %v719_v19 = vpop.permute.xlu1 %718 }
 0x542   :  { %2679 = vrsqrt.f32 %v706_v18  ;;  %v722_v20 = vsel %vm721_vm10, %v719_v19, 0.0 }
 0x543   :  { %723 = vadd.xlane.f32.xlu1 %v722_v20 }
 0x547   :  { %744 = vadd.xlane.f32.xlu1 %v743_v22 }
 0x54c   :  { %v2680_v23 = vpop.eup %2679 }
 0x54d   :  { %v708_v25 = vmul.f32 %v2680_v23, %v3076_v10 }
 0x54f   :  { %v715_v26 = vmul.f32 %v2159_v24, %v708_v25 }
 0x551   :  { %2383 = vmatmul.mubr.msk.f32.vlgmr.msra.gmra.mrb[10].mxu1 %vm700_vm8, %v715_v26  ;;  %vm1823_vm8 = vcmp.eq.s32.totalorder %v2969_v4, 7 }
 0x552   :  { %2389 = vmatprep.mubr.msk.f32.mxu1 %vm2733_vm0, %v2734_v8 }
 0x5d0   :  { %v724_v27 = vpop.xlane.xlu1 %723 }
 0x5d1   :  { %v726_v28 = vmul.f32 0.0625, %v724_v27 }
 0x5d3   :  { %v727_v30 = vadd.f32 1e-06, %v726_v28 }
 0x5d4   :  { %v745_v63 = vpop.xlane.xlu1 %744 }
 0x5d5   :  { %2681 = vrsqrt.f32 %v727_v30  ;;  %v746_v5 = vmul.f32 0.0625, %v745_v63 }
 0x5d7   :  { %v747_v14 = vadd.f32 1e-06, %v746_v5 }
 0x5df   :  { %v2682_v31 = vpop.eup %2681 }
 0x5e0   :  { %v729_v34 = vmul.f32 %v2682_v31, %v3076_v10 }
 0x5e2   :  { %v3100_v35 = vmul.f32 %v736_v33, %v729_v34 }
 0x5e4   :  { %v995_v36 = vrot.slane %v3100_v35, %v3054_v40  ;;  %v875_v37 = vrot.slane %v3100_v35, %v3051_v39  ;;  %v1115_v41 = vrot.slane %v3100_v35, %v3062_v46  ;;  %v1235_v42 = vrot.slane %v3100_v35, %v3066_v52 }
 0x5e5   :  { %v1355_v44 = vrot.slane %v3100_v35, %v3117_v43  ;;  %v1475_v47 = vrot.slane %v3100_v35, %v3123_v45  ;;  %v1595_v49 = vrot.slane %v3100_v35, %v3129_v48 }
 0x5e6   :  { %997 = vrot.lane.b32.xlu1 %v995_v36, %s2737_s21  ;;  %877 = vrot.lane.b32.xlu0 %v875_v37, %s2737_s21 }
 0x5ea   :  { %755 = vrot.lane.b32.xlu1 %v2161_v38, %s2739_s26  ;;  %1117 = vrot.lane.b32.xlu0 %v1115_v41, %s2737_s21  ;;  %v1715_v41 = vrot.slane %v3100_v35, %v3139_v13 }
 0x5ee   :  { %1237 = vrot.lane.b32.xlu0 %v1235_v42, %s2737_s21 }
 0x5f2   :  { %1357 = vrot.lane.b32.xlu0 %v1355_v44, %s2737_s21  ;;  %v2165_v44 = vsel %vm866_vm13, 1.0, %v2734_v8 }
 0x5f6   :  { %1477 = vrot.lane.b32.xlu0 %v1475_v47, %s2737_s21  ;;  %v865_v47 = vadd.s32 8, %v2969_v4 }
 0x5f8   :  { %vm867_vm14 = vcmp.eq.s32.totalorder %v865_v47, %v2903_v29 }
 0x5fa   :  { %1597 = vrot.lane.b32.xlu0 %v1595_v49, %s2737_s21 }
 0x624   :  { %v840_v51 = vpop.f32.mrb[10].mxu1 }
 0x625   :  { %v841_v53 = vadd.f32 %v2162_v50, %v840_v51  ;;  %v2384_v54 = vpop.f32.mrb[11].mxu1 }
 0x627   :  { %v847_v55 = vand.u32 2147483647, %v841_v53  ;;  %v844_v6 = vmax.f32 %v841_v53, 0.0  ;;  %vm845_vm12 = vcmp.ne.f32.partialorder %v841_v53, %v841_v53 }
 0x629   :  { %v848_v56 = vsub.f32 0.0, %v847_v55 }
 0x62b   :  { %v849_v57 = vmul.f32 1.442695, %v848_v56 }
 0x62d   :  { %2683 = vpow2.f32 %v849_v57 }
 0x637   :  { %v2684_v58 = vpop.eup %2683 }
 0x638   :  { %v851_v59 = vadd.f32 1.0, %v2684_v58  ;;  %v854_v60 = vmul.f32 -0.5, %v2684_v58  ;;  %v857_v62 = vand.u32 2147483647, %v2684_v58 }
 0x63a   :  { %2685 = vlog2.f32 %v851_v59  ;;  %v855_v61 = vadd.f32 1.0, %v854_v60  ;;  %vm858_vm11 = vcmp.lt.f32.partialorder %v857_v62, 0.0004427343 }
 0x63b   :  { %2687 = vrsqrt.f32 %v747_v14 }
 0x63c   :  { %v856_v3 = vmul.f32 %v2684_v58, %v855_v61 }
 0x644   :  { %v2686_v0 = vpop.eup %2685 }
 0x645   :  { %v853_v1 = vmul.f32 0.6931472, %v2686_v0  ;;  %v2688_v28 = vpop.eup %2687 }
 0x646   :  { %v749_v34 = vmul.f32 %v2688_v28, %v3076_v10 }
 0x647   :  { %v859_v11 = vsel %vm858_vm11, %v856_v3, %v853_v1 }
 0x648   :  { %v860_v12 = vadd.f32 %v859_v11, %v844_v6 }
 0x64a   :  { %v3141_v15 = vsel %vm845_vm12, %v841_v53, %v860_v12  ;;  %v2166_v53 = vsel %vm867_vm14, 1.0, %v2734_v8 }
 0x64b   :  { %v1731_v18 = vrot.slane %v3141_v15, %v3139_v13  ;;  %v1371_v21 = vrot.slane %v3141_v15, %v3117_v43  ;;  %v1491_v22 = vrot.slane %v3141_v15, %v3123_v45  ;;  %v1611_v27 = vrot.slane %v3141_v15, %v3129_v48 }
 0x64d   :  { %v3156_v19 = vmul.f32 %v1731_v18, %v3146_v16  ;;  %v3159_v20 = vmul.f32 %v1731_v18, %v3151_v17  ;;  %v3166_v23 = vmul.f32 %v1371_v21, %v3151_v17  ;;  %v3169_v24 = vmul.f32 %v1371_v21, %v3146_v16 }
 0x64e   :  { %v3172_v25 = vmul.f32 %v1491_v22, %v3151_v17  ;;  %v3175_v26 = vmul.f32 %v1491_v22, %v3146_v16  ;;  %v3180_v31 = vmul.f32 %v1611_v27, %v3146_v16  ;;  %v3183_v33 = vmul.f32 %v1611_v27, %v3151_v17 }
 0x658   :  { %v998_v30 = vpop.permute.xlu1 %997  ;;  %v878_v10 = vpop.permute.xlu0 %877 }
 0x659   :  { %v880_v49 = vmul.f32 %v2165_v44, %v878_v10  ;;  %v1000_v51 = vmul.f32 %v2165_v44, %v998_v30  ;;  %v1001_v55 = vmul.f32 %v2166_v53, %v998_v30  ;;  %v881_v57 = vmul.f32 %v2166_v53, %v878_v10 }
 0x65b   :  { %v882_v35 = vsel %vm721_vm10, %v880_v49, 0.0  ;;  %v1002_v56 = vsel %vm721_vm10, %v1000_v51, 0.0  ;;  %v1005_v59 = vsel %vm721_vm10, %v1001_v55, 0.0  ;;  %v885_v29 = vsel %vm721_vm10, %v881_v57, 0.0 }
 0x65c   :  { %v756_v36 = vpop.permute.xlu1 %755  ;;  %v1118_v50 = vpop.permute.xlu0 %1117 }
 0x65d   :  { %v3186_v37 = vmul.f32 %v756_v36, %v749_v34  ;;  %v1121_v58 = vmul.f32 %v2166_v53, %v1118_v50  ;;  %v1120_v61 = vmul.f32 %v2165_v44, %v1118_v50 }
 0x65f   :  { %909 = vrot.lane.b32.xlu1 %v3186_v37, %s2736_s5  ;;  %v1028_v38 = vrot.slane %v3186_v37, 1  ;;  %v1148_v42 = vrot.slane %v3186_v37, 2  ;;  %v1125_v63 = vsel %vm721_vm10, %v1121_v58, 0.0  ;;  %v1122_v3 = vsel %vm721_vm10, %v1120_v61, 0.0 }
 0x660   :  { %v1238_v54 = vpop.permute.xlu0 %1237  ;;  %v1268_v55 = vrot.slane %v3186_v37, 3 }
 0x661   :  { %1029 = vrot.lane.b32.xlu0 %v1028_v38, %s2736_s5  ;;  %v1241_v62 = vmul.f32 %v2166_v53, %v1238_v54  ;;  %v1240_v0 = vmul.f32 %v2165_v44, %v1238_v54  ;;  %v1508_v54 = vrot.slane %v3186_v37, 5 }
 0x663   :  { %1717 = vrot.lane.b32.xlu1 %v1715_v41, %s2737_s21  ;;  %v1245_v6 = vsel %vm721_vm10, %v1241_v62, 0.0  ;;  %v1242_v12 = vsel %vm721_vm10, %v1240_v0, 0.0  ;;  %v3242_v62 = vmul.f32 %v3141_v15, %v3072_v7 }
 0x664   :  { %v1358_v60 = vpop.permute.xlu0 %1357 }
 0x665   :  { %v1361_v5 = vmul.f32 %v2166_v53, %v1358_v60  ;;  %v1360_v11 = vmul.f32 %v2165_v44, %v1358_v60 }
 0x667   :  { %1149 = vrot.lane.b32.xlu1 %v1148_v42, %s2736_s5  ;;  %v1365_v18 = vsel %vm721_vm10, %v1361_v5, 0.0  ;;  %v1362_v27 = vsel %vm721_vm10, %v1360_v11, 0.0  ;;  %v1251_v5 = vrot.slane %v3141_v15, %v3066_v52  ;;  %v903_v11 = vrot.slane %v3242_v62, %v3051_v39 }
 0x668   :  { %v1478_v1 = vpop.permute.xlu0 %1477 }
 0x669   :  { %v1481_v14 = vmul.f32 %v2166_v53, %v1478_v1  ;;  %v1480_v22 = vmul.f32 %v2165_v44, %v1478_v1 }
 0x66b   :  { %v1485_v30 = vsel %vm721_vm10, %v1481_v14, 0.0  ;;  %v1482_v34 = vsel %vm721_vm10, %v1480_v22, 0.0 }
 0x66c   :  { %v1598_v21 = vpop.permute.xlu0 %1597 }
 0x66d   :  { %v1600_v28 = vmul.f32 %v2165_v44, %v1598_v21  ;;  %v1601_v36 = vmul.f32 %v2166_v53, %v1598_v21 }
 0x66f   :  { %v1602_v38 = vsel %vm721_vm10, %v1600_v28, 0.0  ;;  %v1605_v41 = vsel %vm721_vm10, %v1601_v36, 0.0 }
 0x680   :  { %883 = vadd.xlane.f32.xlu0 %v882_v35  ;;  %v1388_v35 = vrot.slane %v3186_v37, 4 }
 0x684   :  { %1003 = vadd.xlane.f32.xlu0 %v1002_v56  ;;  %v891_v56 = vrot.slane %v3141_v15, %v3051_v39 }
 0x686   :  { %v892_v57 = vmul.f32 %v891_v56, %v3146_v16  ;;  %v893_v61 = vmul.f32 %v891_v56, %v3151_v17 }
 0x688   :  { %1006 = vadd.xlane.f32.xlu0 %v1005_v59  ;;  %v894_v58 = vmul.f32 1.442695, %v892_v57  ;;  %v1011_v59 = vrot.slane %v3141_v15, %v3054_v40 }
 0x68a   :  { %2689 = vpow2.f32 %v894_v58  ;;  %v1012_v60 = vmul.f32 %v1011_v59, %v3146_v16  ;;  %v1013_v1 = vmul.f32 %v1011_v59, %v3151_v17 }
 0x68b   :  { %886 = vadd.xlane.f32.xlu1 %v885_v29 }
 0x68c   :  { %1126 = vadd.xlane.f32.xlu0 %v1125_v63  ;;  %v1014_v29 = vmul.f32 1.442695, %v1012_v60  ;;  %v896_v63 = vmul.f32 1.442695, %v893_v61  ;;  %v1016_v14 = vmul.f32 1.442695, %v1013_v1  ;;  %v1143_v60 = vrot.slane %v3242_v62, %v3062_v46 }
 0x68e   :  { %2691 = vpow2.f32 %v1014_v29 }
 0x68f   :  { %1123 = vadd.xlane.f32.xlu1 %v1122_v3  ;;  %2693 = vpow2.f32 %v896_v63 }
 0x690   :  { %1246 = vadd.xlane.f32.xlu0 %v1245_v6  ;;  %2695 = vpow2.f32 %v1016_v14 }
 0x693   :  { %1243 = vadd.xlane.f32.xlu1 %v1242_v12 }
 0x694   :  { %1366 = vadd.xlane.f32.xlu0 %v1365_v18  ;;  %v2690_v6 = vpop.eup %2689 }
 0x695   :  { %v898_v28 = vmul.f32 0.0, %v2690_v6  ;;  %v1614_v6 = vmul.f32 1.442695, %v3180_v31 }
 0x697   :  { %1363 = vadd.xlane.f32.xlu1 %v1362_v27  ;;  %v1252_v27 = vmul.f32 %v1251_v5, %v3146_v16 }
 0x698   :  { %1486 = vadd.xlane.f32.xlu0 %v1485_v30 }
 0x69b   :  { %1483 = vadd.xlane.f32.xlu1 %v1482_v34 }
 0x69c   :  { %1603 = vadd.xlane.f32.xlu0 %v1602_v38  ;;  %v1254_v38 = vmul.f32 1.442695, %v1252_v27 }
 0x6a0   :  { %1606 = vadd.xlane.f32.xlu0 %v1605_v41  ;;  %v1023_v41 = vrot.slane %v3242_v62, %v3054_v40  ;;  %v1494_v40 = vmul.f32 1.442695, %v3175_v26 }
 0x6d1   :  { %v3217_v42 = vpop.permute.xlu1 %909 }
 0x6d3   :  { %v3244_v0 = vpop.permute.xlu0 %1029 }
 0x6d5   :  { %v1718_v10 = vpop.permute.xlu1 %1717 }
 0x6d6   :  { %v1720_v47 = vmul.f32 %v2165_v44, %v1718_v10  ;;  %v1721_v49 = vmul.f32 %v2166_v53, %v1718_v10  ;;  %v1628_v44 = vrot.slane %v3186_v37, 6  ;;  %v1748_v53 = vrot.slane %v3186_v37, 7  ;;  %v2692_v10 = vpop.eup %2691 }
 0x6d7   :  { %v1131_v37 = vrot.slane %v3141_v15, %v3062_v46  ;;  %v1253_v15 = vmul.f32 %v1251_v5, %v3151_v17  ;;  %v1263_v46 = vrot.slane %v3242_v62, %v3066_v52 }
 0x6d8   :  { %v1722_v50 = vsel %vm721_vm10, %v1720_v47, 0.0  ;;  %v1725_v51 = vsel %vm721_vm10, %v1721_v49, 0.0 }
 0x6d9   :  { %1723 = vadd.xlane.f32.xlu1 %v1722_v50  ;;  %1726 = vadd.xlane.f32.xlu0 %v1725_v51  ;;  %v1132_v3 = vmul.f32 %v1131_v37, %v3146_v16  ;;  %v1133_v18 = vmul.f32 %v1131_v37, %v3151_v17  ;;  %v3257_v47 = vpop.permute.xlu1 %1149  ;;  %v1256_v16 = vmul.f32 1.442695, %v1253_v15  ;;  %v1376_v17 = vmul.f32 1.442695, %v3166_v23 }
 0x6db   :  { %v1134_v22 = vmul.f32 1.442695, %v1132_v3  ;;  %v1136_v36 = vmul.f32 1.442695, %v1133_v18 }
 0x6dd   :  { %2697 = vpow2.f32 %v1134_v22 }
 0x6de   :  { %2699 = vpow2.f32 %v1136_v36 }
 0x6df   :  { %2701 = vpow2.f32 %v1254_v38  ;;  %v1383_v38 = vrot.slane %v3242_v62, %v3117_v43 }
 0x6e0   :  { %2703 = vpow2.f32 %v1256_v16 }
 0x6ea   :  { %1389 = vrot.lane.b32.xlu1 %v1388_v35, %s2736_s5  ;;  %v2694_v35 = vpop.eup %2693 }
 0x6eb   :  { %v2696_v58 = vpop.eup %2695 }
 0x6ec   :  { %v2698_v61 = vpop.eup %2697 }
 0x6ed   :  { %v2700_v26 = vpop.eup %2699 }
 0x6ee   :  { %1509 = vrot.lane.b32.xlu1 %v1508_v54, %s2736_s5  ;;  %v1374_v54 = vmul.f32 1.442695, %v3169_v24  ;;  %v1496_v24 = vmul.f32 1.442695, %v3172_v25  ;;  %v2702_v14 = vpop.eup %2701  ;;  %v1616_v25 = vmul.f32 1.442695, %v3183_v33 }
 0x6ef   :  { %1269 = vrot.lane.b32.xlu0 %v1268_v55, %s2736_s5  ;;  %v2704_v52 = vpop.eup %2703 }
 0x6f0   :  { %2705 = vpow2.f32 %v1374_v54 }
 0x6f1   :  { %2707 = vpow2.f32 %v1376_v17 }
 0x6f2   :  { %1629 = vrot.lane.b32.xlu1 %v1628_v44, %s2736_s5  ;;  %2709 = vpow2.f32 %v1494_v40 }
 0x6f3   :  { %2711 = vpow2.f32 %v1496_v24 }
 0x6f4   :  { %2713 = vpow2.f32 %v1614_v6 }
 0x6f5   :  { %2715 = vpow2.f32 %v1616_v25  ;;  %v1743_v25 = vrot.slane %v3242_v62, %v3139_v13 }
 0x6f6   :  { %1749 = vrot.lane.b32.xlu1 %v1748_v53, %s2736_s5  ;;  %v899_v53 = vmul.f32 0.0, %v2694_v35  ;;  %v1736_v35 = vmul.f32 1.442695, %v3159_v20 }
 0x6fa   :  { %v2706_v33 = vpop.eup %2705 }
 0x6fb   :  { %v2708_v16 = vpop.eup %2707 }
 0x6fc   :  { %v2710_v17 = vpop.eup %2709 }
 0x70d   :  { %v884_v12 = vpop.xlane.xlu0 %883 }
 0x70e   :  { %v904_v21 = vmul.f32 %v903_v11, %v884_v12 }
 0x710   :  { %v906_v30 = vadd.f32 %v904_v21, %v898_v28 }
 0x711   :  { %v1004_v34 = vpop.xlane.xlu0 %1003 }
 0x712   :  { %v1018_v49 = vmul.f32 %v2692_v10, %v906_v30  ;;  %v1024_v50 = vmul.f32 %v1023_v41, %v1004_v34  ;;  %v1734_v34 = vmul.f32 1.442695, %v3156_v19 }
 0x714   :  { %v1026_v44 = vadd.f32 %v1024_v50, %v1018_v49  ;;  %2717 = vpow2.f32 %v1734_v34 }
 0x715   :  { %v1007_v51 = vpop.xlane.xlu0 %1006  ;;  %2719 = vpow2.f32 %v1736_v35  ;;  %v1855_v35 = vld [vmem:[%s3532_s14 + $0x30] sm:$0xff] }
 0x716   :  { %v1025_v29 = vmul.f32 %v1023_v41, %v1007_v51  ;;  %v1138_v1 = vmul.f32 %v2698_v61, %v1026_v44 }
 0x718   :  { %v887_v55 = vpop.xlane.xlu1 %886 }
 0x719   :  { %v905_v56 = vmul.f32 %v903_v11, %v887_v55  ;;  %v1127_v57 = vpop.xlane.xlu0 %1126  ;;  %v1503_v55 = vrot.slane %v3242_v62, %v3123_v45 }
 0x71a   :  { %v1145_v18 = vmul.f32 %v1143_v60, %v1127_v57 }
 0x71b   :  { %v907_v59 = vadd.f32 %v905_v56, %v899_v53 }
 0x71c   :  { %v1124_v37 = vpop.xlane.xlu1 %1123 }
 0x71d   :  { %v2576_v23 = vpack.c.bf16 %v907_v59, %v906_v30  ;;  %v1019_v63 = vmul.f32 %v2696_v58, %v907_v59  ;;  %v1144_v3 = vmul.f32 %v1143_v60, %v1124_v37  ;;  %v1247_v5 = vpop.xlane.xlu0 %1246  ;;  %v2712_v58 = vpop.eup %2711  ;;  %v1623_v60 = vrot.slane %v3242_v62, %v3129_v48 }
 0x71e   :  { %v1265_v41 = vmul.f32 %v1263_v46, %v1247_v5  ;;  %v2714_v61 = vpop.eup %2713 }
 0x71f   :  { %v1027_v11 = vadd.f32 %v1025_v29, %v1019_v63  ;;  %v1146_v12 = vadd.f32 %v1144_v3, %v1138_v1  ;;  %2577 = vmatpush3.bf16.msra.mxu1 %v2576_v23  ;;  %v2716_v1 = vpop.eup %2715 }
 0x720   :  { %v1244_v21 = vpop.xlane.xlu1 %1243  ;;  %2578 = vmatprep.subr.bf16.mxu1 %v2732_v2  ;;  %v2718_v6 = vpop.eup %2717 }
 0x721   :  { %v1139_v22 = vmul.f32 %v2700_v26, %v1027_v11  ;;  %v1258_v27 = vmul.f32 %v2702_v14, %v1146_v12  ;;  %v1264_v28 = vmul.f32 %v1263_v46, %v1244_v21  ;;  %v1367_v30 = vpop.xlane.xlu0 %1366  ;;  %v2579_v31 = vpack.c.bf16 %v1027_v11, %v1026_v44  ;;  %v2720_v14 = vpop.eup %2719 }
 0x722   :  { %2390 = vmatmul.mubr.msk.f32.vlgmr.msra.gmra.mrb[12].mxu1 %vm721_vm10, %v3217_v42  ;;  %v1385_v44 = vmul.f32 %v1383_v38, %v1367_v30 }
 0x723   :  { %v1147_v36 = vadd.f32 %v1145_v18, %v1139_v22  ;;  %v1266_v15 = vadd.f32 %v1264_v28, %v1258_v27  ;;  %2580 = vmatpush3.bf16.msra.mxu1 %v2579_v31  ;;  %2396 = vmatprep.mubr.msk.f32.mxu1 %vm2733_vm0, %v2734_v8 }
 0x724   :  { %v1364_v10 = vpop.xlane.xlu1 %1363  ;;  %2581 = vmatprep.subr.bf16.mxu1 %v2732_v2 }
 0x725   :  { %v2582_v19 = vpack.c.bf16 %v1147_v36, %v1146_v12  ;;  %v1259_v49 = vmul.f32 %v2704_v52, %v1147_v36  ;;  %v1378_v42 = vmul.f32 %v2706_v33, %v1266_v15  ;;  %v1384_v50 = vmul.f32 %v1383_v38, %v1364_v10  ;;  %v1487_v51 = vpop.xlane.xlu0 %1486  ;;  %v1849_v33 = vld [vmem:[%s3532_s14] sm:$0xff] }
 0x726   :  { %2397 = vmatmul.mubr.msk.f32.vlgmr.msra.gmra.mrb[14].mxu1 %vm721_vm10, %v3244_v0  ;;  %v1505_v29 = vmul.f32 %v1503_v55, %v1487_v51  ;;  %v1854_v51 = vld [vmem:[%s3532_s14 + $0x28] sm:$0xff] }
 0x727   :  { %v1267_v43 = vadd.f32 %v1265_v41, %v1259_v49  ;;  %v1386_v54 = vadd.f32 %v1384_v50, %v1378_v42  ;;  %2583 = vmatpush3.bf16.msra.mxu1 %v2582_v19  ;;  %2403 = vmatprep.mubr.msk.f32.mxu1 %vm2733_vm0, %v2734_v8  ;;  %v1850_v41 = vld [vmem:[%s3532_s14 + $0x8] sm:$0xff]  ;;  %v1851_v19 = vld [vmem:[%s3532_s14 + $0x10] sm:$0xff]  ;;  %v1852_v49 = vld [vmem:[%s3532_s14 + $0x18] sm:$0xff] }
 0x728   :  { %v1484_v53 = vpop.xlane.xlu1 %1483  ;;  %2584 = vmatprep.subr.bf16.mxu1 %v2732_v2  ;;  %v2600_v10 = vpack.c.bf16 %v1850_v41, %v1849_v33  ;;  %v2603_v42 = vpack.c.bf16 %v1852_v49, %v1851_v19  ;;  %v1853_v50 = vld [vmem:[%s3532_s14 + $0x20] sm:$0xff] }
 0x729   :  { %v2585_v56 = vpack.c.bf16 %v1267_v43, %v1266_v15  ;;  %v1379_v20 = vmul.f32 %v2708_v16, %v1267_v43  ;;  %v1498_v57 = vmul.f32 %v2710_v17, %v1386_v54  ;;  %v1504_v40 = vmul.f32 %v1503_v55, %v1484_v53  ;;  %v1604_v0 = vpop.xlane.xlu0 %1603  ;;  %v1856_v43 = vld [vmem:[%s3532_s14 + $0x38] sm:$0xff]  ;;  %v1857_v55 = vld [vmem:[%s3532_s14 + $0x40] sm:$0xff]  ;;  %v1858_v17 = vld [vmem:[%s3532_s14 + $0x48] sm:$0xff] }
 0x72a   :  { %2404 = vmatmul.mubr.msk.f32.vlgmr.msra.gmra.mrb[16].mxu1 %vm721_vm10, %v3257_v47  ;;  %v1624_v63 = vmul.f32 %v1623_v60, %v1604_v0  ;;  %v2606_v16 = vpack.c.bf16 %v1854_v51, %v1853_v50  ;;  %v1859_v53 = vld [vmem:[%s3532_s14 + $0x50] sm:$0xff] }
 0x72b   :  { %v1387_v45 = vadd.f32 %v1385_v44, %v1379_v20  ;;  %v1506_v59 = vadd.f32 %v1504_v40, %v1498_v57  ;;  %2586 = vmatpush3.bf16.msra.mxu1 %v2585_v56  ;;  %2410 = vmatprep.mubr.msk.f32.mxu1 %vm2733_vm0, %v2734_v8  ;;  %v2612_v44 = vpack.c.bf16 %v1858_v17, %v1857_v55  ;;  %v1860_v56 = vld [vmem:[%s3532_s14 + $0x58] sm:$0xff]  ;;  %v1861_v20 = vld [vmem:[%s3532_s14 + $0x60] sm:$0xff]  ;;  %v1862_v40 = vld [vmem:[%s3532_s14 + $0x68] sm:$0xff] }
 0x72c   :  { %2587 = vmatprep.subr.bf16.mxu1 %v2732_v2  ;;  %v2615_v57 = vpack.c.bf16 %v1860_v56, %v1859_v53  ;;  %v2618_v0 = vpack.c.bf16 %v1862_v40, %v1861_v20  ;;  %v2183_v53 = vld [vmem:[%s3533_s13] ss:$0 sm:$0xff] }
 0x72d   :  { %v2588_v37 = vpack.c.bf16 %v1387_v45, %v1386_v54  ;;  %v1499_v24 = vmul.f32 %v2712_v58, %v1387_v45  ;;  %v1618_v23 = vmul.f32 %v2714_v61, %v1506_v59  ;;  %v1607_v47 = vpop.xlane.xlu0 %1606  ;;  %v2609_v54 = vpack.c.bf16 %v1856_v43, %v1855_v35  ;;  %v1863_v58 = vld [vmem:[%s3532_s14 + $0x70] sm:$0xff]  ;;  %v1864_v45 = vld [vmem:[%s3532_s14 + $0x78] sm:$0xff] }
 0x72e   :  { %v1625_v48 = vmul.f32 %v1623_v60, %v1607_v47  ;;  %v1839_v40 = vmul.f32 %v2183_v53, %v3072_v7  ;;  %v1955_v7 = vld [vmem:[%s3535_s16 + $0x18] sm:$0xff]  ;;  %v2063_v53 = vld [vmem:[%s3537_s17 + $0x68] sm:$0xff] }
 0x72f   :  { %v1507_v3 = vadd.f32 %v1505_v29, %v1499_v24  ;;  %v1626_v5 = vadd.f32 %v1624_v63, %v1618_v23  ;;  %v2170_v23 = vsel %vm1103_vm1, 1.0, %v2734_v8 }
 0x731   :  { %v2591_v26 = vpack.c.bf16 %v1507_v3, %v1506_v59  ;;  %v1619_v11 = vmul.f32 %v2716_v1, %v1507_v3  ;;  %v1738_v12 = vmul.f32 %v2718_v6, %v1626_v5  ;;  %v2621_v59 = vpack.c.bf16 %v1864_v45, %v1863_v58 }
 0x732   :  { %v2172_v6 = vsel %vm1223_vm3, 1.0, %v2734_v8 }
 0x733   :  { %v1627_v46 = vadd.f32 %v1625_v48, %v1619_v11 }
 0x735   :  { %v2594_v18 = vpack.c.bf16 %v1627_v46, %v1626_v5  ;;  %v1739_v21 = vmul.f32 %v2720_v14, %v1627_v46  ;;  %v2184_v14 = vmul.f32 -1.442695, %v2974_v9 }
 0x737   :  { %2721 = vpow2.f32 %v2184_v14  ;;  %v1967_v14 = vld [vmem:[%s3535_s16 + $0x78] sm:$0xff] }
 0x766   :  { %v1724_v22 = vpop.xlane.xlu1 %1723  ;;  %v1727_v27 = vpop.xlane.xlu0 %1726 }
 0x767   :  { %v1744_v28 = vmul.f32 %v1743_v25, %v1724_v22  ;;  %v1745_v30 = vmul.f32 %v1743_v25, %v1727_v27  ;;  %v2722_v27 = vpop.eup %2721 }
 0x769   :  { %v1746_v31 = vadd.f32 %v1744_v28, %v1738_v12  ;;  %v1747_v34 = vadd.f32 %v1745_v30, %v1739_v21  ;;  %v2174_v21 = vsel %vm1343_vm4, 1.0, %v2734_v8 }
 0x76a   :  { %v1390_v52 = vpop.permute.xlu1 %1389  ;;  %v1270_v36 = vpop.permute.xlu0 %1269 }
 0x76b   :  { %v2597_v15 = vpack.c.bf16 %v1747_v34, %v1746_v31  ;;  %2411 = vmatmul.mubr.msk.f32.vlgmr.msra.gmra.mrb[18].mxu1 %vm721_vm10, %v1270_v36  ;;  %v2176_v31 = vsel %vm1463_vm5, 1.0, %v2734_v8 }
 0x76c   :  { %2589 = vmatpush3.bf16.msra.mxu1 %v2588_v37  ;;  %2417 = vmatprep.mubr.msk.f32.mxu1 %vm2733_vm0, %v2734_v8  ;;  %v2168_v37 = vsel %vm983_vm15, 1.0, %v2734_v8 }
 0x76d   :  { %2590 = vmatprep.subr.bf16.mxu1 %v2732_v2 }
 0x76e   :  { %v1510_v38 = vpop.permute.xlu1 %1509 }
 0x76f   :  { %2418 = vmatmul.mubr.msk.f32.vlgmr.msra.gmra.mrb[20].mxu1 %vm721_vm10, %v1390_v52 }
 0x770   :  { %2592 = vmatpush3.bf16.msra.mxu1 %v2591_v26  ;;  %2424 = vmatprep.mubr.msk.f32.mxu1 %vm2733_vm0, %v2734_v8 }
 0x771   :  { %2593 = vmatprep.subr.bf16.mxu1 %v2732_v2 }
 0x772   :  { %v1630_v13 = vpop.permute.xlu1 %1629 }
 0x773   :  { %2425 = vmatmul.mubr.msk.f32.vlgmr.msra.gmra.mrb[22].mxu1 %vm721_vm10, %v1510_v38 }
 0x774   :  { %2595 = vmatpush3.bf16.msra.mxu1 %v2594_v18  ;;  %2431 = vmatprep.mubr.msk.f32.mxu1 %vm2733_vm0, %v2734_v8 }
 0x775   :  { %2596 = vmatprep.subr.bf16.mxu1 %v2732_v2 }
 0x776   :  { %v1750_v62 = vpop.permute.xlu1 %1749 }
 0x777   :  { %2432 = vmatmul.mubr.msk.f32.vlgmr.msra.gmra.mrb[24].mxu1 %vm721_vm10, %v1630_v13 }
 0x778   :  { %2598 = vmatpush3.bf16.msra.mxu1 %v2597_v15  ;;  %2438 = vmatprep.mubr.msk.f32.mxu1 %vm2733_vm0, %v2734_v8  ;;  %v1844_v15 = vadd.f32 1.0, %v2722_v27 }
 0x779   :  { %2599 = vmatprep.subr.bf16.mxu1 %v2732_v2 }
 0x77a   :  { %2723 = vrcp.f32 %v1844_v15 }
 0x77b   :  { %2439 = vmatmul.mubr.msk.f32.vlgmr.msra.gmra.mrb[26].mxu1 %vm721_vm10, %v1750_v62  ;;  %v2178_v62 = vsel %vm1583_vm6, 1.0, %v2734_v8 }
 0x77c   :  { %2473 = vmatprep.mubr.msk.f32.mxu1 %vm2733_vm0, %v2734_v8  ;;  %2601 = vmatpush3.bf16.msra.mxu1 %v2600_v10 }
 0x77d   :  { %2602 = vmatprep.subr.bf16.mxu1 %v2732_v2 }
 0x780   :  { %2604 = vmatpush3.bf16.msra.mxu1 %v2603_v42  ;;  %v2180_v42 = vsel %vm1703_vm7, 1.0, %v2734_v8 }
 0x781   :  { %2605 = vmatprep.subr.bf16.mxu1 %v2732_v2 }
 0x784   :  { %2607 = vmatpush3.bf16.msra.mxu1 %v2606_v16  ;;  %v2724_v20 = vpop.eup %2723 }
 0x785   :  { %2608 = vmatprep.subr.bf16.mxu1 %v2732_v2 }
 0x788   :  { %2610 = vmatpush3.bf16.msra.mxu1 %v2609_v54  ;;  %v2182_v54 = vsel %vm1823_vm8, 1.0, %v2734_v8 }
 0x789   :  { %2611 = vmatprep.subr.bf16.mxu1 %v2732_v2 }
 0x78c   :  { %2613 = vmatpush3.bf16.msra.mxu1 %v2612_v44 }
 0x78d   :  { %2614 = vmatprep.subr.bf16.mxu1 %v2732_v2 }
 0x790   :  { %2616 = vmatpush3.bf16.msra.mxu1 %v2615_v57 }
 0x791   :  { %2617 = vmatprep.subr.bf16.mxu1 %v2732_v2 }
 0x794   :  { %2619 = vmatpush3.bf16.msra.mxu1 %v2618_v0  ;;  %v1847_v0 = vmul.f32 %v2724_v20, %v2974_v9  ;;  %v1953_v9 = vld [vmem:[%s3535_s16 + $0x8] sm:$0xff]  ;;  %v2064_v20 = vld [vmem:[%s3537_s17 + $0x70] sm:$0xff] }
 0x795   :  { %2620 = vmatprep.subr.bf16.mxu1 %v2732_v2 }
 0x798   :  { %2622 = vmatpush3.bf16.msra.mxu1 %v2621_v59 }
 0x7f5   :  { %v979_v60 = vpop.f32.mrb[12].mxu1 }
 0x7f6   :  { %v2391_v61 = vpop.f32.mrb[13].mxu1  ;;  %v989_v29 = vrot.slane %v979_v60, %v3051_v39 }
 0x7f8   :  { %v990_v47 = vmul.f32 %v2168_v37, %v989_v29  ;;  %v2623_v29 = vpack.c.bf16 %v1955_v7, %v1953_v9  ;;  %v1954_v37 = vld [vmem:[%s3535_s16 + $0x10] sm:$0xff] }
 0x7f9   :  { %v1099_v24 = vpop.f32.mrb[14].mxu1 }
 0x7fa   :  { %v1109_v63 = vrot.slane %v1099_v24, %v3051_v39  ;;  %v2398_v1 = vpop.f32.mrb[15].mxu1  ;;  %v1957_v24 = vld [vmem:[%s3535_s16 + $0x28] sm:$0xff]  ;;  %2624 = vmatprep.subr.bf16.mxu0 %v2623_v29 }
 0x7fc   :  { %v1110_v3 = vmul.f32 %v2170_v23, %v1109_v63  ;;  %v1959_v23 = vld [vmem:[%s3535_s16 + $0x38] sm:$0xff] }
 0x7fd   :  { %v1219_v5 = vpop.f32.mrb[16].mxu1  ;;  %v2627_v1 = vpack.c.bf16 %v1959_v23, %v1957_v24 }
 0x7fe   :  { %v1111_v26 = vadd.f32 %v1110_v3, %v990_v47  ;;  %v1229_v11 = vrot.slane %v1219_v5, %v3051_v39  ;;  %v2405_v48 = vpop.f32.mrb[17].mxu1  ;;  %v1956_v47 = vld [vmem:[%s3535_s16 + $0x20] sm:$0xff]  ;;  %v1958_v3 = vld [vmem:[%s3535_s16 + $0x30] sm:$0xff]  ;;  %v1961_v5 = vld [vmem:[%s3535_s16 + $0x48] sm:$0xff] }
 0x7ff   :  { %v1960_v48 = vld [vmem:[%s3535_s16 + $0x40] sm:$0xff] }
 0x800   :  { %v1230_v12 = vmul.f32 %v2172_v6, %v1229_v11  ;;  %v1963_v6 = vld [vmem:[%s3535_s16 + $0x58] sm:$0xff] }
 0x801   :  { %v2631_v11 = vpack.c.bf16 %v1963_v6, %v1961_v5 }
 0x802   :  { %v1231_v46 = vadd.f32 %v1230_v12, %v1111_v26  ;;  %v2629_v26 = vpack.c.bf16 %v1958_v3, %v1956_v47  ;;  %v1962_v12 = vld [vmem:[%s3535_s16 + $0x50] sm:$0xff] }
 0x83e   :  { %v1339_v18 = vpop.f32.mrb[18].mxu1 }
 0x83f   :  { %v1349_v25 = vrot.slane %v1339_v18, %v3051_v39  ;;  %v2412_v22 = vpop.f32.mrb[19].mxu1  ;;  %v2633_v18 = vpack.c.bf16 %v1962_v12, %v1960_v48 }
 0x840   :  { %v1966_v22 = vld [vmem:[%s3535_s16 + $0x70] sm:$0xff] }
 0x841   :  { %v1350_v28 = vmul.f32 %v2174_v21, %v1349_v25  ;;  %v1964_v25 = vld [vmem:[%s3535_s16 + $0x60] sm:$0xff] }
 0x842   :  { %v1459_v30 = vpop.f32.mrb[20].mxu1  ;;  %v2637_v27 = vpack.c.bf16 %v1966_v22, %v1964_v25 }
 0x843   :  { %v1351_v34 = vadd.f32 %v1350_v28, %v1231_v46  ;;  %v1469_v52 = vrot.slane %v1459_v30, %v3051_v39  ;;  %v2419_v36 = vpop.f32.mrb[21].mxu1  ;;  %v1965_v46 = vld [vmem:[%s3535_s16 + $0x68] sm:$0xff] }
 0x844   :  { %v2635_v21 = vpack.c.bf16 %v1967_v14, %v1965_v46 }
 0x845   :  { %v1470_v38 = vmul.f32 %v2176_v31, %v1469_v52  ;;  %v2185_v52 = vld [vmem:[%s3536_s15] ss:$0 sm:$0xff] }
 0x846   :  { %v1579_v13 = vpop.f32.mrb[22].mxu1 }
 0x847   :  { %v1471_v33 = vadd.f32 %v1470_v38, %v1351_v34  ;;  %v1589_v41 = vrot.slane %v1579_v13, %v3051_v39  ;;  %v2426_v10 = vpop.f32.mrb[23].mxu1  ;;  %v2050_v38 = vld [vmem:[%s3537_s17] sm:$0xff]  ;;  %v2051_v13 = vld [vmem:[%s3537_s17 + $0x8] sm:$0xff] }
 0x848   :  { %v2054_v10 = vld [vmem:[%s3537_s17 + $0x20] sm:$0xff] }
 0x849   :  { %v1590_v19 = vmul.f32 %v2178_v62, %v1589_v41  ;;  %v2640_v62 = vpack.c.bf16 %v2051_v13, %v2050_v38 }
 0x84a   :  { %v1699_v49 = vpop.f32.mrb[24].mxu1 }
 0x84b   :  { %v1591_v50 = vadd.f32 %v1590_v19, %v1471_v33  ;;  %v1709_v51 = vrot.slane %v1699_v49, %v3051_v39  ;;  %v2433_v16 = vpop.f32.mrb[25].mxu1  ;;  %v2052_v33 = vld [vmem:[%s3537_s17 + $0x10] sm:$0xff]  ;;  %v2055_v19 = vld [vmem:[%s3537_s17 + $0x28] sm:$0xff] }
 0x84c   :  { %v2646_v49 = vpack.c.bf16 %v2055_v19, %v2054_v10  ;;  %v2058_v16 = vld [vmem:[%s3537_s17 + $0x40] sm:$0xff] }
 0x84d   :  { %v1710_v35 = vmul.f32 %v2180_v42, %v1709_v51  ;;  %v2056_v42 = vld [vmem:[%s3537_s17 + $0x30] sm:$0xff] }
 0x84e   :  { %v1819_v43 = vpop.f32.mrb[26].mxu1 }
 0x84f   :  { %v1711_v55 = vadd.f32 %v1710_v35, %v1591_v50  ;;  %v1829_v17 = vrot.slane %v1819_v43, %v3051_v39  ;;  %v2440_v44 = vpop.f32.mrb[27].mxu1  ;;  %v2057_v50 = vld [vmem:[%s3537_s17 + $0x38] sm:$0xff]  ;;  %v2059_v35 = vld [vmem:[%s3537_s17 + $0x48] sm:$0xff] }
 0x850   :  { %v2649_v51 = vpack.c.bf16 %v2057_v50, %v2056_v42  ;;  %v2652_v43 = vpack.c.bf16 %v2059_v35, %v2058_v16  ;;  %v2062_v44 = vld [vmem:[%s3537_s17 + $0x60] sm:$0xff] }
 0x851   :  { %v1830_v56 = vmul.f32 %v2182_v54, %v1829_v17  ;;  %v2060_v54 = vld [vmem:[%s3537_s17 + $0x50] sm:$0xff] }
 0x853   :  { %v1831_v57 = vadd.f32 %v1830_v56, %v1711_v55  ;;  %v2061_v55 = vld [vmem:[%s3537_s17 + $0x58] sm:$0xff]  ;;  %v2658_v56 = vpack.c.bf16 %v2063_v53, %v2062_v44 }
 0x854   :  { %v2655_v17 = vpack.c.bf16 %v2061_v55, %v2060_v54 }
 0x855   :  { %v1840_v4 = vadd.f32 %v1839_v40, %v1831_v57  ;;  %v2065_v57 = vld [vmem:[%s3537_s17 + $0x78] sm:$0xff] }
 0x856   :  { %v2661_v40 = vpack.c.bf16 %v2065_v57, %v2064_v20 }
 0x857   :  { %v1848_v58 = vmul.f32 %v1847_v0, %v1840_v4 }
 0x859   :  { %2474 = vmatmul.mubr.f32.vlgmr.msra.gmra.mrb[28].mxu1 %v1848_v58 }
 0x92c   :  { %v1931_v45 = vpop.f32.mrb[28].mxu1 }
 0x92d   :  { %v1932_v59 = vadd.f32 %v1931_v45, %v2908_v32  ;;  %v2475_v60 = vpop.f32.mrb[29].mxu1  ;;  %v1952_v32 = vld [vmem:[%s3535_s16] sm:$0xff] }
 0x92e   :  { %v2625_v63 = vpack.c.bf16 %v1954_v37, %v1952_v32 }
 0x92f   :  { %1935 = vst.msk [vmem:[%s3534_s19] sm:$0xff] %vm158_vm2, %v1932_v59  ;;  %v1937_v39 = vmul.f32 %v1932_v59, %v1932_v59 }
 0x930   :  { %2626 = vmatpush1.bf16.msra.mxu0 %v2625_v63 }
 0x931   :  { %v1938_v61 = vsel %vm158_vm2, %v1937_v39, 0.0  ;;  %2628 = vmatprep.subr.bf16.mxu0 %v2627_v1 }
 0x932   :  { %1939 = vadd.xlane.f32.xlu0 %v1938_v61 }
 0x934   :  { %2630 = vmatpush1.bf16.msra.mxu0 %v2629_v26 }
 0x935   :  { %2632 = vmatprep.subr.bf16.mxu0 %v2631_v11 }
 0x938   :  { %2634 = vmatpush1.bf16.msra.mxu0 %v2633_v18 }
 0x939   :  { %2636 = vmatprep.subr.bf16.mxu0 %v2635_v21 }
 0x93c   :  { %2638 = vmatpush1.bf16.msra.mxu0 %v2637_v27 }
 0x93d   :  { %2639 = vmatprep.subr.bf16.mxu0 %v2732_v2 }
 0x9bf   :  { %v1940_v28 = vpop.xlane.xlu0 %1939 }
 0x9c0   :  { %v1941_v30 = vmul.f32 0.015625, %v1940_v28 }
 0x9c2   :  { %v1942_v31 = vadd.f32 1e-06, %v1941_v30 }
 0x9c4   :  { %2725 = vrsqrt.f32 %v1942_v31 }
 0x9ce   :  { %v2726_v34 = vpop.eup %2725 }
 0x9cf   :  { %v1944_v36 = vmul.f32 %v2726_v34, %v1932_v59 }
 0x9d1   :  { %v1951_v15 = vmul.f32 %v2185_v52, %v1944_v36 }
 0x9d3   :  { %2186 = vmatmul.mubr.msk.f32.vlgmr.msra.gmra.mrb[4].mxu0 %vm158_vm2, %v1951_v15 }
 0x9d4   :  { %2508 = vmatprep.mubr.msk.f32.mxu0 %vm2733_vm0, %v2734_v8  ;;  %2641 = vmatpush3.bf16.msra.mxu0 %v2640_v62  ;;  %v2053_v8 = vld [vmem:[%s3537_s17 + $0x18] sm:$0xff] }
 0x9d5   :  { %2642 = vmatprep.subr.bf16.mxu0 %v2732_v2  ;;  %v2643_v41 = vpack.c.bf16 %v2053_v8, %v2052_v33 }
 0x9d8   :  { %2644 = vmatpush3.bf16.msra.mxu0 %v2643_v41 }
 0x9d9   :  { %2645 = vmatprep.subr.bf16.mxu0 %v2732_v2 }
 0x9dc   :  { %2647 = vmatpush3.bf16.msra.mxu0 %v2646_v49 }
 0x9dd   :  { %2648 = vmatprep.subr.bf16.mxu0 %v2732_v2 }
 0x9e0   :  { %2650 = vmatpush3.bf16.msra.mxu0 %v2649_v51 }
 0x9e1   :  { %2651 = vmatprep.subr.bf16.mxu0 %v2732_v2 }
 0x9e4   :  { %2653 = vmatpush3.bf16.msra.mxu0 %v2652_v43 }
 0x9e5   :  { %2654 = vmatprep.subr.bf16.mxu0 %v2732_v2 }
 0x9e8   :  { %2656 = vmatpush3.bf16.msra.mxu0 %v2655_v17 }
 0x9e9   :  { %2657 = vmatprep.subr.bf16.mxu0 %v2732_v2 }
 0x9ec   :  { %2659 = vmatpush3.bf16.msra.mxu0 %v2658_v56 }
 0x9ed   :  { %2660 = vmatprep.subr.bf16.mxu0 %v2732_v2 }
 0x9f0   :  { %2662 = vmatpush3.bf16.msra.mxu0 %v2661_v40 }
 0xaa6   :  { %v2037_v0 = vpop.f32.mrb[4].mxu0 }
 0xaa7   :  { %v2187_v4 = vmul.f32 -1.442695, %v2037_v0  ;;  %v2039_v58 = vpop.f32.mrb[5].mxu0 }
 0xaa9   :  { %2727 = vpow2.f32 %v2187_v4 }
 0xab3   :  { %v2728_v45 = vpop.eup %2727 }
 0xab4   :  { %v2045_v59 = vadd.f32 1.0, %v2728_v45 }
 0xab6   :  { %2729 = vrcp.f32 %v2045_v59 }
 0xac0   :  { %v2730_v60 = vpop.eup %2729 }
 0xac1   :  { %v2048_v39 = vmul.f32 %v2730_v60, %v2037_v0 }
 0xac3   :  { %v2049_v61 = vmul.f32 %v2048_v39, %v2039_v58 }
 0xac5   :  { %2509 = vmatmul.mubr.f32.vlgmr.msra.gmra.mrb[6].mxu0 %v2049_v61 }
 0xb98   :  { %v2132_v9 = vpop.f32.mrb[6].mxu0 }
 0xb99   :  { %2136 = vst.msk [vmem:[%s3538_s18] sm:$0xff] %vm158_vm2, %v2132_v9  ;;  %v2510_v7 = vpop.f32.mrb[7].mxu0 }

// kernel: _lambda_.6
= control target key start
LH: loop header
LB: loop body
LE: loop exit
PB: predicated region body
PF: predicated region fallthrough
CT: control target
= control target key end

     0   :  { %vm66_vm0 = vcmask 523264   ;;  %v2560_v18 = vmov 0.0   ;;  %vm2561_vm1 = vmmov 0   ;;  %v172_v37 = vlaneseq  ;;  %s2564_s26 = smov 108   ;;  %s2565_s29 = smov 4   ;;  %s3268_s0 = inlined_call_operand.vmem [shape: f32[8,64], index: 0, kind: input, shape index: {}]   ;;  %s3269_s1 = inlined_call_operand.vmem [shape: f32[8,64], index: 1, kind: input, shape index: {}]   ;;  %s3270_s3 = inlined_call_operand.vmem [shape: f32[64,256], index: 3, kind: input, shape index: {}]   ;;  %s3271_s2 = inlined_call_operand.vmem [shape: f32[1,64], index: 2, kind: input, shape index: {}]   ;;  %s3272_s6 = inlined_call_operand.vmem [shape: f32[128,36], index: 6, kind: input, shape index: {}]   ;;  %s3273_s4 = inlined_call_operand.vmem [shape: f32[4,128], index: 4, kind: input, shape index: {}]   ;;  %s3274_s5 = inlined_call_operand.vmem [shape: f32[1,128], index: 5, kind: input, shape index: {}]   ;;  %s3275_s8 = inlined_call_operand.vmem [shape: f32[1,16], index: 8, kind: input, shape index: {}]   ;;  %s3276_s10 = inlined_call_operand.vmem [shape: f32[4,128], index: 10, kind: input, shape index: {}]   ;;  %s3277_s7 = inlined_call_operand.vmem [shape: f32[1,4], index: 7, kind: input, shape index: {}]   ;;  %s3278_s9 = inlined_call_operand.vmem [shape: f32[1,16], index: 9, kind: input, shape index: {}]   ;;  %s3279_s11 = inlined_call_operand.vmem [shape: f32[1,128], index: 11, kind: input, shape index: {}]   ;;  %s3280_s12 = inlined_call_operand.vmem [shape: f32[16,128], index: 12, kind: input, shape index: {}]   ;;  %s3281_s14 = inlined_call_operand.vmem [shape: f32[128,64], index: 14, kind: input, shape index: {}]   ;;  %s3282_s13 = inlined_call_operand.vmem [shape: f32[1,128], index: 13, kind: input, shape index: {}]   ;;  %s3283_s19 = inlined_call_operand.vmem [shape: f32[8,64], index: 19, kind: output, shape index: {1}]   ;;  %s3284_s16 = inlined_call_operand.vmem [shape: f32[64,256], index: 16, kind: input, shape index: {}]   ;;  %s3285_s15 = inlined_call_operand.vmem [shape: f32[1,64], index: 15, kind: input, shape index: {}]   ;;  %s3286_s17 = inlined_call_operand.vmem [shape: f32[128,64], index: 17, kind: input, shape index: {}]   ;;  %s3287_s18 = inlined_call_operand.vmem [shape: f32[8,64], index: 18, kind: output, shape index: {0}]  }
   0x1   :  { %3289 = sst [smem:[#allocation2_spill]] %s3268_s0  ;;  %165 = vmatprep.mubr.f32.mxu0 %v2560_v18  ;;  %2191 = vmatprep.subr.mxu1 %v2560_v18  ;;  %vm181_vm4 = vcmask 64512   ;;  %v522_v47 = vld [vmem:[%s3272_s6] sm:$0xff]  ;;  %v523_v48 = vld [vmem:[%s3272_s6 + $0x8] sm:$0xff]  ;;  %v2562_v50 = vmov 0.0|0.0   ;;  %v524_v51 = vld [vmem:[%s3272_s6 + $0x10] sm:$0xff] }
   0x2   :  { %3290 = sst [smem:[#allocation3_spill]] %s3269_s1  ;;  %s3294_s20 = sld [smem:[#allocation2_spill]]  ;;  %2193 = vmatprep.mubr.msk.f32.mxu1 %vm2561_vm1, %v2560_v18  ;;  %v2738_v38 = vshrl.u32 %v172_v37, 7  ;;  %v2740_v39 = vand.u32 127, %v172_v37  ;;  %v2384_v49 = vpack.c.bf16 %v523_v48, %v522_v47  ;;  %v525_v52 = vld [vmem:[%s3272_s6 + $0x18] sm:$0xff]  ;;  %v526_v54 = vld [vmem:[%s3272_s6 + $0x20] sm:$0xff] }
   0x3   :  { %3291 = sst [smem:[#allocation4_spill]] %s3270_s3  ;;  %v2387_v53 = vpack.c.bf16 %v525_v52, %v524_v51  ;;  %v527_v55 = vld [vmem:[%s3272_s6 + $0x28] sm:$0xff]  ;;  %v528_v57 = vld [vmem:[%s3272_s6 + $0x30] sm:$0xff]  ;;  %v529_v58 = vld [vmem:[%s3272_s6 + $0x38] sm:$0xff]  ;;  %vm610_vm7 = vcmask 31744   ;;  %vm680_vm8 = vcmask 1043456  }
   0x4   :  { %3292 = sst [smem:[#allocation5_spill]] %s3271_s2  ;;  %s3296_s23 = sld [smem:[#allocation4_spill]]  ;;  %v177_v40 = vsub.s32 %v2738_v38, %v2740_v39  ;;  %v2390_v56 = vpack.c.bf16 %v527_v55, %v526_v54  ;;  %v2393_v59 = vpack.c.bf16 %v529_v58, %v528_v57  ;;  %v530_v60 = vld [vmem:[%s3272_s6 + $0x40] sm:$0xff]  ;;  %v531_v61 = vld [vmem:[%s3272_s6 + $0x48] sm:$0xff]  ;;  %v532_v63 = vld [vmem:[%s3272_s6 + $0x50] sm:$0xff]  ;;  %vm631_vm9 = vcmask 130048  }
   0x5   :  { %3293 = sst [smem:[#allocation6_spill]] %s3282_s13  ;;  %s3295_s13 = sld [smem:[#allocation3_spill]]  ;;  %v2396_v62 = vpack.c.bf16 %v531_v61, %v530_v60  ;;  %v2068_v48 = vld [vmem:[%s3275_s8] ss:$0 sm:$0xff]  ;;  %vm776_vm10 = vcmp.eq.s32.totalorder %v2738_v38, %v2740_v39  ;;  %vm893_vm14 = vcmp.eq.s32.totalorder %v2738_v38, 0  ;;  %vm1013_vm15 = vcmp.eq.s32.totalorder %v2738_v38, 1 }
   0x6   :  { %s3297_s2 = sld [smem:[#allocation5_spill]]  ;;  %vm178_vm2 = vcmp.eq.s32.totalorder %v177_v40, 3  ;;  %vm343_vm3 = vcmp.eq.s32.totalorder %v177_v40, 1  ;;  %vm261_vm5 = vcmp.eq.s32.totalorder %v177_v40, 2  ;;  %vm425_vm6 = vcmp.eq.s32.totalorder %v177_v40, 0  ;;  %s2566_s21 = smov 20  }
   0x7   :  { %v2057_v41 = vsel %vm178_vm2, 1.0, %v2560_v18  ;;  %v2061_v44 = vsel %vm343_vm3, 1.0, %v2560_v18  ;;  %v2059_v45 = vsel %vm261_vm5, 1.0, %v2560_v18  ;;  %v2063_v46 = vsel %vm425_vm6, 1.0, %v2560_v18 }
   0x8   :  { %v61_v0 = vld [vmem:[%s3294_s20] sm:$0xff]  ;;  %vm1133_vm2 = vcmp.eq.s32.totalorder %v2738_v38, 2  ;;  %vm1253_vm3 = vcmp.eq.s32.totalorder %v2738_v38, 3  ;;  %vm1493_vm5 = vcmp.eq.s32.totalorder %v2738_v38, 5  ;;  %vm1613_vm6 = vcmp.eq.s32.totalorder %v2738_v38, 6 }
   0xa   :  { %v83_v5 = vld [vmem:[%s3296_s23 + $0x8] sm:$0xff]  ;;  %v85_v6 = vld [vmem:[%s3296_s23 + $0x18] sm:$0xff]  ;;  %v82_v8 = vld [vmem:[%s3296_s23] sm:$0xff] }
   0xb   :  { %v62_v1 = vld [vmem:[%s3295_s13] sm:$0xff]  ;;  %v2367_v7 = vpack.c.bf16 %v85_v6, %v83_v5  ;;  %v84_v9 = vld [vmem:[%s3296_s23 + $0x10] sm:$0xff]  ;;  %v87_v11 = vld [vmem:[%s3296_s23 + $0x28] sm:$0xff] }
   0xc   :  { %v2673_v2 = vadd.f32 %v62_v1, %v61_v0  ;;  %v2369_v10 = vpack.c.bf16 %v84_v9, %v82_v8  ;;  %v89_v12 = vld [vmem:[%s3296_s23 + $0x38] sm:$0xff]  ;;  %v86_v13 = vld [vmem:[%s3296_s23 + $0x20] sm:$0xff]  ;;  %v88_v15 = vld [vmem:[%s3296_s23 + $0x30] sm:$0xff]  ;;  %v2823_v9 = vsub.s32 0, %v2738_v38 }
   0xd   :  { %2368 = vmatprep.subr.bf16.mxu0 %v2367_v7  ;;  %v2371_v14 = vpack.c.bf16 %v89_v12, %v87_v11  ;;  %v91_v16 = vld [vmem:[%s3296_s23 + $0x48] sm:$0xff]  ;;  %v93_v17 = vld [vmem:[%s3296_s23 + $0x58] sm:$0xff]  ;;  %v2373_v19 = vpack.c.bf16 %v88_v15, %v86_v13  ;;  %v90_v21 = vld [vmem:[%s3296_s23 + $0x40] sm:$0xff]  ;;  %v2832_v12 = vsub.s32 2, %v2738_v38  ;;  %v2835_v13 = vsub.s32 3, %v2738_v38 }
   0xe   :  { %v65_v3 = vmul.f32 %v2673_v2, %v2673_v2  ;;  %2370 = vmatpush1.bf16.msra.mxu0 %v2369_v10  ;;  %v2375_v20 = vpack.c.bf16 %v93_v17, %v91_v16  ;;  %v92_v22 = vld [vmem:[%s3296_s23 + $0x50] sm:$0xff]  ;;  %v95_v23 = vld [vmem:[%s3296_s23 + $0x68] sm:$0xff]  ;;  %v97_v24 = vld [vmem:[%s3296_s23 + $0x78] sm:$0xff]  ;;  %v2826_v10 = vsub.s32 1, %v2738_v38 }
   0xf   :  { %2372 = vmatprep.subr.bf16.mxu0 %v2371_v14  ;;  %v2377_v25 = vpack.c.bf16 %v92_v22, %v90_v21  ;;  %v2379_v26 = vpack.c.bf16 %v97_v24, %v95_v23  ;;  %v94_v27 = vld [vmem:[%s3296_s23 + $0x60] sm:$0xff]  ;;  %v96_v28 = vld [vmem:[%s3296_s23 + $0x70] sm:$0xff]  ;;  %v533_v0 = vld [vmem:[%s3272_s6 + $0x58] sm:$0xff] }
  0x10   :  { %v67_v4 = vsel %vm66_vm0, %v65_v3, 0.0  ;;  %v2381_v29 = vpack.c.bf16 %v96_v28, %v94_v27  ;;  %v2055_v34 = vld [vmem:[%s3297_s2] ss:$0 sm:$0xff]  ;;  %v2399_v1 = vpack.c.bf16 %v533_v0, %v532_v63  ;;  %v536_v6 = vld [vmem:[%s3272_s6 + $0x70] sm:$0xff]  ;;  %v537_v7 = vld [vmem:[%s3272_s6 + $0x78] sm:$0xff] }
  0x11   :  { %68 = vadd.xlane.f32.xlu0 %v67_v4  ;;  %v534_v3 = vld [vmem:[%s3272_s6 + $0x60] sm:$0xff]  ;;  %v535_v4 = vld [vmem:[%s3272_s6 + $0x68] sm:$0xff]  ;;  %v2405_v8 = vpack.c.bf16 %v537_v7, %v536_v6 }
  0x12   :  { %2374 = vmatpush1.bf16.msra.mxu0 %v2373_v19  ;;  %v2402_v5 = vpack.c.bf16 %v535_v4, %v534_v3  ;;  %v176_v11 = vld [vmem:[%s3273_s4] sm:$0xf] }
  0x13   :  { %2376 = vmatprep.subr.bf16.mxu0 %v2375_v20  ;;  %v258_v15 = vrot.slane %v176_v11, %v2823_v9  ;;  %v340_v17 = vrot.slane %v176_v11, %v2826_v10  ;;  %v422_v20 = vrot.slane %v176_v11, %v2832_v12  ;;  %v504_v22 = vrot.slane %v176_v11, %v2835_v13 }
  0x16   :  { %2378 = vmatpush1.bf16.msra.mxu0 %v2377_v25 }
  0x17   :  { %2380 = vmatprep.subr.bf16.mxu0 %v2379_v26 }
  0x1a   :  { %2382 = vmatpush1.bf16.msra.mxu0 %v2381_v29 }
  0x1b   :  { %2181 = vmatprep.subr.mxu0 %v2560_v18 }
  0x9e   :  { %v69_v30 = vpop.xlane.xlu0 %68 }
  0x9f   :  { %v71_v31 = vmul.f32 0.015625, %v69_v30 }
  0xa1   :  { %v72_v32 = vadd.f32 1e-06, %v71_v31 }
  0xa3   :  { %2502 = vrsqrt.f32 %v72_v32 }
  0xad   :  { %v2503_v33 = vpop.eup %2502 }
  0xae   :  { %v74_v35 = vmul.f32 %v2503_v33, %v2673_v2  ;;  %v2065_v33 = vld [vmem:[%s3274_s5] ss:$0 sm:$0xff]  ;;  %s2563_s5 = smov 124  }
  0xb0   :  { %v81_v36 = vmul.f32 %v2055_v34, %v74_v35 }
  0xb2   :  { %2056 = vmatmul.mubr.msk.f32.vlgmr.msra.gmra.mrb[0].mxu0 %vm66_vm0, %v81_v36 }
  0xb3   :  { %2183 = vmatprep.mubr.msk.f32.mxu0 %vm2561_vm1, %v2560_v18 }
 0x185   :  { %v167_v42 = vpop.f32.mrb[0].mxu0 }
 0x186   :  { %v2745_v43 = vpop.f32.mrb[1].mxu0  ;;  %2182 = vmatpush3.msra.mxu0 %v167_v42  ;;  %2192 = vmatpush3.msra.mxu1 %v167_v42 }
 0x187   :  { %2184 = vmatmul.mubr.msk.f32.vlgmr.msra.gmra.mrb[2].mxu0 %vm181_vm4, %v2057_v41  ;;  %2186 = vmatprep.subr.mxu0 %v2560_v18 }
 0x188   :  { %2196 = vmatprep.subr.mxu1 %v2560_v18  ;;  %2187 = vmatpush3.msra.mxu0 %v167_v42 }
 0x189   :  { %2194 = vmatmul.mubr.msk.f32.vlgmr.msra.gmra.mrb[0].mxu1 %vm181_vm4, %v2061_v44  ;;  %2188 = vmatprep.mubr.msk.f32.mxu0 %vm2561_vm1, %v2560_v18 }
 0x18a   :  { %2197 = vmatpush3.msra.mxu1 %v167_v42  ;;  %2198 = vmatprep.mubr.msk.f32.mxu1 %vm2561_vm1, %v2560_v18 }
 0x18b   :  { %2189 = vmatmul.mubr.msk.f32.vlgmr.msra.gmra.mrb[4].mxu0 %vm181_vm4, %v2059_v45  ;;  %2236 = vmatprep.subr.mxu0 %v2560_v18 }
 0x18c   :  { %2238 = vmatprep.mubr.msk.f32.mxu0 %vm2561_vm1, %v2560_v18  ;;  %2383 = vmatprep.subr.bf16.mxu1 %v2562_v50 }
 0x18d   :  { %2199 = vmatmul.mubr.msk.f32.vlgmr.msra.gmra.mrb[2].mxu1 %vm181_vm4, %v2063_v46  ;;  %vm1373_vm4 = vcmp.eq.s32.totalorder %v2738_v38, 4 }
 0x18e   :  { %2233 = vmatprep.mubr.msk.f32.mxu1 %vm2561_vm1, %v2560_v18  ;;  %2385 = vmatpush3.bf16.msra.mxu1 %v2384_v49  ;;  %v669_v49 = vld [vmem:[%s3276_s10] sm:$0xf] }
 0x18f   :  { %2386 = vmatprep.subr.bf16.mxu1 %v2562_v50  ;;  %2237 = vmatpush3.msk.msra.mxu0 %vm680_vm8, %v669_v49 }
 0x190   :  { %2407 = vmatprep.subr.bf16.mxu0 %v2562_v50 }
 0x192   :  { %2388 = vmatpush3.bf16.msra.mxu1 %v2387_v53 }
 0x193   :  { %2389 = vmatprep.subr.bf16.mxu1 %v2562_v50 }
 0x196   :  { %2391 = vmatpush3.bf16.msra.mxu1 %v2390_v56 }
 0x197   :  { %2392 = vmatprep.subr.bf16.mxu1 %v2562_v50 }
 0x19a   :  { %2394 = vmatpush3.bf16.msra.mxu1 %v2393_v59  ;;  %v2067_v59 = vld [vmem:[%s3277_s7] ss:$0 sm:$0xff] }
 0x19b   :  { %2395 = vmatprep.subr.bf16.mxu1 %v2562_v50 }
 0x19e   :  { %2397 = vmatpush3.bf16.msra.mxu1 %v2396_v62 }
 0x19f   :  { %2398 = vmatprep.subr.bf16.mxu1 %v2562_v50 }
 0x1a2   :  { %2400 = vmatpush3.bf16.msra.mxu1 %v2399_v1 }
 0x1a3   :  { %2401 = vmatprep.subr.bf16.mxu1 %v2562_v50 }
 0x1a6   :  { %2403 = vmatpush3.bf16.msra.mxu1 %v2402_v5 }
 0x1a7   :  { %2404 = vmatprep.subr.bf16.mxu1 %v2562_v50 }
 0x1aa   :  { %2406 = vmatpush3.bf16.msra.mxu1 %v2405_v8 }
 0x1ab   :  { %2428 = vmatprep.subr.bf16.mxu1 %v2562_v50 }
 0x25a   :  { %v251_v14 = vpop.f32.mrb[2].mxu0 }
 0x25b   :  { %v2185_v16 = vpop.f32.mrb[3].mxu0  ;;  %v259_v24 = vmul.f32 %v258_v15, %v251_v14  ;;  %v2069_v14 = vld [vmem:[%s3278_s9] ss:$0 sm:$0xff]  ;;  %v2885_v15 = vsub.s32 4, %v2738_v38 }
 0x25c   :  { %v415_v19 = vpop.f32.mrb[0].mxu1 }
 0x25d   :  { %v2195_v21 = vpop.f32.mrb[1].mxu1  ;;  %v423_v29 = vmul.f32 %v422_v20, %v415_v19  ;;  %v2894_v20 = vsub.s32 6, %v2738_v38 }
 0x25e   :  { %v333_v23 = vpop.f32.mrb[4].mxu0 }
 0x25f   :  { %v341_v25 = vmul.f32 %v340_v17, %v333_v23  ;;  %v2190_v26 = vpop.f32.mrb[5].mxu0  ;;  %v2889_v17 = vsub.s32 5, %v2738_v38 }
 0x260   :  { %v497_v27 = vpop.f32.mrb[2].mxu1 }
 0x261   :  { %v342_v28 = vadd.f32 %v341_v25, %v259_v24  ;;  %v505_v30 = vmul.f32 %v504_v22, %v497_v27  ;;  %v2200_v31 = vpop.f32.mrb[3].mxu1  ;;  %v2899_v22 = vsub.s32 7, %v2738_v38 }
 0x263   :  { %v424_v32 = vadd.f32 %v423_v29, %v342_v28 }
 0x265   :  { %v506_v34 = vadd.f32 %v505_v30, %v424_v32 }
 0x267   :  { %v514_v35 = vadd.f32 %v2065_v33, %v506_v34 }
 0x269   :  { %v2066_v36 = vmul.f32 -1.442695, %v514_v35 }
 0x26b   :  { %2504 = vpow2.f32 %v2066_v36 }
 0x275   :  { %v2505_v37 = vpop.eup %2504 }
 0x276   :  { %v518_v40 = vadd.f32 1.0, %v2505_v37 }
 0x278   :  { %2506 = vrcp.f32 %v518_v40 }
 0x282   :  { %v2507_v41 = vpop.eup %2506 }
 0x283   :  { %v2844_v42 = vmul.f32 %v2507_v41, %v514_v35 }
 0x285   :  { %2234 = vmatmul.mubr.f32.vlgmr.msra.gmra.mrb[4].mxu1 %v2844_v42 }
 0x286   :  { %2294 = vmatprep.mubr.msk.f32.mxu1 %vm2561_vm1, %v2560_v18 }
 0x358   :  { %v2849_v44 = vpop.f32.mrb[4].mxu1 }
 0x359   :  { %v2235_v45 = vpop.f32.mrb[5].mxu1  ;;  %v609_v46 = vmul.f32 %v2849_v44, %v2849_v44 }
 0x35a   :  { %v775_v45 = vadd.s32 8, %v2738_v38 }
 0x35b   :  { %628 = vrot.lane.b32.xlu1 %v609_v46, %s2563_s5  ;;  %v611_v47 = vsel %vm610_vm7, %v609_v46, 0.0 }
 0x35c   :  { %612 = vadd.xlane.f32.xlu0 %v611_v47  ;;  %vm777_vm11 = vcmp.eq.s32.totalorder %v775_v45, %v2740_v39 }
 0x35d   :  { %v2074_v47 = vsel %vm777_vm11, 1.0, %v2560_v18 }
 0x372   :  { %650 = vrot.lane.b32.xlu0 %v609_v46, %s2564_s26  ;;  %v2073_v46 = vsel %vm776_vm10, 1.0, %v2560_v18 }
 0x376   :  { %645 = vrot.lane.b32.xlu0 %v2068_v48, %s2565_s29 }
 0x3cd   :  { %v629_v51 = vpop.permute.xlu1 %628 }
 0x3ce   :  { %v632_v52 = vsel %vm631_vm9, %v629_v51, 0.0 }
 0x3cf   :  { %633 = vadd.xlane.f32.xlu1 %v632_v52 }
 0x3e9   :  { %v613_v53 = vpop.xlane.xlu0 %612 }
 0x3ea   :  { %v615_v54 = vmul.f32 0.25, %v613_v53 }
 0x3ec   :  { %v616_v55 = vadd.f32 1e-06, %v615_v54 }
 0x3ed   :  { %v651_v56 = vpop.permute.xlu0 %650 }
 0x3ee   :  { %2508 = vrsqrt.f32 %v616_v55  ;;  %v653_v57 = vsel %vm631_vm9, %v651_v56, 0.0 }
 0x3ef   :  { %654 = vadd.xlane.f32.xlu0 %v653_v57 }
 0x3f1   :  { %v646_v3 = vpop.permute.xlu0 %645 }
 0x3f8   :  { %v2509_v58 = vpop.eup %2508 }
 0x3f9   :  { %v618_v60 = vmul.f32 %v2509_v58, %v2849_v44 }
 0x3fb   :  { %v625_v61 = vmul.f32 %v2067_v59, %v618_v60 }
 0x3fd   :  { %2239 = vmatmul.mubr.msk.f32.vlgmr.msra.gmra.mrb[6].mxu0 %vm610_vm7, %v625_v61  ;;  %vm1733_vm7 = vcmp.eq.s32.totalorder %v2738_v38, 7 }
 0x3fe   :  { %2245 = vmatprep.mubr.msk.f32.mxu0 %vm2561_vm1, %v2560_v18 }
 0x45c   :  { %v634_v62 = vpop.xlane.xlu1 %633 }
 0x45d   :  { %v636_v63 = vmul.f32 0.0625, %v634_v62 }
 0x45f   :  { %v637_v0 = vadd.f32 1e-06, %v636_v63 }
 0x461   :  { %2510 = vrsqrt.f32 %v637_v0 }
 0x46b   :  { %v2511_v1 = vpop.eup %2510 }
 0x46c   :  { %v639_v4 = vmul.f32 %v2511_v1, %v2849_v44 }
 0x46e   :  { %v648_v5 = vmul.f32 %v646_v3, %v639_v4 }
 0x470   :  { %v1145_v6 = vrot.slane %v648_v5, %v2835_v13  ;;  %v785_v7 = vrot.slane %v648_v5, %v2823_v9  ;;  %v905_v8 = vrot.slane %v648_v5, %v2826_v10  ;;  %v1025_v11 = vrot.slane %v648_v5, %v2832_v12 }
 0x471   :  { %v1265_v16 = vrot.slane %v648_v5, %v2885_v15  ;;  %v1385_v19 = vrot.slane %v648_v5, %v2889_v17  ;;  %v1505_v21 = vrot.slane %v648_v5, %v2894_v20  ;;  %v1625_v23 = vrot.slane %v648_v5, %v2899_v22 }
 0x472   :  { %1147 = vrot.lane.b32.xlu0 %v1145_v6, %s2563_s5  ;;  %787 = vrot.lane.b32.xlu1 %v785_v7, %s2563_s5 }
 0x476   :  { %907 = vrot.lane.b32.xlu1 %v905_v8, %s2563_s5 }
 0x47a   :  { %1027 = vrot.lane.b32.xlu1 %v1025_v11, %s2563_s5 }
 0x47c   :  { %v655_v26 = vpop.xlane.xlu0 %654 }
 0x47d   :  { %v656_v27 = vmul.f32 0.0625, %v655_v26 }
 0x47e   :  { %665 = vrot.lane.b32.xlu1 %v2069_v14, %s2566_s21 }
 0x47f   :  { %v657_v28 = vadd.f32 1e-06, %v656_v27 }
 0x481   :  { %2512 = vrsqrt.f32 %v657_v28 }
 0x482   :  { %1267 = vrot.lane.b32.xlu1 %v1265_v16, %s2563_s5 }
 0x486   :  { %1387 = vrot.lane.b32.xlu1 %v1385_v19, %s2563_s5 }
 0x48a   :  { %1507 = vrot.lane.b32.xlu1 %v1505_v21, %s2563_s5 }
 0x48b   :  { %v2513_v31 = vpop.eup %2512 }
 0x48c   :  { %v659_v33 = vmul.f32 %v2513_v31, %v2849_v44 }
 0x48e   :  { %1627 = vrot.lane.b32.xlu1 %v1625_v23, %s2563_s5 }
 0x4d0   :  { %v2904_v24 = vpop.f32.mrb[6].mxu0 }
 0x4d1   :  { %v2240_v25 = vpop.f32.mrb[7].mxu0 }
 0x4e4   :  { %v788_v29 = vpop.permute.xlu1 %787  ;;  %v1148_v58 = vpop.permute.xlu0 %1147 }
 0x4e5   :  { %v790_v48 = vmul.f32 %v2073_v46, %v788_v29  ;;  %v791_v49 = vmul.f32 %v2074_v47, %v788_v29  ;;  %v1151_v60 = vmul.f32 %v2074_v47, %v1148_v58  ;;  %v1150_v62 = vmul.f32 %v2073_v46, %v1148_v58 }
 0x4e7   :  { %v792_v52 = vsel %vm631_vm9, %v790_v48, 0.0  ;;  %v795_v54 = vsel %vm631_vm9, %v791_v49, 0.0  ;;  %v1155_v3 = vsel %vm631_vm9, %v1151_v60, 0.0  ;;  %v1152_v5 = vsel %vm631_vm9, %v1150_v62, 0.0 }
 0x4e8   :  { %v908_v30 = vpop.permute.xlu1 %907 }
 0x4e9   :  { %v911_v51 = vmul.f32 %v2074_v47, %v908_v30  ;;  %v910_v53 = vmul.f32 %v2073_v46, %v908_v30 }
 0x4eb   :  { %v915_v57 = vsel %vm631_vm9, %v911_v51, 0.0  ;;  %v912_v59 = vsel %vm631_vm9, %v910_v53, 0.0 }
 0x4ec   :  { %v1028_v32 = vpop.permute.xlu1 %1027 }
 0x4ed   :  { %v1031_v56 = vmul.f32 %v2074_v47, %v1028_v32  ;;  %v1030_v39 = vmul.f32 %v2073_v46, %v1028_v32 }
 0x4ef   :  { %v1035_v61 = vsel %vm631_vm9, %v1031_v56, 0.0  ;;  %v1032_v0 = vsel %vm631_vm9, %v1030_v39, 0.0  ;;  %v2958_v56 = vld [vmem:[%s3280_s12] sm:$0xff] }
 0x4f0   :  { %v666_v34 = vpop.permute.xlu1 %665 }
 0x4f1   :  { %v2907_v35 = vmul.f32 %v666_v34, %v659_v33  ;;  %v2070_v34 = vld [vmem:[%s3279_s11] ss:$0 sm:$0xff] }
 0x4f3   :  { %819 = vrot.lane.b32.xlu0 %v2907_v35, %s2564_s26  ;;  %v938_v36 = vrot.slane %v2907_v35, 1  ;;  %v1058_v37 = vrot.slane %v2907_v35, 2  ;;  %v1298_v40 = vrot.slane %v2907_v35, 4  ;;  %v1178_v41 = vrot.slane %v2907_v35, 3 }
 0x4f4   :  { %v1418_v44 = vrot.slane %v2907_v35, 5  ;;  %v1268_v55 = vpop.permute.xlu1 %1267  ;;  %v1658_v32 = vrot.slane %v2907_v35, 7  ;;  %v1538_v33 = vrot.slane %v2907_v35, 6 }
 0x4f5   :  { %939 = vrot.lane.b32.xlu1 %v938_v36, %s2564_s26  ;;  %v1271_v1 = vmul.f32 %v2074_v47, %v1268_v55  ;;  %v1270_v4 = vmul.f32 %v2073_v46, %v1268_v55  ;;  %v751_v36 = vadd.f32 %v2070_v34, %v2904_v24 }
 0x4f7   :  { %1059 = vrot.lane.b32.xlu0 %v1058_v37, %s2564_s26  ;;  %v1275_v8 = vsel %vm631_vm9, %v1271_v1, 0.0  ;;  %v1272_v14 = vsel %vm631_vm9, %v1270_v4, 0.0  ;;  %v757_v37 = vand.u32 2147483647, %v751_v36  ;;  %v754_v53 = vmax.f32 %v751_v36, 0.0 }
 0x4f8   :  { %v1388_v63 = vpop.permute.xlu1 %1387  ;;  %vm755_vm13 = vcmp.ne.f32.partialorder %v751_v36, %v751_v36 }
 0x4f9   :  { %1299 = vrot.lane.b32.xlu1 %v1298_v40, %s2564_s26  ;;  %v1391_v7 = vmul.f32 %v2074_v47, %v1388_v63  ;;  %v1390_v11 = vmul.f32 %v2073_v46, %v1388_v63  ;;  %v758_v40 = vsub.f32 0.0, %v757_v37 }
 0x4fb   :  { %1179 = vrot.lane.b32.xlu0 %v1178_v41, %s2564_s26  ;;  %v1395_v19 = vsel %vm631_vm9, %v1391_v7, 0.0  ;;  %v1392_v25 = vsel %vm631_vm9, %v1390_v11, 0.0  ;;  %v759_v41 = vmul.f32 1.442695, %v758_v40 }
 0x4fc   :  { %v1508_v6 = vpop.permute.xlu1 %1507 }
 0x4fd   :  { %v1511_v16 = vmul.f32 %v2074_v47, %v1508_v6  ;;  %v1510_v21 = vmul.f32 %v2073_v46, %v1508_v6  ;;  %2514 = vpow2.f32 %v759_v41 }
 0x4ff   :  { %1419 = vrot.lane.b32.xlu0 %v1418_v44, %s2564_s26  ;;  %v1515_v27 = vsel %vm631_vm9, %v1511_v16, 0.0  ;;  %v1512_v28 = vsel %vm631_vm9, %v1510_v21, 0.0 }
 0x500   :  { %v1628_v23 = vpop.permute.xlu1 %1627 }
 0x501   :  { %v1630_v26 = vmul.f32 %v2073_v46, %v1628_v23  ;;  %v1631_v29 = vmul.f32 %v2074_v47, %v1628_v23 }
 0x503   :  { %v1632_v30 = vsel %vm631_vm9, %v1630_v26, 0.0  ;;  %v1635_v31 = vsel %vm631_vm9, %v1631_v29, 0.0 }
 0x507   :  { %v2515_v44 = vpop.eup %2514 }
 0x508   :  { %v761_v45 = vadd.f32 1.0, %v2515_v44  ;;  %v764_v46 = vmul.f32 -0.5, %v2515_v44  ;;  %v767_v49 = vand.u32 2147483647, %v2515_v44 }
 0x50a   :  { %2516 = vlog2.f32 %v761_v45  ;;  %v765_v48 = vadd.f32 1.0, %v764_v46  ;;  %vm768_vm12 = vcmp.lt.f32.partialorder %v767_v49, 0.0004427343 }
 0x50c   :  { %v766_v51 = vmul.f32 %v2515_v44, %v765_v48 }
 0x514   :  { %v2517_v47 = vpop.eup %2516 }
 0x515   :  { %v763_v35 = vmul.f32 0.6931472, %v2517_v47 }
 0x51d   :  { %793 = vadd.xlane.f32.xlu1 %v792_v52  ;;  %v769_v52 = vsel %vm768_vm12, %v766_v51, %v763_v35 }
 0x51e   :  { %796 = vadd.xlane.f32.xlu0 %v795_v54  ;;  %v770_v54 = vadd.f32 %v769_v52, %v754_v53 }
 0x520   :  { %v2951_v55 = vsel %vm755_vm13, %v751_v36, %v770_v54 }
 0x521   :  { %916 = vadd.xlane.f32.xlu1 %v915_v57  ;;  %v801_v24 = vrot.slane %v2951_v55, %v2823_v9  ;;  %v2963_v57 = vld [vmem:[%s3280_s12 + $0x8] sm:$0xff]  ;;  %v921_v60 = vrot.slane %v2951_v55, %v2826_v10  ;;  %v1041_v1 = vrot.slane %v2951_v55, %v2832_v12  ;;  %v1161_v7 = vrot.slane %v2951_v55, %v2835_v13 }
 0x522   :  { %913 = vadd.xlane.f32.xlu0 %v912_v59  ;;  %v1281_v21 = vrot.slane %v2951_v55, %v2885_v15  ;;  %v2990_v23 = vmul.f32 %v2951_v55, %v2844_v42  ;;  %v1401_v29 = vrot.slane %v2951_v55, %v2889_v17  ;;  %v1521_v48 = vrot.slane %v2951_v55, %v2894_v20 }
 0x523   :  { %v802_v39 = vmul.f32 %v801_v24, %v2958_v56  ;;  %v803_v59 = vmul.f32 %v801_v24, %v2963_v57  ;;  %v1043_v6 = vmul.f32 %v1041_v1, %v2963_v57  ;;  %v1162_v26 = vmul.f32 %v1161_v7, %v2958_v56 }
 0x524   :  { %v813_v34 = vrot.slane %v2990_v23, %v2823_v9  ;;  %v1282_v37 = vmul.f32 %v1281_v21, %v2958_v56  ;;  %v933_v41 = vrot.slane %v2990_v23, %v2826_v10  ;;  %v1403_v47 = vmul.f32 %v1401_v29, %v2963_v57 }
 0x525   :  { %1036 = vadd.xlane.f32.xlu1 %v1035_v61  ;;  %v804_v61 = vmul.f32 1.442695, %v802_v39  ;;  %v806_v63 = vmul.f32 1.442695, %v803_v59  ;;  %v1046_v16 = vmul.f32 1.442695, %v1043_v6  ;;  %v1402_v54 = vmul.f32 %v1401_v29, %v2958_v56 }
 0x526   :  { %1033 = vadd.xlane.f32.xlu0 %v1032_v0  ;;  %v922_v0 = vmul.f32 %v921_v60, %v2958_v56  ;;  %v1164_v36 = vmul.f32 1.442695, %v1162_v26  ;;  %v1284_v53 = vmul.f32 1.442695, %v1282_v37  ;;  %v1641_v26 = vrot.slane %v2951_v55, %v2899_v22 }
 0x527   :  { %2518 = vpow2.f32 %v804_v61  ;;  %v1173_v37 = vrot.slane %v2990_v23, %v2835_v13 }
 0x528   :  { %2520 = vpow2.f32 %v806_v63  ;;  %v1643_v13 = vmul.f32 %v1641_v26, %v2963_v57 }
 0x529   :  { %1156 = vadd.xlane.f32.xlu1 %v1155_v3  ;;  %v923_v3 = vmul.f32 %v921_v60, %v2963_v57 }
 0x52a   :  { %1153 = vadd.xlane.f32.xlu0 %v1152_v5  ;;  %v924_v5 = vmul.f32 1.442695, %v922_v0  ;;  %v1406_v0 = vmul.f32 1.442695, %v1403_v47 }
 0x52b   :  { %v926_v11 = vmul.f32 1.442695, %v923_v3 }
 0x52c   :  { %2522 = vpow2.f32 %v924_v5 }
 0x52d   :  { %1276 = vadd.xlane.f32.xlu1 %v1275_v8  ;;  %2524 = vpow2.f32 %v926_v11  ;;  %v1404_v11 = vmul.f32 1.442695, %v1402_v54 }
 0x52e   :  { %1273 = vadd.xlane.f32.xlu0 %v1272_v14  ;;  %v1042_v14 = vmul.f32 %v1041_v1, %v2958_v56  ;;  %2526 = vpow2.f32 %v1046_v16  ;;  %v1523_v1 = vmul.f32 %v1521_v48, %v2963_v57 }
 0x531   :  { %1396 = vadd.xlane.f32.xlu1 %v1395_v19  ;;  %v1163_v19 = vmul.f32 %v1161_v7, %v2963_v57  ;;  %v1053_v7 = vrot.slane %v2990_v23, %v2832_v12 }
 0x532   :  { %1393 = vadd.xlane.f32.xlu0 %v1392_v25  ;;  %v1044_v25 = vmul.f32 1.442695, %v1042_v14  ;;  %v1522_v14 = vmul.f32 %v1521_v48, %v2958_v56 }
 0x534   :  { %2528 = vpow2.f32 %v1044_v25 }
 0x535   :  { %1516 = vadd.xlane.f32.xlu1 %v1515_v27 }
 0x536   :  { %1513 = vadd.xlane.f32.xlu0 %v1512_v28 }
 0x539   :  { %1633 = vadd.xlane.f32.xlu1 %v1632_v30  ;;  %v2519_v30 = vpop.eup %2518 }
 0x53a   :  { %v808_v44 = vmul.f32 0.0, %v2519_v30 }
 0x53d   :  { %1636 = vadd.xlane.f32.xlu1 %v1635_v31  ;;  %v1166_v31 = vmul.f32 1.442695, %v1163_v19 }
 0x53f   :  { %2530 = vpow2.f32 %v1166_v31 }
 0x540   :  { %2532 = vpow2.f32 %v1164_v36 }
 0x54c   :  { %1659 = vrot.lane.b32.xlu0 %v1658_v32, %s2564_s26  ;;  %v1283_v32 = vmul.f32 %v1281_v21, %v2963_v57 }
 0x54e   :  { %1539 = vrot.lane.b32.xlu1 %v1538_v33, %s2564_s26  ;;  %v2521_v33 = vpop.eup %2520  ;;  %v1286_v51 = vmul.f32 1.442695, %v1283_v32  ;;  %v1526_v32 = vmul.f32 1.442695, %v1523_v1  ;;  %s3298_s26 = sld [smem:[#allocation6_spill]] }
 0x54f   :  { %v809_v49 = vmul.f32 0.0, %v2521_v33  ;;  %v2523_v24 = vpop.eup %2522 }
 0x550   :  { %v2525_v59 = vpop.eup %2524  ;;  %2534 = vpow2.f32 %v1286_v51 }
 0x551   :  { %2536 = vpow2.f32 %v1284_v53  ;;  %v2527_v16 = vpop.eup %2526  ;;  %v1293_v53 = vrot.slane %v2990_v23, %v2885_v15 }
 0x552   :  { %v2529_v29 = vpop.eup %2528  ;;  %2538 = vpow2.f32 %v1406_v0 }
 0x553   :  { %2540 = vpow2.f32 %v1404_v11  ;;  %v2531_v55 = vpop.eup %2530 }
 0x554   :  { %v2533_v47 = vpop.eup %2532  ;;  %2542 = vpow2.f32 %v1526_v32 }
 0x565   :  { %v2965_v58 = vpop.permute.xlu0 %819 }
 0x567   :  { %v2977_v4 = vpop.permute.xlu1 %939 }
 0x569   :  { %v2971_v62 = vpop.permute.xlu0 %1059 }
 0x56b   :  { %v2993_v27 = vpop.permute.xlu1 %1299 }
 0x56d   :  { %v2982_v8 = vpop.permute.xlu0 %1179 }
 0x571   :  { %v2995_v28 = vpop.permute.xlu0 %1419 }
 0x5aa   :  { %v794_v40 = vpop.xlane.xlu1 %793 }
 0x5ab   :  { %v814_v45 = vmul.f32 %v813_v34, %v794_v40  ;;  %v797_v46 = vpop.xlane.xlu0 %796  ;;  %v1524_v40 = vmul.f32 1.442695, %v1522_v14 }
 0x5ac   :  { %v815_v35 = vmul.f32 %v813_v34, %v797_v46  ;;  %v1642_v46 = vmul.f32 %v1641_v26, %v2958_v56  ;;  %v2535_v56 = vpop.eup %2534 }
 0x5ad   :  { %v816_v52 = vadd.f32 %v814_v45, %v808_v44  ;;  %2544 = vpow2.f32 %v1524_v40 }
 0x5ae   :  { %v817_v39 = vadd.f32 %v815_v35, %v809_v49  ;;  %v917_v10 = vpop.xlane.xlu1 %916  ;;  %v1644_v57 = vmul.f32 1.442695, %v1642_v46 }
 0x5af   :  { %v935_v60 = vmul.f32 %v933_v41, %v917_v10  ;;  %v914_v61 = vpop.xlane.xlu0 %913  ;;  %v928_v63 = vmul.f32 %v2523_v24, %v816_v52  ;;  %v2537_v10 = vpop.eup %2536 }
 0x5b0   :  { %v2408_v3 = vpack.c.bf16 %v817_v39, %v816_v52  ;;  %v929_v5 = vmul.f32 %v2525_v59, %v817_v39  ;;  %v934_v6 = vmul.f32 %v933_v41, %v914_v61  ;;  %v1646_v61 = vmul.f32 1.442695, %v1643_v13  ;;  %v2539_v1 = vpop.eup %2538 }
 0x5b1   :  { %2546 = vpow2.f32 %v1644_v57  ;;  %v2541_v11 = vpop.eup %2540  ;;  %v1764_v57 = vld [vmem:[%s3281_s14 + $0x28] sm:$0xff] }
 0x5b2   :  { %v937_v19 = vadd.f32 %v935_v60, %v929_v5  ;;  %v936_v21 = vadd.f32 %v934_v6, %v928_v63  ;;  %v1037_v25 = vpop.xlane.xlu1 %1036  ;;  %2409 = vmatpush3.bf16.msra.mxu0 %v2408_v3  ;;  %v1413_v3 = vrot.slane %v2990_v23, %v2889_v17  ;;  %2548 = vpow2.f32 %v1646_v61  ;;  %v2543_v26 = vpop.eup %2542 }
 0x5b3   :  { %v1055_v30 = vmul.f32 %v1053_v7, %v1037_v25  ;;  %v1034_v31 = vpop.xlane.xlu0 %1033  ;;  %2410 = vmatprep.subr.bf16.mxu0 %v2562_v50  ;;  %v1533_v17 = vrot.slane %v2990_v23, %v2894_v20 }
 0x5b4   :  { %v2411_v12 = vpack.c.bf16 %v937_v19, %v936_v21  ;;  %v1049_v33 = vmul.f32 %v2527_v16, %v937_v19  ;;  %v1048_v34 = vmul.f32 %v2529_v29, %v936_v21  ;;  %v1054_v36 = vmul.f32 %v1053_v7, %v1034_v31 }
 0x5b5   :  { %2246 = vmatmul.mubr.msk.f32.vlgmr.msra.gmra.mrb[8].mxu0 %vm631_vm9, %v2965_v58 }
 0x5b6   :  { %v1057_v41 = vadd.f32 %v1055_v30, %v1049_v33  ;;  %v1056_v44 = vadd.f32 %v1054_v36, %v1048_v34  ;;  %v1157_v45 = vpop.xlane.xlu1 %1156  ;;  %2412 = vmatpush3.bf16.msra.mxu0 %v2411_v12  ;;  %2252 = vmatprep.mubr.msk.f32.mxu0 %vm2561_vm1, %v2560_v18 }
 0x5b7   :  { %v1175_v48 = vmul.f32 %v1173_v37, %v1157_v45  ;;  %v1154_v49 = vpop.xlane.xlu0 %1153  ;;  %2413 = vmatprep.subr.bf16.mxu0 %v2562_v50  ;;  %v2545_v32 = vpop.eup %2544 }
 0x5b8   :  { %v2414_v58 = vpack.c.bf16 %v1057_v41, %v1056_v44  ;;  %v1169_v35 = vmul.f32 %v2531_v55, %v1057_v41  ;;  %v1168_v51 = vmul.f32 %v2533_v47, %v1056_v44  ;;  %v1174_v52 = vmul.f32 %v1173_v37, %v1154_v49 }
 0x5b9   :  { %2253 = vmatmul.mubr.msk.f32.vlgmr.msra.gmra.mrb[10].mxu0 %vm631_vm9, %v2977_v4  ;;  %v1653_v41 = vrot.slane %v2990_v23, %v2899_v22 }
 0x5ba   :  { %v1177_v54 = vadd.f32 %v1175_v48, %v1169_v35  ;;  %v1176_v24 = vadd.f32 %v1174_v52, %v1168_v51  ;;  %v1277_v39 = vpop.xlane.xlu1 %1276  ;;  %2415 = vmatpush3.bf16.msra.mxu0 %v2414_v58  ;;  %2259 = vmatprep.mubr.msk.f32.mxu0 %vm2561_vm1, %v2560_v18  ;;  %v1759_v51 = vld [vmem:[%s3281_s14] sm:$0xff]  ;;  %v1760_v52 = vld [vmem:[%s3281_s14 + $0x8] sm:$0xff] }
 0x5bb   :  { %v1295_v59 = vmul.f32 %v1293_v53, %v1277_v39  ;;  %v1274_v60 = vpop.xlane.xlu0 %1273  ;;  %2416 = vmatprep.subr.bf16.mxu0 %v2562_v50  ;;  %v2547_v44 = vpop.eup %2546  ;;  %v1763_v39 = vld [vmem:[%s3281_s14 + $0x20] sm:$0xff] }
 0x5bc   :  { %v2417_v4 = vpack.c.bf16 %v1177_v54, %v1176_v24  ;;  %v1289_v63 = vmul.f32 %v2535_v56, %v1177_v54  ;;  %v1288_v0 = vmul.f32 %v2537_v10, %v1176_v24  ;;  %v1294_v15 = vmul.f32 %v1293_v53, %v1274_v60  ;;  %v2549_v46 = vpop.eup %2548  ;;  %v1761_v56 = vld [vmem:[%s3281_s14 + $0x10] sm:$0xff]  ;;  %v1762_v54 = vld [vmem:[%s3281_s14 + $0x18] sm:$0xff] }
 0x5bd   :  { %2260 = vmatmul.mubr.msk.f32.vlgmr.msra.gmra.mrb[12].mxu0 %vm631_vm9, %v2971_v62  ;;  %v2432_v53 = vpack.c.bf16 %v1760_v52, %v1759_v51  ;;  %v2435_v24 = vpack.c.bf16 %v1762_v54, %v1761_v56  ;;  %v2438_v10 = vpack.c.bf16 %v1764_v57, %v1763_v39  ;;  %v1766_v60 = vld [vmem:[%s3281_s14 + $0x38] sm:$0xff]  ;;  %v2088_v39 = vsel %vm1613_vm6, 1.0, %v2560_v18 }
 0x5be   :  { %v1297_v5 = vadd.f32 %v1295_v59, %v1289_v63  ;;  %v1296_v6 = vadd.f32 %v1294_v15, %v1288_v0  ;;  %v1397_v7 = vpop.xlane.xlu1 %1396  ;;  %2418 = vmatpush3.bf16.msra.mxu0 %v2417_v4  ;;  %2266 = vmatprep.mubr.msk.f32.mxu0 %vm2561_vm1, %v2560_v18  ;;  %v1765_v59 = vld [vmem:[%s3281_s14 + $0x30] sm:$0xff]  ;;  %v1767_v4 = vld [vmem:[%s3281_s14 + $0x40] sm:$0xff]  ;;  %v1768_v63 = vld [vmem:[%s3281_s14 + $0x48] sm:$0xff] }
 0x5bf   :  { %v1415_v14 = vmul.f32 %v1413_v3, %v1397_v7  ;;  %v1394_v16 = vpop.xlane.xlu0 %1393  ;;  %2419 = vmatprep.subr.bf16.mxu0 %v2562_v50  ;;  %v2441_v61 = vpack.c.bf16 %v1766_v60, %v1765_v59  ;;  %v2444_v0 = vpack.c.bf16 %v1768_v63, %v1767_v4  ;;  %v1769_v15 = vld [vmem:[%s3281_s14 + $0x50] sm:$0xff]  ;;  %v2090_v4 = vsel %vm1733_vm7, 1.0, %v2560_v18 }
 0x5c0   :  { %v2420_v19 = vpack.c.bf16 %v1297_v5, %v1296_v6  ;;  %v1409_v21 = vmul.f32 %v2539_v1, %v1297_v5  ;;  %v1408_v62 = vmul.f32 %v2541_v11, %v1296_v6  ;;  %v1414_v25 = vmul.f32 %v1413_v3, %v1394_v16  ;;  %v1770_v1 = vld [vmem:[%s3281_s14 + $0x58] sm:$0xff]  ;;  %v1771_v3 = vld [vmem:[%s3281_s14 + $0x60] sm:$0xff]  ;;  %v1772_v6 = vld [vmem:[%s3281_s14 + $0x68] sm:$0xff] }
 0x5c1   :  { %2267 = vmatmul.mubr.msk.f32.vlgmr.msra.gmra.mrb[14].mxu0 %vm631_vm9, %v2982_v8  ;;  %v2447_v5 = vpack.c.bf16 %v1770_v1, %v1769_v15  ;;  %v2450_v7 = vpack.c.bf16 %v1772_v6, %v1771_v3  ;;  %v1773_v11 = vld [vmem:[%s3281_s14 + $0x70] sm:$0xff]  ;;  %v2091_v15 = vld [vmem:[%s3298_s26] ss:$0 sm:$0xff] }
 0x5c2   :  { %v1417_v29 = vadd.f32 %v1415_v14, %v1409_v21  ;;  %v1416_v30 = vadd.f32 %v1414_v25, %v1408_v62  ;;  %v1517_v31 = vpop.xlane.xlu1 %1516  ;;  %2421 = vmatpush3.bf16.msra.mxu0 %v2420_v19  ;;  %2273 = vmatprep.mubr.msk.f32.mxu0 %vm2561_vm1, %v2560_v18  ;;  %v1774_v14 = vld [vmem:[%s3281_s14 + $0x78] sm:$0xff]  ;;  %v2092_v25 = vmul.f32 -1.442695, %v2745_v43  ;;  %v1749_v6 = vmul.f32 %v2091_v15, %v2844_v42  ;;  %v1973_v15 = vld [vmem:[%s3286_s17 + $0x68] sm:$0xff] }
 0x5c3   :  { %v1535_v12 = vmul.f32 %v1533_v17, %v1517_v31  ;;  %v1514_v33 = vpop.xlane.xlu0 %1513  ;;  %2422 = vmatprep.subr.bf16.mxu0 %v2562_v50  ;;  %v2453_v16 = vpack.c.bf16 %v1774_v14, %v1773_v11  ;;  %v1865_v42 = vld [vmem:[%s3284_s16 + $0x18] sm:$0xff] }
 0x5c4   :  { %v2423_v34 = vpack.c.bf16 %v1417_v29, %v1416_v30  ;;  %v1529_v36 = vmul.f32 %v2543_v26, %v1417_v29  ;;  %v1528_v37 = vmul.f32 %v2545_v32, %v1416_v30  ;;  %v1534_v40 = vmul.f32 %v1533_v17, %v1514_v33 }
 0x5c5   :  { %2274 = vmatmul.mubr.msk.f32.vlgmr.msra.gmra.mrb[16].mxu0 %vm631_vm9, %v2993_v27  ;;  %v2076_v26 = vsel %vm893_vm14, 1.0, %v2560_v18  ;;  %v2078_v29 = vsel %vm1013_vm15, 1.0, %v2560_v18  ;;  %2550 = vpow2.f32 %v2092_v25  ;;  %v1864_v25 = vld [vmem:[%s3284_s16 + $0x10] sm:$0xff] }
 0x5c6   :  { %v1537_v20 = vadd.f32 %v1535_v12, %v1529_v36  ;;  %v1536_v8 = vadd.f32 %v1534_v40, %v1528_v37  ;;  %v1634_v55 = vpop.xlane.xlu1 %1633  ;;  %2424 = vmatpush3.bf16.msra.mxu0 %v2423_v34  ;;  %2280 = vmatprep.mubr.msk.f32.mxu0 %vm2561_vm1, %v2560_v18  ;;  %v2080_v34 = vsel %vm1133_vm2, 1.0, %v2560_v18 }
 0x5c7   :  { %2425 = vmatprep.subr.bf16.mxu0 %v2562_v50  ;;  %v1654_v48 = vmul.f32 %v1653_v41, %v1634_v55  ;;  %v2082_v55 = vsel %vm1253_vm3, 1.0, %v2560_v18 }
 0x5c8   :  { %v2426_v45 = vpack.c.bf16 %v1537_v20, %v1536_v8  ;;  %v1648_v47 = vmul.f32 %v2547_v44, %v1536_v8  ;;  %v1649_v49 = vmul.f32 %v2549_v46, %v1537_v20 }
 0x5c9   :  { %2281 = vmatmul.mubr.msk.f32.vlgmr.msra.gmra.mrb[18].mxu0 %vm631_vm9, %v2995_v28  ;;  %v1660_v28 = vpop.permute.xlu0 %1659 }
 0x5ca   :  { %v1637_v27 = vpop.xlane.xlu1 %1636  ;;  %2427 = vmatpush3.bf16.msra.mxu0 %v2426_v45  ;;  %2287 = vmatprep.mubr.msk.f32.mxu0 %vm2561_vm1, %v2560_v18  ;;  %v1656_v22 = vadd.f32 %v1654_v48, %v1648_v47  ;;  %v2084_v48 = vsel %vm1373_vm4, 1.0, %v2560_v18 }
 0x5cb   :  { %v1655_v13 = vmul.f32 %v1653_v41, %v1637_v27  ;;  %2431 = vmatprep.subr.bf16.mxu0 %v2562_v50 }
 0x5cd   :  { %v1657_v23 = vadd.f32 %v1655_v13, %v1649_v49 }
 0x5ce   :  { %v1540_v58 = vpop.permute.xlu1 %1539 }
 0x5cf   :  { %v2429_v35 = vpack.c.bf16 %v1657_v23, %v1656_v22  ;;  %2288 = vmatmul.mubr.msk.f32.vlgmr.msra.gmra.mrb[20].mxu0 %vm631_vm9, %v1540_v58  ;;  %v2551_v22 = vpop.eup %2550 }
 0x5d0   :  { %2329 = vmatprep.mubr.msk.f32.mxu0 %vm2561_vm1, %v2560_v18  ;;  %2433 = vmatpush3.bf16.msra.mxu0 %v2432_v53 }
 0x5d1   :  { %2430 = vmatpush3.bf16.msra.mxu1 %v2429_v35  ;;  %2434 = vmatprep.subr.bf16.mxu0 %v2562_v50  ;;  %v2086_v35 = vsel %vm1493_vm5, 1.0, %v2560_v18 }
 0x5d4   :  { %2295 = vmatmul.mubr.msk.f32.vlgmr.msra.gmra.mrb[6].mxu1 %vm631_vm9, %v1660_v28  ;;  %2436 = vmatpush3.bf16.msra.mxu0 %v2435_v24  ;;  %v1754_v28 = vadd.f32 1.0, %v2551_v22 }
 0x5d5   :  { %1945 = vmatprep.mubr.f32.mxu1 %v2560_v18  ;;  %2437 = vmatprep.subr.bf16.mxu0 %v2562_v50 }
 0x5d6   :  { %2552 = vrcp.f32 %v1754_v28 }
 0x5d8   :  { %2439 = vmatpush3.bf16.msra.mxu0 %v2438_v10 }
 0x5d9   :  { %2440 = vmatprep.subr.bf16.mxu0 %v2562_v50 }
 0x5dc   :  { %2442 = vmatpush3.bf16.msra.mxu0 %v2441_v61 }
 0x5dd   :  { %2443 = vmatprep.subr.bf16.mxu0 %v2562_v50 }
 0x5e0   :  { %2445 = vmatpush3.bf16.msra.mxu0 %v2444_v0  ;;  %v2553_v3 = vpop.eup %2552 }
 0x5e1   :  { %2446 = vmatprep.subr.bf16.mxu0 %v2562_v50 }
 0x5e4   :  { %2448 = vmatpush3.bf16.msra.mxu0 %v2447_v5 }
 0x5e5   :  { %2449 = vmatprep.subr.bf16.mxu0 %v2562_v50 }
 0x5e8   :  { %2451 = vmatpush3.bf16.msra.mxu0 %v2450_v7  ;;  %v1757_v7 = vmul.f32 %v2553_v3, %v2745_v43  ;;  %v1863_v43 = vld [vmem:[%s3284_s16 + $0x8] sm:$0xff]  ;;  %v1974_v3 = vld [vmem:[%s3286_s17 + $0x70] sm:$0xff] }
 0x5e9   :  { %2452 = vmatprep.subr.bf16.mxu0 %v2562_v50 }
 0x5ec   :  { %2454 = vmatpush3.bf16.msra.mxu0 %v2453_v16 }
 0x688   :  { %v889_v19 = vpop.f32.mrb[8].mxu0 }
 0x689   :  { %v2247_v21 = vpop.f32.mrb[9].mxu0  ;;  %v899_v62 = vrot.slane %v889_v19, %v2823_v9 }
 0x68b   :  { %v900_v32 = vmul.f32 %v2076_v26, %v899_v62  ;;  %v2455_v62 = vpack.c.bf16 %v1865_v42, %v1863_v43  ;;  %v1867_v26 = vld [vmem:[%s3284_s16 + $0x28] sm:$0xff] }
 0x68c   :  { %v1009_v17 = vpop.f32.mrb[10].mxu0 }
 0x68d   :  { %v1019_v30 = vrot.slane %v1009_v17, %v2823_v9  ;;  %v2254_v31 = vpop.f32.mrb[11].mxu0  ;;  %v1869_v17 = vld [vmem:[%s3284_s16 + $0x38] sm:$0xff]  ;;  %2456 = vmatprep.subr.bf16.mxu1 %v2455_v62 }
 0x68e   :  { %v1866_v31 = vld [vmem:[%s3284_s16 + $0x20] sm:$0xff] }
 0x68f   :  { %v1020_v12 = vmul.f32 %v2078_v29, %v1019_v30  ;;  %v2459_v30 = vpack.c.bf16 %v1869_v17, %v1867_v26 }
 0x690   :  { %v1129_v33 = vpop.f32.mrb[12].mxu0 }
 0x691   :  { %v1021_v36 = vadd.f32 %v1020_v12, %v900_v32  ;;  %v1139_v37 = vrot.slane %v1129_v33, %v2823_v9  ;;  %v2261_v40 = vpop.f32.mrb[13].mxu0  ;;  %v1868_v32 = vld [vmem:[%s3284_s16 + $0x30] sm:$0xff]  ;;  %v1871_v12 = vld [vmem:[%s3284_s16 + $0x48] sm:$0xff]  ;;  %v1873_v33 = vld [vmem:[%s3284_s16 + $0x58] sm:$0xff] }
 0x692   :  { %v1872_v40 = vld [vmem:[%s3284_s16 + $0x50] sm:$0xff] }
 0x693   :  { %v1140_v20 = vmul.f32 %v2080_v34, %v1139_v37  ;;  %v2461_v34 = vpack.c.bf16 %v1868_v32, %v1866_v31  ;;  %v1870_v37 = vld [vmem:[%s3284_s16 + $0x40] sm:$0xff] }
 0x694   :  { %v1249_v8 = vpop.f32.mrb[14].mxu0 }
 0x695   :  { %v1141_v41 = vadd.f32 %v1140_v20, %v1021_v36  ;;  %v1259_v44 = vrot.slane %v1249_v8, %v2823_v9  ;;  %v2268_v45 = vpop.f32.mrb[15].mxu0  ;;  %v2463_v36 = vpack.c.bf16 %v1873_v33, %v1871_v12  ;;  %v1875_v20 = vld [vmem:[%s3284_s16 + $0x68] sm:$0xff]  ;;  %v1877_v8 = vld [vmem:[%s3284_s16 + $0x78] sm:$0xff] }
 0x696   :  { %v1876_v45 = vld [vmem:[%s3284_s16 + $0x70] sm:$0xff] }
 0x697   :  { %v1260_v46 = vmul.f32 %v2082_v55, %v1259_v44  ;;  %v2465_v55 = vpack.c.bf16 %v1872_v40, %v1870_v37  ;;  %v1874_v44 = vld [vmem:[%s3284_s16 + $0x60] sm:$0xff] }
 0x698   :  { %v1369_v47 = vpop.f32.mrb[16].mxu0 }
 0x699   :  { %v1261_v27 = vadd.f32 %v1260_v46, %v1141_v41  ;;  %v1379_v49 = vrot.slane %v1369_v47, %v2823_v9  ;;  %v2275_v13 = vpop.f32.mrb[17].mxu0  ;;  %v2467_v41 = vpack.c.bf16 %v1877_v8, %v1875_v20  ;;  %v2469_v46 = vpack.c.bf16 %v1876_v45, %v1874_v44 }
 0x69a   :  { %v2093_v13 = vld [vmem:[%s3285_s15] ss:$0 sm:$0xff] }
 0x69b   :  { %v1380_v23 = vmul.f32 %v2084_v48, %v1379_v49 }
 0x69c   :  { %v1489_v58 = vpop.f32.mrb[18].mxu0 }
 0x69d   :  { %v1381_v51 = vadd.f32 %v1380_v23, %v1261_v27  ;;  %v1499_v52 = vrot.slane %v1489_v58, %v2823_v9  ;;  %v2282_v53 = vpop.f32.mrb[19].mxu0  ;;  %v1960_v58 = vld [vmem:[%s3286_s17] sm:$0xff] }
 0x69e   :  { %v1964_v53 = vld [vmem:[%s3286_s17 + $0x20] sm:$0xff] }
 0x69f   :  { %v1500_v56 = vmul.f32 %v2086_v35, %v1499_v52  ;;  %v1961_v35 = vld [vmem:[%s3286_s17 + $0x8] sm:$0xff] }
 0x6a0   :  { %v2472_v28 = vpack.c.bf16 %v1961_v35, %v1960_v58 }
 0x6a1   :  { %v1501_v54 = vadd.f32 %v1500_v56, %v1381_v51  ;;  %v1962_v51 = vld [vmem:[%s3286_s17 + $0x10] sm:$0xff]  ;;  %v1965_v56 = vld [vmem:[%s3286_s17 + $0x28] sm:$0xff] }
 0x6a2   :  { %v1609_v24 = vpop.f32.mrb[20].mxu0 }
 0x6a3   :  { %v1619_v57 = vrot.slane %v1609_v24, %v2823_v9  ;;  %v2289_v10 = vpop.f32.mrb[21].mxu0  ;;  %v1966_v24 = vld [vmem:[%s3286_s17 + $0x30] sm:$0xff] }
 0x6a4   :  { %v1968_v10 = vld [vmem:[%s3286_s17 + $0x40] sm:$0xff] }
 0x6a5   :  { %v1620_v59 = vmul.f32 %v2088_v39, %v1619_v57  ;;  %v1967_v39 = vld [vmem:[%s3286_s17 + $0x38] sm:$0xff] }
 0x6a6   :  { %v2481_v57 = vpack.c.bf16 %v1967_v39, %v1966_v24 }
 0x6a7   :  { %v1621_v60 = vadd.f32 %v1620_v59, %v1501_v54  ;;  %v1729_v61 = vpop.f32.mrb[6].mxu1  ;;  %v2478_v54 = vpack.c.bf16 %v1965_v56, %v1964_v53  ;;  %v1969_v59 = vld [vmem:[%s3286_s17 + $0x48] sm:$0xff] }
 0x6a8   :  { %v1739_v63 = vrot.slane %v1729_v61, %v2823_v9  ;;  %v2296_v0 = vpop.f32.mrb[7].mxu1  ;;  %v1970_v61 = vld [vmem:[%s3286_s17 + $0x50] sm:$0xff] }
 0x6a9   :  { %v1972_v0 = vld [vmem:[%s3286_s17 + $0x60] sm:$0xff] }
 0x6aa   :  { %v1740_v1 = vmul.f32 %v2090_v4, %v1739_v63  ;;  %v1971_v4 = vld [vmem:[%s3286_s17 + $0x58] sm:$0xff] }
 0x6ab   :  { %v2487_v63 = vpack.c.bf16 %v1971_v4, %v1970_v61 }
 0x6ac   :  { %v1741_v5 = vadd.f32 %v1740_v1, %v1621_v60  ;;  %v2484_v60 = vpack.c.bf16 %v1969_v59, %v1968_v10  ;;  %v2490_v1 = vpack.c.bf16 %v1973_v15, %v1972_v0 }
 0x6ae   :  { %v1750_v38 = vadd.f32 %v1749_v6, %v1741_v5  ;;  %v1975_v5 = vld [vmem:[%s3286_s17 + $0x78] sm:$0xff] }
 0x6af   :  { %v2493_v6 = vpack.c.bf16 %v1975_v5, %v1974_v3 }
 0x6b0   :  { %v1758_v11 = vmul.f32 %v1757_v7, %v1750_v38 }
 0x6b2   :  { %2330 = vmatmul.mubr.f32.vlgmr.msra.gmra.mrb[22].mxu0 %v1758_v11 }
 0x785   :  { %v1841_v14 = vpop.f32.mrb[22].mxu0 }
 0x786   :  { %v1842_v16 = vadd.f32 %v1841_v14, %v2673_v2  ;;  %v2331_v19 = vpop.f32.mrb[23].mxu0  ;;  %v1862_v2 = vld [vmem:[%s3284_s16] sm:$0xff] }
 0x787   :  { %v2457_v29 = vpack.c.bf16 %v1864_v25, %v1862_v2 }
 0x788   :  { %1845 = vst.msk [vmem:[%s3283_s19] sm:$0xff] %vm66_vm0, %v1842_v16  ;;  %v1847_v9 = vmul.f32 %v1842_v16, %v1842_v16 }
 0x789   :  { %2458 = vmatpush1.bf16.msra.mxu1 %v2457_v29 }
 0x78a   :  { %v1848_v21 = vsel %vm66_vm0, %v1847_v9, 0.0  ;;  %2460 = vmatprep.subr.bf16.mxu1 %v2459_v30 }
 0x78b   :  { %1849 = vadd.xlane.f32.xlu1 %v1848_v21 }
 0x78d   :  { %2462 = vmatpush1.bf16.msra.mxu1 %v2461_v34 }
 0x78e   :  { %2464 = vmatprep.subr.bf16.mxu1 %v2463_v36 }
 0x791   :  { %2466 = vmatpush1.bf16.msra.mxu1 %v2465_v55 }
 0x792   :  { %2468 = vmatprep.subr.bf16.mxu1 %v2467_v41 }
 0x795   :  { %2470 = vmatpush1.bf16.msra.mxu1 %v2469_v46 }
 0x796   :  { %2471 = vmatprep.subr.bf16.mxu1 %v2562_v50 }
 0x818   :  { %v1850_v47 = vpop.xlane.xlu1 %1849 }
 0x819   :  { %v1851_v48 = vmul.f32 0.015625, %v1850_v47 }
 0x81b   :  { %v1852_v27 = vadd.f32 1e-06, %v1851_v48 }
 0x81d   :  { %2554 = vrsqrt.f32 %v1852_v27 }
 0x827   :  { %v2555_v49 = vpop.eup %2554 }
 0x828   :  { %v1854_v22 = vmul.f32 %v2555_v49, %v1842_v16 }
 0x82a   :  { %v1861_v23 = vmul.f32 %v2093_v13, %v1854_v22 }
 0x82c   :  { %2094 = vmatmul.mubr.msk.f32.vlgmr.msra.gmra.mrb[8].mxu1 %vm66_vm0, %v1861_v23 }
 0x82d   :  { %2364 = vmatprep.mubr.msk.f32.mxu1 %vm2561_vm1, %v2560_v18  ;;  %2473 = vmatpush3.bf16.msra.mxu1 %v2472_v28  ;;  %v1963_v18 = vld [vmem:[%s3286_s17 + $0x18] sm:$0xff] }
 0x82e   :  { %2474 = vmatprep.subr.bf16.mxu1 %v2562_v50  ;;  %v2475_v52 = vpack.c.bf16 %v1963_v18, %v1962_v51 }
 0x831   :  { %2476 = vmatpush3.bf16.msra.mxu1 %v2475_v52 }
 0x832   :  { %2477 = vmatprep.subr.bf16.mxu1 %v2562_v50 }
 0x835   :  { %2479 = vmatpush3.bf16.msra.mxu1 %v2478_v54 }
 0x836   :  { %2480 = vmatprep.subr.bf16.mxu1 %v2562_v50 }
 0x839   :  { %2482 = vmatpush3.bf16.msra.mxu1 %v2481_v57 }
 0x83a   :  { %2483 = vmatprep.subr.bf16.mxu1 %v2562_v50 }
 0x83d   :  { %2485 = vmatpush3.bf16.msra.mxu1 %v2484_v60 }
 0x83e   :  { %2486 = vmatprep.subr.bf16.mxu1 %v2562_v50 }
 0x841   :  { %2488 = vmatpush3.bf16.msra.mxu1 %v2487_v63 }
 0x842   :  { %2489 = vmatprep.subr.bf16.mxu1 %v2562_v50 }
 0x845   :  { %2491 = vmatpush3.bf16.msra.mxu1 %v2490_v1 }
 0x846   :  { %2492 = vmatprep.subr.bf16.mxu1 %v2562_v50 }
 0x849   :  { %2494 = vmatpush3.bf16.msra.mxu1 %v2493_v6 }
 0x8ff   :  { %v1947_v7 = vpop.f32.mrb[8].mxu1 }
 0x900   :  { %v2095_v38 = vmul.f32 -1.442695, %v1947_v7  ;;  %v1949_v11 = vpop.f32.mrb[9].mxu1 }
 0x902   :  { %2556 = vpow2.f32 %v2095_v38 }
 0x90c   :  { %v2557_v14 = vpop.eup %2556 }
 0x90d   :  { %v1955_v16 = vadd.f32 1.0, %v2557_v14 }
 0x90f   :  { %2558 = vrcp.f32 %v1955_v16 }
 0x919   :  { %v2559_v19 = vpop.eup %2558 }
 0x91a   :  { %v1958_v9 = vmul.f32 %v2559_v19, %v1947_v7 }
 0x91c   :  { %v1959_v21 = vmul.f32 %v1958_v9, %v1949_v11 }
 0x91e   :  { %2365 = vmatmul.mubr.f32.vlgmr.msra.gmra.mrb[10].mxu1 %v1959_v21 }
 0x9f1   :  { %v2042_v43 = vpop.f32.mrb[10].mxu1 }
 0x9f2   :  { %2046 = vst.msk [vmem:[%s3287_s18] sm:$0xff] %vm66_vm0, %v2042_v43  ;;  %v2366_v42 = vpop.f32.mrb[11].mxu1 }

// kernel: _lambda_.7
= control target key start
LH: loop header
LB: loop body
LE: loop exit
PB: predicated region body
PF: predicated region fallthrough
CT: control target
= control target key end

     0   :  { %17 = vsyncpa [#allocation3], 0  ;;  %s3696_s0 = inlined_call_operand.vmem [shape: f32[8,64], index: 0, kind: input, shape index: {}]   ;;  %s3697_s1 = inlined_call_operand.vmem [shape: f32[8,64], index: 1, kind: input, shape index: {}]   ;;  %s3698_s2 = inlined_call_operand.vmem [shape: f32[1,64], index: 2, kind: input, shape index: {}]   ;;  %s3699_s3 = inlined_call_operand.vmem [shape: f32[64,128], index: 3, kind: input, shape index: {}]   ;;  %s3700_s4 = inlined_call_operand.vmem [shape: f32[64,64], index: 4, kind: input, shape index: {}]   ;;  %s3701_s5 = inlined_call_operand.vmem [shape: f32[1,64], index: 5, kind: input, shape index: {}]   ;;  %s3702_s6 = inlined_call_operand.vmem [shape: f32[64,4], index: 6, kind: input, shape index: {}]   ;;  %s3703_s7 = inlined_call_operand.vmem [shape: f32[4,64,256], index: 7, kind: input, shape index: {}]   ;;  %s3704_s8 = inlined_call_operand.vmem [shape: f32[4,128,64], index: 8, kind: input, shape index: {}]   ;;  %s3705_s9 = inlined_call_operand.vmem [shape: f32[1,64], index: 9, kind: input, shape index: {}]   ;;  %s3706_s10 = inlined_call_operand.hbm [shape: f32[8,64], index: 10, kind: output, shape index: {0}]   ;;  %s3707_s11 = inlined_call_operand.hbm [shape: f32[8,64], index: 11, kind: output, shape index: {1}]  }
   0x1   :  { %v39_v0 = vld [vmem:[%s3696_s0] sm:$0xff] }
   0x2   :  { %v40_v1 = vld [vmem:[%s3697_s1] sm:$0xff] }
   0x3   :  { %18 = vsyncpa [#allocation5], 0  ;;  %v3011_v2 = vadd.f32 %v40_v1, %v39_v0  ;;  %vm44_vm0 = vcmask 523264   ;;  %v60_v5 = vld [vmem:[%s3699_s3] sm:$0xff]  ;;  %v61_v6 = vld [vmem:[%s3699_s3 + $0x8] sm:$0xff]  ;;  %v2925_v8 = vmov 0.0|0.0   ;;  %v141_v30 = vlaneseq }
   0x4   :  { %v2596_v7 = vpack.c.bf16 %v61_v6, %v60_v5  ;;  %2595 = vmatprep.subr.bf16.mxu0 %v2925_v8  ;;  %v62_v9 = vld [vmem:[%s3699_s3 + $0x10] sm:$0xff]  ;;  %v63_v10 = vld [vmem:[%s3699_s3 + $0x18] sm:$0xff]  ;;  %v64_v12 = vld [vmem:[%s3699_s3 + $0x20] sm:$0xff]  ;;  %vm2926_vm1 = vmmov 0   ;;  %v2927_v14 = vmov 0.0   ;;  %s2929_s18 = smov 64  }
   0x5   :  { %v43_v3 = vmul.f32 %v3011_v2, %v3011_v2  ;;  %v2599_v11 = vpack.c.bf16 %v63_v10, %v62_v9  ;;  %v65_v13 = vld [vmem:[%s3699_s3 + $0x28] sm:$0xff]  ;;  %2365 = vmatprep.mubr.msk.f32.mxu0 %vm2926_vm1, %v2927_v14  ;;  %2378 = vmatprep.subr.mxu1 %v2927_v14  ;;  %v66_v16 = vld [vmem:[%s3699_s3 + $0x30] sm:$0xff]  ;;  %v67_v17 = vld [vmem:[%s3699_s3 + $0x38] sm:$0xff]  ;;  %s2928_s3 = smov 112   ;;  %vm157_vm2 = vcmask 130048   ;;  %v3072_v31 = vshrl.u32 %v141_v30, 7 }
   0x6   :  { %2597 = vmatpush3.bf16.msra.mxu0 %v2596_v7  ;;  %2380 = vmatprep.mubr.msk.f32.mxu1 %vm2926_vm1, %v2927_v14  ;;  %v2602_v15 = vpack.c.bf16 %v65_v13, %v64_v12  ;;  %v2605_v18 = vpack.c.bf16 %v67_v17, %v66_v16  ;;  %v2104_v23 = vld [vmem:[%s3698_s2] ss:$0 sm:$0xff]  ;;  %v3074_v32 = vand.u32 127, %v141_v30  ;;  %vm234_vm4 = vcmask 64512   ;;  %s2930_s2 = smov 32   ;;  %s2931_s19 = smov 48  }
   0x7   :  { %v45_v4 = vsel %vm44_vm0, %v43_v3, 0.0  ;;  %2598 = vmatprep.subr.bf16.mxu0 %v2925_v8  ;;  %s2932_s20 = smov 96   ;;  %s2933_s21 = smov 16   ;;  %v146_v57 = vld [vmem:[%s3700_s4] sm:$0xff]  ;;  %v147_v58 = vld [vmem:[%s3700_s4 + $0x8] sm:$0xff]  ;;  %v148_v61 = vld [vmem:[%s3700_s4 + $0x10] sm:$0xff] }
   0x8   :  { %46 = vadd.xlane.f32.xlu0 %v45_v4  ;;  %vm145_vm3 = vcmp.le.s32.totalorder %v3074_v32, %v3072_v31  ;;  %v2611_v59 = vpack.c.bf16 %v147_v58, %v146_v57  ;;  %v149_v62 = vld [vmem:[%s3700_s4 + $0x18] sm:$0xff]  ;;  %s2934_s28 = smov 80   ;;  %vm1202_vm5 = vcmask 31744   ;;  %s2936_s27 = smov 1  }
   0x9   :  { %v2608_v0 = vpack.c.bf16 %v149_v62, %v148_v61  ;;  %v153_v31 = vld [vmem:[%s3700_s4 + $0x38] sm:$0xff]  ;;  %s2939_s29 = smov 126   ;;  %s2942_s30 = smov 125  }
   0xa   :  { %2600 = vmatpush3.bf16.msra.mxu0 %v2599_v11  ;;  %s2943_s12 = smov [#allocation4]  }
   0xb   :  { %2601 = vmatprep.subr.bf16.mxu0 %v2925_v8  ;;  %s2092_s13 = sshll.u32 %s2943_s12, 4  ;;  %s2093_s13 = int_to_ptr.vmem [resolvable:$true] %s2092_s13 }
   0xc   :  { %s2877_s14 = scalar_lea.vmem %s2093_s13, 128  ;;  %p2882_p1 = scmp.lt.s32.totalorder %s2093_s13, %s2093_s13 }
   0xd   :  { %p2878_p0 = scmp.ne.s32.totalorder %s2093_s13, %s2877_s14  ;;  %p2883_p2 = scmp.lt.s32.totalorder %s2877_s14, %s2877_s14 }
   0xe   :  { %2603 = vmatpush3.bf16.msra.mxu0 %v2602_v15 }
   0xf   :  { %2604 = vmatprep.subr.bf16.mxu0 %v2925_v8  ;;  %p2884_p3 = por %p2883_p2, %p2882_p1 }
  0x11   :  { %p2885_p4 = pnand %p2884_p3, %p2878_p0 }
  0x12   :  { %2606 = vmatpush3.bf16.msra.mxu0 %v2605_v18 }
  0x13   :  { %2368 = vmatprep.subr.mxu0 %v2927_v14 }
  0x95   :  { %v47_v19 = vpop.xlane.xlu0 %46 }
  0x96   :  { %v49_v20 = vmul.f32 0.015625, %v47_v19 }
  0x98   :  { %v50_v21 = vadd.f32 1e-06, %v49_v20 }
  0x9a   :  { %2829 = vrsqrt.f32 %v50_v21 }
  0xa4   :  { %v2830_v22 = vpop.eup %2829 }
  0xa5   :  { %v52_v24 = vmul.f32 %v2830_v22, %v3011_v2 }
  0xa7   :  { %v59_v25 = vmul.f32 %v2104_v23, %v52_v24 }
  0xa9   :  { %2366 = vmatmul.mubr.msk.f32.vlgmr.msra.gmra.mrb[0].mxu0 %vm44_vm0, %v59_v25 }
  0xaa   :  { %2370 = vmatprep.mubr.msk.f32.mxu0 %vm2926_vm1, %v2927_v14 }
 0x17c   :  { %v3057_v26 = vpop.f32.mrb[0].mxu0 }
 0x17d   :  { %322 = vrot.lane.b32.xlu1 %v3057_v26, %s2928_s3  ;;  %155 = vrot.lane.b32.xlu0 %v3057_v26, %s2929_s18  ;;  %v2367_v27 = vpop.f32.mrb[1].mxu0 }
 0x1ef   :  { %v156_v28 = vpop.permute.xlu0 %155  ;;  %v323_v29 = vpop.permute.xlu1 %322 }
 0x1f0   :  { %2369 = vmatpush3.xpose.msk.msra.mxu0 %vm157_vm2, %v156_v28  ;;  %2379 = vmatpush3.xpose.msk.msra.mxu1 %vm157_vm2, %v156_v28  ;;  %v150_v28 = vld [vmem:[%s3700_s4 + $0x20] sm:$0xff] }
 0x1f1   :  { %2383 = vmatprep.subr.mxu1 %v2927_v14  ;;  %2373 = vmatprep.subr.mxu0 %v2927_v14 }
 0x1f3   :  { %2371 = vmatmul.mubr.msk.f32.vlgmr.msra.gmra.mrb[2].mxu0 %vm157_vm2, %v3057_v26  ;;  %2381 = vmatmul.mubr.msk.f32.vlgmr.msra.gmra.mrb[0].mxu1 %vm157_vm2, %v323_v29  ;;  %v151_v29 = vld [vmem:[%s3700_s4 + $0x28] sm:$0xff] }
 0x1f4   :  { %2385 = vmatprep.mubr.msk.f32.mxu1 %vm2926_vm1, %v2927_v14  ;;  %2375 = vmatprep.mubr.msk.f32.mxu0 %vm2926_vm1, %v2927_v14  ;;  %v2614_v30 = vpack.c.bf16 %v151_v29, %v150_v28  ;;  %v1259_v29 = vld [vmem:[%s3703_s7 + $0x68] sm:$0xff] }
 0x2c6   :  { %v228_v33 = vpop.f32.mrb[2].mxu0  ;;  %v392_v34 = vpop.f32.mrb[0].mxu1 }
 0x2c7   :  { %v396_v35 = vmul.f32 0.25, %v392_v34  ;;  %v2372_v36 = vpop.f32.mrb[3].mxu0  ;;  %v2382_v37 = vpop.f32.mrb[1].mxu1  ;;  %v232_v44 = vmul.f32 0.25, %v228_v33 }
 0x2c9   :  { %v397_v38 = vsel %vm145_vm3, %v396_v35, -1e+30  ;;  %v233_v47 = vsel %vm145_vm3, %v232_v44, -1e+30 }
 0x2ca   :  { %v398_v39 = vsel %vm234_vm4, %v397_v38, -inf  ;;  %v235_v48 = vsel %vm234_vm4, %v233_v47, -inf }
 0x2cb   :  { %399 = vmax.xlane.f32.xlu1 %v398_v39 }
 0x2dc   :  { %246 = vrot.lane.b32.xlu1 %v3057_v26, %s2930_s2 }
 0x358   :  { %v400_v40 = vpop.xlane.xlu1 %399 }
 0x359   :  { %v401_v41 = vsub.f32 %v397_v38, %v400_v40 }
 0x35b   :  { %v402_v42 = vmul.f32 1.442695, %v401_v41 }
 0x35c   :  { %v247_v43 = vpop.permute.xlu1 %246 }
 0x35d   :  { %2831 = vpow2.f32 %v402_v42  ;;  %2374 = vmatpush3.msra.mxu0 %v247_v43  ;;  %2384 = vmatpush3.msra.mxu1 %v247_v43 }
 0x35e   :  { %2607 = vmatprep.subr.bf16.mxu0 %v2925_v8  ;;  %2610 = vmatprep.subr.bf16.mxu1 %v2925_v8 }
 0x367   :  { %v2832_v45 = vpop.eup %2831 }
 0x368   :  { %v404_v46 = vsel %vm234_vm4, %v2832_v45, 0.0 }
 0x369   :  { %405 = vadd.xlane.f32.xlu0 %v404_v46 }
 0x36d   :  { %236 = vmax.xlane.f32.xlu0 %v235_v48  ;;  %v152_v48 = vld [vmem:[%s3700_s4 + $0x30] sm:$0xff] }
 0x36e   :  { %v2617_v32 = vpack.c.bf16 %v153_v31, %v152_v48  ;;  %v2135_v48 = vld [vmem:[%s3703_s7 + $0xa8] sm:$0xff] }
 0x383   :  { %630 = vrot.lane.b32.xlu0 %v3057_v26, %s2931_s19 }
 0x387   :  { %628 = vrot.lane.b32.xlu0 %v3057_v26, %s2932_s20 }
 0x3f6   :  { %v406_v49 = vpop.xlane.xlu0 %405 }
 0x3f7   :  { %2833 = vrcp.f32 %v406_v49 }
 0x3fa   :  { %v237_v50 = vpop.xlane.xlu0 %236 }
 0x3fb   :  { %v238_v51 = vsub.f32 %v233_v47, %v237_v50 }
 0x3fd   :  { %v239_v52 = vmul.f32 1.442695, %v238_v51 }
 0x3fe   :  { %v631_v3 = vpop.permute.xlu0 %630 }
 0x3ff   :  { %2835 = vpow2.f32 %v239_v52 }
 0x401   :  { %v2834_v53 = vpop.eup %2833 }
 0x402   :  { %v408_v54 = vmul.f32 %v2834_v53, %v2832_v45  ;;  %v629_v6 = vpop.permute.xlu0 %628 }
 0x404   :  { %2386 = vmatmul.mubr.msk.f32.vlgmr.msra.gmra.mrb[2].mxu1 %vm234_vm4, %v408_v54 }
 0x405   :  { %2399 = vmatprep.mubr.msk.f32.mxu1 %vm2926_vm1, %v2927_v14  ;;  %2612 = vmatpush3.bf16.msra.mxu1 %v2611_v59 }
 0x406   :  { %2407 = vmatprep.subr.mxu1 %v2927_v14 }
 0x409   :  { %v2836_v55 = vpop.eup %2835 }
 0x40a   :  { %v241_v56 = vsel %vm234_vm4, %v2836_v55, 0.0 }
 0x40b   :  { %242 = vadd.xlane.f32.xlu1 %v241_v56 }
 0x41c   :  { %719 = vrot.lane.b32.xlu1 %v3057_v26, %s2933_s21 }
 0x498   :  { %v243_v60 = vpop.xlane.xlu1 %242 }
 0x499   :  { %2837 = vrcp.f32 %v243_v60 }
 0x49c   :  { %v720_v9 = vpop.permute.xlu1 %719 }
 0x4a3   :  { %v2838_v63 = vpop.eup %2837 }
 0x4a4   :  { %v245_v1 = vmul.f32 %v2838_v63, %v2836_v55  ;;  %v1247_v63 = vld [vmem:[%s3703_s7 + $0x8] sm:$0xff] }
 0x4a6   :  { %2376 = vmatmul.mubr.msk.f32.vlgmr.msra.gmra.mrb[4].mxu0 %vm234_vm4, %v245_v1 }
 0x4a7   :  { %2609 = vmatpush3.bf16.msra.mxu0 %v2608_v0  ;;  %2392 = vmatprep.mubr.msk.f32.mxu0 %vm2926_vm1, %v2927_v14  ;;  %v1249_v0 = vld [vmem:[%s3703_s7 + $0x18] sm:$0xff] }
 0x4a8   :  { %2402 = vmatprep.subr.mxu0 %v2927_v14  ;;  %v2631_v1 = vpack.c.bf16 %v1249_v0, %v1247_v63  ;;  %v2138_v63 = vld [vmem:[%s3703_s7 + $0xc0] sm:$0xff]  ;;  %v2140_v0 = vld [vmem:[%s3703_s7 + $0xd0] sm:$0xff] }
 0x4d7   :  { %v478_v4 = vpop.f32.mrb[2].mxu1 }
 0x4d8   :  { %v2387_v5 = vpop.f32.mrb[3].mxu1  ;;  %2393 = vmatmul.mubr.msk.f32.vlgmr.msra.gmra.mrb[6].mxu0 %vm157_vm2, %v478_v4 }
 0x4d9   :  { %2403 = vmatpush3.xpose.msk.msra.mxu0 %vm157_vm2, %v631_v3  ;;  %2404 = vmatprep.mubr.msk.f32.mxu0 %vm2926_vm1, %v2927_v14  ;;  %v1121_v5 = vld [vmem:[%s3702_s6] sm:$0xff] }
 0x4da   :  { %2613 = vmatprep.subr.bf16.mxu0 %v2925_v8 }
 0x4dc   :  { %2405 = vmatmul.mubr.msk.f32.vlgmr.msra.gmra.mrb[8].mxu0 %vm157_vm2, %v629_v6  ;;  %v1122_v6 = vld [vmem:[%s3702_s6 + $0x8] sm:$0xff] }
 0x4dd   :  { %2416 = vmatprep.mubr.msk.f32.mxu0 %vm2926_vm1, %v2927_v14  ;;  %2615 = vmatpush3.bf16.msra.mxu0 %v2614_v30  ;;  %v1261_v30 = vld [vmem:[%s3703_s7 + $0x78] sm:$0xff] }
 0x4de   :  { %2424 = vmatprep.subr.mxu0 %v2927_v14 }
 0x579   :  { %v318_v7 = vpop.f32.mrb[4].mxu0 }
 0x57a   :  { %v2377_v10 = vpop.f32.mrb[5].mxu0  ;;  %2400 = vmatmul.mubr.msk.f32.vlgmr.msra.gmra.mrb[4].mxu1 %vm157_vm2, %v318_v7  ;;  %v2620_v7 = vpack.c.bf16 %v1122_v6, %v1121_v5  ;;  %v2142_v5 = vld [vmem:[%s3703_s7 + $0xe0] sm:$0xff]  ;;  %v2144_v6 = vld [vmem:[%s3703_s7 + $0xf0] sm:$0xff] }
 0x57b   :  { %2408 = vmatpush3.msra.mxu1 %v720_v9  ;;  %2409 = vmatprep.mubr.msk.f32.mxu1 %vm2926_vm1, %v2927_v14  ;;  %v1253_v10 = vld [vmem:[%s3703_s7 + $0x38] sm:$0xff] }
 0x57c   :  { %2419 = vmatprep.subr.mxu1 %v2927_v14 }
 0x5ab   :  { %v551_v11 = vpop.f32.mrb[6].mxu0 }
 0x5ac   :  { %v2394_v12 = vpop.f32.mrb[7].mxu0 }
 0x5ad   :  { %v1250_v12 = vld [vmem:[%s3703_s7 + $0x20] sm:$0xff] }
 0x5af   :  { %v702_v13 = vpop.f32.mrb[8].mxu0 }
 0x5b0   :  { %v706_v15 = vmul.f32 0.25, %v702_v13  ;;  %v2406_v16 = vpop.f32.mrb[9].mxu0  ;;  %v1252_v13 = vld [vmem:[%s3703_s7 + $0x30] sm:$0xff] }
 0x5b1   :  { %v1123_v16 = vld [vmem:[%s3702_s6 + $0x10] sm:$0xff] }
 0x5b2   :  { %v707_v17 = vsel %vm145_vm3, %v706_v15, -1e+30  ;;  %v2637_v15 = vpack.c.bf16 %v1252_v13, %v1250_v12  ;;  %v1345_v12 = vld [vmem:[%s3704_s8 + $0x20] sm:$0xff]  ;;  %v1346_v13 = vld [vmem:[%s3704_s8 + $0x28] sm:$0xff] }
 0x5b3   :  { %v708_v18 = vsel %vm234_vm4, %v707_v17, -inf }
 0x5b4   :  { %709 = vmax.xlane.f32.xlu0 %v708_v18 }
 0x641   :  { %v710_v19 = vpop.xlane.xlu0 %709 }
 0x642   :  { %v711_v20 = vsub.f32 %v707_v17, %v710_v19  ;;  %v1124_v17 = vld [vmem:[%s3702_s6 + $0x18] sm:$0xff]  ;;  %v1255_v19 = vld [vmem:[%s3703_s7 + $0x48] sm:$0xff] }
 0x643   :  { %v2623_v18 = vpack.c.bf16 %v1124_v17, %v1123_v16  ;;  %v1347_v16 = vld [vmem:[%s3704_s8 + $0x30] sm:$0xff]  ;;  %v1348_v17 = vld [vmem:[%s3704_s8 + $0x38] sm:$0xff] }
 0x644   :  { %v712_v21 = vmul.f32 1.442695, %v711_v20  ;;  %v1257_v20 = vld [vmem:[%s3703_s7 + $0x58] sm:$0xff] }
 0x646   :  { %2839 = vpow2.f32 %v712_v21  ;;  %v2639_v21 = vpack.c.bf16 %v1257_v20, %v1255_v19  ;;  %v2148_v19 = vld [vmem:[%s3704_s8 + $0x80] sm:$0xff]  ;;  %v2149_v20 = vld [vmem:[%s3704_s8 + $0x88] sm:$0xff] }
 0x64d   :  { %v624_v22 = vpop.f32.mrb[4].mxu1 }
 0x64e   :  { %v625_v23 = vadd.f32 %v624_v22, %v551_v11  ;;  %v2401_v24 = vpop.f32.mrb[5].mxu1  ;;  %v1254_v22 = vld [vmem:[%s3703_s7 + $0x40] sm:$0xff] }
 0x650   :  { %v2840_v25 = vpop.eup %2839 }
 0x651   :  { %v714_v27 = vsel %vm234_vm4, %v2840_v25, 0.0 }
 0x652   :  { %715 = vadd.xlane.f32.xlu1 %v714_v27  ;;  %v1126_v27 = vld [vmem:[%s3702_s6 + $0x28] sm:$0xff] }
 0x663   :  { %869 = vrot.lane.b32.xlu1 %v3057_v26, %s2934_s28  ;;  %s2938_s28 = smov 127  }
 0x6df   :  { %v716_v33 = vpop.xlane.xlu1 %715 }
 0x6e0   :  { %2841 = vrcp.f32 %v716_v33  ;;  %v2643_v33 = vpack.c.bf16 %v1261_v30, %v1259_v29  ;;  %v1351_v29 = vld [vmem:[%s3704_s8 + $0x50] sm:$0xff]  ;;  %v1352_v30 = vld [vmem:[%s3704_s8 + $0x58] sm:$0xff] }
 0x6e3   :  { %v870_v26 = vpop.permute.xlu1 %869 }
 0x6ea   :  { %v2842_v34 = vpop.eup %2841 }
 0x6eb   :  { %v718_v35 = vmul.f32 %v2842_v34, %v2840_v25  ;;  %v1125_v25 = vld [vmem:[%s3702_s6 + $0x20] sm:$0xff] }
 0x6ec   :  { %v2626_v28 = vpack.c.bf16 %v1126_v27, %v1125_v25  ;;  %v1258_v34 = vld [vmem:[%s3703_s7 + $0x60] sm:$0xff]  ;;  %v2150_v25 = vld [vmem:[%s3704_s8 + $0x90] sm:$0xff]  ;;  %v2151_v27 = vld [vmem:[%s3704_s8 + $0x98] sm:$0xff] }
 0x6ed   :  { %2410 = vmatmul.mubr.msk.f32.vlgmr.msra.gmra.mrb[6].mxu1 %vm234_vm4, %v718_v35  ;;  %v1260_v35 = vld [vmem:[%s3703_s7 + $0x70] sm:$0xff] }
 0x6ee   :  { %2420 = vmatpush3.xpose.msk.msra.mxu1 %vm157_vm2, %v631_v3  ;;  %2421 = vmatprep.mubr.msk.f32.mxu1 %vm2926_vm1, %v2927_v14  ;;  %v1248_v3 = vld [vmem:[%s3703_s7 + $0x10] sm:$0xff] }
 0x6ef   :  { %2616 = vmatprep.subr.bf16.mxu1 %v2925_v8 }
 0x6f1   :  { %2422 = vmatmul.mubr.msk.f32.vlgmr.msra.gmra.mrb[8].mxu1 %vm157_vm2, %v870_v26  ;;  %v2645_v26 = vpack.c.bf16 %v1260_v35, %v1258_v34  ;;  %v2152_v34 = vld [vmem:[%s3704_s8 + $0xa0] sm:$0xff]  ;;  %v2153_v35 = vld [vmem:[%s3704_s8 + $0xa8] sm:$0xff] }
 0x6f2   :  { %2433 = vmatprep.mubr.msk.f32.mxu1 %vm2926_vm1, %v2927_v14  ;;  %2618 = vmatpush3.bf16.msra.mxu1 %v2617_v32  ;;  %v2137_v32 = vld [vmem:[%s3703_s7 + $0xb8] sm:$0xff] }
 0x6f3   :  { %2632 = vmatprep.subr.bf16.mxu1 %v2631_v1  ;;  %v2143_v1 = vld [vmem:[%s3703_s7 + $0xe8] sm:$0xff] }
 0x7c0   :  { %v791_v36 = vpop.f32.mrb[6].mxu1 }
 0x7c1   :  { %v2411_v37 = vpop.f32.mrb[7].mxu1  ;;  %2417 = vmatmul.mubr.msk.f32.vlgmr.msra.gmra.mrb[10].mxu0 %vm157_vm2, %v791_v36  ;;  %v1127_v36 = vld [vmem:[%s3702_s6 + $0x30] sm:$0xff] }
 0x7c2   :  { %2425 = vmatpush3.msra.mxu0 %v720_v9  ;;  %2426 = vmatprep.mubr.msk.f32.mxu0 %vm2926_vm1, %v2927_v14  ;;  %v1251_v9 = vld [vmem:[%s3703_s7 + $0x28] sm:$0xff]  ;;  %v1128_v37 = vld [vmem:[%s3702_s6 + $0x38] sm:$0xff] }
 0x7c3   :  { %2619 = vmatprep.subr.bf16.mxu0 %v2925_v8  ;;  %v2635_v11 = vpack.c.bf16 %v1253_v10, %v1251_v9  ;;  %v1343_v9 = vld [vmem:[%s3704_s8 + $0x10] sm:$0xff]  ;;  %v1344_v10 = vld [vmem:[%s3704_s8 + $0x18] sm:$0xff] }
 0x7c4   :  { %v939_v38 = vpop.f32.mrb[8].mxu1 }
 0x7c5   :  { %v943_v39 = vmul.f32 0.25, %v939_v38  ;;  %v2423_v40 = vpop.f32.mrb[9].mxu1  ;;  %v2629_v38 = vpack.c.bf16 %v1128_v37, %v1127_v36  ;;  %v1353_v36 = vld [vmem:[%s3704_s8 + $0x60] sm:$0xff]  ;;  %v1354_v37 = vld [vmem:[%s3704_s8 + $0x68] sm:$0xff] }
 0x7c6   :  { %v2133_v40 = vld [vmem:[%s3703_s7 + $0x98] sm:$0xff] }
 0x7c7   :  { %v944_v41 = vsel %vm145_vm3, %v943_v39, -1e+30  ;;  %v2131_v39 = vld [vmem:[%s3703_s7 + $0x88] sm:$0xff] }
 0x7c8   :  { %v945_v42 = vsel %vm234_vm4, %v944_v41, -inf }
 0x7c9   :  { %946 = vmax.xlane.f32.xlu0 %v945_v42 }
 0x856   :  { %v947_v43 = vpop.xlane.xlu0 %946 }
 0x857   :  { %v948_v44 = vsub.f32 %v944_v41, %v947_v43  ;;  %v2671_v41 = vpack.c.bf16 %v2133_v40, %v2131_v39  ;;  %v2154_v39 = vld [vmem:[%s3704_s8 + $0xb0] sm:$0xff]  ;;  %v2155_v40 = vld [vmem:[%s3704_s8 + $0xb8] sm:$0xff] }
 0x859   :  { %v949_v45 = vmul.f32 1.442695, %v948_v44 }
 0x85b   :  { %2843 = vpow2.f32 %v949_v45  ;;  %v2122_v45 = vld [vmem:[%s3701_s5] ss:$0 sm:$0xff]  ;;  %s2937_s5 = smov 3  }
 0x865   :  { %v2844_v46 = vpop.eup %2843 }
 0x866   :  { %v951_v47 = vsel %vm234_vm4, %v2844_v46, 0.0 }
 0x867   :  { %952 = vadd.xlane.f32.xlu1 %v951_v47  ;;  %v2132_v47 = vld [vmem:[%s3703_s7 + $0x90] sm:$0xff] }
 0x894   :  { %v864_v49 = vpop.f32.mrb[10].mxu0 }
 0x895   :  { %v868_v50 = vadd.f32 %v864_v49, %v625_v23  ;;  %v2418_v51 = vpop.f32.mrb[11].mxu0  ;;  %v1256_v23 = vld [vmem:[%s3703_s7 + $0x50] sm:$0xff]  ;;  %v1341_v49 = vld [vmem:[%s3704_s8] sm:$0xff] }
 0x896   :  { %v2641_v24 = vpack.c.bf16 %v1256_v23, %v1254_v22  ;;  %v1349_v22 = vld [vmem:[%s3704_s8 + $0x40] sm:$0xff]  ;;  %v1350_v23 = vld [vmem:[%s3704_s8 + $0x48] sm:$0xff] }
 0x8f4   :  { %v953_v52 = vpop.xlane.xlu1 %952 }
 0x8f5   :  { %2845 = vrcp.f32 %v953_v52 }
 0x8ff   :  { %v2846_v53 = vpop.eup %2845 }
 0x900   :  { %v955_v54 = vmul.f32 %v2846_v53, %v2844_v46  ;;  %v2130_v46 = vld [vmem:[%s3703_s7 + $0x80] sm:$0xff] }
 0x901   :  { %v2673_v52 = vpack.c.bf16 %v2132_v47, %v2130_v46  ;;  %v2157_v46 = vld [vmem:[%s3704_s8 + $0xc8] sm:$0xff] }
 0x902   :  { %2427 = vmatmul.mubr.msk.f32.vlgmr.msra.gmra.mrb[12].mxu0 %vm234_vm4, %v955_v54  ;;  %v2675_v54 = vpack.c.bf16 %v2137_v32, %v2135_v48  ;;  %v2166_v47 = vld [vmem:[%s3703_s7 + $0x108] sm:$0xff] }
 0x903   :  { %2452 = vmatprep.mubr.msk.f32.mxu0 %vm2926_vm1, %v2927_v14  ;;  %2621 = vmatpush3.bf16.msra.mxu0 %v2620_v7  ;;  %v2685_v7 = vpack.c.bf16 %v2144_v6, %v2142_v5 }
 0x904   :  { %2622 = vmatprep.subr.bf16.mxu0 %v2925_v8 }
 0x907   :  { %2624 = vmatpush3.bf16.msra.mxu0 %v2623_v18  ;;  %v2657_v18 = vpack.c.bf16 %v1348_v17, %v1347_v16  ;;  %v2172_v16 = vld [vmem:[%s3703_s7 + $0x138] sm:$0xff] }
 0x908   :  { %2625 = vmatprep.subr.bf16.mxu0 %v2925_v8 }
 0x90b   :  { %2627 = vmatpush3.bf16.msra.mxu0 %v2626_v28  ;;  %v2691_v28 = vpack.c.bf16 %v2151_v27, %v2150_v25  ;;  %v2174_v25 = vld [vmem:[%s3703_s7 + $0x148] sm:$0xff]  ;;  %v2176_v27 = vld [vmem:[%s3703_s7 + $0x158] sm:$0xff] }
 0x90c   :  { %2628 = vmatprep.subr.bf16.mxu0 %v2925_v8 }
 0x90f   :  { %2630 = vmatpush3.bf16.msra.mxu0 %v2629_v38  ;;  %v2666_v38 = vpack.c.bf16 %v1354_v37, %v1353_v36  ;;  %v2177_v37 = vld [vmem:[%s3703_s7 + $0x160] sm:$0xff] }
 0x910   :  { %2647 = vmatprep.subr.bf16.mxu0 %v2925_v8 }
 0x9d5   :  { %v1025_v55 = vpop.f32.mrb[12].mxu0 }
 0x9d6   :  { %v2428_v56 = vpop.f32.mrb[13].mxu0  ;;  %2434 = vmatmul.mubr.msk.f32.vlgmr.msra.gmra.mrb[10].mxu1 %vm157_vm2, %v1025_v55  ;;  %v2134_v55 = vld [vmem:[%s3703_s7 + $0xa0] sm:$0xff] }
 0x9d7   :  { %1326 = vmatprep.mubr.f32.mxu1 %v2927_v14  ;;  %v2136_v56 = vld [vmem:[%s3703_s7 + $0xb0] sm:$0xff] }
 0xaa9   :  { %v1098_v57 = vpop.f32.mrb[10].mxu1 }
 0xaaa   :  { %v1102_v58 = vadd.f32 %v1098_v57, %v868_v50  ;;  %v2435_v59 = vpop.f32.mrb[11].mxu1  ;;  %v1342_v50 = vld [vmem:[%s3704_s8 + $0x8] sm:$0xff] }
 0xaab   :  { %v2648_v57 = vpack.c.bf16 %v1342_v50, %v1341_v49  ;;  %v2141_v59 = vld [vmem:[%s3703_s7 + $0xd8] sm:$0xff]  ;;  %v2158_v49 = vld [vmem:[%s3704_s8 + $0xd0] sm:$0xff] }
 0xaac   :  { %v3168_v60 = vadd.f32 %v1102_v58, %v3011_v2  ;;  %v1246_v2 = vld [vmem:[%s3703_s7] sm:$0xff]  ;;  %v2139_v58 = vld [vmem:[%s3703_s7 + $0xc8] sm:$0xff]  ;;  %v2159_v50 = vld [vmem:[%s3704_s8 + $0xd8] sm:$0xff] }
 0xaad   :  { %v2633_v4 = vpack.c.bf16 %v1248_v3, %v1246_v2  ;;  %v2145_v2 = vld [vmem:[%s3703_s7 + $0xf8] sm:$0xff]  ;;  %v2681_v3 = vpack.c.bf16 %v2140_v0, %v2138_v63 }
 0xaae   :  { %1104 = vst.msk [vmem:[#allocation4] sm:$0xff] %vm44_vm0, %v3168_v60  ;;  %v1106_v61 = vmul.f32 %v3168_v60, %v3168_v60 }
 0xaaf   :  { %2634 = vmatpush1.bf16.msra.mxu1 %v2633_v4  ;;  %v2683_v4 = vpack.c.bf16 %v2145_v2, %v2143_v1 }
 0xab0   :  { %v1107_v62 = vsel %vm44_vm0, %v1106_v61, 0.0  ;;  %2636 = vmatprep.subr.bf16.mxu1 %v2635_v11  ;;  %v2677_v61 = vpack.c.bf16 %v2136_v56, %v2134_v55  ;;  %v2651_v11 = vpack.c.bf16 %v1344_v10, %v1343_v9  ;;  %v2162_v56 = vld [vmem:[%s3704_s8 + $0xf0] sm:$0xff] }
 0xab1   :  { %1108 = vadd.xlane.f32.xlu0 %v1107_v62  ;;  %v2679_v62 = vpack.c.bf16 %v2141_v59, %v2139_v58  ;;  %v2201_v59 = vld [vmem:[%s3703_s7 + $0x188] sm:$0xff] }
 0xab3   :  { %2638 = vmatpush1.bf16.msra.mxu1 %v2637_v15  ;;  %v2654_v15 = vpack.c.bf16 %v1346_v13, %v1345_v12  ;;  %v2167_v12 = vld [vmem:[%s3703_s7 + $0x110] sm:$0xff] }
 0xab4   :  { %2640 = vmatprep.subr.bf16.mxu1 %v2639_v21  ;;  %v2688_v21 = vpack.c.bf16 %v2149_v20, %v2148_v19 }
 0xab7   :  { %2642 = vmatpush1.bf16.msra.mxu1 %v2641_v24  ;;  %v2660_v24 = vpack.c.bf16 %v1350_v23, %v1349_v22  ;;  %v2169_v22 = vld [vmem:[%s3703_s7 + $0x120] sm:$0xff]  ;;  %v2171_v23 = vld [vmem:[%s3703_s7 + $0x130] sm:$0xff] }
 0xab8   :  { %2644 = vmatprep.subr.bf16.mxu1 %v2643_v33  ;;  %v2663_v33 = vpack.c.bf16 %v1352_v30, %v1351_v29  ;;  %v2719_v29 = vpack.c.bf16 %v2176_v27, %v2174_v25  ;;  %v2173_v30 = vld [vmem:[%s3703_s7 + $0x140] sm:$0xff]  ;;  %v2193_v25 = vld [vmem:[%s3704_s8 + $0x150] sm:$0xff]  ;;  %v2194_v27 = vld [vmem:[%s3704_s8 + $0x158] sm:$0xff] }
 0xabb   :  { %2646 = vmatpush1.bf16.msra.mxu1 %v2645_v26  ;;  %v2694_v26 = vpack.c.bf16 %v2153_v35, %v2152_v34  ;;  %v2178_v34 = vld [vmem:[%s3703_s7 + $0x168] sm:$0xff]  ;;  %v2180_v35 = vld [vmem:[%s3703_s7 + $0x178] sm:$0xff] }
 0xabc   :  { %2672 = vmatprep.subr.bf16.mxu1 %v2671_v41  ;;  %v2697_v41 = vpack.c.bf16 %v2155_v40, %v2154_v39  ;;  %v2723_v36 = vpack.c.bf16 %v2180_v35, %v2178_v34  ;;  %v2200_v40 = vld [vmem:[%s3703_s7 + $0x180] sm:$0xff]  ;;  %v2196_v35 = vld [vmem:[%s3704_s8 + $0x168] sm:$0xff] }
 0xabd   :  { %v2195_v34 = vld [vmem:[%s3704_s8 + $0x160] sm:$0xff] }
 0xb3e   :  { %v1109_v42 = vpop.xlane.xlu0 %1108 }
 0xb3f   :  { %v1110_v43 = vmul.f32 0.015625, %v1109_v42  ;;  %v1355_v42 = vld [vmem:[%s3704_s8 + $0x70] sm:$0xff] }
 0xb41   :  { %v1111_v44 = vadd.f32 1e-06, %v1110_v43  ;;  %v1356_v43 = vld [vmem:[%s3704_s8 + $0x78] sm:$0xff] }
 0xb43   :  { %2847 = vrsqrt.f32 %v1111_v44  ;;  %v2669_v44 = vpack.c.bf16 %v1356_v43, %v1355_v42  ;;  %v2205_v43 = vld [vmem:[%s3703_s7 + $0x1a8] sm:$0xff] }
 0xb4d   :  { %v2848_v31 = vpop.eup %2847 }
 0xb4e   :  { %v1113_v51 = vmul.f32 %v2848_v31, %v3168_v60  ;;  %v2168_v31 = vld [vmem:[%s3703_s7 + $0x118] sm:$0xff] }
 0xb4f   :  { %v2711_v32 = vpack.c.bf16 %v2168_v31, %v2166_v47  ;;  %v2204_v31 = vld [vmem:[%s3703_s7 + $0x1a0] sm:$0xff] }
 0xb50   :  { %v3279_v53 = vmul.f32 %v2122_v45, %v1113_v51  ;;  %v2156_v45 = vld [vmem:[%s3704_s8 + $0xc0] sm:$0xff]  ;;  %v2703_v51 = vpack.c.bf16 %v2159_v50, %v2158_v49  ;;  %v2209_v49 = vld [vmem:[%s3703_s7 + $0x1c8] sm:$0xff]  ;;  %v2211_v50 = vld [vmem:[%s3703_s7 + $0x1d8] sm:$0xff] }
 0xb51   :  { %v2700_v48 = vpack.c.bf16 %v2157_v46, %v2156_v45 }
 0xb52   :  { %2453 = vmatmul.mubr.msk.f32.vlgmr.msra.gmra.mrb[14].mxu0 %vm44_vm0, %v3279_v53  ;;  %2127 = vmatmul.mubr.msk.f32.vlgmr.msra.gmra.mrb[12].mxu1 %vm44_vm0, %v3279_v53 }
 0xb53   :  { %2674 = vmatpush1.bf16.msra.mxu1 %v2673_v52  ;;  %1533 = vmatprep.mubr.f32.mxu1 %v2927_v14  ;;  %v2160_v52 = vld [vmem:[%s3704_s8 + $0xe0] sm:$0xff] }
 0xb54   :  { %2676 = vmatprep.subr.bf16.mxu1 %v2675_v54  ;;  %2649 = vmatpush3.bf16.msra.mxu0 %v2648_v57  ;;  %v2161_v54 = vld [vmem:[%s3704_s8 + $0xe8] sm:$0xff]  ;;  %v2163_v57 = vld [vmem:[%s3704_s8 + $0xf8] sm:$0xff] }
 0xb55   :  { %2650 = vmatprep.subr.bf16.mxu0 %v2925_v8  ;;  %2487 = vmatprep.mubr.msk.f32.mxu0 %vm2926_vm1, %v2927_v14  ;;  %v2706_v55 = vpack.c.bf16 %v2161_v54, %v2160_v52  ;;  %v2709_v58 = vpack.c.bf16 %v2163_v57, %v2162_v56  ;;  %v2759_v52 = vpack.c.bf16 %v2211_v50, %v2209_v49  ;;  %v2208_v54 = vld [vmem:[%s3703_s7 + $0x1c0] sm:$0xff]  ;;  %v2213_v56 = vld [vmem:[%s3703_s7 + $0x1e8] sm:$0xff]  ;;  %v2215_v57 = vld [vmem:[%s3703_s7 + $0x1f8] sm:$0xff] }
 0xb56   :  { %v2231_v49 = vld [vmem:[%s3704_s8 + $0x1e8] sm:$0xff] }
 0xb57   :  { %2678 = vmatpush1.bf16.msra.mxu1 %v2677_v61  ;;  %v2203_v61 = vld [vmem:[%s3703_s7 + $0x198] sm:$0xff] }
 0xb58   :  { %2680 = vmatprep.subr.bf16.mxu1 %v2679_v62  ;;  %2652 = vmatpush3.bf16.msra.mxu0 %v2651_v11  ;;  %v2751_v62 = vpack.c.bf16 %v2203_v61, %v2201_v59  ;;  %v2165_v11 = vld [vmem:[%s3703_s7 + $0x100] sm:$0xff]  ;;  %v2763_v59 = vpack.c.bf16 %v2215_v57, %v2213_v56 }
 0xb59   :  { %2653 = vmatprep.subr.bf16.mxu0 %v2925_v8  ;;  %v2212_v61 = vld [vmem:[%s3703_s7 + $0x1e0] sm:$0xff] }
 0xb5b   :  { %2682 = vmatpush1.bf16.msra.mxu1 %v2681_v3 }
 0xb5c   :  { %2684 = vmatprep.subr.bf16.mxu1 %v2683_v4  ;;  %2655 = vmatpush3.bf16.msra.mxu0 %v2654_v15  ;;  %v2170_v15 = vld [vmem:[%s3703_s7 + $0x128] sm:$0xff] }
 0xb5d   :  { %2656 = vmatprep.subr.bf16.mxu0 %v2925_v8 }
 0xb5f   :  { %2686 = vmatpush1.bf16.msra.mxu1 %v2685_v7 }
 0xb60   :  { %2687 = vmatprep.subr.bf16.mxu1 %v2925_v8  ;;  %2658 = vmatpush3.bf16.msra.mxu0 %v2657_v18  ;;  %v2713_v18 = vpack.c.bf16 %v2167_v12, %v2165_v11  ;;  %v2190_v11 = vld [vmem:[%s3704_s8 + $0x138] sm:$0xff] }
 0xb61   :  { %2659 = vmatprep.subr.bf16.mxu0 %v2925_v8 }
 0xb62   :  { %2146 = vmatmul.mubr.msk.f32.vlgmr.msra.gmra.mrb[14].mxu1 %vm44_vm0, %v3279_v53 }
 0xb63   :  { %2522 = vmatprep.mubr.msk.f32.mxu1 %vm2926_vm1, %v2927_v14  ;;  %2689 = vmatpush3.bf16.msra.mxu1 %v2688_v21  ;;  %v2715_v21 = vpack.c.bf16 %v2172_v16, %v2170_v15  ;;  %v2218_v15 = vld [vmem:[%s3704_s8 + $0x180] sm:$0xff]  ;;  %v2219_v16 = vld [vmem:[%s3704_s8 + $0x188] sm:$0xff] }
 0xb64   :  { %2661 = vmatpush3.bf16.msra.mxu0 %v2660_v24  ;;  %2690 = vmatprep.subr.bf16.mxu1 %v2925_v8 }
 0xb65   :  { %2662 = vmatprep.subr.bf16.mxu0 %v2925_v8 }
 0xb67   :  { %2692 = vmatpush3.bf16.msra.mxu1 %v2691_v28  ;;  %v2717_v28 = vpack.c.bf16 %v2171_v23, %v2169_v22  ;;  %v2221_v23 = vld [vmem:[%s3704_s8 + $0x198] sm:$0xff] }
 0xb68   :  { %2664 = vmatpush3.bf16.msra.mxu0 %v2663_v33  ;;  %2693 = vmatprep.subr.bf16.mxu1 %v2925_v8  ;;  %v2175_v33 = vld [vmem:[%s3703_s7 + $0x150] sm:$0xff] }
 0xb69   :  { %2665 = vmatprep.subr.bf16.mxu0 %v2925_v8 }
 0xb6b   :  { %2695 = vmatpush3.bf16.msra.mxu1 %v2694_v26  ;;  %v2721_v26 = vpack.c.bf16 %v2175_v33, %v2173_v30  ;;  %v2223_v30 = vld [vmem:[%s3704_s8 + $0x1a8] sm:$0xff] }
 0xb6c   :  { %2667 = vmatpush3.bf16.msra.mxu0 %v2666_v38  ;;  %2696 = vmatprep.subr.bf16.mxu1 %v2925_v8  ;;  %v2179_v38 = vld [vmem:[%s3703_s7 + $0x170] sm:$0xff] }
 0xb6d   :  { %2668 = vmatprep.subr.bf16.mxu0 %v2925_v8  ;;  %v2725_v39 = vpack.c.bf16 %v2179_v38, %v2177_v37  ;;  %v2225_v37 = vld [vmem:[%s3704_s8 + $0x1b8] sm:$0xff] }
 0xb6f   :  { %2698 = vmatpush3.bf16.msra.mxu1 %v2697_v41  ;;  %v2202_v41 = vld [vmem:[%s3703_s7 + $0x190] sm:$0xff] }
 0xb70   :  { %2670 = vmatpush3.bf16.msra.mxu0 %v2669_v44  ;;  %2699 = vmatprep.subr.bf16.mxu1 %v2925_v8  ;;  %v2207_v44 = vld [vmem:[%s3703_s7 + $0x1b8] sm:$0xff]  ;;  %v2753_v46 = vpack.c.bf16 %v2202_v41, %v2200_v40 }
 0xb71   :  { %2712 = vmatprep.subr.bf16.mxu0 %v2711_v32  ;;  %v2206_v32 = vld [vmem:[%s3703_s7 + $0x1b0] sm:$0xff]  ;;  %v2198_v40 = vld [vmem:[%s3704_s8 + $0x178] sm:$0xff] }
 0xb73   :  { %2701 = vmatpush3.bf16.msra.mxu1 %v2700_v48  ;;  %v2755_v48 = vpack.c.bf16 %v2207_v44, %v2205_v43  ;;  %v2226_v44 = vld [vmem:[%s3704_s8 + $0x1c0] sm:$0xff] }
 0xb74   :  { %2702 = vmatprep.subr.bf16.mxu1 %v2925_v8 }
 0xb77   :  { %2704 = vmatpush3.bf16.msra.mxu1 %v2703_v51  ;;  %v2757_v51 = vpack.c.bf16 %v2206_v32, %v2204_v31  ;;  %v2230_v32 = vld [vmem:[%s3704_s8 + $0x1e0] sm:$0xff] }
 0xb78   :  { %2705 = vmatprep.subr.bf16.mxu1 %v2925_v8  ;;  %v2786_v50 = vpack.c.bf16 %v2231_v49, %v2230_v32 }
 0xb7b   :  { %2707 = vmatpush3.bf16.msra.mxu1 %v2706_v55  ;;  %v2210_v55 = vld [vmem:[%s3703_s7 + $0x1d0] sm:$0xff] }
 0xb7c   :  { %2708 = vmatprep.subr.bf16.mxu1 %v2925_v8 }
 0xb7f   :  { %2710 = vmatpush3.bf16.msra.mxu1 %v2709_v58  ;;  %v2761_v58 = vpack.c.bf16 %v2210_v55, %v2208_v54 }
 0xb80   :  { %2752 = vmatprep.subr.bf16.mxu1 %v2751_v62  ;;  %v2214_v62 = vld [vmem:[%s3703_s7 + $0x1f0] sm:$0xff] }
 0xc25   :  { %v3439_v63 = vpop.f32.mrb[14].mxu0  ;;  %v1328_v0 = vpop.f32.mrb[12].mxu1 }
 0xc26   :  { %v2128_v1 = vmul.f32 -1.442695, %v1328_v0  ;;  %v2454_v2 = vpop.f32.mrb[15].mxu0  ;;  %v1330_v3 = vpop.f32.mrb[13].mxu1  ;;  %v1203_v4 = vsel %vm1202_vm5, %v3439_v63, -inf }
 0xc27   :  { %1204 = vmax.xlane.f32.xlu0 %v1203_v4  ;;  %v2184_v2 = vld [vmem:[%s3704_s8 + $0x108] sm:$0xff]  ;;  %v2185_v4 = vld [vmem:[%s3704_s8 + $0x110] sm:$0xff] }
 0xc28   :  { %2849 = vpow2.f32 %v2128_v1  ;;  %v2183_v1 = vld [vmem:[%s3704_s8 + $0x100] sm:$0xff] }
 0xc32   :  { %v2850_v5 = vpop.eup %2849 }
 0xc33   :  { %v1336_v6 = vadd.f32 1.0, %v2850_v5 }
 0xc35   :  { %2851 = vrcp.f32 %v1336_v6  ;;  %v1535_v7 = vpop.f32.mrb[14].mxu1  ;;  %v2187_v6 = vld [vmem:[%s3704_s8 + $0x120] sm:$0xff] }
 0xc36   :  { %v2147_v9 = vmul.f32 -1.442695, %v1535_v7  ;;  %v1537_v10 = vpop.f32.mrb[15].mxu1 }
 0xc38   :  { %2853 = vpow2.f32 %v2147_v9 }
 0xc3f   :  { %v2852_v13 = vpop.eup %2851 }
 0xc40   :  { %v1339_v17 = vmul.f32 %v2852_v13, %v1328_v0  ;;  %v2765_v0 = vpack.c.bf16 %v2214_v62, %v2212_v61 }
 0xc42   :  { %v2854_v19 = vpop.eup %2853  ;;  %v1340_v20 = vmul.f32 %v1339_v17, %v1330_v3  ;;  %v2728_v3 = vpack.c.bf16 %v2184_v2, %v2183_v1 }
 0xc43   :  { %v1543_v24 = vadd.f32 1.0, %v2854_v19  ;;  %v2191_v19 = vld [vmem:[%s3704_s8 + $0x140] sm:$0xff] }
 0xc44   :  { %2488 = vmatmul.mubr.f32.vlgmr.msra.gmra.mrb[16].mxu0 %v1340_v20  ;;  %v2192_v20 = vld [vmem:[%s3704_s8 + $0x148] sm:$0xff] }
 0xc45   :  { %2855 = vrcp.f32 %v1543_v24  ;;  %2714 = vmatpush1.bf16.msra.mxu0 %v2713_v18  ;;  %1741 = vmatprep.mubr.f32.mxu0 %v2927_v14  ;;  %v2768_v18 = vpack.c.bf16 %v2219_v16, %v2218_v15 }
 0xc46   :  { %2716 = vmatprep.subr.bf16.mxu0 %v2715_v21  ;;  %v2740_v21 = vpack.c.bf16 %v2192_v20, %v2191_v19  ;;  %v2940_v19 = vmov 1  }
 0xc47   :  { %2826 = vset.pattern.permute.xlu0 %v2940_v19 }
 0xc49   :  { %2718 = vmatpush1.bf16.msra.mxu0 %v2717_v28  ;;  %v2743_v28 = vpack.c.bf16 %v2194_v27, %v2193_v25  ;;  %v2941_v27 = vmov 0  }
 0xc4a   :  { %2720 = vmatprep.subr.bf16.mxu0 %v2719_v29  ;;  %v2222_v29 = vld [vmem:[%s3704_s8 + $0x1a0] sm:$0xff]  ;;  %2827 = vset.pattern.permute.xlu1 %v2941_v27 }
 0xc4b   :  { %v2774_v33 = vpack.c.bf16 %v2223_v30, %v2222_v29 }
 0xc4d   :  { %2722 = vmatpush1.bf16.msra.mxu0 %v2721_v26  ;;  %v2746_v26 = vpack.c.bf16 %v2196_v35, %v2195_v34 }
 0xc4e   :  { %2724 = vmatprep.subr.bf16.mxu0 %v2723_v36  ;;  %v2224_v36 = vld [vmem:[%s3704_s8 + $0x1b0] sm:$0xff] }
 0xc4f   :  { %v2856_v42 = vpop.eup %2855  ;;  %v2777_v38 = vpack.c.bf16 %v2225_v37, %v2224_v36 }
 0xc50   :  { %v1546_v45 = vmul.f32 %v2856_v42, %v1535_v7  ;;  %v2188_v7 = vld [vmem:[%s3704_s8 + $0x128] sm:$0xff] }
 0xc51   :  { %2726 = vmatpush1.bf16.msra.mxu0 %v2725_v39  ;;  %v2734_v9 = vpack.c.bf16 %v2188_v7, %v2187_v6  ;;  %v2197_v39 = vld [vmem:[%s3704_s8 + $0x170] sm:$0xff] }
 0xc52   :  { %v1547_v47 = vmul.f32 %v1546_v45, %v1537_v10  ;;  %2727 = vmatprep.subr.bf16.mxu0 %v2925_v8  ;;  %v2189_v10 = vld [vmem:[%s3704_s8 + $0x130] sm:$0xff]  ;;  %v2749_v41 = vpack.c.bf16 %v2198_v40, %v2197_v39  ;;  %v2227_v45 = vld [vmem:[%s3704_s8 + $0x1c8] sm:$0xff] }
 0xc53   :  { %v2737_v12 = vpack.c.bf16 %v2190_v11, %v2189_v10 }
 0xc54   :  { %2523 = vmatmul.mubr.f32.vlgmr.msra.gmra.mrb[16].mxu1 %v1547_v47  ;;  %2181 = vmatmul.mubr.msk.f32.vlgmr.msra.gmra.mrb[18].mxu0 %vm44_vm0, %v3279_v53  ;;  %v2228_v47 = vld [vmem:[%s3704_s8 + $0x1d0] sm:$0xff] }
 0xc55   :  { %2754 = vmatpush1.bf16.msra.mxu1 %v2753_v46  ;;  %1949 = vmatprep.mubr.f32.mxu1 %v2927_v14  ;;  %v2780_v46 = vpack.c.bf16 %v2227_v45, %v2226_v44 }
 0xc56   :  { %2756 = vmatprep.subr.bf16.mxu1 %v2755_v48  ;;  %2557 = vmatprep.mubr.msk.f32.mxu0 %vm2926_vm1, %v2927_v14  ;;  %v2229_v48 = vld [vmem:[%s3704_s8 + $0x1d8] sm:$0xff] }
 0xc57   :  { %2729 = vmatpush3.bf16.msra.mxu0 %v2728_v3  ;;  %v2783_v31 = vpack.c.bf16 %v2229_v48, %v2228_v47 }
 0xc58   :  { %2730 = vmatprep.subr.bf16.mxu0 %v2925_v8 }
 0xc59   :  { %2758 = vmatpush1.bf16.msra.mxu1 %v2757_v51  ;;  %v2232_v51 = vld [vmem:[%s3704_s8 + $0x1f0] sm:$0xff] }
 0xc5a   :  { %2760 = vmatprep.subr.bf16.mxu1 %v2759_v52  ;;  %v2233_v52 = vld [vmem:[%s3704_s8 + $0x1f8] sm:$0xff] }
 0xc5b   :  { %v2789_v54 = vpack.c.bf16 %v2233_v52, %v2232_v51 }
 0xc5d   :  { %2762 = vmatpush1.bf16.msra.mxu1 %v2761_v58 }
 0xc5e   :  { %2764 = vmatprep.subr.bf16.mxu1 %v2763_v59 }
 0xc61   :  { %2766 = vmatpush1.bf16.msra.mxu1 %v2765_v0 }
 0xc62   :  { %2767 = vmatprep.subr.bf16.mxu1 %v2925_v8 }
 0xc64   :  { %2216 = vmatmul.mubr.msk.f32.vlgmr.msra.gmra.mrb[18].mxu1 %vm44_vm0, %v3279_v53  ;;  %v2186_v53 = vld [vmem:[%s3704_s8 + $0x118] sm:$0xff] }
 0xc65   :  { %2592 = vmatprep.mubr.msk.f32.mxu1 %vm2926_vm1, %v2927_v14  ;;  %v2731_v5 = vpack.c.bf16 %v2186_v53, %v2185_v4  ;;  %2769 = vmatpush3.bf16.msra.mxu1 %v2768_v18 }
 0xc66   :  { %2770 = vmatprep.subr.bf16.mxu1 %v2925_v8 }
 0xc67   :  { %2732 = vmatpush3.bf16.msra.mxu0 %v2731_v5 }
 0xc68   :  { %2733 = vmatprep.subr.bf16.mxu0 %v2925_v8 }
 0xc6b   :  { %2735 = vmatpush3.bf16.msra.mxu0 %v2734_v9 }
 0xc6c   :  { %2736 = vmatprep.subr.bf16.mxu0 %v2925_v8 }
 0xc6f   :  { %2738 = vmatpush3.bf16.msra.mxu0 %v2737_v12 }
 0xc70   :  { %2739 = vmatprep.subr.bf16.mxu0 %v2925_v8 }
 0xc73   :  { %2741 = vmatpush3.bf16.msra.mxu0 %v2740_v21 }
 0xc74   :  { %2742 = vmatprep.subr.bf16.mxu0 %v2925_v8 }
 0xc77   :  { %2744 = vmatpush3.bf16.msra.mxu0 %v2743_v28 }
 0xc78   :  { %2745 = vmatprep.subr.bf16.mxu0 %v2925_v8 }
 0xc7b   :  { %2747 = vmatpush3.bf16.msra.mxu0 %v2746_v26 }
 0xc7c   :  { %2748 = vmatprep.subr.bf16.mxu0 %v2925_v8 }
 0xc7f   :  { %2750 = vmatpush3.bf16.msra.mxu0 %v2749_v41 }
 0xcb4   :  { %v1205_v13 = vpop.xlane.xlu0 %1204 }
 0xcb5   :  { %v1206_v17 = vsub.f32 %v3439_v63, %v1205_v13  ;;  %v2220_v63 = vld [vmem:[%s3704_s8 + $0x190] sm:$0xff]  ;;  %s2935_s8 = smov 2  }
 0xcb6   :  { %v2771_v24 = vpack.c.bf16 %v2221_v23, %v2220_v63 }
 0xcb7   :  { %v1207_v22 = vmul.f32 1.442695, %v1206_v17 }
 0xcb8   :  { %2772 = vmatpush3.bf16.msra.mxu1 %v2771_v24 }
 0xcb9   :  { %2857 = vpow2.f32 %v1207_v22  ;;  %2773 = vmatprep.subr.bf16.mxu1 %v2925_v8 }
 0xcbc   :  { %2775 = vmatpush3.bf16.msra.mxu1 %v2774_v33 }
 0xcbd   :  { %2776 = vmatprep.subr.bf16.mxu1 %v2925_v8 }
 0xcc0   :  { %2778 = vmatpush3.bf16.msra.mxu1 %v2777_v38 }
 0xcc1   :  { %2779 = vmatprep.subr.bf16.mxu1 %v2925_v8 }
 0xcc3   :  { %v2858_v42 = vpop.eup %2857 }
 0xcc4   :  { %v1209_v43 = vsel %vm1202_vm5, %v2858_v42, 0.0  ;;  %2781 = vmatpush3.bf16.msra.mxu1 %v2780_v46 }
 0xcc5   :  { %1210 = vadd.xlane.f32.xlu0 %v1209_v43  ;;  %2782 = vmatprep.subr.bf16.mxu1 %v2925_v8 }
 0xcc8   :  { %2784 = vmatpush3.bf16.msra.mxu1 %v2783_v31 }
 0xcc9   :  { %2785 = vmatprep.subr.bf16.mxu1 %v2925_v8 }
 0xccc   :  { %2787 = vmatpush3.bf16.msra.mxu1 %v2786_v50 }
 0xccd   :  { %2788 = vmatprep.subr.bf16.mxu1 %v2925_v8 }
 0xcd0   :  { %2790 = vmatpush3.bf16.msra.mxu1 %v2789_v54 }
 0xd17   :  { %v3651_v55 = vpop.f32.mrb[16].mxu0 }
 0xd18   :  { %v2489_v56 = vpop.f32.mrb[17].mxu0 }
 0xd27   :  { %v3653_v57 = vpop.f32.mrb[16].mxu1  ;;  %v1743_v58 = vpop.f32.mrb[18].mxu0 }
 0xd28   :  { %v2182_v59 = vmul.f32 -1.442695, %v1743_v58  ;;  %v2524_v61 = vpop.f32.mrb[17].mxu1  ;;  %v1745_v62 = vpop.f32.mrb[19].mxu0 }
 0xd2a   :  { %2859 = vpow2.f32 %v2182_v59 }
 0xd34   :  { %v2860_v8 = vpop.eup %2859 }
 0xd35   :  { %v1751_v0 = vadd.f32 1.0, %v2860_v8 }
 0xd37   :  { %2861 = vrcp.f32 %v1751_v0  ;;  %v1951_v1 = vpop.f32.mrb[18].mxu1 }
 0xd38   :  { %v2217_v2 = vmul.f32 -1.442695, %v1951_v1  ;;  %v1953_v3 = vpop.f32.mrb[19].mxu1 }
 0xd3a   :  { %2863 = vpow2.f32 %v2217_v2 }
 0xd41   :  { %v2862_v4 = vpop.eup %2861 }
 0xd42   :  { %v1754_v53 = vmul.f32 %v2862_v4, %v1743_v58 }
 0xd44   :  { %v2864_v5 = vpop.eup %2863  ;;  %v1755_v6 = vmul.f32 %v1754_v53, %v1745_v62 }
 0xd45   :  { %v1959_v7 = vadd.f32 1.0, %v2864_v5 }
 0xd46   :  { %2558 = vmatmul.mubr.f32.vlgmr.msra.gmra.mrb[20].mxu0 %v1755_v6 }
 0xd47   :  { %2865 = vrcp.f32 %v1959_v7 }
 0xd51   :  { %v2866_v9 = vpop.eup %2865 }
 0xd52   :  { %v1962_v10 = vmul.f32 %v2866_v9, %v1951_v1  ;;  %v1211_v11 = vpop.xlane.xlu0 %1210 }
 0xd53   :  { %2867 = vrcp.f32 %v1211_v11 }
 0xd54   :  { %v1963_v12 = vmul.f32 %v1962_v10, %v1953_v3 }
 0xd56   :  { %2593 = vmatmul.mubr.f32.vlgmr.msra.gmra.mrb[20].mxu1 %v1963_v12 }
 0xd5d   :  { %v2868_v13 = vpop.eup %2867 }
 0xd5e   :  { %v1213_v15 = vmul.f32 %v2868_v13, %v2858_v42 }
 0xd60   :  { %1222 = vrot.lane.b32.xlu1 %v1213_v15, %s2935_s8  ;;  %1215 = vrot.lane.b32.xlu0 %v1213_v15, %s2936_s27 }
 0xd64   :  { %1233 = vrot.lane.b32.xlu0 %v1213_v15, %s2937_s5 }
 0xd68   :  { %1434 = vrot.lane.b32.xlu0 %v1213_v15, %s2938_s28 }
 0xd6c   :  { %1642 = vrot.lane.b32.xlu0 %v1213_v15, %s2939_s29 }
 0xdd2   :  { %v1216_v16 = vpop.permute.xlu0 %1215  ;;  %v1223_v17 = vpop.permute.xlu1 %1222 }
 0xdd3   :  { %vm1218_vm6 = vcmp.gt.f32.partialorder %v1213_v15, %v1216_v16  ;;  %vm1225_vm8 = vcmp.gt.f32.partialorder %v1213_v15, %v1223_v17 }
 0xdd4   :  { %v2124_v20 = vsel %vm1218_vm6, 1.0, %v2927_v14  ;;  %v2125_v23 = vsel %vm1225_vm8, 1.0, %v2927_v14 }
 0xdd5   :  { %v2821_v29 = vpack.i.bf16 %v2124_v20, %v2125_v23 }
 0xdd6   :  { %v1234_v18 = vpop.permute.xlu0 %1233 }
 0xdd7   :  { %vm1236_vm7 = vcmp.gt.f32.partialorder %v1213_v15, %v1234_v18 }
 0xdd8   :  { %v2126_v21 = vsel %vm1236_vm7, 1.0, %v2927_v14 }
 0xdd9   :  { %v2816_v22 = vpack.i.bf16 %v2126_v21, %v2124_v20 }
 0xdda   :  { %v1435_v63 = vpop.permute.xlu0 %1434 }
 0xddb   :  { %vm1437_vm9 = vcmp.gt.f32.partialorder %v1213_v15, %v1435_v63  ;;  %2817 = vrot.lane.b32.xlu1 %v2816_v22, %s2939_s29 }
 0xddc   :  { %v2129_v24 = vsel %vm1437_vm9, 1.0, %v2927_v14 }
 0xddd   :  { %v2811_v25 = vpack.i.bf16 %v2129_v24, %v2125_v23 }
 0xdde   :  { %v1643_v28 = vpop.permute.xlu0 %1642 }
 0xddf   :  { %1850 = vrot.lane.b32.xlu1 %v1213_v15, %s2942_s30  ;;  %2812 = vrot.lane.b32.xlu0 %v2811_v25, %s2938_s28  ;;  %vm1645_vm10 = vcmp.gt.f32.partialorder %v1213_v15, %v1643_v28 }
 0xde0   :  { %v2164_v30 = vsel %vm1645_vm10, 1.0, %v2927_v14 }
 0xde3   :  { %1862 = vrot.lane.b32.xlu1 %v2129_v24, %s2939_s29  ;;  %2822 = vrot.lane.b32.xlu0 %v2821_v29, %s2942_s30 }
 0xde7   :  { %1858 = vrot.lane.b32.xlu0 %v2164_v30, %s2938_s28 }
 0xe19   :  { %v1839_v33 = vpop.f32.mrb[20].mxu0 }
 0xe1a   :  { %v2559_v34 = vpop.f32.mrb[21].mxu0 }
 0xe29   :  { %v2047_v35 = vpop.f32.mrb[20].mxu1 }
 0xe2a   :  { %v2594_v26 = vpop.f32.mrb[21].mxu1 }
 0xe4d   :  { %v2818_v36 = vpop.permute.xlu1 %2817 }
 0xe4e   :  { %v2872_v40 = vadd.low.f32.bf16 %v2129_v24, %v2818_v36 }
 0xe51   :  { %v2813_v37 = vpop.permute.xlu0 %2812  ;;  %v1851_v38 = vpop.permute.xlu1 %1850 }
 0xe52   :  { %v2871_v39 = vadd.low.f32.bf16 %v2124_v20, %v2813_v37  ;;  %vm1853_vm11 = vcmp.gt.f32.partialorder %v1213_v15, %v1851_v38  ;;  %v2873_v42 = vadd.high.f32.bf16 %v2164_v30, %v2813_v37 }
 0xe53   :  { %v2199_v46 = vsel %vm1853_vm11, 1.0, %v2927_v14 }
 0xe54   :  { %v2874_v43 = vadd.high.f32.bf16 %v2871_v39, %v2818_v36 }
 0xe55   :  { %v2823_v41 = vpop.permute.xlu0 %2822  ;;  %v1863_v32 = vpop.permute.xlu1 %1862 }
 0xe56   :  { %vm1244_vm12 = vcmp.lt.f32.partialorder %v2874_v43, 2.0  ;;  %v2875_v44 = vadd.low.f32.bf16 %v2872_v40, %v2823_v41  ;;  %v2876_v45 = vadd.high.f32.bf16 %v2873_v42, %v2823_v41 }
 0xe57   :  { %v1245_v48 = vsel %vm1244_vm12, %v1216_v16, 0.0 }
 0xe58   :  { %1429 = vperm.xlu0 %2826, %v1245_v48   ;;  %vm1450_vm13 = vcmp.lt.f32.partialorder %v2875_v44, 2.0  ;;  %vm1658_vm14 = vcmp.lt.f32.partialorder %v2876_v45, 2.0 }
 0xe59   :  { %v1859_v47 = vpop.permute.xlu0 %1858  ;;  %v1451_v49 = vsel %vm1450_vm13, %v1435_v63, 0.0  ;;  %v1659_v51 = vsel %vm1658_vm14, %v1643_v28, 0.0 }
 0xe5a   :  { %v1861_v31 = vadd.f32 %v2199_v46, %v1859_v47  ;;  %1637 = vperm.xlu1 %2827, %v1451_v49  }
 0xe5c   :  { %v1865_v50 = vadd.f32 %v1863_v32, %v1861_v31  ;;  %2828 = vset.pattern.permute.xlu0 %v2941_v27 }
 0xe5e   :  { %vm1866_vm15 = vcmp.lt.f32.partialorder %v1865_v50, 2.0  ;;  %1845 = vperm.xlu1 %2827, %v1659_v51  }
 0xe5f   :  { %v1867_v52 = vsel %vm1866_vm15, %v1851_v38, 0.0 }
 0xe60   :  { %2053 = vperm.xlu0 %2828, %v1867_v52  }
 0xed7   :  { %v1430_v54 = vpop.permute.xlu0 %1429 }
 0xed8   :  { %v1432_v14 = vmul.f32 %v1430_v54, %v3651_v55 }
 0xed9   :  { %v1638_v56 = vpop.permute.xlu1 %1637 }
 0xeda   :  { %v1640_v58 = vmul.f32 %v1638_v56, %v3653_v57 }
 0xedc   :  { %v1641_v59 = vadd.f32 %v1640_v58, %v1432_v14 }
 0xedd   :  { %v1846_v61 = vpop.permute.xlu1 %1845 }
 0xede   :  { %v1848_v8 = vmul.f32 %v1846_v61, %v1839_v33 }
 0xedf   :  { %v2054_v62 = vpop.permute.xlu0 %2053 }
 0xee0   :  { %v1849_v0 = vadd.f32 %v1848_v8, %v1641_v59  ;;  %v2056_v1 = vmul.f32 %v2054_v62, %v2047_v35 }
 0xee2   :  { %v2057_v2 = vadd.f32 %v2056_v1, %v1849_v0 }
 0xee4   :  { %v2058_v3 = vadd.f32 %v2057_v2, %v3168_v60 }
 0xee6   :  { %v2060_v4 = vmul.f32 %v2058_v3, %v2058_v3 }
 0xee8   :  { %v2061_v53 = vsel %vm44_vm0, %v2060_v4, 0.0 }
 0xee9   :  { %2062 = vadd.xlane.f32.xlu1 %v2061_v53 }
 0xeea   :  { %2888 = shalt.err (!%p2885_p4)
}
 0xeeb   :  { %s2889_s17 = scalar_lea.hbm %s3707_s11, 128 }
 0xeec   :  { %p2890_p5 = scmp.ne.s32.totalorder %s3707_s11, %s2889_s17  ;;  %p2893_p6 = scmp.lt.u32.totalorder %s2889_s17, %s3707_s11 }
 0xeee   :  { %p2895_p7 = pnand %p2893_p6, %p2890_p5 }
 0xef0   :  { %2898 = shalt.err (!%p2895_p7)
}
 0xef1   :  { %2095 = dma.vmem_to_hbm [thread:$0]  %s2093_s13, 128, %s3707_s11, [#allocation5]   ;;  %v2234_v6 = vld [vmem:[%s3705_s9] ss:$0 sm:$0xff] }
 0xef2   :  { %s2944_s22 = smov [#allocation2]  }
 0xef3   :  { %s2082_s23 = sshll.u32 %s2944_s22, 4  ;;  %s2083_s23 = int_to_ptr.vmem [resolvable:$true] %s2082_s23 }
 0xef4   :  { %s2899_s7 = scalar_lea.vmem %s2083_s23, 128  ;;  %p2904_p9 = scmp.lt.s32.totalorder %s2083_s23, %s2083_s23 }
 0xef5   :  { %p2900_p8 = scmp.ne.s32.totalorder %s2083_s23, %s2899_s7  ;;  %p2905_p10 = scmp.lt.s32.totalorder %s2899_s7, %s2899_s7 }
 0xef7   :  { %p2906_p11 = por %p2905_p10, %p2904_p9 }
 0xef9   :  { %p2907_p12 = pnand %p2906_p11, %p2900_p8 }
 0xf76   :  { %v2063_v60 = vpop.xlane.xlu1 %2062 }
 0xf77   :  { %v2064_v55 = vmul.f32 0.015625, %v2063_v60 }
 0xf79   :  { %v2065_v57 = vadd.f32 1e-06, %v2064_v55 }
 0xf7b   :  { %2869 = vrsqrt.f32 %v2065_v57 }
 0xf85   :  { %v2870_v5 = vpop.eup %2869 }
 0xf86   :  { %v2067_v7 = vmul.f32 %v2870_v5, %v2058_v3 }
 0xf88   :  { %v2074_v9 = vmul.f32 %v2234_v6, %v2067_v7 }
 0xf8a   :  { %2075 = vst.msk [vmem:[#allocation2] sm:$0xff] %vm44_vm0, %v2074_v9 }
 0xf8b   :  { %2910 = shalt.err (!%p2907_p12)
}
 0xf8c   :  { %s2911_s1 = scalar_lea.hbm %s3706_s10, 128 }
 0xf8d   :  { %p2912_p13 = scmp.ne.s32.totalorder %s3706_s10, %s2911_s1  ;;  %p2915_p0 = scmp.lt.u32.totalorder %s2911_s1, %s3706_s10 }
 0xf8f   :  { %p2917_p1 = pnand %p2915_p0, %p2912_p13 }
 0xf91   :  { %2920 = shalt.err (!%p2917_p1)
}
 0xf92   :  { %2085 = dma.vmem_to_hbm [thread:$0]  %s2083_s23, 128, %s3706_s10, [#allocation3]  }
 0xf93   :  { %2921 = dma.done.wait [#allocation3], 128  }
 0xf94   :  { %2922 = vsyncadd [#allocation3], 4294967168 }
 0xf95   :  { %2923 = dma.done.wait [#allocation5], 128  }
 0xf96   :  { %2924 = vsyncadd [#allocation5], 4294967168 }
 0xf97   :  { %2102 = vsyncpa [#allocation3], 1 }
 0xf98   :  { %2103 = vsyncpa [#allocation5], 1 }

</bundles_post_ra>
